<compile_context>
chip_gen: v5e
topology: v5e:2x2
jax: 0.10.0
libtpu: 0.0.40
codegen_flags: <defaults>
</compile_context>

<pallas_src>
import functools

import numpy as np
import jax
import jax.numpy as jnp
from jax.experimental import pallas as pl
from jax.experimental.pallas import tpu as pltpu


CPAD = 128          # padded channel width of activations between layers (lane-dense)
CIN_PAD0 = 16       # padded input-image channels for conv1
NUM_CLASSES = 3
CLS_PAD = 128       # padded logits width (lane-dense classifier output)

IMG = 16            # input spatial size
HW2 = IMG // 2      # conv2 input spatial size (after maxpool1) = 8
# conv1 stores its pooled output directly in conv2's zero-padded flattened layout:
# a (HW2+2) x (HW2+2) = 10x10 row-major map, padded up to a multiple of 8 rows.
ROUT1 = 104         # ceil(10*10 / 8) * 8
ROUT2 = 16          # conv2 pooled map: 4x4


# --------------------------------------------------------------------------
# Pallas kernels
# --------------------------------------------------------------------------
def _conv3x3_relu_maxpool_kernel(*refs, H, W, rout, fuse_avgpool):
    """Fused 3x3 same-pad conv + bias + ReLU + 2x2/2 max-pool (+ optional 2x2 avg-pool)
    for ONE image (the grid iterates over the batch).

      xf_ref : (1, >= (H+2)*(W+2), Cin) bf16  flattened, spatially zero-padded image
      w_ref  : (9, Cin, Cout) bf16            per-tap weights, tap index = kh*3 + kw
      b_ref  : (1, Cout) f32
      sel_ref: (4*rout, L) bf16 0/1           max-pool row selection, one block / phase
      avg_ref: (A, rout) f32                  optional avg-pool matrix (conv2 only)
      o_ref  : (1, rout or A, Cout) bf16
    """
    if fuse_avgpool:
        xf_ref, w_ref, b_ref, sel_ref, avg_ref, o_ref = refs
    else:
        xf_ref, w_ref, b_ref, sel_ref, o_ref = refs

    Wp = W + 2
    L = (H - 1) * Wp + W                       # rows of the full-res conv accumulator
    cout = w_ref.shape[-1]

    # Halo conv: 9 contiguous row slices of the flattened padded image, one MXU
    # matmul per tap, f32 accumulation.  acc row r = h*Wp + w is the conv output at
    # (h, w); rows with w >= W are halo junk and are never selected below.
    acc = jnp.zeros((L, cout), jnp.float32)
    for kh in range(3):
        for kw in range(3):
            start = kh * Wp + kw
            patch = xf_ref[0, start:start + L, :]
            acc = acc + jnp.dot(patch, w_ref[kh * 3 + kw],
                                preferred_element_type=jnp.float32)

    act = jnp.maximum(acc + b_ref[...], 0.0).astype(jnp.bfloat16)

    # 2x2/2 max-pool as an exact 0/1-selection matmul (MXU) + elementwise max of the
    # four pool phases (VPU).  All-zero selection rows produce exact 0.0, which also
    # serves as the next conv's spatial zero padding (conv1) for free.
    m = jnp.dot(sel_ref[...], act, preferred_element_type=jnp.float32)
    pooled = jnp.maximum(jnp.maximum(m[0 * rout:1 * rout], m[1 * rout:2 * rout]),
                         jnp.maximum(m[2 * rout:3 * rout], m[3 * rout:4 * rout]))

    if fuse_avgpool:
        # AdaptiveAvgPool2d((2,2)) on the pooled 4x4 map == one tiny f32 matmul.
        pooled = jnp.dot(avg_ref[...], pooled, preferred_element_type=jnp.float32)

    o_ref[0] = pooled.astype(o_ref.dtype)


def _classifier_kernel(x_ref, w1_ref, b1_ref, w2_ref, b2_ref, o_ref, acc_ref):
    k = pl.program_id(0)

    @pl.when(k == 0)
    def _():
        acc_ref[...] = jnp.zeros_like(acc_ref)

    # fc chunk (classifier[0], no activation): (N, 512) x (512, chunk) -> f32 + bias.
    h = jnp.dot(x_ref[...], w1_ref[...], preferred_element_type=jnp.float32)
    h = h + b1_ref[...]
    # fcEnd partial contribution; h is kept in f32 for parity with a f32 reference.
    acc_ref[...] += jnp.dot(h, w2_ref[...].astype(jnp.float32),
                            preferred_element_type=jnp.float32)

    @pl.when(k == pl.num_programs(0) - 1)
    def _():
        logits = acc_ref[...] + b2_ref[...]
        # Padded class lanes have all-zero weight columns and a -1e30 bias, so
        # exp(logit - max) underflows to exactly 0 and the softmax over 128 lanes
        # equals the softmax over the 3 real classes (real logits are finite >> -1e30).
        mx = jnp.max(logits, axis=1, keepdims=True)
        e = jnp.exp(logits - mx)
        o_ref[...] = (e / jnp.sum(e, axis=1, keepdims=True)).astype(o_ref.dtype)


# --------------------------------------------------------------------------
# Pallas wrappers
# --------------------------------------------------------------------------
def conv3x3_relu_maxpool(xf, w, b, sel, avg=None, *, H, W, rout):
    """Fused conv + ReLU + maxpool (+ avgpool).  xf: (N, rows, Cin) bf16 flattened,
    spatially pre-padded images; grid over the batch keeps per-step VMEM bounded."""
    N, rin, cin = xf.shape
    cout = w.shape[-1]
    out_rows = rout if avg is None else avg.shape[0]
    L = (H - 1) * (W + 2) + W
    flops = int(N * (18 * L * cin * cout + 8 * rout * L * cout))
    bytes_accessed = int(2 * (xf.size + w.size + sel.size + N * out_rows * cout)
                         + 4 * b.size)

    in_specs = [
        pl.BlockSpec((1, rin, cin), lambda n: (n, 0, 0)),
        pl.BlockSpec(w.shape, lambda n: (0, 0, 0)),
        pl.BlockSpec(b.shape, lambda n: (0, 0)),
        pl.BlockSpec(sel.shape, lambda n: (0, 0)),
    ]
    operands = [xf, w, b, sel]
    if avg is not None:
        in_specs.append(pl.BlockSpec(avg.shape, lambda n: (0, 0)))
        operands.append(avg)

    return pl.pallas_call(
        functools.partial(_conv3x3_relu_maxpool_kernel, H=H, W=W, rout=rout,
                          fuse_avgpool=avg is not None),
        out_shape=jax.ShapeDtypeStruct((N, out_rows, cout), jnp.bfloat16),
        grid=(N,),
        in_specs=in_specs,
        out_specs=pl.BlockSpec((1, out_rows, cout), lambda n: (n, 0, 0)),
        compiler_params=pltpu.CompilerParams(dimension_semantics=("parallel",)),
        cost_estimate=pl.CostEstimate(flops=flops, transcendentals=0,
                                      bytes_accessed=bytes_accessed),
    )(*operands)


def classifier_softmax(flat, w1, b1, w2, b2, *, chunk=512):
    """Fused fc -> fcEnd -> softmax.  The 4096-wide hidden dim is a grid axis so
    BlockSpec pipelining streams the classifier weights (512-col / 512-row chunks)
    while the MXU works; the (N, 4096) intermediate never leaves VMEM/vregs.
    Output is (N, CLS_PAD); padded lanes are exact zeros."""
    N, kin = flat.shape
    hidden = w1.shape[1]
    ncls = w2.shape[1]
    assert hidden % chunk == 0
    flops = int(2 * N * kin * hidden + 2 * N * hidden * ncls)
    bytes_accessed = int(2 * (flat.size + w1.size + w2.size)
                         + 4 * (b1.size + b2.size) + 4 * N * ncls)

    return pl.pallas_call(
        _classifier_kernel,
        out_shape=jax.ShapeDtypeStruct((N, ncls), jnp.float32),
        grid=(hidden // chunk,),
        in_specs=[
            pl.BlockSpec((N, kin), lambda k: (0, 0)),
            pl.BlockSpec((kin, chunk), lambda k: (0, k)),
            pl.BlockSpec((1, chunk), lambda k: (0, k)),
            pl.BlockSpec((chunk, ncls), lambda k: (k, 0)),
            pl.BlockSpec((1, ncls), lambda k: (0, 0)),
        ],
        out_specs=pl.BlockSpec((N, ncls), lambda k: (0, 0)),
        scratch_shapes=[pltpu.VMEM((N, ncls), jnp.float32)],
        compiler_params=pltpu.CompilerParams(dimension_semantics=("arbitrary",)),
        cost_estimate=pl.CostEstimate(flops=flops, transcendentals=int(N * ncls),
                                      bytes_accessed=bytes_accessed),
    )(flat, w1, b1, w2, b2)


# --------------------------------------------------------------------------
# Parameter preparation (one-time, outside the per-forward hot path)
# --------------------------------------------------------------------------
def _maxpool_select(H, W, out_rows, out_index):
    """0/1 selection matrix (4*out_rows, L): for pool phase p=(hi,wi) and pooled
    position (i,j), selects conv-accumulator row (2i+hi)*(W+2) + (2j+wi)."""
    Wp = W + 2
    L = (H - 1) * Wp + W
    S = np.zeros((4, out_rows, L), np.float32)
    for hi in (0, 1):
        for wi in (0, 1):
            for i in range(H // 2):
                for j in range(W // 2):
                    S[hi * 2 + wi, out_index(i, j),
                      (2 * i + hi) * Wp + (2 * j + wi)] = 1.0
    return jnp.asarray(S.reshape(4 * out_rows, L), jnp.bfloat16)


def _avgpool_matrix():
    """2x2/2 average pool on a row-major 4x4 map as a (4, 16) matrix (carries the 0.25)."""
    A = np.zeros((4, ROUT2), np.float32)
    for ph in (0, 1):
        for pw in (0, 1):
            for dh in (0, 1):
                for dw in (0, 1):
                    A[ph * 2 + pw, (2 * ph + dh) * 4 + (2 * pw + dw)] = 0.25
    return jnp.asarray(A, jnp.float32)


def prepare_params(params):
    """Repack PyTorch-layout weights into padded, lane-/MXU-friendly matrices and
    build the constant pooling matrices."""
    def conv_w(w_pt, b, cin_pad):
        cout, cin, kh, kw = w_pt.shape
        w = jnp.transpose(w_pt, (2, 3, 1, 0))              # (kh, kw, cin, cout)
        w = jnp.pad(w, ((0, 0), (0, 0), (0, cin_pad - cin), (0, CPAD - cout)))
        wr = w.reshape(kh * kw, cin_pad, CPAD).astype(jnp.bfloat16)
        br = jnp.pad(b, (0, CPAD - cout)).reshape(1, CPAD).astype(jnp.float32)
        return wr, br

    c1w, c1b = conv_w(params["conv1_w"], params["conv1_b"], CIN_PAD0)
    c2w, c2b = conv_w(params["conv2_w"], params["conv2_b"], CPAD)

    # conv1's maxpool writes straight into conv2's zero-padded 10x10 flattened layout
    # (interior rows (i+1)*10 + (j+1)); conv2's maxpool writes a dense 4x4 map.
    sel1 = _maxpool_select(IMG, IMG, ROUT1, lambda i, j: (i + 1) * (HW2 + 2) + (j + 1))
    sel2 = _maxpool_select(HW2, HW2, ROUT2, lambda i, j: i * (HW2 // 2) + j)
    avg = _avgpool_matrix()

    # fc: PyTorch flatten order is (C=16, H=2, W=2); our flattened activations are
    # (H=2, W=2, Cpad=128) -> permute + zero-pad the K axis to 512.
    fc_w = params["fc_w"].reshape(4096, 16, 2, 2)          # (out, c, h, w)
    fc_w = jnp.transpose(fc_w, (2, 3, 1, 0))               # (h, w, c, out)
    fc_w = jnp.pad(fc_w, ((0, 0), (0, 0), (0, CPAD - 16), (0, 0)))
    w_fc = fc_w.reshape(2 * 2 * CPAD, 4096).astype(jnp.bfloat16)     # (512, 4096)
    b_fc = params["fc_b"].reshape(1, 4096).astype(jnp.float32)

    # fcEnd: pad the 3 classes to 128 lanes; padded logits get a -1e30 bias so
    # exp(logit - max) underflows to exactly 0 and the softmax is unchanged.
    w_end = jnp.pad(params["fcEnd_w"].T,
                    ((0, 0), (0, CLS_PAD - NUM_CLASSES))).astype(jnp.bfloat16)
    b_end = jnp.concatenate(
        [params["fcEnd_b"].astype(jnp.float32),
         jnp.full((CLS_PAD - NUM_CLASSES,), -1e30, jnp.float32)]).reshape(1, CLS_PAD)

    return {"conv1_w": c1w, "conv1_b": c1b, "conv2_w": c2w, "conv2_b": c2b,
            "sel1": sel1, "sel2": sel2, "avg": avg,
            "fc_w": w_fc, "fc_b": b_fc, "fcEnd_w": w_end, "fcEnd_b": b_end}


# --------------------------------------------------------------------------
# FeatureExtractor forward
# --------------------------------------------------------------------------
def feature_extractor_forward(x_nchw, p):
    N, C, H, W = x_nchw.shape
    # NCHW -> NHWC, pad channels (3 -> 16) and the spatial halo (+1 ring) once, then
    # flatten rows.  This is the only plain-JAX activation glue in the forward.
    x = jnp.transpose(x_nchw, (0, 2, 3, 1))
    x = jnp.pad(x, ((0, 0), (1, 1), (1, 1), (0, CIN_PAD0 - C))).astype(jnp.bfloat16)
    xf = x.reshape(N, (H + 2) * (W + 2), CIN_PAD0)

    # features: conv1 + ReLU + maxpool -> conv2's padded flattened input (N, 104, 128)
    y1 = conv3x3_relu_maxpool(xf, p["conv1_w"], p["conv1_b"], p["sel1"],
                              H=H, W=W, rout=ROUT1)
    # features: conv2 + ReLU + maxpool, fused with AdaptiveAvgPool2d((2,2)) -> (N,4,128)
    y2 = conv3x3_relu_maxpool(y1, p["conv2_w"], p["conv2_b"], p["sel2"], p["avg"],
                              H=HW2, W=HW2, rout=ROUT2)

    # flatten -> fused fc -> fcEnd -> softmax (weights streamed over the hidden dim)
    flat = y2.reshape(N, 2 * 2 * CPAD)                     # (N, 512)
    probs = classifier_softmax(flat, p["fc_w"], p["fc_b"],
                               p["fcEnd_w"], p["fcEnd_b"])  # (N, 128)
    return probs[:, :NUM_CLASSES]                          # (N, 3)


# --------------------------------------------------------------------------
# Pure-JAX f32 reference (PyTorch semantics) and setup
# --------------------------------------------------------------------------
def reference_forward(x_nchw, params):
    def conv3x3_relu(x, w_pt, b):
        w = jnp.transpose(w_pt, (2, 3, 1, 0))              # (kh, kw, cin, cout)
        H, W = x.shape[1], x.shape[2]
        xp = jnp.pad(x, ((0, 0), (1, 1), (1, 1), (0, 0)))
        out = sum(jnp.einsum("nhwc,cd->nhwd", xp[:, i:i + H, j:j + W, :], w[i, j])
                  for i in range(3) for j in range(3))
        return jax.nn.relu(out + b)

    def pool2x2(x, op):
        N, H, W, C = x.shape
        x = x.reshape(N, H // 2, 2, W // 2, 2, C)
        return op(op(x, axis=4), axis=2)

    x = jnp.transpose(x_nchw, (0, 2, 3, 1))
    y = pool2x2(conv3x3_relu(x, params["conv1_w"], params["conv1_b"]), jnp.max)
    y = pool2x2(conv3x3_relu(y, params["conv2_w"], params["conv2_b"]), jnp.max)
    y = pool2x2(y, jnp.mean)                               # AdaptiveAvgPool2d((2, 2))
    flat = jnp.transpose(y, (0, 3, 1, 2)).reshape(x.shape[0], -1)
    h = flat @ params["fc_w"].T + params["fc_b"]
    logits = h @ params["fcEnd_w"].T + params["fcEnd_b"]
    return jax.nn.softmax(logits, axis=1)


def init_params(key):
    ks = jax.random.split(key, 8)
    s = 0.05
    return {
        "conv1_w": s * jax.random.normal(ks[0], (8, 3, 3, 3), jnp.float32),
        "conv1_b": s * jax.random.normal(ks[1], (8,), jnp.float32),
        "conv2_w": s * jax.random.normal(ks[2], (16, 8, 3, 3), jnp.float32),
        "conv2_b": s * jax.random.normal(ks[3], (16,), jnp.float32),
        # PyTorch Linear weight layout: (out_features, in_features)
        "fc_w": s * jax.random.normal(ks[4], (4096, 64), jnp.float32),
        "fc_b": s * jax.random.normal(ks[5], (4096,), jnp.float32),
        "fcEnd_w": s * jax.random.normal(ks[6], (3, 4096), jnp.float32),
        "fcEnd_b": s * jax.random.normal(ks[7], (3,), jnp.float32),
    }


if __name__ == "__main__":
    key = jax.random.PRNGKey(0)
    pkey, xkey = jax.random.split(key)
    params = init_params(pkey)
    prepped = prepare_params(params)
    x = jax.random.normal(xkey, (2, 3, IMG, IMG), jnp.float32)   # NCHW

    fwd = jax.jit(feature_extractor_forward)
    out = jax.block_until_ready(fwd(x, prepped))

    assert out.shape == (2, NUM_CLASSES), out.shape
    assert bool(jnp.all(jnp.isfinite(out)))
    # exact softmax normalization (no approx reciprocal)
    assert bool(jnp.allclose(jnp.sum(out, axis=1), 1.0, atol=1e-3))
    # parity with a pure-JAX f32 PyTorch-semantics reference (bf16 tolerance)
    ref = reference_forward(x, params)
    assert bool(jnp.allclose(out, ref, atol=3e-2))
    print("KERNEL_OK")
</pallas_src>

<mosaic_0001>
module attributes {stable_mosaic.version = 11 : i64} {
  func.func @_conv3x3_relu_maxpool_kernel(%arg0: i32, %arg1: memref<1x324x16xbf16, #tpu.memory_space<vmem>>, %arg2: memref<9x16x128xbf16, #tpu.memory_space<vmem>>, %arg3: memref<1x128xf32, #tpu.memory_space<vmem>>, %arg4: memref<416x286xbf16, #tpu.memory_space<vmem>>, %arg5: memref<1x104x128xbf16, #tpu.memory_space<vmem>>) attributes {dimension_semantics = [#tpu.dimension_semantics<parallel>], iteration_bounds = array<i64: 2>, scalar_prefetch = 0 : i64, scratch_operands = 0 : i64, tpu.core_type = #tpu.core_type<tc>, window_params = [{transform_indices = @transform_0, window_bounds = array<i64: 1, 324, 16>}, {pipeline_mode = #tpu.pipeline_mode<synchronous>, transform_indices = @transform_1, window_bounds = array<i64: 9, 16, 128>}, {pipeline_mode = #tpu.pipeline_mode<synchronous>, transform_indices = @transform_2, window_bounds = array<i64: 1, 128>}, {pipeline_mode = #tpu.pipeline_mode<synchronous>, transform_indices = @transform_3, window_bounds = array<i64: 416, 286>}, {transform_indices = @transform_4, window_bounds = array<i64: 1, 104, 128>}]} {
    %cst = arith.constant 0.000000e+00 : f32
    %0 = vector.broadcast %cst : f32 to vector<286x128xf32>
    %c0 = arith.constant 0 : index
    %c0_0 = arith.constant 0 : index
    %c0_1 = arith.constant 0 : index
    %1 = vector.load %arg1[%c0, %c0_0, %c0_1] : memref<1x324x16xbf16, #tpu.memory_space<vmem>>, vector<1x286x16xbf16>
    %2 = vector.shape_cast %1 : vector<1x286x16xbf16> to vector<286x16xbf16>
    %c0_2 = arith.constant 0 : index
    %c0_3 = arith.constant 0 : index
    %c0_4 = arith.constant 0 : index
    %3 = vector.load %arg2[%c0_2, %c0_3, %c0_4] : memref<9x16x128xbf16, #tpu.memory_space<vmem>>, vector<1x16x128xbf16>
    %4 = vector.shape_cast %3 : vector<1x16x128xbf16> to vector<16x128xbf16>
    %cst_5 = arith.constant dense<0.000000e+00> : vector<286x128xf32>
    %5 = tpu.matmul %2, %4, %cst_5 {dimension_numbers = #tpu.dot_dimension_numbers<[1], [0], [0], [1], [0, 0, 1, 1], [], []>} : vector<286x16xbf16>, vector<16x128xbf16>, vector<286x128xf32> -> vector<286x128xf32>
    %6 = arith.addf %0, %5 : vector<286x128xf32>
    %c0_6 = arith.constant 0 : index
    %c1 = arith.constant 1 : index
    %c0_7 = arith.constant 0 : index
    %7 = vector.load %arg1[%c0_6, %c1, %c0_7] : memref<1x324x16xbf16, #tpu.memory_space<vmem>>, vector<1x286x16xbf16>
    %8 = vector.shape_cast %7 : vector<1x286x16xbf16> to vector<286x16xbf16>
    %c1_8 = arith.constant 1 : index
    %c0_9 = arith.constant 0 : index
    %c0_10 = arith.constant 0 : index
    %9 = vector.load %arg2[%c1_8, %c0_9, %c0_10] : memref<9x16x128xbf16, #tpu.memory_space<vmem>>, vector<1x16x128xbf16>
    %10 = vector.shape_cast %9 : vector<1x16x128xbf16> to vector<16x128xbf16>
    %cst_11 = arith.constant dense<0.000000e+00> : vector<286x128xf32>
    %11 = tpu.matmul %8, %10, %cst_11 {dimension_numbers = #tpu.dot_dimension_numbers<[1], [0], [0], [1], [0, 0, 1, 1], [], []>} : vector<286x16xbf16>, vector<16x128xbf16>, vector<286x128xf32> -> vector<286x128xf32>
    %12 = arith.addf %6, %11 : vector<286x128xf32>
    %c0_12 = arith.constant 0 : index
    %c2 = arith.constant 2 : index
    %c0_13 = arith.constant 0 : index
    %13 = vector.load %arg1[%c0_12, %c2, %c0_13] : memref<1x324x16xbf16, #tpu.memory_space<vmem>>, vector<1x286x16xbf16>
    %14 = vector.shape_cast %13 : vector<1x286x16xbf16> to vector<286x16xbf16>
    %c2_14 = arith.constant 2 : index
    %c0_15 = arith.constant 0 : index
    %c0_16 = arith.constant 0 : index
    %15 = vector.load %arg2[%c2_14, %c0_15, %c0_16] : memref<9x16x128xbf16, #tpu.memory_space<vmem>>, vector<1x16x128xbf16>
    %16 = vector.shape_cast %15 : vector<1x16x128xbf16> to vector<16x128xbf16>
    %cst_17 = arith.constant dense<0.000000e+00> : vector<286x128xf32>
    %17 = tpu.matmul %14, %16, %cst_17 {dimension_numbers = #tpu.dot_dimension_numbers<[1], [0], [0], [1], [0, 0, 1, 1], [], []>} : vector<286x16xbf16>, vector<16x128xbf16>, vector<286x128xf32> -> vector<286x128xf32>
    %18 = arith.addf %12, %17 : vector<286x128xf32>
    %c0_18 = arith.constant 0 : index
    %c18 = arith.constant 18 : index
    %c0_19 = arith.constant 0 : index
    %19 = vector.load %arg1[%c0_18, %c18, %c0_19] : memref<1x324x16xbf16, #tpu.memory_space<vmem>>, vector<1x286x16xbf16>
    %20 = vector.shape_cast %19 : vector<1x286x16xbf16> to vector<286x16xbf16>
    %c3 = arith.constant 3 : index
    %c0_20 = arith.constant 0 : index
    %c0_21 = arith.constant 0 : index
    %21 = vector.load %arg2[%c3, %c0_20, %c0_21] : memref<9x16x128xbf16, #tpu.memory_space<vmem>>, vector<1x16x128xbf16>
    %22 = vector.shape_cast %21 : vector<1x16x128xbf16> to vector<16x128xbf16>
    %cst_22 = arith.constant dense<0.000000e+00> : vector<286x128xf32>
    %23 = tpu.matmul %20, %22, %cst_22 {dimension_numbers = #tpu.dot_dimension_numbers<[1], [0], [0], [1], [0, 0, 1, 1], [], []>} : vector<286x16xbf16>, vector<16x128xbf16>, vector<286x128xf32> -> vector<286x128xf32>
    %24 = arith.addf %18, %23 : vector<286x128xf32>
    %c0_23 = arith.constant 0 : index
    %c19 = arith.constant 19 : index
    %c0_24 = arith.constant 0 : index
    %25 = vector.load %arg1[%c0_23, %c19, %c0_24] : memref<1x324x16xbf16, #tpu.memory_space<vmem>>, vector<1x286x16xbf16>
    %26 = vector.shape_cast %25 : vector<1x286x16xbf16> to vector<286x16xbf16>
    %c4 = arith.constant 4 : index
    %c0_25 = arith.constant 0 : index
    %c0_26 = arith.constant 0 : index
    %27 = vector.load %arg2[%c4, %c0_25, %c0_26] : memref<9x16x128xbf16, #tpu.memory_space<vmem>>, vector<1x16x128xbf16>
    %28 = vector.shape_cast %27 : vector<1x16x128xbf16> to vector<16x128xbf16>
    %cst_27 = arith.constant dense<0.000000e+00> : vector<286x128xf32>
    %29 = tpu.matmul %26, %28, %cst_27 {dimension_numbers = #tpu.dot_dimension_numbers<[1], [0], [0], [1], [0, 0, 1, 1], [], []>} : vector<286x16xbf16>, vector<16x128xbf16>, vector<286x128xf32> -> vector<286x128xf32>
    %30 = arith.addf %24, %29 : vector<286x128xf32>
    %c0_28 = arith.constant 0 : index
    %c20 = arith.constant 20 : index
    %c0_29 = arith.constant 0 : index
    %31 = vector.load %arg1[%c0_28, %c20, %c0_29] : memref<1x324x16xbf16, #tpu.memory_space<vmem>>, vector<1x286x16xbf16>
    %32 = vector.shape_cast %31 : vector<1x286x16xbf16> to vector<286x16xbf16>
    %c5 = arith.constant 5 : index
    %c0_30 = arith.constant 0 : index
    %c0_31 = arith.constant 0 : index
    %33 = vector.load %arg2[%c5, %c0_30, %c0_31] : memref<9x16x128xbf16, #tpu.memory_space<vmem>>, vector<1x16x128xbf16>
    %34 = vector.shape_cast %33 : vector<1x16x128xbf16> to vector<16x128xbf16>
    %cst_32 = arith.constant dense<0.000000e+00> : vector<286x128xf32>
    %35 = tpu.matmul %32, %34, %cst_32 {dimension_numbers = #tpu.dot_dimension_numbers<[1], [0], [0], [1], [0, 0, 1, 1], [], []>} : vector<286x16xbf16>, vector<16x128xbf16>, vector<286x128xf32> -> vector<286x128xf32>
    %36 = arith.addf %30, %35 : vector<286x128xf32>
    %c0_33 = arith.constant 0 : index
    %c36 = arith.constant 36 : index
    %c0_34 = arith.constant 0 : index
    %37 = vector.load %arg1[%c0_33, %c36, %c0_34] : memref<1x324x16xbf16, #tpu.memory_space<vmem>>, vector<1x286x16xbf16>
    %38 = vector.shape_cast %37 : vector<1x286x16xbf16> to vector<286x16xbf16>
    %c6 = arith.constant 6 : index
    %c0_35 = arith.constant 0 : index
    %c0_36 = arith.constant 0 : index
    %39 = vector.load %arg2[%c6, %c0_35, %c0_36] : memref<9x16x128xbf16, #tpu.memory_space<vmem>>, vector<1x16x128xbf16>
    %40 = vector.shape_cast %39 : vector<1x16x128xbf16> to vector<16x128xbf16>
    %cst_37 = arith.constant dense<0.000000e+00> : vector<286x128xf32>
    %41 = tpu.matmul %38, %40, %cst_37 {dimension_numbers = #tpu.dot_dimension_numbers<[1], [0], [0], [1], [0, 0, 1, 1], [], []>} : vector<286x16xbf16>, vector<16x128xbf16>, vector<286x128xf32> -> vector<286x128xf32>
    %42 = arith.addf %36, %41 : vector<286x128xf32>
    %c0_38 = arith.constant 0 : index
    %c37 = arith.constant 37 : index
    %c0_39 = arith.constant 0 : index
    %43 = vector.load %arg1[%c0_38, %c37, %c0_39] : memref<1x324x16xbf16, #tpu.memory_space<vmem>>, vector<1x286x16xbf16>
    %44 = vector.shape_cast %43 : vector<1x286x16xbf16> to vector<286x16xbf16>
    %c7 = arith.constant 7 : index
    %c0_40 = arith.constant 0 : index
    %c0_41 = arith.constant 0 : index
    %45 = vector.load %arg2[%c7, %c0_40, %c0_41] : memref<9x16x128xbf16, #tpu.memory_space<vmem>>, vector<1x16x128xbf16>
    %46 = vector.shape_cast %45 : vector<1x16x128xbf16> to vector<16x128xbf16>
    %cst_42 = arith.constant dense<0.000000e+00> : vector<286x128xf32>
    %47 = tpu.matmul %44, %46, %cst_42 {dimension_numbers = #tpu.dot_dimension_numbers<[1], [0], [0], [1], [0, 0, 1, 1], [], []>} : vector<286x16xbf16>, vector<16x128xbf16>, vector<286x128xf32> -> vector<286x128xf32>
    %48 = arith.addf %42, %47 : vector<286x128xf32>
    %c0_43 = arith.constant 0 : index
    %c38 = arith.constant 38 : index
    %c0_44 = arith.constant 0 : index
    %49 = vector.load %arg1[%c0_43, %c38, %c0_44] : memref<1x324x16xbf16, #tpu.memory_space<vmem>>, vector<1x286x16xbf16>
    %50 = vector.shape_cast %49 : vector<1x286x16xbf16> to vector<286x16xbf16>
    %c8 = arith.constant 8 : index
    %c0_45 = arith.constant 0 : index
    %c0_46 = arith.constant 0 : index
    %51 = vector.load %arg2[%c8, %c0_45, %c0_46] : memref<9x16x128xbf16, #tpu.memory_space<vmem>>, vector<1x16x128xbf16>
    %52 = vector.shape_cast %51 : vector<1x16x128xbf16> to vector<16x128xbf16>
    %cst_47 = arith.constant dense<0.000000e+00> : vector<286x128xf32>
    %53 = tpu.matmul %50, %52, %cst_47 {dimension_numbers = #tpu.dot_dimension_numbers<[1], [0], [0], [1], [0, 0, 1, 1], [], []>} : vector<286x16xbf16>, vector<16x128xbf16>, vector<286x128xf32> -> vector<286x128xf32>
    %54 = arith.addf %48, %53 : vector<286x128xf32>
    %c0_48 = arith.constant 0 : index
    %c0_49 = arith.constant 0 : index
    %55 = vector.load %arg3[%c0_48, %c0_49] : memref<1x128xf32, #tpu.memory_space<vmem>>, vector<1x128xf32>
    %56 = vector.broadcast %55 : vector<1x128xf32> to vector<286x128xf32>
    %57 = arith.addf %54, %56 : vector<286x128xf32>
    %cst_50 = arith.constant 0.000000e+00 : f32
    %58 = vector.broadcast %cst_50 : f32 to vector<286x128xf32>
    %59 = arith.maximumf %57, %58 : vector<286x128xf32>
    %60 = arith.truncf %59 : vector<286x128xf32> to vector<286x128xbf16>
    %c0_51 = arith.constant 0 : index
    %c0_52 = arith.constant 0 : index
    %61 = vector.load %arg4[%c0_51, %c0_52] : memref<416x286xbf16, #tpu.memory_space<vmem>>, vector<416x286xbf16>
    %cst_53 = arith.constant dense<0.000000e+00> : vector<416x128xf32>
    %62 = tpu.matmul %61, %60, %cst_53 {dimension_numbers = #tpu.dot_dimension_numbers<[1], [0], [0], [1], [0, 0, 1, 1], [], []>} : vector<416x286xbf16>, vector<286x128xbf16>, vector<416x128xf32> -> vector<416x128xf32>
    %63 = vector.extract_strided_slice %62 {offsets = [0, 0], sizes = [104, 128], strides = [1, 1]} : vector<416x128xf32> to vector<104x128xf32>
    %64 = vector.extract_strided_slice %62 {offsets = [104, 0], sizes = [104, 128], strides = [1, 1]} : vector<416x128xf32> to vector<104x128xf32>
    %65 = arith.maximumf %63, %64 : vector<104x128xf32>
    %66 = vector.extract_strided_slice %62 {offsets = [208, 0], sizes = [104, 128], strides = [1, 1]} : vector<416x128xf32> to vector<104x128xf32>
    %67 = vector.extract_strided_slice %62 {offsets = [312, 0], sizes = [104, 128], strides = [1, 1]} : vector<416x128xf32> to vector<104x128xf32>
    %68 = arith.maximumf %66, %67 : vector<104x128xf32>
    %69 = arith.maximumf %65, %68 : vector<104x128xf32>
    %70 = arith.truncf %69 : vector<104x128xf32> to vector<104x128xbf16>
    %c0_54 = arith.constant 0 : index
    %c0_55 = arith.constant 0 : index
    %c0_56 = arith.constant 0 : index
    %71 = vector.load %arg5[%c0_54, %c0_55, %c0_56] : memref<1x104x128xbf16, #tpu.memory_space<vmem>>, vector<1x104x128xbf16>
    %72 = vector.shape_cast %71 : vector<1x104x128xbf16> to vector<104x128xbf16>
    %73 = vector.shape_cast %70 : vector<104x128xbf16> to vector<1x104x128xbf16>
    tpu.vector_store %arg5[%c0_54, %c0_55, %c0_56], %73 {strides = array<i32>} : memref<1x104x128xbf16, #tpu.memory_space<vmem>>, vector<1x104x128xbf16>,
    return
  }
  func.func @transform_0(%arg0: i32) -> (i32, i32, i32) {
    %c0_i32 = arith.constant 0 : i32
    %c0_i32_0 = arith.constant 0 : i32
    %c0_i32_1 = arith.constant 0 : i32
    return %arg0, %c0_i32, %c0_i32_0 : i32, i32, i32
  }
  func.func @transform_1(%arg0: i32) -> (i32, i32, i32) {
    %c0_i32 = arith.constant 0 : i32
    %c0_i32_0 = arith.constant 0 : i32
    %c0_i32_1 = arith.constant 0 : i32
    %c0_i32_2 = arith.constant 0 : i32
    return %c0_i32, %c0_i32_0, %c0_i32_1 : i32, i32, i32
  }
  func.func @transform_2(%arg0: i32) -> (i32, i32) {
    %c0_i32 = arith.constant 0 : i32
    %c0_i32_0 = arith.constant 0 : i32
    %c0_i32_1 = arith.constant 0 : i32
    return %c0_i32, %c0_i32_0 : i32, i32
  }
  func.func @transform_3(%arg0: i32) -> (i32, i32) {
    %c0_i32 = arith.constant 0 : i32
    %c0_i32_0 = arith.constant 0 : i32
    %c0_i32_1 = arith.constant 0 : i32
    return %c0_i32, %c0_i32_0 : i32, i32
  }
  func.func @transform_4(%arg0: i32) -> (i32, i32, i32) {
    %c0_i32 = arith.constant 0 : i32
    %c0_i32_0 = arith.constant 0 : i32
    %c0_i32_1 = arith.constant 0 : i32
    return %arg0, %c0_i32, %c0_i32_0 : i32, i32, i32
  }
}

module attributes {stable_mosaic.version = 11 : i64} {
  func.func @_conv3x3_relu_maxpool_kernel(%arg0: i32, %arg1: memref<1x104x128xbf16, #tpu.memory_space<vmem>>, %arg2: memref<9x128x128xbf16, #tpu.memory_space<vmem>>, %arg3: memref<1x128xf32, #tpu.memory_space<vmem>>, %arg4: memref<64x78xbf16, #tpu.memory_space<vmem>>, %arg5: memref<4x16xf32, #tpu.memory_space<vmem>>, %arg6: memref<1x4x128xbf16, #tpu.memory_space<vmem>>) attributes {dimension_semantics = [#tpu.dimension_semantics<parallel>], iteration_bounds = array<i64: 2>, scalar_prefetch = 0 : i64, scratch_operands = 0 : i64, tpu.core_type = #tpu.core_type<tc>, window_params = [{transform_indices = @transform_0, window_bounds = array<i64: 1, 104, 128>}, {pipeline_mode = #tpu.pipeline_mode<synchronous>, transform_indices = @transform_1, window_bounds = array<i64: 9, 128, 128>}, {pipeline_mode = #tpu.pipeline_mode<synchronous>, transform_indices = @transform_2, window_bounds = array<i64: 1, 128>}, {pipeline_mode = #tpu.pipeline_mode<synchronous>, transform_indices = @transform_3, window_bounds = array<i64: 64, 78>}, {pipeline_mode = #tpu.pipeline_mode<synchronous>, transform_indices = @transform_4, window_bounds = array<i64: 4, 16>}, {transform_indices = @transform_5, window_bounds = array<i64: 1, 4, 128>}]} {
    %cst = arith.constant 0.000000e+00 : f32
    %0 = vector.broadcast %cst : f32 to vector<78x128xf32>
    %c0 = arith.constant 0 : index
    %c0_0 = arith.constant 0 : index
    %c0_1 = arith.constant 0 : index
    %1 = vector.load %arg1[%c0, %c0_0, %c0_1] : memref<1x104x128xbf16, #tpu.memory_space<vmem>>, vector<1x78x128xbf16>
    %2 = vector.shape_cast %1 : vector<1x78x128xbf16> to vector<78x128xbf16>
    %c0_2 = arith.constant 0 : index
    %c0_3 = arith.constant 0 : index
    %c0_4 = arith.constant 0 : index
    %3 = vector.load %arg2[%c0_2, %c0_3, %c0_4] : memref<9x128x128xbf16, #tpu.memory_space<vmem>>, vector<1x128x128xbf16>
    %4 = vector.shape_cast %3 : vector<1x128x128xbf16> to vector<128x128xbf16>
    %cst_5 = arith.constant dense<0.000000e+00> : vector<78x128xf32>
    %5 = tpu.matmul %2, %4, %cst_5 {dimension_numbers = #tpu.dot_dimension_numbers<[1], [0], [0], [1], [0, 0, 1, 1], [], []>} : vector<78x128xbf16>, vector<128x128xbf16>, vector<78x128xf32> -> vector<78x128xf32>
    %6 = arith.addf %0, %5 : vector<78x128xf32>
    %c0_6 = arith.constant 0 : index
    %c1 = arith.constant 1 : index
    %c0_7 = arith.constant 0 : index
    %7 = vector.load %arg1[%c0_6, %c1, %c0_7] : memref<1x104x128xbf16, #tpu.memory_space<vmem>>, vector<1x78x128xbf16>
    %8 = vector.shape_cast %7 : vector<1x78x128xbf16> to vector<78x128xbf16>
    %c1_8 = arith.constant 1 : index
    %c0_9 = arith.constant 0 : index
    %c0_10 = arith.constant 0 : index
    %9 = vector.load %arg2[%c1_8, %c0_9, %c0_10] : memref<9x128x128xbf16, #tpu.memory_space<vmem>>, vector<1x128x128xbf16>
    %10 = vector.shape_cast %9 : vector<1x128x128xbf16> to vector<128x128xbf16>
    %cst_11 = arith.constant dense<0.000000e+00> : vector<78x128xf32>
    %11 = tpu.matmul %8, %10, %cst_11 {dimension_numbers = #tpu.dot_dimension_numbers<[1], [0], [0], [1], [0, 0, 1, 1], [], []>} : vector<78x128xbf16>, vector<128x128xbf16>, vector<78x128xf32> -> vector<78x128xf32>
    %12 = arith.addf %6, %11 : vector<78x128xf32>
    %c0_12 = arith.constant 0 : index
    %c2 = arith.constant 2 : index
    %c0_13 = arith.constant 0 : index
    %13 = vector.load %arg1[%c0_12, %c2, %c0_13] : memref<1x104x128xbf16, #tpu.memory_space<vmem>>, vector<1x78x128xbf16>
    %14 = vector.shape_cast %13 : vector<1x78x128xbf16> to vector<78x128xbf16>
    %c2_14 = arith.constant 2 : index
    %c0_15 = arith.constant 0 : index
    %c0_16 = arith.constant 0 : index
    %15 = vector.load %arg2[%c2_14, %c0_15, %c0_16] : memref<9x128x128xbf16, #tpu.memory_space<vmem>>, vector<1x128x128xbf16>
    %16 = vector.shape_cast %15 : vector<1x128x128xbf16> to vector<128x128xbf16>
    %cst_17 = arith.constant dense<0.000000e+00> : vector<78x128xf32>
    %17 = tpu.matmul %14, %16, %cst_17 {dimension_numbers = #tpu.dot_dimension_numbers<[1], [0], [0], [1], [0, 0, 1, 1], [], []>} : vector<78x128xbf16>, vector<128x128xbf16>, vector<78x128xf32> -> vector<78x128xf32>
    %18 = arith.addf %12, %17 : vector<78x128xf32>
    %c0_18 = arith.constant 0 : index
    %c10 = arith.constant 10 : index
    %c0_19 = arith.constant 0 : index
    %19 = vector.load %arg1[%c0_18, %c10, %c0_19] : memref<1x104x128xbf16, #tpu.memory_space<vmem>>, vector<1x78x128xbf16>
    %20 = vector.shape_cast %19 : vector<1x78x128xbf16> to vector<78x128xbf16>
    %c3 = arith.constant 3 : index
    %c0_20 = arith.constant 0 : index
    %c0_21 = arith.constant 0 : index
    %21 = vector.load %arg2[%c3, %c0_20, %c0_21] : memref<9x128x128xbf16, #tpu.memory_space<vmem>>, vector<1x128x128xbf16>
    %22 = vector.shape_cast %21 : vector<1x128x128xbf16> to vector<128x128xbf16>
    %cst_22 = arith.constant dense<0.000000e+00> : vector<78x128xf32>
    %23 = tpu.matmul %20, %22, %cst_22 {dimension_numbers = #tpu.dot_dimension_numbers<[1], [0], [0], [1], [0, 0, 1, 1], [], []>} : vector<78x128xbf16>, vector<128x128xbf16>, vector<78x128xf32> -> vector<78x128xf32>
    %24 = arith.addf %18, %23 : vector<78x128xf32>
    %c0_23 = arith.constant 0 : index
    %c11 = arith.constant 11 : index
    %c0_24 = arith.constant 0 : index
    %25 = vector.load %arg1[%c0_23, %c11, %c0_24] : memref<1x104x128xbf16, #tpu.memory_space<vmem>>, vector<1x78x128xbf16>
    %26 = vector.shape_cast %25 : vector<1x78x128xbf16> to vector<78x128xbf16>
    %c4 = arith.constant 4 : index
    %c0_25 = arith.constant 0 : index
    %c0_26 = arith.constant 0 : index
    %27 = vector.load %arg2[%c4, %c0_25, %c0_26] : memref<9x128x128xbf16, #tpu.memory_space<vmem>>, vector<1x128x128xbf16>
    %28 = vector.shape_cast %27 : vector<1x128x128xbf16> to vector<128x128xbf16>
    %cst_27 = arith.constant dense<0.000000e+00> : vector<78x128xf32>
    %29 = tpu.matmul %26, %28, %cst_27 {dimension_numbers = #tpu.dot_dimension_numbers<[1], [0], [0], [1], [0, 0, 1, 1], [], []>} : vector<78x128xbf16>, vector<128x128xbf16>, vector<78x128xf32> -> vector<78x128xf32>
    %30 = arith.addf %24, %29 : vector<78x128xf32>
    %c0_28 = arith.constant 0 : index
    %c12 = arith.constant 12 : index
    %c0_29 = arith.constant 0 : index
    %31 = vector.load %arg1[%c0_28, %c12, %c0_29] : memref<1x104x128xbf16, #tpu.memory_space<vmem>>, vector<1x78x128xbf16>
    %32 = vector.shape_cast %31 : vector<1x78x128xbf16> to vector<78x128xbf16>
    %c5 = arith.constant 5 : index
    %c0_30 = arith.constant 0 : index
    %c0_31 = arith.constant 0 : index
    %33 = vector.load %arg2[%c5, %c0_30, %c0_31] : memref<9x128x128xbf16, #tpu.memory_space<vmem>>, vector<1x128x128xbf16>
    %34 = vector.shape_cast %33 : vector<1x128x128xbf16> to vector<128x128xbf16>
    %cst_32 = arith.constant dense<0.000000e+00> : vector<78x128xf32>
    %35 = tpu.matmul %32, %34, %cst_32 {dimension_numbers = #tpu.dot_dimension_numbers<[1], [0], [0], [1], [0, 0, 1, 1], [], []>} : vector<78x128xbf16>, vector<128x128xbf16>, vector<78x128xf32> -> vector<78x128xf32>
    %36 = arith.addf %30, %35 : vector<78x128xf32>
    %c0_33 = arith.constant 0 : index
    %c20 = arith.constant 20 : index
    %c0_34 = arith.constant 0 : index
    %37 = vector.load %arg1[%c0_33, %c20, %c0_34] : memref<1x104x128xbf16, #tpu.memory_space<vmem>>, vector<1x78x128xbf16>
    %38 = vector.shape_cast %37 : vector<1x78x128xbf16> to vector<78x128xbf16>
    %c6 = arith.constant 6 : index
    %c0_35 = arith.constant 0 : index
    %c0_36 = arith.constant 0 : index
    %39 = vector.load %arg2[%c6, %c0_35, %c0_36] : memref<9x128x128xbf16, #tpu.memory_space<vmem>>, vector<1x128x128xbf16>
    %40 = vector.shape_cast %39 : vector<1x128x128xbf16> to vector<128x128xbf16>
    %cst_37 = arith.constant dense<0.000000e+00> : vector<78x128xf32>
    %41 = tpu.matmul %38, %40, %cst_37 {dimension_numbers = #tpu.dot_dimension_numbers<[1], [0], [0], [1], [0, 0, 1, 1], [], []>} : vector<78x128xbf16>, vector<128x128xbf16>, vector<78x128xf32> -> vector<78x128xf32>
    %42 = arith.addf %36, %41 : vector<78x128xf32>
    %c0_38 = arith.constant 0 : index
    %c21 = arith.constant 21 : index
    %c0_39 = arith.constant 0 : index
    %43 = vector.load %arg1[%c0_38, %c21, %c0_39] : memref<1x104x128xbf16, #tpu.memory_space<vmem>>, vector<1x78x128xbf16>
    %44 = vector.shape_cast %43 : vector<1x78x128xbf16> to vector<78x128xbf16>
    %c7 = arith.constant 7 : index
    %c0_40 = arith.constant 0 : index
    %c0_41 = arith.constant 0 : index
    %45 = vector.load %arg2[%c7, %c0_40, %c0_41] : memref<9x128x128xbf16, #tpu.memory_space<vmem>>, vector<1x128x128xbf16>
    %46 = vector.shape_cast %45 : vector<1x128x128xbf16> to vector<128x128xbf16>
    %cst_42 = arith.constant dense<0.000000e+00> : vector<78x128xf32>
    %47 = tpu.matmul %44, %46, %cst_42 {dimension_numbers = #tpu.dot_dimension_numbers<[1], [0], [0], [1], [0, 0, 1, 1], [], []>} : vector<78x128xbf16>, vector<128x128xbf16>, vector<78x128xf32> -> vector<78x128xf32>
    %48 = arith.addf %42, %47 : vector<78x128xf32>
    %c0_43 = arith.constant 0 : index
    %c22 = arith.constant 22 : index
    %c0_44 = arith.constant 0 : index
    %49 = vector.load %arg1[%c0_43, %c22, %c0_44] : memref<1x104x128xbf16, #tpu.memory_space<vmem>>, vector<1x78x128xbf16>
    %50 = vector.shape_cast %49 : vector<1x78x128xbf16> to vector<78x128xbf16>
    %c8 = arith.constant 8 : index
    %c0_45 = arith.constant 0 : index
    %c0_46 = arith.constant 0 : index
    %51 = vector.load %arg2[%c8, %c0_45, %c0_46] : memref<9x128x128xbf16, #tpu.memory_space<vmem>>, vector<1x128x128xbf16>
    %52 = vector.shape_cast %51 : vector<1x128x128xbf16> to vector<128x128xbf16>
    %cst_47 = arith.constant dense<0.000000e+00> : vector<78x128xf32>
    %53 = tpu.matmul %50, %52, %cst_47 {dimension_numbers = #tpu.dot_dimension_numbers<[1], [0], [0], [1], [0, 0, 1, 1], [], []>} : vector<78x128xbf16>, vector<128x128xbf16>, vector<78x128xf32> -> vector<78x128xf32>
    %54 = arith.addf %48, %53 : vector<78x128xf32>
    %c0_48 = arith.constant 0 : index
    %c0_49 = arith.constant 0 : index
    %55 = vector.load %arg3[%c0_48, %c0_49] : memref<1x128xf32, #tpu.memory_space<vmem>>, vector<1x128xf32>
    %56 = vector.broadcast %55 : vector<1x128xf32> to vector<78x128xf32>
    %57 = arith.addf %54, %56 : vector<78x128xf32>
    %cst_50 = arith.constant 0.000000e+00 : f32
    %58 = vector.broadcast %cst_50 : f32 to vector<78x128xf32>
    %59 = arith.maximumf %57, %58 : vector<78x128xf32>
    %60 = arith.truncf %59 : vector<78x128xf32> to vector<78x128xbf16>
    %c0_51 = arith.constant 0 : index
    %c0_52 = arith.constant 0 : index
    %61 = vector.load %arg4[%c0_51, %c0_52] : memref<64x78xbf16, #tpu.memory_space<vmem>>, vector<64x78xbf16>
    %cst_53 = arith.constant dense<0.000000e+00> : vector<64x128xf32>
    %62 = tpu.matmul %61, %60, %cst_53 {dimension_numbers = #tpu.dot_dimension_numbers<[1], [0], [0], [1], [0, 0, 1, 1], [], []>} : vector<64x78xbf16>, vector<78x128xbf16>, vector<64x128xf32> -> vector<64x128xf32>
    %63 = vector.extract_strided_slice %62 {offsets = [0, 0], sizes = [16, 128], strides = [1, 1]} : vector<64x128xf32> to vector<16x128xf32>
    %64 = vector.extract_strided_slice %62 {offsets = [16, 0], sizes = [16, 128], strides = [1, 1]} : vector<64x128xf32> to vector<16x128xf32>
    %65 = arith.maximumf %63, %64 : vector<16x128xf32>
    %66 = vector.extract_strided_slice %62 {offsets = [32, 0], sizes = [16, 128], strides = [1, 1]} : vector<64x128xf32> to vector<16x128xf32>
    %67 = vector.extract_strided_slice %62 {offsets = [48, 0], sizes = [16, 128], strides = [1, 1]} : vector<64x128xf32> to vector<16x128xf32>
    %68 = arith.maximumf %66, %67 : vector<16x128xf32>
    %69 = arith.maximumf %65, %68 : vector<16x128xf32>
    %c0_54 = arith.constant 0 : index
    %c0_55 = arith.constant 0 : index
    %70 = vector.load %arg5[%c0_54, %c0_55] : memref<4x16xf32, #tpu.memory_space<vmem>>, vector<4x16xf32>
    %cst_56 = arith.constant dense<0.000000e+00> : vector<4x128xf32>
    %71 = tpu.matmul %70, %69, %cst_56 {dimension_numbers = #tpu.dot_dimension_numbers<[1], [0], [0], [1], [0, 0, 1, 1], [], []>} : vector<4x16xf32>, vector<16x128xf32>, vector<4x128xf32> -> vector<4x128xf32>
    %72 = arith.truncf %71 : vector<4x128xf32> to vector<4x128xbf16>
    %c0_57 = arith.constant 0 : index
    %c0_58 = arith.constant 0 : index
    %c0_59 = arith.constant 0 : index
    %73 = vector.load %arg6[%c0_57, %c0_58, %c0_59] : memref<1x4x128xbf16, #tpu.memory_space<vmem>>, vector<1x4x128xbf16>
    %74 = vector.shape_cast %73 : vector<1x4x128xbf16> to vector<4x128xbf16>
    %75 = vector.shape_cast %72 : vector<4x128xbf16> to vector<1x4x128xbf16>
    tpu.vector_store %arg6[%c0_57, %c0_58, %c0_59], %75 {strides = array<i32>} : memref<1x4x128xbf16, #tpu.memory_space<vmem>>, vector<1x4x128xbf16>,
    return
  }
  func.func @transform_0(%arg0: i32) -> (i32, i32, i32) {
    %c0_i32 = arith.constant 0 : i32
    %c0_i32_0 = arith.constant 0 : i32
    %c0_i32_1 = arith.constant 0 : i32
    return %arg0, %c0_i32, %c0_i32_0 : i32, i32, i32
  }
  func.func @transform_1(%arg0: i32) -> (i32, i32, i32) {
    %c0_i32 = arith.constant 0 : i32
    %c0_i32_0 = arith.constant 0 : i32
    %c0_i32_1 = arith.constant 0 : i32
    %c0_i32_2 = arith.constant 0 : i32
    return %c0_i32, %c0_i32_0, %c0_i32_1 : i32, i32, i32
  }
  func.func @transform_2(%arg0: i32) -> (i32, i32) {
    %c0_i32 = arith.constant 0 : i32
    %c0_i32_0 = arith.constant 0 : i32
    %c0_i32_1 = arith.constant 0 : i32
    return %c0_i32, %c0_i32_0 : i32, i32
  }
  func.func @transform_3(%arg0: i32) -> (i32, i32) {
    %c0_i32 = arith.constant 0 : i32
    %c0_i32_0 = arith.constant 0 : i32
    %c0_i32_1 = arith.constant 0 : i32
    return %c0_i32, %c0_i32_0 : i32, i32
  }
  func.func @transform_4(%arg0: i32) -> (i32, i32) {
    %c0_i32 = arith.constant 0 : i32
    %c0_i32_0 = arith.constant 0 : i32
    %c0_i32_1 = arith.constant 0 : i32
    return %c0_i32, %c0_i32_0 : i32, i32
  }
  func.func @transform_5(%arg0: i32) -> (i32, i32, i32) {
    %c0_i32 = arith.constant 0 : i32
    %c0_i32_0 = arith.constant 0 : i32
    %c0_i32_1 = arith.constant 0 : i32
    return %arg0, %c0_i32, %c0_i32_0 : i32, i32, i32
  }
}

module attributes {stable_mosaic.version = 11 : i64} {
  func.func @_classifier_kernel(%arg0: i32, %arg1: memref<2x512xbf16, #tpu.memory_space<vmem>>, %arg2: memref<512x512xbf16, #tpu.memory_space<vmem>>, %arg3: memref<1x512xf32, #tpu.memory_space<vmem>>, %arg4: memref<512x128xbf16, #tpu.memory_space<vmem>>, %arg5: memref<1x128xf32, #tpu.memory_space<vmem>>, %arg6: memref<2x128xf32, #tpu.memory_space<vmem>>, %arg7: memref<2x128xf32, #tpu.memory_space<vmem>>) attributes {dimension_semantics = [#tpu.dimension_semantics<arbitrary>], iteration_bounds = array<i64: 8>, scalar_prefetch = 0 : i64, scratch_operands = 1 : i64, tpu.core_type = #tpu.core_type<tc>, window_params = [{pipeline_mode = #tpu.pipeline_mode<synchronous>, transform_indices = @transform_0, window_bounds = array<i64: 2, 512>}, {transform_indices = @transform_1, window_bounds = array<i64: 512, 512>}, {transform_indices = @transform_2, window_bounds = array<i64: 1, 512>}, {transform_indices = @transform_3, window_bounds = array<i64: 512, 128>}, {pipeline_mode = #tpu.pipeline_mode<synchronous>, transform_indices = @transform_4, window_bounds = array<i64: 1, 128>}, {pipeline_mode = #tpu.pipeline_mode<synchronous>, transform_indices = @transform_5, window_bounds = array<i64: 2, 128>}]} {
    %c0_i32 = arith.constant 0 : i32
    %0 = arith.cmpi eq, %arg0, %c0_i32 : i32
    %1 = arith.extui %0 : i1 to i32
    %c0_i32_0 = arith.constant 0 : i32
    %2 = arith.cmpi ne, %1, %c0_i32_0 : i32
    scf.if %2 {
      %cst_14 = arith.constant 0.000000e+00 : f32
      %18 = vector.broadcast %cst_14 : f32 to vector<2x128xf32>
      %c0_15 = arith.constant 0 : index
      %c0_16 = arith.constant 0 : index
      %19 = vector.load %arg7[%c0_15, %c0_16] : memref<2x128xf32, #tpu.memory_space<vmem>>, vector<2x128xf32>
      tpu.vector_store %arg7[%c0_15, %c0_16], %18 {strides = array<i32>} : memref<2x128xf32, #tpu.memory_space<vmem>>, vector<2x128xf32>,
    } else {
    }
    %c0 = arith.constant 0 : index
    %c0_1 = arith.constant 0 : index
    %3 = vector.load %arg1[%c0, %c0_1] : memref<2x512xbf16, #tpu.memory_space<vmem>>, vector<2x512xbf16>
    %c0_2 = arith.constant 0 : index
    %c0_3 = arith.constant 0 : index
    %4 = vector.load %arg2[%c0_2, %c0_3] : memref<512x512xbf16, #tpu.memory_space<vmem>>, vector<512x512xbf16>
    %cst = arith.constant dense<0.000000e+00> : vector<2x512xf32>
    %5 = tpu.matmul %3, %4, %cst {dimension_numbers = #tpu.dot_dimension_numbers<[1], [0], [0], [1], [0, 0, 1, 1], [], []>} : vector<2x512xbf16>, vector<512x512xbf16>, vector<2x512xf32> -> vector<2x512xf32>
    %c0_4 = arith.constant 0 : index
    %c0_5 = arith.constant 0 : index
    %6 = vector.load %arg3[%c0_4, %c0_5] : memref<1x512xf32, #tpu.memory_space<vmem>>, vector<1x512xf32>
    %7 = vector.broadcast %6 : vector<1x512xf32> to vector<2x512xf32>
    %8 = arith.addf %5, %7 : vector<2x512xf32>
    %c0_6 = arith.constant 0 : index
    %c0_7 = arith.constant 0 : index
    %9 = vector.load %arg7[%c0_6, %c0_7] : memref<2x128xf32, #tpu.memory_space<vmem>>, vector<2x128xf32>
    %c0_8 = arith.constant 0 : index
    %c0_9 = arith.constant 0 : index
    %10 = vector.load %arg4[%c0_8, %c0_9] : memref<512x128xbf16, #tpu.memory_space<vmem>>, vector<512x128xbf16>
    %11 = arith.extf %10 : vector<512x128xbf16> to vector<512x128xf32>
    %cst_10 = arith.constant dense<0.000000e+00> : vector<2x128xf32>
    %12 = tpu.matmul %8, %11, %cst_10 {dimension_numbers = #tpu.dot_dimension_numbers<[1], [0], [0], [1], [0, 0, 1, 1], [], []>} : vector<2x512xf32>, vector<512x128xf32>, vector<2x128xf32> -> vector<2x128xf32>
    %13 = arith.addf %9, %12 : vector<2x128xf32>
    %c0_11 = arith.constant 0 : index
    %c0_12 = arith.constant 0 : index
    %14 = vector.load %arg7[%c0_11, %c0_12] : memref<2x128xf32, #tpu.memory_space<vmem>>, vector<2x128xf32>
    tpu.vector_store %arg7[%c0_11, %c0_12], %13 {strides = array<i32>} : memref<2x128xf32, #tpu.memory_space<vmem>>, vector<2x128xf32>,
    %c7_i32 = arith.constant 7 : i32
    %15 = arith.cmpi eq, %arg0, %c7_i32 : i32
    %16 = arith.extui %15 : i1 to i32
    %c0_i32_13 = arith.constant 0 : i32
    %17 = arith.cmpi ne, %16, %c0_i32_13 : i32
    scf.if %17 {
      %c0_14 = arith.constant 0 : index
      %c0_15 = arith.constant 0 : index
      %18 = vector.load %arg7[%c0_14, %c0_15] : memref<2x128xf32, #tpu.memory_space<vmem>>, vector<2x128xf32>
      %c0_16 = arith.constant 0 : index
      %c0_17 = arith.constant 0 : index
      %19 = vector.load %arg5[%c0_16, %c0_17] : memref<1x128xf32, #tpu.memory_space<vmem>>, vector<1x128xf32>
      %20 = vector.broadcast %19 : vector<1x128xf32> to vector<2x128xf32>
      %21 = arith.addf %18, %20 : vector<2x128xf32>
      %cst_18 = arith.constant dense<0xFF800000> : vector<2xf32>
      %22 = vector.multi_reduction <maximumf>, %21, %cst_18 [1] : vector<2x128xf32> to vector<2xf32>
      %23 = vector.shape_cast %22 : vector<2xf32> to vector<2x1xf32>
      %24 = vector.broadcast %23 : vector<2x1xf32> to vector<2x128xf32>
      %25 = arith.subf %21, %24 : vector<2x128xf32>
      %26 = math.exp %25 : vector<2x128xf32>
      %cst_19 = arith.constant dense<0.000000e+00> : vector<2xf32>
      %27 = vector.multi_reduction <add>, %26, %cst_19 [1] : vector<2x128xf32> to vector<2xf32>
      %28 = vector.shape_cast %27 : vector<2xf32> to vector<2x1xf32>
      %29 = vector.broadcast %28 : vector<2x1xf32> to vector<2x128xf32>
      %30 = arith.divf %26, %29 : vector<2x128xf32>
      %c0_20 = arith.constant 0 : index
      %c0_21 = arith.constant 0 : index
      %31 = vector.load %arg6[%c0_20, %c0_21] : memref<2x128xf32, #tpu.memory_space<vmem>>, vector<2x128xf32>
      tpu.vector_store %arg6[%c0_20, %c0_21], %30 {strides = array<i32>} : memref<2x128xf32, #tpu.memory_space<vmem>>, vector<2x128xf32>,
    } else {
    }
    return
  }
  func.func @transform_0(%arg0: i32) -> (i32, i32) {
    %c0_i32 = arith.constant 0 : i32
    %c0_i32_0 = arith.constant 0 : i32
    %c0_i32_1 = arith.constant 0 : i32
    return %c0_i32, %c0_i32_0 : i32, i32
  }
  func.func @transform_1(%arg0: i32) -> (i32, i32) {
    %c0_i32 = arith.constant 0 : i32
    %c0_i32_0 = arith.constant 0 : i32
    return %c0_i32, %arg0 : i32, i32
  }
  func.func @transform_2(%arg0: i32) -> (i32, i32) {
    %c0_i32 = arith.constant 0 : i32
    %c0_i32_0 = arith.constant 0 : i32
    return %c0_i32, %arg0 : i32, i32
  }
  func.func @transform_3(%arg0: i32) -> (i32, i32) {
    %c0_i32 = arith.constant 0 : i32
    %c0_i32_0 = arith.constant 0 : i32
    return %arg0, %c0_i32 : i32, i32
  }
  func.func @transform_4(%arg0: i32) -> (i32, i32) {
    %c0_i32 = arith.constant 0 : i32
    %c0_i32_0 = arith.constant 0 : i32
    %c0_i32_1 = arith.constant 0 : i32
    return %c0_i32, %c0_i32_0 : i32, i32
  }
  func.func @transform_5(%arg0: i32) -> (i32, i32) {
    %c0_i32 = arith.constant 0 : i32
    %c0_i32_0 = arith.constant 0 : i32
    %c0_i32_1 = arith.constant 0 : i32
    return %c0_i32, %c0_i32_0 : i32, i32
  }
}

</mosaic_0001>

<bundles_post_ra>
// kernel: feature_extractor_forward.5
= control target key start
LH: loop header
LB: loop body
LE: loop exit
PB: predicated region body
PF: predicated region fallthrough
CT: control target
= control target key end

     0   :  { %s3316_s0 = inlined_call_operand.vmem [shape: bf16[2,512], index: 0, kind: input, shape index: {}]   ;;  %s3317_s1 = inlined_call_operand.hbm [shape: bf16[512,4096], index: 1, kind: input, shape index: {}]   ;;  %s3318_s2 = inlined_call_operand.hbm [shape: f32[1,4096], index: 2, kind: input, shape index: {}]   ;;  %s3319_s3 = inlined_call_operand.hbm [shape: bf16[4096,128], index: 3, kind: input, shape index: {}]   ;;  %s3320_s4 = inlined_call_operand.hbm [shape: f32[1,128], index: 4, kind: input, shape index: {}]   ;;  %s3321_s5 = inlined_call_operand.hbm [shape: f32[2,128], index: 5, kind: output, shape index: {}]  }
   0x1   :  { %3322 = sst [smem:[#allocation16_spill]] %s3318_s2 }
   0x2   :  { %3323 = sst [smem:[#allocation17_spill]] %s3320_s4 }
   0x3   :  { %10 = vsyncpa [#allocation4], 0 }
   0x4   :  { %12 = vsyncpa [#allocation4 + $0x1], 0 }
   0x5   :  { %13 = vsyncpa [#allocation7], 0 }
   0x6   :  { %15 = vsyncpa [#allocation7 + $0x1], 0 }
   0x7   :  { %16 = vsyncpa [#allocation10], 0 }
   0x8   :  { %17 = vsyncpa [#allocation5], 0  ;;  %s2826_s18 = smov 0   ;;  %s2828_s19 = smov 0  }
   0x9   :  { %s2830_s20 = smov 0   ;;  %s2832_s21 = smov 0  }
   0xa LB: > { %s2847_s22 = sadd.s32 1, %s2786_s21   ;;  %s51_s23 = sadd.s32 1, %s2782_s20  ;;  %s2786_s21 = sphi %s2832_s21, %s3333_s21   ;;  %s2782_s20 = sphi %s2830_s20, %s3332_s20   ;;  %s2778_s19 = sphi %s2828_s19, %s3331_s19   ;;  %s2774_s18 = sphi %s2826_s18, %s3330_s18  }
   0xb   : > { %s48_s24 = ssub.s32 %s2786_s21, %s2847_s22  ;;  %p58_p0 = scmp.ne.s32.totalorder %s2782_s20, %s2778_s19 }
   0xc   : > { %p49_p1 = scmp.eq.s32.totalorder %s48_s24, 0  ;;  %p59_p2 = scmp.eq.s32.totalorder %s2786_s21, 0 }
   0xd   : > { %p2543_p3 = scmp.lt.s32.totalorder %s2786_s21, 8  ;;  %s2860_s26 = sand.u32 1, %s2782_s20  }
   0xe   : > { %s2857_s25 = scalar_select %p49_p1, %s2782_s20, %s51_s23  }
   0xf   : > { %p60_p4 = por %p59_p2, %p58_p0  ;;  %s1694_s27 = sshll.u32 %s2860_s26, 10 }
  0x10   : > { %s219_s28 = sand.u32 1, %s2786_s21   ;;  %s1697_s30 = sshll.u32 %s2860_s26, 2 }
  0x11   : > { %p2864_p5 = pnand %p2543_p3, %p60_p4  ;;  %s1698_s6 = sshll.u32 %s2786_s21, 2 }
  0x12   : > { %s3325_s2 = sld [smem:[#allocation16_spill]]  ;;  %s223_s10 = scalar_lea.vmem [#allocation6], %s1697_s30 }
  0x13   : > { %s231_s11 = sshll.u32 %s223_s10, 4  ;;  %s2874_s14 = scalar_lea.sflag [#allocation7], %s219_s28  ;;  %s232_s11 = int_to_ptr.vmem [resolvable:$true] %s231_s11 }
  0x14   : > { %p2596_p7 = pneg %p2864_p5 }
  0x18   : > { %s227_s9 = scalar_lea.hbm %s3325_s2, %s1698_s6  ;;  %s2599_s24 = scalar_lea.hbm %s3325_s2, 32 }
  0x19   : > { %s229_s12 = sshll.u32 %s227_s9, 4  ;;  %s230_s12 = int_to_ptr.hbm [resolvable:$true] %s229_s12 }
  0x1a   : > { %s2592_s15 = sshra.s32 %s230_s12, 4  ;;  %s2593_s15 = int_to_ptr.hbm [resolvable:$true] %s2592_s15 }
  0x1b   : > { %s2594_s16 = scalar_lea.hbm %s2593_s15, 4  ;;  %p2600_p10 = scmp.lt.s32.totalorder %s2593_s15, %s3325_s2 }
  0x1c   : > { %p2595_p6 = scmp.ne.s32.totalorder %s2593_s15, %s2594_s16  ;;  %p2601_p11 = scmp.lt.s32.totalorder %s2599_s24, %s2594_s16 }
  0x1e   : > { %p2597_p8 = pnand %p2596_p7, %p2595_p6  ;;  %p2602_p12 = por %p2601_p11, %p2600_p10 }
  0x20   : > { %p2598_p9 = pneg %p2597_p8 }
  0x22   : > { %p2603_p13 = pnand %p2602_p12, %p2598_p9 }
  0x24   : > { %2606 = shalt.err (!%p2603_p13)
}
  0x25   : > { %2538 = dma.hbm_to_vmem [thread:$0]  (!%p2864_p5), %s230_s12, 64, %s232_s11, %s2874_s14  }
  0x26   : > { %s2891_s28 = sadd.s32 4294967295, %s2786_s21   ;;  %p64_p1 = scmp.ne.s32.totalorder %s2778_s19, %s2774_s18 }
  0x27   : > { %p65_p0 = scmp.eq.s32.totalorder %s2891_s28, 0  ;;  %p1691_p2 = scmp.ge.s32.totalorder %s2786_s21, 1 }
  0x28   : > { %p169_p3 = scmp.lt.s32.totalorder %s2786_s21, 9  ;;  %p1692_p4 = scmp.ne.s32.totalorder %s2891_s28, 0 }
  0x29   : > { %p2901_p6 = por %p65_p0, %p64_p1  ;;  %s3327_s4 = sld [smem:[#allocation17_spill]] }
  0x2a   : > { %p2908_p8 = pnand %p1691_p2, %p169_p3  ;;  %s2788_s18 = smov [#allocation9]  }
  0x2b   : > { %s186_s12 = sshll.u32 %s2788_s18, 4  ;;  %s2225_s15 = sshll.u32 %s2786_s21, 4  ;;  %s187_s12 = int_to_ptr.vmem [resolvable:$true] %s186_s12 }
  0x2c   : > { %p2528_p9 = pneg %p2908_p8  ;;  %s206_s23 = scalar_lea.hbm %s3317_s1, %s2225_s15 }
  0x2d   : > { %s201_s24 = scalar_lea.vmem [#allocation3], %s1694_s27  ;;  %s207_s6 = sshll.u32 %s206_s23, 4  ;;  %s208_s6 = int_to_ptr.hbm [resolvable:$true] %s207_s6 }
  0x2e   : > { %p2529_p10 = pnand %p2528_p9, %p65_p0  ;;  %s209_s30 = sshll.u32 %s201_s24, 4  ;;  %s210_s30 = int_to_ptr.vmem [resolvable:$true] %s209_s30 }
  0x2f   : > { %s184_s10 = sshll.u32 %s3327_s4, 4  ;;  %s198_s8 = scalar_lea.sflag [#allocation4], %s2860_s26  ;;  %s185_s10 = int_to_ptr.hbm [resolvable:$true] %s184_s10 }
  0x30   : > { %2531 = dma.hbm_to_vmem [thread:$0]  (!%p2529_p10), %s185_s10, 16, %s187_s12, [#allocation10]  }
  0x31   : > { %s2652_s9 = sshra.s32 %s208_s6, 4  ;;  %s2659_s15 = scalar_lea.hbm %s3317_s1, 8192  ;;  %s2653_s9 = int_to_ptr.hbm [resolvable:$true] %s2652_s9 }
  0x32   : > { %s2654_s18 = scalar_lea.hbm %s2653_s9, 1024  ;;  %p2660_p1 = scmp.lt.s32.totalorder %s2653_s9, %s3317_s1 }
  0x33   : > { %p2655_p11 = scmp.ne.s32.totalorder %s2653_s9, %s2654_s18  ;;  %p2661_p2 = scmp.lt.s32.totalorder %s2659_s15, %s2654_s18 }
  0x35   : > { %p2657_p12 = pnand %p2655_p11, %p2596_p7  ;;  %p2662_p3 = por %p2661_p2, %p2660_p1 }
  0x37   : > { %p2658_p13 = pneg %p2657_p12 }
  0x39   : > { %p2663_p9 = pnand %p2662_p3, %p2658_p13 }
  0x3b   : > { %2666 = shalt.err (!%p2663_p9)
}
  0x3c   : > { %s2789_s10 = smov 2048   ;;  %s2790_s12 = smov 256  }
  0x3d   : > { %s2791_s17 = smov 16   ;;  %s2226_s23 = sshll.u32 %s2786_s21, 8 }
  0x3e   : > { %2535 = dma.hbm_to_vmem [thread:$0]  (!%p2864_p5), %s208_s6, 16384, %s210_s30, %s198_s8, %s2789_s10, %s2790_s12, %s2791_s17  }
  0x3f   : > { %s3329_s2 = sshll.u32 %s2860_s26, 8  ;;  %s247_s9 = scalar_lea.hbm %s3319_s3, %s2226_s23 }
  0x40   : > { %s242_s13 = scalar_lea.vmem [#allocation8], %s3329_s2  ;;  %s248_s18 = sshll.u32 %s247_s9, 4  ;;  %s249_s18 = int_to_ptr.hbm [resolvable:$true] %s248_s18 }
  0x41   : > { %s250_s24 = sshll.u32 %s242_s13, 4  ;;  %s2682_s15 = sshra.s32 %s249_s18, 4  ;;  %s251_s24 = int_to_ptr.vmem [resolvable:$true] %s250_s24  ;;  %s2683_s15 = int_to_ptr.hbm [resolvable:$true] %s2682_s15 }
  0x42   : > { %s2684_s27 = scalar_lea.hbm %s2683_s15, 256  ;;  %s2689_s26 = scalar_lea.hbm %s3319_s3, 2048 }
  0x43   : > { %p2685_p10 = scmp.ne.s32.totalorder %s2683_s15, %s2684_s27  ;;  %p2690_p13 = scmp.lt.s32.totalorder %s2683_s15, %s3319_s3 }
  0x44   : > { %p2691_p1 = scmp.lt.s32.totalorder %s2689_s26, %s2684_s27 }
  0x45   : > { %p2687_p11 = pnand %p2685_p10, %p2596_p7 }
  0x46   : > { %p2692_p2 = por %p2691_p1, %p2690_p13 }
  0x47   : > { %p2688_p12 = pneg %p2687_p11 }
  0x49   : > { %p2693_p3 = pnand %p2692_p2, %p2688_p12 }
  0x4b   : > { %2696 = shalt.err (!%p2693_p3)
}
  0x4c   : > { %s2792_s4 = smov 64   ;;  %s2793_s10 = smov 4  }
  0x4d   : > { %2541 = dma.hbm_to_vmem [thread:$0]  (!%p2864_p5), %s249_s18, 4096, %s251_s24, %s2874_s14, %s2792_s4, %s2792_s4, %s2793_s10  }
  0x4e   : > { %262 = sbr.rel (%p2908_p8) target bundleno = 781 (0x30d), region = 40  ;;  %s264_s12 = sand.u32 (!%p2908_p8), 1, %s2778_s19  }
  0x4f   : > { %s1703_s17 = sshll.u32 (!%p2908_p8), %s264_s12, 10  ;;  %s265_s23 = scalar_lea.sflag (!%p2908_p8), [#allocation4], %s264_s12 }
  0x50   : > { %s2955_s2 = scalar_lea.vmem (!%p2908_p8), [#allocation3], %s1703_s17 }
  0x53   : > { %2757 = dma.done.wait (%p2901_p6), %s265_s23, 16384  }
  0x54   : > { %2759 = vsyncadd (%p2901_p6), %s265_s23, 4294950912  ;;  %s274_s13 = sand.u32 1, %s2891_s28   ;;  %s1704_s29 = sshll.u32 %s264_s12, 2 }
  0x55   : > { %s275_s14 = scalar_lea.sflag [#allocation7], %s274_s13  ;;  %s2962_s24 = scalar_lea.vmem [#allocation6], %s1704_s29 }
  0x56   : > { %2761 = dma.done.wait (%p2901_p6), %s275_s14, 4160  }
  0x57   : > { %2763 = vsyncadd (%p2901_p6), %s275_s14, 4294963136  ;;  %s1705_s11 = sshll.u32 %s264_s12, 8 }
  0x58   : > { %s2968_s16 = scalar_lea.vmem [#allocation8], %s1705_s11 }
  0x59   : > { %2765 = dma.done.wait (%p65_p0), [#allocation10], 16  }
  0x5a   : > { %2767 = vsyncadd (%p65_p0), [#allocation10], 4294967280  ;;  %332 = sbr.rel (%p1692_p4) target bundleno = 97 (0x61), region = 60 }
  0x5f   : > { %v2794_v0 = vmov 0.0  }
  0x60   : > { %333 = vst [vmem:[#allocation2] sm:$0x3] %v2794_v0 }
  0x61 PF: > { %v1822_v1 = vld [vmem:[%s2955_s2 + $0xe0] sm:$0xf]  ;;  %v2257_v2 = vld [vmem:[%s2955_s2 + $0xec] sm:$0xf0]  ;;  %p2220_p5 = scmp.ne.s32.totalorder %s2891_s28, 7 }
  0x62   : > { %v1950_v3 = vld [vmem:[%s2955_s2 + $0x1e0] sm:$0xf]  ;;  %v1823_v4 = vor.u32 %v2257_v2, %v1822_v1  ;;  %v2289_v5 = vld [vmem:[%s2955_s2 + $0x1ec] sm:$0xf0] }
  0x63   : > { %v2078_v6 = vld [vmem:[%s2955_s2 + $0x2e0] sm:$0xf]  ;;  %v2321_v7 = vld [vmem:[%s2955_s2 + $0x2ec] sm:$0xf0]  ;;  %v1951_v8 = vor.u32 %v2289_v5, %v1950_v3 }
  0x64   : > { %v2079_v9 = vor.u32 %v2321_v7, %v2078_v6  ;;  %v2206_v10 = vld [vmem:[%s2955_s2 + $0x3e0] sm:$0xf]  ;;  %v2353_v11 = vld [vmem:[%s2955_s2 + $0x3ec] sm:$0xf0]  ;;  %1123 = vmatpush.bf16.msra.mxu0 %v1823_v4 }
  0x65   : > { %v1806_v12 = vld [vmem:[%s2955_s2 + $0xc0] sm:$0xf]  ;;  %v2207_v13 = vor.u32 %v2353_v11, %v2206_v10  ;;  %v2253_v14 = vld [vmem:[%s2955_s2 + $0xcc] sm:$0xf0]  ;;  %1136 = vmatpush.bf16.msra.mxu1 %v1951_v8 }
  0x66   : > { %v1934_v15 = vld [vmem:[%s2955_s2 + $0x1c0] sm:$0xf]  ;;  %v2285_v16 = vld [vmem:[%s2955_s2 + $0x1cc] sm:$0xf0]  ;;  %1149 = vmatpush.bf16.msra.mxu2 %v2079_v9  ;;  %v1807_v17 = vor.u32 %v2253_v14, %v1806_v12 }
  0x67   : > { %v1935_v18 = vor.u32 %v2285_v16, %v1934_v15  ;;  %v2062_v19 = vld [vmem:[%s2955_s2 + $0x2c0] sm:$0xf]  ;;  %v2317_v20 = vld [vmem:[%s2955_s2 + $0x2cc] sm:$0xf0]  ;;  %1162 = vmatpush.bf16.msra.mxu3 %v2207_v13 }
  0x68   : > { %v2190_v21 = vld [vmem:[%s2955_s2 + $0x3c0] sm:$0xf]  ;;  %v2063_v22 = vor.u32 %v2317_v20, %v2062_v19  ;;  %v2349_v23 = vld [vmem:[%s2955_s2 + $0x3cc] sm:$0xf0]  ;;  %1124 = vmatpush.bf16.msra.mxu0 %v1807_v17 }
  0x69   : > { %v1790_v24 = vld [vmem:[%s2955_s2 + $0xa0] sm:$0xf]  ;;  %v2249_v25 = vld [vmem:[%s2955_s2 + $0xac] sm:$0xf0]  ;;  %v2191_v26 = vor.u32 %v2349_v23, %v2190_v21  ;;  %1137 = vmatpush.bf16.msra.mxu1 %v1935_v18 }
  0x6a   : > { %v1918_v27 = vld [vmem:[%s2955_s2 + $0x1a0] sm:$0xf]  ;;  %v2281_v28 = vld [vmem:[%s2955_s2 + $0x1ac] sm:$0xf0]  ;;  %v1791_v30 = vor.u32 %v2249_v25, %v1790_v24  ;;  %1150 = vmatpush.bf16.msra.mxu2 %v2063_v22 }
  0x6b   : > { %v2046_v29 = vld [vmem:[%s2955_s2 + $0x2a0] sm:$0xf]  ;;  %v2313_v31 = vld [vmem:[%s2955_s2 + $0x2ac] sm:$0xf0]  ;;  %v1919_v34 = vor.u32 %v2281_v28, %v1918_v27  ;;  %1163 = vmatpush.bf16.msra.mxu3 %v2191_v26 }
  0x6c   : > { %v2174_v32 = vld [vmem:[%s2955_s2 + $0x3a0] sm:$0xf]  ;;  %v2345_v33 = vld [vmem:[%s2955_s2 + $0x3ac] sm:$0xf0]  ;;  %v2047_v35 = vor.u32 %v2313_v31, %v2046_v29  ;;  %1125 = vmatpush.bf16.msra.mxu0 %v1791_v30  ;;  %v2255_v29 = vld [vmem:[%s2955_s2 + $0xe4] sm:$0xf] }
  0x6d   : > { %v1774_v36 = vld [vmem:[%s2955_s2 + $0x80] sm:$0xf]  ;;  %v2245_v37 = vld [vmem:[%s2955_s2 + $0x8c] sm:$0xf0]  ;;  %v2175_v39 = vor.u32 %v2345_v33, %v2174_v32  ;;  %1138 = vmatpush.bf16.msra.mxu1 %v1919_v34  ;;  %v1824_v30 = vld [vmem:[%s2955_s2 + $0xf0] sm:$0xf0] }
  0x6e   : > { %v1902_v38 = vld [vmem:[%s2955_s2 + $0x180] sm:$0xf]  ;;  %v2277_v40 = vld [vmem:[%s2955_s2 + $0x18c] sm:$0xf0]  ;;  %v1775_v45 = vor.u32 %v2245_v37, %v1774_v36  ;;  %1151 = vmatpush.bf16.msra.mxu2 %v2047_v35  ;;  %v2287_v31 = vld [vmem:[%s2955_s2 + $0x1e4] sm:$0xf] }
  0x6f   : > { %v2030_v41 = vld [vmem:[%s2955_s2 + $0x280] sm:$0xf]  ;;  %v2309_v42 = vld [vmem:[%s2955_s2 + $0x28c] sm:$0xf0]  ;;  %v1903_v46 = vor.u32 %v2277_v40, %v1902_v38  ;;  %1164 = vmatpush.bf16.msra.mxu3 %v2175_v39  ;;  %v1952_v33 = vld [vmem:[%s2955_s2 + $0x1f0] sm:$0xf0] }
  0x70   : > { %v2158_v43 = vld [vmem:[%s2955_s2 + $0x380] sm:$0xf]  ;;  %v2341_v44 = vld [vmem:[%s2955_s2 + $0x38c] sm:$0xf0]  ;;  %v2031_v47 = vor.u32 %v2309_v42, %v2030_v41  ;;  %1126 = vmatpush.bf16.msra.mxu0 %v1775_v45  ;;  %v2319_v34 = vld [vmem:[%s2955_s2 + $0x2e4] sm:$0xf]  ;;  %v1827_v41 = vor.u32 %v2255_v29, %v1824_v30  ;;  %v1955_v42 = vor.u32 %v2287_v31, %v1952_v33 }
  0x71   : > { %v1758_v48 = vld [vmem:[%s2955_s2 + $0x60] sm:$0xf]  ;;  %v2241_v49 = vld [vmem:[%s2955_s2 + $0x6c] sm:$0xf0]  ;;  %v2159_v51 = vor.u32 %v2341_v44, %v2158_v43  ;;  %1139 = vmatpush.bf16.msra.mxu1 %v1903_v46  ;;  %v2080_v35 = vld [vmem:[%s2955_s2 + $0x2f0] sm:$0xf0] }
  0x72   : > { %v1886_v50 = vld [vmem:[%s2955_s2 + $0x160] sm:$0xf]  ;;  %v2273_v52 = vld [vmem:[%s2955_s2 + $0x16c] sm:$0xf0]  ;;  %v1759_v57 = vor.u32 %v2241_v49, %v1758_v48  ;;  %1152 = vmatpush.bf16.msra.mxu2 %v2031_v47  ;;  %v2351_v38 = vld [vmem:[%s2955_s2 + $0x3e4] sm:$0xf]  ;;  %v2083_v43 = vor.u32 %v2319_v34, %v2080_v35 }
  0x73   : > { %v2014_v53 = vld [vmem:[%s2955_s2 + $0x260] sm:$0xf]  ;;  %v2305_v54 = vld [vmem:[%s2955_s2 + $0x26c] sm:$0xf0]  ;;  %v1887_v58 = vor.u32 %v2273_v52, %v1886_v50  ;;  %1165 = vmatpush.bf16.msra.mxu3 %v2159_v51  ;;  %v2208_v39 = vld [vmem:[%s2955_s2 + $0x3f0] sm:$0xf0] }
  0x74   : > { %v2142_v55 = vld [vmem:[%s2955_s2 + $0x360] sm:$0xf]  ;;  %v2337_v56 = vld [vmem:[%s2955_s2 + $0x36c] sm:$0xf0]  ;;  %v2015_v59 = vor.u32 %v2305_v54, %v2014_v53  ;;  %1127 = vmatpush.bf16.msra.mxu0 %v1759_v57  ;;  %v2251_v44 = vld [vmem:[%s2955_s2 + $0xc4] sm:$0xf]  ;;  %v2211_v47 = vor.u32 %v2351_v38, %v2208_v39 }
  0x75   : > { %v1742_v60 = vld [vmem:[%s2955_s2 + $0x40] sm:$0xf]  ;;  %v2237_v61 = vld [vmem:[%s2955_s2 + $0x4c] sm:$0xf0]  ;;  %v2143_v63 = vor.u32 %v2337_v56, %v2142_v55  ;;  %1140 = vmatpush.bf16.msra.mxu1 %v1887_v58  ;;  %v1808_v45 = vld [vmem:[%s2955_s2 + $0xd0] sm:$0xf0] }
  0x76   : > { %v1870_v62 = vld [vmem:[%s2955_s2 + $0x140] sm:$0xf]  ;;  %v2269_v0 = vld [vmem:[%s2955_s2 + $0x14c] sm:$0xf0]  ;;  %v1743_v5 = vor.u32 %v2237_v61, %v1742_v60  ;;  %1153 = vmatpush.bf16.msra.mxu2 %v2015_v59  ;;  %v2283_v46 = vld [vmem:[%s2955_s2 + $0x1c4] sm:$0xf]  ;;  %v1811_v54 = vor.u32 %v2251_v44, %v1808_v45 }
  0x77   : > { %v1998_v1 = vld [vmem:[%s2955_s2 + $0x240] sm:$0xf]  ;;  %v2301_v2 = vld [vmem:[%s2955_s2 + $0x24c] sm:$0xf0]  ;;  %v1871_v6 = vor.u32 %v2269_v0, %v1870_v62  ;;  %1166 = vmatpush.bf16.msra.mxu3 %v2143_v63  ;;  %v1936_v48 = vld [vmem:[%s2955_s2 + $0x1d0] sm:$0xf0] }
  0x78   : > { %v2126_v3 = vld [vmem:[%s2955_s2 + $0x340] sm:$0xf]  ;;  %v2333_v4 = vld [vmem:[%s2955_s2 + $0x34c] sm:$0xf0]  ;;  %v1999_v7 = vor.u32 %v2301_v2, %v1998_v1  ;;  %1128 = vmatpush.bf16.msra.mxu0 %v1743_v5  ;;  %v2315_v49 = vld [vmem:[%s2955_s2 + $0x2c4] sm:$0xf]  ;;  %v1939_v55 = vor.u32 %v2283_v46, %v1936_v48 }
  0x79   : > { %v1726_v8 = vld [vmem:[%s2955_s2 + $0x20] sm:$0xf]  ;;  %v2233_v9 = vld [vmem:[%s2955_s2 + $0x2c] sm:$0xf0]  ;;  %v2127_v11 = vor.u32 %v2333_v4, %v2126_v3  ;;  %1141 = vmatpush.bf16.msra.mxu1 %v1871_v6  ;;  %v2064_v50 = vld [vmem:[%s2955_s2 + $0x2d0] sm:$0xf0] }
  0x7a   : > { %v1854_v10 = vld [vmem:[%s2955_s2 + $0x120] sm:$0xf]  ;;  %v2265_v12 = vld [vmem:[%s2955_s2 + $0x12c] sm:$0xf0]  ;;  %v1727_v17 = vor.u32 %v2233_v9, %v1726_v8  ;;  %1154 = vmatpush.bf16.msra.mxu2 %v1999_v7  ;;  %v2347_v51 = vld [vmem:[%s2955_s2 + $0x3c4] sm:$0xf]  ;;  %v2067_v56 = vor.u32 %v2315_v49, %v2064_v50 }
  0x7b   : > { %v1982_v13 = vld [vmem:[%s2955_s2 + $0x220] sm:$0xf]  ;;  %v2297_v14 = vld [vmem:[%s2955_s2 + $0x22c] sm:$0xf0]  ;;  %v1855_v20 = vor.u32 %v2265_v12, %v1854_v10  ;;  %1167 = vmatpush.bf16.msra.mxu3 %v2127_v11  ;;  %v2192_v52 = vld [vmem:[%s2955_s2 + $0x3d0] sm:$0xf0] }
  0x7c   : > { %v2110_v15 = vld [vmem:[%s2955_s2 + $0x320] sm:$0xf]  ;;  %v2329_v16 = vld [vmem:[%s2955_s2 + $0x32c] sm:$0xf0]  ;;  %v1983_v21 = vor.u32 %v2297_v14, %v1982_v13  ;;  %1129 = vmatpush.bf16.msra.mxu0 %v1727_v17  ;;  %v334_v53 = vld [vmem:[%s3316_s0] sm:$0xf]  ;;  %v2195_v60 = vor.u32 %v2347_v51, %v2192_v52 }
  0x7d   : > { %v1710_v18 = vld [vmem:[%s2955_s2] sm:$0xf]  ;;  %v2229_v19 = vld [vmem:[%s2955_s2 + $0xc] sm:$0xf0]  ;;  %v2111_v25 = vor.u32 %v2329_v16, %v2110_v15  ;;  %1142 = vmatpush.bf16.msra.mxu1 %v1855_v20  ;;  %474 = vst [vmem:[#allocation1] ss:$9 sm:$0xff] %v334_v53 }
  0x7e   : > { %v1838_v22 = vld [vmem:[%s2955_s2 + $0x100] sm:$0xf]  ;;  %v2261_v23 = vld [vmem:[%s2955_s2 + $0x10c] sm:$0xf0]  ;;  %v1711_v32 = vor.u32 %v2229_v19, %v1710_v18  ;;  %1155 = vmatpush.bf16.msra.mxu2 %v1983_v21  ;;  %v2247_v57 = vld [vmem:[%s2955_s2 + $0xa4] sm:$0xf] }
  0x7f   : > { %v1966_v24 = vld [vmem:[%s2955_s2 + $0x200] sm:$0xf]  ;;  %v2293_v26 = vld [vmem:[%s2955_s2 + $0x20c] sm:$0xf0]  ;;  %v1839_v36 = vor.u32 %v2261_v23, %v1838_v22  ;;  %1168 = vmatpush.bf16.msra.mxu3 %v2111_v25  ;;  %v1792_v58 = vld [vmem:[%s2955_s2 + $0xb0] sm:$0xf0] }
  0x80   : > { %v2094_v27 = vld [vmem:[%s2955_s2 + $0x300] sm:$0xf]  ;;  %v2325_v28 = vld [vmem:[%s2955_s2 + $0x30c] sm:$0xf0]  ;;  %v1967_v37 = vor.u32 %v2293_v26, %v1966_v24  ;;  %1130 = vmatpush.bf16.msra.mxu0 %v1711_v32  ;;  %v2279_v59 = vld [vmem:[%s2955_s2 + $0x1a4] sm:$0xf]  ;;  %v1795_v2 = vor.u32 %v2247_v57, %v1792_v58 }
  0x81   : > { %v2095_v40 = vor.u32 %v2325_v28, %v2094_v27  ;;  %1143 = vmatpush.bf16.msra.mxu1 %v1839_v36  ;;  %v1920_v61 = vld [vmem:[%s2955_s2 + $0x1b0] sm:$0xf0]  ;;  %v2311_v62 = vld [vmem:[%s2955_s2 + $0x2a4] sm:$0xf] }
  0x82   : > { %1156 = vmatpush.bf16.msra.mxu2 %v1967_v37  ;;  %v2048_v63 = vld [vmem:[%s2955_s2 + $0x2b0] sm:$0xf0]  ;;  %v2343_v0 = vld [vmem:[%s2955_s2 + $0x3a4] sm:$0xf]  ;;  %v1923_v4 = vor.u32 %v2279_v59, %v1920_v61 }
  0x83   : > { %1169 = vmatpush.bf16.msra.mxu3 %v2095_v40  ;;  %v2176_v1 = vld [vmem:[%s2955_s2 + $0x3b0] sm:$0xf0]  ;;  %v2243_v3 = vld [vmem:[%s2955_s2 + $0x84] sm:$0xf]  ;;  %v2051_v5 = vor.u32 %v2311_v62, %v2048_v63 }
  0x84   : > { %1175 = vmatpush.bf16.msrb.mxu0 %v1827_v41  ;;  %v1776_v6 = vld [vmem:[%s2955_s2 + $0x90] sm:$0xf0]  ;;  %v2275_v7 = vld [vmem:[%s2955_s2 + $0x184] sm:$0xf]  ;;  %v2179_v9 = vor.u32 %v2343_v0, %v2176_v1  ;;  %v3075_v14 = vld [vmem:[#allocation1 + $0x12] sm:$0xff] }
  0x85   : > { %1188 = vmatpush.bf16.msrb.mxu1 %v1955_v42  ;;  %v1904_v8 = vld [vmem:[%s2955_s2 + $0x190] sm:$0xf0]  ;;  %v2307_v10 = vld [vmem:[%s2955_s2 + $0x284] sm:$0xf]  ;;  %v1779_v16 = vor.u32 %v2243_v3, %v1776_v6  ;;  %1157 = vmatmul.bf16.vlgmr.msra.gmra.mxu2 %v3075_v14  ;;  %v2258_v3 = vld [vmem:[%s2955_s2 + $0xf4] sm:$0xf0] }
  0x86   : > { %1201 = vmatpush.bf16.msrb.mxu2 %v2083_v43  ;;  %v2032_v11 = vld [vmem:[%s2955_s2 + $0x290] sm:$0xf0]  ;;  %v2339_v12 = vld [vmem:[%s2955_s2 + $0x384] sm:$0xf]  ;;  %v1907_v19 = vor.u32 %v2275_v7, %v1904_v8  ;;  %v2290_v6 = vld [vmem:[%s2955_s2 + $0x1f4] sm:$0xf0] }
  0x87   : > { %1214 = vmatpush.bf16.msrb.mxu3 %v2211_v47  ;;  %v2160_v13 = vld [vmem:[%s2955_s2 + $0x390] sm:$0xf0]  ;;  %v3082_v18 = vld [vmem:[#allocation1 + $0x9] sm:$0xff]  ;;  %v2035_v20 = vor.u32 %v2307_v10, %v2032_v11  ;;  %v2086_v7 = vld [vmem:[%s2955_s2 + $0x2e8] sm:$0xf] }
  0x88   : > { %1176 = vmatpush.bf16.msrb.mxu0 %v1811_v54  ;;  %v3077_v15 = vld [vmem:[#allocation1] sm:$0xff]  ;;  %v2239_v21 = vld [vmem:[%s2955_s2 + $0x64] sm:$0xf]  ;;  %v2163_v24 = vor.u32 %v2339_v12, %v2160_v13  ;;  %1144 = vmatmul.bf16.vlgmr.msra.gmra.mxu1 %v3082_v18  ;;  %v2214_v11 = vld [vmem:[%s2955_s2 + $0x3e8] sm:$0xf] }
  0x89   : > { %1189 = vmatpush.bf16.msrb.mxu1 %v1939_v55  ;;  %v3080_v17 = vld [vmem:[#allocation1 + $0x1b] sm:$0xff]  ;;  %v2271_v23 = vld [vmem:[%s2955_s2 + $0x164] sm:$0xf]  ;;  %1131 = vmatmul.bf16.vlgmr.msra.gmra.mxu0 %v3077_v15 }
  0x8a   : > { %1202 = vmatpush.bf16.msrb.mxu2 %v2067_v56  ;;  %v1760_v22 = vld [vmem:[%s2955_s2 + $0x70] sm:$0xf0]  ;;  %v2303_v26 = vld [vmem:[%s2955_s2 + $0x264] sm:$0xf]  ;;  %1170 = vmatmul.bf16.vlgmr.msra.gmra.mxu3 %v3080_v17  ;;  %v2322_v8 = vld [vmem:[%s2955_s2 + $0x2f4] sm:$0xf0] }
  0x8b   : > { %1215 = vmatpush.bf16.msrb.mxu3 %v2195_v60  ;;  %v1888_v25 = vld [vmem:[%s2955_s2 + $0x170] sm:$0xf0]  ;;  %v2335_v28 = vld [vmem:[%s2955_s2 + $0x364] sm:$0xf]  ;;  %v1763_v30 = vor.u32 %v2239_v21, %v1760_v22  ;;  %v2354_v12 = vld [vmem:[%s2955_s2 + $0x3f4] sm:$0xf0] }
  0x8c   : > { %1177 = vmatpush.bf16.msrb.mxu0 %v1795_v2  ;;  %v2016_v27 = vld [vmem:[%s2955_s2 + $0x270] sm:$0xf0]  ;;  %v1891_v31 = vor.u32 %v2271_v23, %v1888_v25  ;;  %v2235_v33 = vld [vmem:[%s2955_s2 + $0x44] sm:$0xf]  ;;  %v1830_v2 = vld [vmem:[%s2955_s2 + $0xe8] sm:$0xf] }
  0x8d   : > { %1190 = vmatpush.bf16.msrb.mxu1 %v1923_v4  ;;  %v2144_v29 = vld [vmem:[%s2955_s2 + $0x370] sm:$0xf0]  ;;  %v2019_v32 = vor.u32 %v2303_v26, %v2016_v27  ;;  %v2267_v35 = vld [vmem:[%s2955_s2 + $0x144] sm:$0xf]  ;;  %v1958_v4 = vld [vmem:[%s2955_s2 + $0x1e8] sm:$0xf] }
  0x8e   : > { %1203 = vmatpush.bf16.msrb.mxu2 %v2051_v5  ;;  %v1744_v34 = vld [vmem:[%s2955_s2 + $0x50] sm:$0xf0]  ;;  %v2147_v36 = vor.u32 %v2335_v28, %v2144_v29  ;;  %v2299_v38 = vld [vmem:[%s2955_s2 + $0x244] sm:$0xf]  ;;  %v1814_v21 = vld [vmem:[%s2955_s2 + $0xc8] sm:$0xf] }
  0x8f   : > { %1216 = vmatpush.bf16.msrb.mxu3 %v2179_v9  ;;  %v1872_v37 = vld [vmem:[%s2955_s2 + $0x150] sm:$0xf0]  ;;  %v2331_v40 = vld [vmem:[%s2955_s2 + $0x344] sm:$0xf]  ;;  %v1747_v42 = vor.u32 %v2235_v33, %v1744_v34  ;;  %v2254_v22 = vld [vmem:[%s2955_s2 + $0xd4] sm:$0xf0] }
  0x90   : > { %1178 = vmatpush.bf16.msrb.mxu0 %v1779_v16  ;;  %v2000_v39 = vld [vmem:[%s2955_s2 + $0x250] sm:$0xf0]  ;;  %v1875_v43 = vor.u32 %v2267_v35, %v1872_v37  ;;  %v2231_v45 = vld [vmem:[%s2955_s2 + $0x24] sm:$0xf]  ;;  %v1831_v16 = vor.u32 %v2258_v3, %v1830_v2  ;;  %v1942_v23 = vld [vmem:[%s2955_s2 + $0x1c8] sm:$0xf] }
  0x91   : > { %1191 = vmatpush.bf16.msrb.mxu1 %v1907_v19  ;;  %v2128_v41 = vld [vmem:[%s2955_s2 + $0x350] sm:$0xf0]  ;;  %v2003_v44 = vor.u32 %v2299_v38, %v2000_v39  ;;  %v2263_v47 = vld [vmem:[%s2955_s2 + $0x124] sm:$0xf]  ;;  %v1959_v19 = vor.u32 %v2290_v6, %v1958_v4  ;;  %v2286_v25 = vld [vmem:[%s2955_s2 + $0x1d4] sm:$0xf0] }
  0x92   : > { %1204 = vmatpush.bf16.msrb.mxu2 %v2035_v20  ;;  %v1728_v46 = vld [vmem:[%s2955_s2 + $0x30] sm:$0xf0]  ;;  %v2131_v48 = vor.u32 %v2331_v40, %v2128_v41  ;;  %v2295_v50 = vld [vmem:[%s2955_s2 + $0x224] sm:$0xf]  ;;  %v2087_v20 = vor.u32 %v2322_v8, %v2086_v7  ;;  %v2070_v26 = vld [vmem:[%s2955_s2 + $0x2c8] sm:$0xf] }
  0x93   : > { %1217 = vmatpush.bf16.msrb.mxu3 %v2163_v24  ;;  %v1856_v49 = vld [vmem:[%s2955_s2 + $0x130] sm:$0xf0]  ;;  %v2327_v52 = vld [vmem:[%s2955_s2 + $0x324] sm:$0xf]  ;;  %v1731_v54 = vor.u32 %v2231_v45, %v1728_v46  ;;  %v2215_v24 = vor.u32 %v2354_v12, %v2214_v11  ;;  %v2318_v27 = vld [vmem:[%s2955_s2 + $0x2d4] sm:$0xf0] }
  0x94   : > { %1179 = vmatpush.bf16.msrb.mxu0 %v1763_v30  ;;  %v1984_v51 = vld [vmem:[%s2955_s2 + $0x230] sm:$0xf0]  ;;  %v2227_v55 = vld [vmem:[%s2955_s2 + $0x4] sm:$0xf]  ;;  %v1859_v57 = vor.u32 %v2263_v47, %v1856_v49  ;;  %v2198_v28 = vld [vmem:[%s2955_s2 + $0x3c8] sm:$0xf]  ;;  %v1815_v30 = vor.u32 %v2254_v22, %v1814_v21 }
  0x95   : > { %1192 = vmatpush.bf16.msrb.mxu1 %v1891_v31  ;;  %v2112_v53 = vld [vmem:[%s2955_s2 + $0x330] sm:$0xf0]  ;;  %v1987_v58 = vor.u32 %v2295_v50, %v1984_v51  ;;  %v2259_v59 = vld [vmem:[%s2955_s2 + $0x104] sm:$0xf]  ;;  %v2350_v29 = vld [vmem:[%s2955_s2 + $0x3d4] sm:$0xf0]  ;;  %v1943_v31 = vor.u32 %v2286_v25, %v1942_v23 }
  0x96   : > { %1205 = vmatpush.bf16.msrb.mxu2 %v2019_v32  ;;  %v1712_v56 = vld [vmem:[%s2955_s2 + $0x10] sm:$0xf0]  ;;  %v2291_v61 = vld [vmem:[%s2955_s2 + $0x204] sm:$0xf]  ;;  %v2115_v62 = vor.u32 %v2327_v52, %v2112_v53  ;;  %v2071_v32 = vor.u32 %v2318_v27, %v2070_v26  ;;  %v1798_v33 = vld [vmem:[%s2955_s2 + $0xa8] sm:$0xf] }
  0x97   : > { %1218 = vmatpush.bf16.msrb.mxu3 %v2147_v36  ;;  %v1840_v60 = vld [vmem:[%s2955_s2 + $0x110] sm:$0xf0]  ;;  %v2323_v0 = vld [vmem:[%s2955_s2 + $0x304] sm:$0xf]  ;;  %v1715_v5 = vor.u32 %v2227_v55, %v1712_v56  ;;  %v2250_v34 = vld [vmem:[%s2955_s2 + $0xb4] sm:$0xf0]  ;;  %v2199_v36 = vor.u32 %v2350_v29, %v2198_v28 }
  0x98   : > { %1180 = vmatpush.bf16.msrb.mxu0 %v1747_v42  ;;  %v1968_v63 = vld [vmem:[%s2955_s2 + $0x210] sm:$0xf0]  ;;  %v1843_v9 = vor.u32 %v2259_v59, %v1840_v60  ;;  %v1926_v35 = vld [vmem:[%s2955_s2 + $0x1a8] sm:$0xf]  ;;  %v2282_v37 = vld [vmem:[%s2955_s2 + $0x1b4] sm:$0xf0]  ;;  %v1799_v42 = vor.u32 %v2250_v34, %v1798_v33 }
  0x99   : > { %1193 = vmatpush.bf16.msrb.mxu1 %v1875_v43  ;;  %v2096_v1 = vld [vmem:[%s2955_s2 + $0x310] sm:$0xf0]  ;;  %v1971_v10 = vor.u32 %v2291_v61, %v1968_v63  ;;  %v2054_v38 = vld [vmem:[%s2955_s2 + $0x2a8] sm:$0xf]  ;;  %v2314_v39 = vld [vmem:[%s2955_s2 + $0x2b4] sm:$0xf0]  ;;  %v1927_v43 = vor.u32 %v2282_v37, %v1926_v35 }
  0x9a   : > { %1206 = vmatpush.bf16.msrb.mxu2 %v2003_v44  ;;  %v2099_v13 = vor.u32 %v2323_v0, %v2096_v1  ;;  %v2182_v40 = vld [vmem:[%s2955_s2 + $0x3a8] sm:$0xf]  ;;  %v2346_v41 = vld [vmem:[%s2955_s2 + $0x3b4] sm:$0xf0]  ;;  %v2055_v44 = vor.u32 %v2314_v39, %v2054_v38 }
  0x9b   : > { %1219 = vmatpush.bf16.msrb.mxu3 %v2131_v48  ;;  %v1782_v45 = vld [vmem:[%s2955_s2 + $0x88] sm:$0xf]  ;;  %v2246_v46 = vld [vmem:[%s2955_s2 + $0x94] sm:$0xf0]  ;;  %v2183_v48 = vor.u32 %v2346_v41, %v2182_v40 }
  0x9c   : > { %1181 = vmatpush.bf16.msrb.mxu0 %v1731_v54  ;;  %v1910_v47 = vld [vmem:[%s2955_s2 + $0x188] sm:$0xf]  ;;  %v2278_v49 = vld [vmem:[%s2955_s2 + $0x194] sm:$0xf0]  ;;  %v1783_v54 = vor.u32 %v2246_v46, %v1782_v45  ;;  %v1960_v46 = vld [vmem:[%s2955_s2 + $0x1f8] sm:$0xf0] }
  0x9d   : > { %1194 = vmatpush.bf16.msrb.mxu1 %v1859_v57  ;;  %v2038_v50 = vld [vmem:[%s2955_s2 + $0x288] sm:$0xf]  ;;  %v2310_v51 = vld [vmem:[%s2955_s2 + $0x294] sm:$0xf0]  ;;  %v1911_v55 = vor.u32 %v2278_v49, %v1910_v47  ;;  %v2320_v47 = vld [vmem:[%s2955_s2 + $0x2ec] sm:$0xf] }
  0x9e   : > { %1207 = vmatpush.bf16.msrb.mxu2 %v1987_v58  ;;  %v2166_v52 = vld [vmem:[%s2955_s2 + $0x388] sm:$0xf]  ;;  %v2342_v53 = vld [vmem:[%s2955_s2 + $0x394] sm:$0xf0]  ;;  %v2039_v56 = vor.u32 %v2310_v51, %v2038_v50  ;;  %v2352_v51 = vld [vmem:[%s2955_s2 + $0x3ec] sm:$0xf] }
  0x9f   : > { %1220 = vmatpush.bf16.msrb.mxu3 %v2115_v62  ;;  %v1766_v57 = vld [vmem:[%s2955_s2 + $0x68] sm:$0xf]  ;;  %v2242_v58 = vld [vmem:[%s2955_s2 + $0x74] sm:$0xf0]  ;;  %v2167_v60 = vor.u32 %v2342_v53, %v2166_v52  ;;  %v2216_v52 = vld [vmem:[%s2955_s2 + $0x3f8] sm:$0xf0] }
  0xa0   : > { %1182 = vmatpush.bf16.msrb.mxu0 %v1715_v5  ;;  %v1894_v59 = vld [vmem:[%s2955_s2 + $0x168] sm:$0xf]  ;;  %v2274_v61 = vld [vmem:[%s2955_s2 + $0x174] sm:$0xf0]  ;;  %v1767_v2 = vor.u32 %v2242_v58, %v1766_v57  ;;  %v2252_v57 = vld [vmem:[%s2955_s2 + $0xcc] sm:$0xf] }
  0xa1   : > { %1195 = vmatpush.bf16.msrb.mxu1 %v1843_v9  ;;  %v2022_v62 = vld [vmem:[%s2955_s2 + $0x268] sm:$0xf]  ;;  %v2306_v63 = vld [vmem:[%s2955_s2 + $0x274] sm:$0xf0]  ;;  %v1895_v3 = vor.u32 %v2274_v61, %v1894_v59  ;;  %v1816_v58 = vld [vmem:[%s2955_s2 + $0xd8] sm:$0xf0] }
  0xa2   : > { %1208 = vmatpush.bf16.msrb.mxu2 %v1971_v10  ;;  %v2150_v0 = vld [vmem:[%s2955_s2 + $0x368] sm:$0xf]  ;;  %v2338_v1 = vld [vmem:[%s2955_s2 + $0x374] sm:$0xf0]  ;;  %v2023_v4 = vor.u32 %v2306_v63, %v2022_v62  ;;  %v2284_v59 = vld [vmem:[%s2955_s2 + $0x1cc] sm:$0xf] }
  0xa3   : > { %1221 = vmatpush.bf16.msrb.mxu3 %v2099_v13  ;;  %1183 = vmatmul.bf16.vlgmr.msrb.gmra.mxu0 %v3077_v15  ;;  %v1750_v5 = vld [vmem:[%s2955_s2 + $0x48] sm:$0xf]  ;;  %v2238_v6 = vld [vmem:[%s2955_s2 + $0x54] sm:$0xf0]  ;;  %v2151_v8 = vor.u32 %v2338_v1, %v2150_v0  ;;  %v1944_v61 = vld [vmem:[%s2955_s2 + $0x1d8] sm:$0xf0] }
  0xa4   : > { %1227 = vmatpush.bf16.msra.mxu0 %v1831_v16  ;;  %1196 = vmatmul.bf16.vlgmr.msrb.gmra.mxu1 %v3082_v18  ;;  %v1878_v7 = vld [vmem:[%s2955_s2 + $0x148] sm:$0xf]  ;;  %v2270_v9 = vld [vmem:[%s2955_s2 + $0x154] sm:$0xf0]  ;;  %v1751_v16 = vor.u32 %v2238_v6, %v1750_v5  ;;  %v2316_v62 = vld [vmem:[%s2955_s2 + $0x2cc] sm:$0xf] }
  0xa5   : > { %1240 = vmatpush.bf16.msra.mxu1 %v1959_v19  ;;  %1209 = vmatmul.bf16.vlgmr.msrb.gmra.mxu2 %v3075_v14  ;;  %v2006_v10 = vld [vmem:[%s2955_s2 + $0x248] sm:$0xf]  ;;  %v2302_v11 = vld [vmem:[%s2955_s2 + $0x254] sm:$0xf0]  ;;  %v1879_v19 = vor.u32 %v2270_v9, %v1878_v7  ;;  %v2072_v63 = vld [vmem:[%s2955_s2 + $0x2d8] sm:$0xf0] }
  0xa6   : > { %1253 = vmatpush.bf16.msra.mxu2 %v2087_v20  ;;  %1222 = vmatmul.bf16.vlgmr.msrb.gmra.mxu3 %v3080_v17  ;;  %v2134_v12 = vld [vmem:[%s2955_s2 + $0x348] sm:$0xf]  ;;  %v2334_v13 = vld [vmem:[%s2955_s2 + $0x354] sm:$0xf0]  ;;  %v2007_v20 = vor.u32 %v2302_v11, %v2006_v10  ;;  %v2348_v0 = vld [vmem:[%s2955_s2 + $0x3cc] sm:$0xf] }
  0xa7   : > { %1266 = vmatpush.bf16.msra.mxu3 %v2215_v24  ;;  %v1734_v21 = vld [vmem:[%s2955_s2 + $0x28] sm:$0xf]  ;;  %v2234_v22 = vld [vmem:[%s2955_s2 + $0x34] sm:$0xf0]  ;;  %v2135_v24 = vor.u32 %v2334_v13, %v2134_v12  ;;  %v2200_v1 = vld [vmem:[%s2955_s2 + $0x3d8] sm:$0xf0] }
  0xa8   : > { %1228 = vmatpush.bf16.msra.mxu0 %v1815_v30  ;;  %v1862_v23 = vld [vmem:[%s2955_s2 + $0x128] sm:$0xf]  ;;  %v2266_v25 = vld [vmem:[%s2955_s2 + $0x134] sm:$0xf0]  ;;  %v1735_v30 = vor.u32 %v2234_v22, %v1734_v21  ;;  %v2248_v5 = vld [vmem:[%s2955_s2 + $0xac] sm:$0xf] }
  0xa9   : > { %1241 = vmatpush.bf16.msra.mxu1 %v1943_v31  ;;  %v1990_v26 = vld [vmem:[%s2955_s2 + $0x228] sm:$0xf]  ;;  %v2298_v27 = vld [vmem:[%s2955_s2 + $0x234] sm:$0xf0]  ;;  %v1863_v33 = vor.u32 %v2266_v25, %v1862_v23  ;;  %v1800_v6 = vld [vmem:[%s2955_s2 + $0xb8] sm:$0xf0] }
  0xaa   : > { %1254 = vmatpush.bf16.msra.mxu2 %v2071_v32  ;;  %v2118_v28 = vld [vmem:[%s2955_s2 + $0x328] sm:$0xf]  ;;  %v2330_v29 = vld [vmem:[%s2955_s2 + $0x334] sm:$0xf0]  ;;  %v1991_v34 = vor.u32 %v2298_v27, %v1990_v26  ;;  %v2280_v7 = vld [vmem:[%s2955_s2 + $0x1ac] sm:$0xf] }
  0xab   : > { %1267 = vmatpush.bf16.msra.mxu3 %v2199_v36  ;;  %v1718_v31 = vld [vmem:[%s2955_s2 + $0x8] sm:$0xf]  ;;  %v2230_v32 = vld [vmem:[%s2955_s2 + $0x14] sm:$0xf0]  ;;  %v2119_v38 = vor.u32 %v2330_v29, %v2118_v28  ;;  %v1928_v9 = vld [vmem:[%s2955_s2 + $0x1b8] sm:$0xf0] }
  0xac   : > { %1229 = vmatpush.bf16.msra.mxu0 %v1799_v42  ;;  %v1846_v35 = vld [vmem:[%s2955_s2 + $0x108] sm:$0xf]  ;;  %v2262_v36 = vld [vmem:[%s2955_s2 + $0x114] sm:$0xf0]  ;;  %v2256_v42 = vld [vmem:[%s2955_s2 + $0xec] sm:$0xf]  ;;  %v1719_v45 = vor.u32 %v2230_v32, %v1718_v31 }
  0xad   : > { %1242 = vmatpush.bf16.msra.mxu1 %v1927_v43  ;;  %v1974_v37 = vld [vmem:[%s2955_s2 + $0x208] sm:$0xf]  ;;  %v2294_v39 = vld [vmem:[%s2955_s2 + $0x214] sm:$0xf0]  ;;  %v1832_v43 = vld [vmem:[%s2955_s2 + $0xf8] sm:$0xf0]  ;;  %v1847_v49 = vor.u32 %v2262_v36, %v1846_v35 }
  0xae   : > { %1255 = vmatpush.bf16.msra.mxu2 %v2055_v44  ;;  %v2102_v40 = vld [vmem:[%s2955_s2 + $0x308] sm:$0xf]  ;;  %v2326_v41 = vld [vmem:[%s2955_s2 + $0x314] sm:$0xf0]  ;;  %v2288_v44 = vld [vmem:[%s2955_s2 + $0x1ec] sm:$0xf]  ;;  %v1975_v50 = vor.u32 %v2294_v39, %v1974_v37 }
  0xaf   : > { %1268 = vmatpush.bf16.msra.mxu3 %v2183_v48  ;;  %v2088_v48 = vld [vmem:[%s2955_s2 + $0x2f8] sm:$0xf0]  ;;  %v2103_v53 = vor.u32 %v2326_v41, %v2102_v40  ;;  %v2312_v10 = vld [vmem:[%s2955_s2 + $0x2ac] sm:$0xf] }
  0xb0   : > { %1230 = vmatpush.bf16.msra.mxu0 %v1783_v54  ;;  %v1835_v54 = vor.u32 %v2256_v42, %v1832_v43  ;;  %v2056_v11 = vld [vmem:[%s2955_s2 + $0x2b8] sm:$0xf0]  ;;  %v2344_v12 = vld [vmem:[%s2955_s2 + $0x3ac] sm:$0xf] }
  0xb1   : > { %1243 = vmatpush.bf16.msra.mxu1 %v1911_v55  ;;  %v1963_v55 = vor.u32 %v2288_v44, %v1960_v46  ;;  %v2184_v13 = vld [vmem:[%s2955_s2 + $0x3b8] sm:$0xf0]  ;;  %v2244_v21 = vld [vmem:[%s2955_s2 + $0x8c] sm:$0xf] }
  0xb2   : > { %1256 = vmatpush.bf16.msra.mxu2 %v2039_v56  ;;  %v2091_v56 = vor.u32 %v2320_v47, %v2088_v48  ;;  %v1784_v22 = vld [vmem:[%s2955_s2 + $0x98] sm:$0xf0]  ;;  %v2276_v23 = vld [vmem:[%s2955_s2 + $0x18c] sm:$0xf] }
  0xb3   : > { %1269 = vmatpush.bf16.msra.mxu3 %v2167_v60  ;;  %v2219_v60 = vor.u32 %v2352_v51, %v2216_v52  ;;  %v1912_v25 = vld [vmem:[%s2955_s2 + $0x198] sm:$0xf0]  ;;  %v2308_v26 = vld [vmem:[%s2955_s2 + $0x28c] sm:$0xf] }
  0xb4   : > { %1231 = vmatpush.bf16.msra.mxu0 %v1767_v2  ;;  %v1819_v2 = vor.u32 %v2252_v57, %v1816_v58  ;;  %v2040_v27 = vld [vmem:[%s2955_s2 + $0x298] sm:$0xf0]  ;;  %v2340_v28 = vld [vmem:[%s2955_s2 + $0x38c] sm:$0xf]  ;;  %v1915_v31 = vor.u32 %v2276_v23, %v1912_v25 }
  0xb5   : > { %1244 = vmatpush.bf16.msra.mxu1 %v1895_v3  ;;  %v1947_v3 = vor.u32 %v2284_v59, %v1944_v61  ;;  %v2168_v29 = vld [vmem:[%s2955_s2 + $0x398] sm:$0xf0]  ;;  %v2043_v32 = vor.u32 %v2308_v26, %v2040_v27  ;;  %v2272_v35 = vld [vmem:[%s2955_s2 + $0x16c] sm:$0xf] }
  0xb6   : > { %1257 = vmatpush.bf16.msra.mxu2 %v2023_v4  ;;  %v2075_v4 = vor.u32 %v2316_v62, %v2072_v63  ;;  %v2171_v36 = vor.u32 %v2340_v28, %v2168_v29  ;;  %v1896_v37 = vld [vmem:[%s2955_s2 + $0x178] sm:$0xf0]  ;;  %v2336_v40 = vld [vmem:[%s2955_s2 + $0x36c] sm:$0xf] }
  0xb7   : > { %1270 = vmatpush.bf16.msra.mxu3 %v2151_v8  ;;  %v2203_v8 = vor.u32 %v2348_v0, %v2200_v1  ;;  %v2024_v39 = vld [vmem:[%s2955_s2 + $0x278] sm:$0xf0]  ;;  %v1899_v43 = vor.u32 %v2272_v35, %v1896_v37  ;;  %v2268_v47 = vld [vmem:[%s2955_s2 + $0x14c] sm:$0xf] }
  0xb8   : > { %1232 = vmatpush.bf16.msra.mxu0 %v1751_v16  ;;  %v1803_v16 = vor.u32 %v2248_v5, %v1800_v6  ;;  %v2152_v41 = vld [vmem:[%s2955_s2 + $0x378] sm:$0xf0]  ;;  %v2332_v52 = vld [vmem:[%s2955_s2 + $0x34c] sm:$0xf] }
  0xb9   : > { %1245 = vmatpush.bf16.msra.mxu1 %v1879_v19  ;;  %v1931_v19 = vor.u32 %v2280_v7, %v1928_v9  ;;  %v1752_v46 = vld [vmem:[%s2955_s2 + $0x58] sm:$0xf0]  ;;  %v2155_v48 = vor.u32 %v2336_v40, %v2152_v41  ;;  %v2232_v57 = vld [vmem:[%s2955_s2 + $0x2c] sm:$0xf]  ;;  %v2485_v40 = vld [vmem:[%s2968_s16 + $0x18] sm:$0xff]  }
  0xba   : > { %1258 = vmatpush.bf16.msra.mxu2 %v2007_v20  ;;  %v2059_v20 = vor.u32 %v2312_v10, %v2056_v11  ;;  %v2008_v51 = vld [vmem:[%s2955_s2 + $0x258] sm:$0xf0]  ;;  %v2264_v59 = vld [vmem:[%s2955_s2 + $0x12c] sm:$0xf] }
  0xbb   : > { %1271 = vmatpush.bf16.msra.mxu3 %v2135_v24  ;;  %v2187_v24 = vor.u32 %v2344_v12, %v2184_v13  ;;  %v1736_v58 = vld [vmem:[%s2955_s2 + $0x38] sm:$0xf0]  ;;  %v2296_v62 = vld [vmem:[%s2955_s2 + $0x22c] sm:$0xf] }
  0xbc   : > { %1233 = vmatpush.bf16.msra.mxu0 %v1735_v30  ;;  %v1787_v30 = vor.u32 %v2244_v21, %v1784_v22  ;;  %v1864_v61 = vld [vmem:[%s2955_s2 + $0x138] sm:$0xf0]  ;;  %v2328_v0 = vld [vmem:[%s2955_s2 + $0x32c] sm:$0xf] }
  0xbd   : > { %1246 = vmatpush.bf16.msra.mxu1 %v1863_v33  ;;  %v2240_v33 = vld [vmem:[%s2955_s2 + $0x6c] sm:$0xf]  ;;  %v1992_v63 = vld [vmem:[%s2955_s2 + $0x238] sm:$0xf0] }
  0xbe   : > { %1259 = vmatpush.bf16.msra.mxu2 %v1991_v34  ;;  %v1768_v34 = vld [vmem:[%s2955_s2 + $0x78] sm:$0xf0]  ;;  %v2228_v5 = vld [vmem:[%s2955_s2 + $0xc] sm:$0xf] }
  0xbf   : > { %1272 = vmatpush.bf16.msra.mxu3 %v2119_v38  ;;  %v2304_v38 = vld [vmem:[%s2955_s2 + $0x26c] sm:$0xf]  ;;  %v1771_v42 = vor.u32 %v2240_v33, %v1768_v34  ;;  %v2120_v1 = vld [vmem:[%s2955_s2 + $0x338] sm:$0xf0]  ;;  %v2487_v33 = vld [vmem:[%s2968_s16 + $0x28] sm:$0xff]  }
  0xc0   : > { %1234 = vmatpush.bf16.msra.mxu0 %v1719_v45  ;;  %v2027_v44 = vor.u32 %v2304_v38, %v2024_v39  ;;  %v2236_v45 = vld [vmem:[%s2955_s2 + $0x4c] sm:$0xf]  ;;  %v1720_v6 = vld [vmem:[%s2955_s2 + $0x18] sm:$0xf0]  ;;  %v2378_v34 = vunpack.c.h.bf16 %v2487_v33  ;;  %v2377_v35 = vunpack.c.l.bf16 %v2487_v33 }
  0xc1   : > { %1247 = vmatpush.bf16.msra.mxu1 %v1847_v49  ;;  %v1880_v49 = vld [vmem:[%s2955_s2 + $0x158] sm:$0xf0]  ;;  %v2260_v7 = vld [vmem:[%s2955_s2 + $0x10c] sm:$0xf] }
  0xc2   : > { %1260 = vmatpush.bf16.msra.mxu2 %v1975_v50  ;;  %v2300_v50 = vld [vmem:[%s2955_s2 + $0x24c] sm:$0xf]  ;;  %v1848_v9 = vld [vmem:[%s2955_s2 + $0x118] sm:$0xf0] }
  0xc3   : > { %1273 = vmatpush.bf16.msra.mxu3 %v2103_v53  ;;  %1235 = vmatmul.bf16.vlgmr.msra.gmra.mxu0 %v3077_v15  ;;  %v2136_v53 = vld [vmem:[%s2955_s2 + $0x358] sm:$0xf0]  ;;  %v2292_v10 = vld [vmem:[%s2955_s2 + $0x20c] sm:$0xf]  ;;  %v1851_v21 = vor.u32 %v2260_v7, %v1848_v9 }
  0xc4   : > { %1279 = vmatpush.bf16.msrb.mxu0 %v1835_v54  ;;  %1248 = vmatmul.bf16.vlgmr.msra.gmra.mxu1 %v3082_v18  ;;  %v1755_v54 = vor.u32 %v2236_v45, %v1752_v46  ;;  %v1976_v11 = vld [vmem:[%s2955_s2 + $0x218] sm:$0xf0]  ;;  %v2324_v12 = vld [vmem:[%s2955_s2 + $0x30c] sm:$0xf]  ;;  %v2369_v45 = vunpack.c.l.bf16 %v2485_v40 }
  0xc5   : > { %1292 = vmatpush.bf16.msrb.mxu1 %v1963_v55  ;;  %1261 = vmatmul.bf16.vlgmr.msra.gmra.mxu2 %v3075_v14  ;;  %v1883_v55 = vor.u32 %v2268_v47, %v1880_v49  ;;  %v2104_v13 = vld [vmem:[%s2955_s2 + $0x318] sm:$0xf0]  ;;  %v1979_v22 = vor.u32 %v2292_v10, %v1976_v11  ;;  %v2494_v39 = vld [vmem:[%s2968_s16 + $0x60] sm:$0xff]  }
  0xc6   : > { %1305 = vmatpush.bf16.msrb.mxu2 %v2091_v56  ;;  %1274 = vmatmul.bf16.vlgmr.msra.gmra.mxu3 %v3080_v17  ;;  %v2011_v56 = vor.u32 %v2300_v50, %v2008_v51  ;;  %v2107_v23 = vor.u32 %v2324_v12, %v2104_v13  ;;  %v2488_v26 = vld [vmem:[%s2968_s16 + $0x30] sm:$0xff]   ;;  %v2406_v41 = vunpack.c.h.bf16 %v2494_v39  ;;  %v2503_v13 = vld [vmem:[%s2968_s16 + $0xa8] sm:$0xff]  }
  0xc7   : > { %1318 = vmatpush.bf16.msrb.mxu3 %v2219_v60  ;;  %v2139_v60 = vor.u32 %v2332_v52, %v2136_v53  ;;  %v2496_v28 = vld [vmem:[%s2968_s16 + $0x70] sm:$0xff]   ;;  %v2483_v53 = vld [vmem:[%s2968_s16 + $0x8] sm:$0xff]  }
  0xc8   : > { %1280 = vmatpush.bf16.msrb.mxu0 %v1819_v2  ;;  %v1739_v2 = vor.u32 %v2232_v57, %v1736_v58  ;;  %v2484_v47 = vld [vmem:[%s2968_s16 + $0x10] sm:$0xff]   ;;  %v2361_v57 = vunpack.c.l.bf16 %v2483_v53  ;;  %v2491_v58 = vld [vmem:[%s2968_s16 + $0x48] sm:$0xff]  }
  0xc9   : > { %1293 = vmatpush.bf16.msrb.mxu1 %v1947_v3  ;;  %v1867_v3 = vor.u32 %v2264_v59, %v1864_v61  ;;  %v2365_v50 = vunpack.c.l.bf16 %v2484_v47  ;;  %v2492_v51 = vld [vmem:[%s2968_s16 + $0x50] sm:$0xff]   ;;  %v2394_v59 = vunpack.c.h.bf16 %v2491_v58 }
  0xca   : > { %1306 = vmatpush.bf16.msrb.mxu2 %v2075_v4  ;;  %v1995_v4 = vor.u32 %v2296_v62, %v1992_v63  ;;  %v2398_v52 = vunpack.c.h.bf16 %v2492_v51  ;;  %v2393_v63 = vunpack.c.l.bf16 %v2491_v58  ;;  %v2504_v10 = vld [vmem:[%s2968_s16 + $0xb0] sm:$0xff]  }
  0xcb   : > { %1319 = vmatpush.bf16.msrb.mxu3 %v2203_v8  ;;  %v2123_v8 = vor.u32 %v2328_v0, %v2120_v1  ;;  %v2490_v0 = vld [vmem:[%s2968_s16 + $0x40] sm:$0xff]   ;;  %v2446_v11 = vunpack.c.h.bf16 %v2504_v10 }
  0xcc   : > { %1281 = vmatpush.bf16.msrb.mxu0 %v1803_v16  ;;  %v2489_v16 = vld [vmem:[%s2968_s16 + $0x38] sm:$0xff]  }
  0xcd   : > { %1294 = vmatpush.bf16.msrb.mxu1 %v1931_v19  ;;  %v1723_v19 = vor.u32 %v2228_v5, %v1720_v6  ;;  %v2385_v27 = vunpack.c.l.bf16 %v2489_v16 }
  0xce   : > { %1307 = vmatpush.bf16.msrb.mxu2 %v2059_v20  ;;  %v2497_v20 = vld [vmem:[%s2968_s16 + $0x78] sm:$0xff]  }
  0xcf   : > { %1320 = vmatpush.bf16.msrb.mxu3 %v2187_v24  ;;  %v2386_v24 = vunpack.c.h.bf16 %v2489_v16  ;;  %v2418_v25 = vunpack.c.h.bf16 %v2497_v20  ;;  %v2417_v29 = vunpack.c.l.bf16 %v2497_v20 }
  0xd0   : > { %1282 = vmatpush.bf16.msrb.mxu0 %v1787_v30  ;;  %v2382_v30 = vunpack.c.h.bf16 %v2488_v26 }
  0xd1   : > { %1295 = vmatpush.bf16.msrb.mxu1 %v1915_v31  ;;  %v2414_v31 = vunpack.c.h.bf16 %v2496_v28 }
  0xd2   : > { %1308 = vmatpush.bf16.msrb.mxu2 %v2043_v32  ;;  %v2381_v32 = vunpack.c.l.bf16 %v2488_v26  ;;  %v2441_v26 = vunpack.c.l.bf16 %v2503_v13 }
  0xd3   : > { %1321 = vmatpush.bf16.msrb.mxu3 %v2171_v36  ;;  %v2486_v36 = vld [vmem:[%s2968_s16 + $0x20] sm:$0xff]  }
  0xd4   : > { %1283 = vmatpush.bf16.msrb.mxu0 %v1771_v42  ;;  %v2373_v38 = vunpack.c.l.bf16 %v2486_v36  ;;  %v2370_v42 = vunpack.c.h.bf16 %v2485_v40 }
  0xd5   : > { %1296 = vmatpush.bf16.msrb.mxu1 %v1899_v43  ;;  %v2405_v43 = vunpack.c.l.bf16 %v2494_v39 }
  0xd6   : > { %1309 = vmatpush.bf16.msrb.mxu2 %v2027_v44  ;;  %v2493_v44 = vld [vmem:[%s2968_s16 + $0x58] sm:$0xff]  }
  0xd7   : > { %1322 = vmatpush.bf16.msrb.mxu3 %v2155_v48  ;;  %v2402_v46 = vunpack.c.h.bf16 %v2493_v44  ;;  %v2366_v48 = vunpack.c.h.bf16 %v2484_v47  ;;  %v2401_v49 = vunpack.c.l.bf16 %v2493_v44 }
  0xd8   : > { %1284 = vmatpush.bf16.msrb.mxu0 %v1755_v54  ;;  %v2397_v54 = vunpack.c.l.bf16 %v2492_v51 }
  0xd9   : > { %1297 = vmatpush.bf16.msrb.mxu1 %v1883_v55  ;;  %v2362_v55 = vunpack.c.h.bf16 %v2483_v53  ;;  %v2512_v53 = vld [vmem:[%s2968_s16 + $0xf0] sm:$0xff]  }
  0xda   : > { %1310 = vmatpush.bf16.msrb.mxu2 %v2011_v56  ;;  %v3273_v56 = vld [vmem:[%s2962_s24] sm:$0xf]  ;;  %v2477_v58 = vunpack.c.l.bf16 %v2512_v53 }
  0xdb   : > { %1323 = vmatpush.bf16.msrb.mxu3 %v2139_v60  ;;  %v2356_v60 = vld [vmem:[%s2968_s16] sm:$0xff]   ;;  %v465_v61 = vperm.slane %v3273_v56, 0 }
  0xdc   : > { %1285 = vmatpush.bf16.msrb.mxu0 %v1739_v2  ;;  %v2358_v62 = vunpack.c.h.bf16 %v2356_v60  ;;  %v2357_v1 = vunpack.c.l.bf16 %v2356_v60  ;;  %v2390_v2 = vunpack.c.h.bf16 %v2490_v0 }
  0xdd   : > { %1298 = vmatpush.bf16.msrb.mxu1 %v1867_v3  ;;  %v2505_v3 = vld [vmem:[%s2968_s16 + $0xb8] sm:$0xff]  }
  0xde   : > { %1311 = vmatpush.bf16.msrb.mxu2 %v1995_v4  ;;  %v2389_v4 = vunpack.c.l.bf16 %v2490_v0  ;;  %v2450_v6 = vunpack.c.h.bf16 %v2505_v3  ;;  %v2449_v9 = vunpack.c.l.bf16 %v2505_v3 }
  0xdf   : > { %1324 = vmatpush.bf16.msrb.mxu3 %v2123_v8 }
  0xe0   : > { %1286 = vmatpush.bf16.msrb.mxu0 %v1723_v19  ;;  %v2445_v19 = vunpack.c.l.bf16 %v2504_v10 }
  0xe1   : > { %1299 = vmatpush.bf16.msrb.mxu1 %v1851_v21  ;;  %v2442_v21 = vunpack.c.h.bf16 %v2503_v13 }
  0xe2   : > { %1312 = vmatpush.bf16.msrb.mxu2 %v1979_v22 }
  0xe3   : > { %1325 = vmatpush.bf16.msrb.mxu3 %v2107_v23  ;;  %1287 = vmatmul.bf16.vlgmr.msrb.gmra.mxu0 %v3077_v15  ;;  %v2413_v15 = vunpack.c.l.bf16 %v2496_v28  ;;  %v2502_v23 = vld [vmem:[%s2968_s16 + $0xa0] sm:$0xff]  }
  0xe4   : > { %1460 = vmatpush.msra.mxu0 %v2386_v24  ;;  %1300 = vmatmul.bf16.vlgmr.msrb.gmra.mxu1 %v3082_v18  ;;  %v2495_v18 = vld [vmem:[%s2968_s16 + $0x68] sm:$0xff]   ;;  %v2438_v28 = vunpack.c.h.bf16 %v2502_v23 }
  0xe5   : > { %1480 = vmatpush.msra.mxu1 %v2418_v25  ;;  %1313 = vmatmul.bf16.vlgmr.msrb.gmra.mxu2 %v3075_v14  ;;  %v2410_v14 = vunpack.c.h.bf16 %v2495_v18  ;;  %v2409_v37 = vunpack.c.l.bf16 %v2495_v18  ;;  %v466_v18 = vperm.slane %v3273_v56, 1 }
  0xe6   : > { %1326 = vmatmul.bf16.vlgmr.msrb.gmra.mxu3 %v3080_v17  ;;  %1461 = vmatpush.msra.mxu0 %v2385_v27  ;;  %v2374_v17 = vunpack.c.h.bf16 %v2486_v36 }
  0xe7   : > { %1481 = vmatpush.msra.mxu1 %v2417_v29  ;;  %1500 = vmatpush.msra.mxu2 %v2450_v6  ;;  %v2501_v29 = vld [vmem:[%s2968_s16 + $0x98] sm:$0xff]  }
  0xe8   : > { %1462 = vmatpush.msra.mxu0 %v2382_v30 }
  0xe9   : > { %1482 = vmatpush.msra.mxu1 %v2414_v31  ;;  %1501 = vmatpush.msra.mxu2 %v2449_v9  ;;  %v2437_v31 = vunpack.c.l.bf16 %v2502_v23  ;;  %v2507_v9 = vld [vmem:[%s2968_s16 + $0xc8] sm:$0xff]  }
  0xea   : > { %1463 = vmatpush.msra.mxu0 %v2381_v32  ;;  %v2434_v32 = vunpack.c.h.bf16 %v2501_v29 }
  0xeb   : > { %1483 = vmatpush.msra.mxu1 %v2413_v15  ;;  %1502 = vmatpush.msra.mxu2 %v2446_v11  ;;  %v2500_v15 = vld [vmem:[%s2968_s16 + $0x90] sm:$0xff]   ;;  %v2458_v11 = vunpack.c.h.bf16 %v2507_v9 }
  0xec   : > { %1464 = vmatpush.msra.mxu0 %v2378_v34  ;;  %v2433_v34 = vunpack.c.l.bf16 %v2501_v29 }
  0xed   : > { %1484 = vmatpush.msra.mxu1 %v2410_v14  ;;  %1503 = vmatpush.msra.mxu2 %v2445_v19  ;;  %v2429_v14 = vunpack.c.l.bf16 %v2500_v15 }
  0xee   : > { %1465 = vmatpush.msra.mxu0 %v2377_v35  ;;  %v2430_v35 = vunpack.c.h.bf16 %v2500_v15 }
  0xef   : > { %1485 = vmatpush.msra.mxu1 %v2409_v37  ;;  %1504 = vmatpush.msra.mxu2 %v2442_v21  ;;  %v2499_v37 = vld [vmem:[%s2968_s16 + $0x88] sm:$0xff]  }
  0xf0   : > { %1466 = vmatpush.msra.mxu0 %v2374_v17  ;;  %v2426_v39 = vunpack.c.h.bf16 %v2499_v37 }
  0xf1   : > { %1486 = vmatpush.msra.mxu1 %v2406_v41  ;;  %1505 = vmatpush.msra.mxu2 %v2441_v26  ;;  %v2425_v41 = vunpack.c.l.bf16 %v2499_v37 }
  0xf2   : > { %1467 = vmatpush.msra.mxu0 %v2373_v38 }
  0xf3   : > { %1487 = vmatpush.msra.mxu1 %v2405_v43  ;;  %1506 = vmatpush.msra.mxu2 %v2438_v28 }
  0xf4   : > { %1468 = vmatpush.msra.mxu0 %v2370_v42  ;;  %v2498_v42 = vld [vmem:[%s2968_s16 + $0x80] sm:$0xff]  }
  0xf5   : > { %1488 = vmatpush.msra.mxu1 %v2402_v46  ;;  %1507 = vmatpush.msra.mxu2 %v2437_v31  ;;  %v2422_v44 = vunpack.c.h.bf16 %v2498_v42  ;;  %v468_v31 = vperm.slane %v3273_v56, 3 }
  0xf6   : > { %1469 = vmatpush.msra.mxu0 %v2369_v45  ;;  %v2513_v45 = vld [vmem:[%s2968_s16 + $0xf8] sm:$0xff]  }
  0xf7   : > { %1489 = vmatpush.msra.mxu1 %v2401_v49  ;;  %1508 = vmatpush.msra.mxu2 %v2434_v32  ;;  %v2421_v49 = vunpack.c.l.bf16 %v2498_v42 }
  0xf8   : > { %1470 = vmatpush.msra.mxu0 %v2366_v48  ;;  %v2482_v48 = vunpack.c.h.bf16 %v2513_v45 }
  0xf9   : > { %1490 = vmatpush.msra.mxu1 %v2398_v52  ;;  %1509 = vmatpush.msra.mxu2 %v2433_v34  ;;  %v2481_v52 = vunpack.c.l.bf16 %v2513_v45  ;;  %v1331_v45 = vld [vmem:[#allocation2] sm:$0x3] }
  0xfa   : > { %1471 = vmatpush.msra.mxu0 %v2365_v50  ;;  %1520 = vmatpush.msra.mxu3 %v2482_v48 }
  0xfb   : > { %1491 = vmatpush.msra.mxu1 %v2397_v54  ;;  %1510 = vmatpush.msra.mxu2 %v2430_v35 }
  0xfc   : > { %1472 = vmatpush.msra.mxu0 %v2362_v55  ;;  %v2478_v55 = vunpack.c.h.bf16 %v2512_v53  ;;  %1521 = vmatpush.msra.mxu3 %v2481_v52 }
  0xfd   : > { %1492 = vmatpush.msra.mxu1 %v2394_v59  ;;  %1511 = vmatpush.msra.mxu2 %v2429_v14 }
  0xfe   : > { %1473 = vmatpush.msra.mxu0 %v2361_v57  ;;  %v2511_v57 = vld [vmem:[%s2968_s16 + $0xe8] sm:$0xff]   ;;  %1522 = vmatpush.msra.mxu3 %v2478_v55 }
  0xff   : > { %1493 = vmatpush.msra.mxu1 %v2393_v63  ;;  %1512 = vmatpush.msra.mxu2 %v2426_v39  ;;  %v2474_v59 = vunpack.c.h.bf16 %v2511_v57  ;;  %v2473_v63 = vunpack.c.l.bf16 %v2511_v57 }
 0x100   : > { %1474 = vmatpush.msra.mxu0 %v2358_v62  ;;  %1523 = vmatpush.msra.mxu3 %v2477_v58 }
 0x101   : > { %1494 = vmatpush.msra.mxu1 %v2390_v2  ;;  %1513 = vmatpush.msra.mxu2 %v2425_v41 }
 0x102   : > { %1475 = vmatpush.msra.mxu0 %v2357_v1  ;;  %1524 = vmatpush.msra.mxu3 %v2474_v59  ;;  %v2509_v1 = vld [vmem:[%s2968_s16 + $0xd8] sm:$0xff]  }
 0x103   : > { %1495 = vmatpush.msra.mxu1 %v2389_v4  ;;  %1514 = vmatpush.msra.mxu2 %v2422_v44  ;;  %v2466_v3 = vunpack.c.h.bf16 %v2509_v1  ;;  %v2465_v4 = vunpack.c.l.bf16 %v2509_v1 }
 0x104   : > { %1525 = vmatpush.msra.mxu3 %v2473_v63 }
 0x105   : > { %v1145_v8 = vpop.f32.mrf.mxu1  ;;  %1515 = vmatpush.msra.mxu2 %v2421_v49 }
 0x106   : > { %v1132_v5 = vpop.f32.mrf.mxu0 }
 0x107   : > { %v1133_v7 = vadd.f32 %v1132_v5, %v465_v61  ;;  %v2510_v61 = vld [vmem:[%s2968_s16 + $0xe0] sm:$0xff]   ;;  %v2508_v5 = vld [vmem:[%s2968_s16 + $0xd0] sm:$0xff]  }
 0x108   : > { %v1158_v16 = vpop.f32.mrf.mxu2  ;;  %v2470_v0 = vunpack.c.h.bf16 %v2510_v61  ;;  %v2469_v2 = vunpack.c.l.bf16 %v2510_v61  ;;  %v2462_v6 = vunpack.c.h.bf16 %v2508_v5 }
 0x109   : > { %v1146_v12 = vadd.f32 %v1145_v8, %v1133_v7  ;;  %v467_v7 = vperm.slane %v3273_v56, 2  ;;  %v2461_v8 = vunpack.c.l.bf16 %v2508_v5 }
 0x10a   : > { %1526 = vmatpush.msra.mxu3 %v2470_v0 }
 0x10b   : > { %v1159_v20 = vadd.f32 %v1158_v16, %v1146_v12  ;;  %v2457_v16 = vunpack.c.l.bf16 %v2507_v9 }
 0x10c   : > { %1527 = vmatpush.msra.mxu3 %v2469_v2 }
 0x10d   : > { %v1171_v22 = vpop.f32.mrf.mxu3  ;;  %v1147_v27 = vpop.f32.mrf.mxu1 }
 0x10e   : > { %v1172_v24 = vadd.f32 %v1171_v22, %v1159_v20  ;;  %v1134_v25 = vpop.f32.mrf.mxu0  ;;  %1528 = vmatpush.msra.mxu3 %v2466_v3  ;;  %v2506_v20 = vld [vmem:[%s2968_s16 + $0xc0] sm:$0xff]  }
 0x10f   : > { %v2454_v21 = vunpack.c.h.bf16 %v2506_v20  ;;  %v2453_v25 = vunpack.c.l.bf16 %v2506_v20 }
 0x110   : > { %1476 = vmatmul.f32.vlgmr.msra.gmra.mxu0 %v1172_v24  ;;  %v1160_v30 = vpop.f32.mrf.mxu2  ;;  %1529 = vmatpush.msra.mxu3 %v2465_v4 }
 0x112   : > { %1530 = vmatpush.msra.mxu3 %v2462_v6 }
 0x114   : > { %1531 = vmatpush.msra.mxu3 %v2461_v8 }
 0x115   : > { %v1173_v33 = vpop.f32.mrf.mxu3 }
 0x116   : > { %1532 = vmatpush.msra.mxu3 %v2458_v11 }
 0x118   : > { %1533 = vmatpush.msra.mxu3 %v2457_v16 }
 0x11a   : > { %1534 = vmatpush.msra.mxu3 %v2454_v21 }
 0x11c   : > { %1535 = vmatpush.msra.mxu3 %v2453_v25 }
 0x120   : > { %v1184_v36 = vpop.f32.mrf.mxu0 }
 0x121   : > { %v1185_v17 = vadd.f32 %v1184_v36, %v466_v18  ;;  %v1197_v38 = vpop.f32.mrf.mxu1 }
 0x123   : > { %v1198_v40 = vadd.f32 %v1197_v38, %v1185_v17 }
 0x128   : > { %v1210_v43 = vpop.f32.mrf.mxu2  ;;  %v1186_v51 = vpop.f32.mrf.mxu0 }
 0x129   : > { %v1211_v46 = vadd.f32 %v1210_v43, %v1198_v40  ;;  %v1223_v47 = vpop.f32.mrf.mxu3  ;;  %v1199_v54 = vpop.f32.mrf.mxu1 }
 0x12b   : > { %v1224_v50 = vadd.f32 %v1223_v47, %v1211_v46 }
 0x12d   : > { %1496 = vmatmul.f32.vlgmr.msra.gmra.mxu1 %v1224_v50 }
 0x130   : > { %v1212_v60 = vpop.f32.mrf.mxu2 }
 0x131   : > { %v1225_v62 = vpop.f32.mrf.mxu3 }
 0x140   : > { %v1236_v10 = vpop.f32.mrf.mxu0 }
 0x141   : > { %v1237_v12 = vadd.f32 %v1236_v10, %v467_v7  ;;  %v1249_v13 = vpop.f32.mrf.mxu1 }
 0x143   : > { %v1250_v19 = vadd.f32 %v1249_v13, %v1237_v12 }
 0x148   : > { %v1262_v22 = vpop.f32.mrf.mxu2  ;;  %v1238_v27 = vpop.f32.mrf.mxu0 }
 0x149   : > { %v1263_v23 = vadd.f32 %v1262_v22, %v1250_v19  ;;  %v1275_v24 = vpop.f32.mrf.mxu3  ;;  %v1251_v28 = vpop.f32.mrf.mxu1 }
 0x14b   : > { %v1276_v26 = vadd.f32 %v1275_v24, %v1263_v23 }
 0x14d   : > { %1516 = vmatmul.f32.vlgmr.msra.gmra.mxu2 %v1276_v26 }
 0x150   : > { %v1264_v29 = vpop.f32.mrf.mxu2 }
 0x151   : > { %v1277_v30 = vpop.f32.mrf.mxu3 }
 0x160   : > { %v1288_v32 = vpop.f32.mrf.mxu0 }
 0x161   : > { %v1289_v33 = vadd.f32 %v1288_v32, %v468_v31  ;;  %v1301_v15 = vpop.f32.mrf.mxu1 }
 0x163   : > { %v1302_v34 = vadd.f32 %v1301_v15, %v1289_v33 }
 0x168   : > { %v1314_v35 = vpop.f32.mrf.mxu2  ;;  %v1290_v36 = vpop.f32.mrf.mxu0 }
 0x169   : > { %v1315_v18 = vadd.f32 %v1314_v35, %v1302_v34  ;;  %v1327_v14 = vpop.f32.mrf.mxu3  ;;  %v1303_v37 = vpop.f32.mrf.mxu1 }
 0x16b   : > { %v1328_v17 = vadd.f32 %v1327_v14, %v1315_v18 }
 0x16d   : > { %1536 = vmatmul.f32.vlgmr.msra.gmra.mxu3 %v1328_v17 }
 0x170   : > { %v1316_v38 = vpop.f32.mrf.mxu2 }
 0x171   : > { %v1329_v39 = vpop.f32.mrf.mxu3 }
 0x18d   : > { %v1477_v41 = vpop.f32.mrf.mxu0 }
 0x1aa   : > { %v1497_v40 = vpop.f32.mrf.mxu1 }
 0x1ab   : > { %v1498_v43 = vadd.f32 %v1497_v40, %v1477_v41 }
 0x1d0   : > { %v1517_v42 = vpop.f32.mrf.mxu2 }
 0x1d1   : > { %v1518_v44 = vadd.f32 %v1517_v42, %v1498_v43 }
 0x1f0   : > { %v1537_v56 = vpop.f32.mrf.mxu3 }
 0x1f1   : > { %v1538_v46 = vadd.f32 %v1537_v56, %v1518_v44  ;;  %1545 = sbr.rel (%p2220_p5) target bundleno = 776 (0x308), region = 64 }
 0x1f3   : > { %v1540_v47 = vadd.f32 %v1538_v46, %v1331_v45 }
 0x1f5   : > { %1541 = vst [vmem:[#allocation2] sm:$0x3] %v1540_v47 }
 0x1f6   : > { %v2587_v49 = vld [vmem:[#allocation9] ss:$0 sm:$0xff]  ;;  %vm1552_vm0 = vcmask 1041408  }
 0x1fc   : > { %v1546_v48 = vld [vmem:[#allocation2] sm:$0x3] }
 0x1fd   : > { %v1551_v50 = vadd.f32 %v2587_v49, %v1546_v48 }
 0x1ff   : > { %v1553_v51 = vsel %vm1552_vm0, %v1551_v50, -inf }
 0x200   : > { %1554 = vmax.xlane.f32.xlu0 %v1553_v51 }
 0x273   : > { %v1555_v52 = vpop.xlane.xlu0 %1554 }
 0x274   : > { %v1556_v53 = vsub.f32 %v1551_v50, %v1555_v52 }
 0x276   : > { %v1557_v54 = vmul.f32 1.442695, %v1556_v53 }
 0x278   : > { %2588 = vpow2.f32 %v1557_v54 }
 0x27e   : > { %v2589_v55 = vpop.eup %2588 }
 0x27f   : > { %v1559_v57 = vsel %vm1552_vm0, %v2589_v55, 0.0 }
 0x280   : > { %1560 = vadd.xlane.f32.xlu0 %v1559_v57 }
 0x2f3   : > { %v1561_v58 = vpop.xlane.xlu0 %1560 }
 0x2f4   : > { %2590 = vrcp.f32 %v1561_v58  ;;  %v1573_v62 = vand.u32 2147483648, %v1561_v58  ;;  %v1571_v0 = vand.u32 2147483647, %v1561_v58  ;;  %vm1567_vm2 = vweird.f32 %v1561_v58 }
 0x2f6   : > { %v1574_v2 = vor.u32 1.1754944e-38, %v1573_v62  ;;  %vm1572_vm4 = vcmp.eq.f32.partialorder %v1571_v0, 8.507059e+37 }
 0x2fa   : > { %v2591_v59 = vpop.eup %2590 }
 0x2fb   : > { %v1563_v60 = vmul.f32 %v2591_v59, %v1561_v58  ;;  %vm1568_vm1 = vweird.f32 %v2591_v59 }
 0x2fc   : > { %vm1569_vm3 = vmor %vm1567_vm2, %vm1568_vm1 }
 0x2fd   : > { %v1564_v61 = vsub.f32 1.0, %v1563_v60 }
 0x2ff   : > { %v1565_v63 = vmul.f32 %v2591_v59, %v1564_v61 }
 0x301   : > { %v1566_v1 = vadd.f32 %v2591_v59, %v1565_v63 }
 0x303   : > { %v1570_v3 = vsel %vm1569_vm3, %v2591_v59, %v1566_v1 }
 0x304   : > { %v1575_v4 = vsel %vm1572_vm4, %v1574_v2, %v1570_v3 }
 0x305   : > { %v1576_v5 = vmul.f32 %v2589_v55, %v1575_v4 }
 0x307   : > { %1577 = vst [vmem:[#allocation11] sm:$0x3] %v1576_v5 }
 0x308 PF: > { %p2545_p7 = scmp.eq.s32.totalorder %s2891_s28, 7  ;;  %s2795_s18 = smov [#allocation11]  }
 0x309   : > { %s1584_s15 = sshll.u32 %s2795_s18, 4  ;;  %s1586_s21 = sshll.u32 %s3321_s5, 4  ;;  %s1585_s15 = int_to_ptr.vmem [resolvable:$true] %s1584_s15  ;;  %s1587_s21 = int_to_ptr.hbm [resolvable:$true] %s1586_s21 }
 0x30a   : > { %2525 = dma.vmem_to_hbm [thread:$0]  (%p2545_p7), %s1585_s15, 32, %s1587_s21, [#allocation5]  }
 0x30b   : > { %2769 = dma.done.wait (%p2545_p7), [#allocation5], 32  }
 0x30c   : > { %2771 = vsyncadd (%p2545_p7), [#allocation5], 4294967264 }
 0x30d PF: > { %p20_p0 = scmp.ge.s32.totalorder %s2847_s22, 10   ;;  %s3330_s18 = smov %s2778_s19 }
 0x30e   : > { %s3331_s19 = smov %s2782_s20  ;;  %s3332_s20 = smov %s2857_s25 }
 0x30f   : > { %s3333_s21 = smov %s2847_s22  ;;  %22 = sbr.rel (!%p20_p0) target bundleno = 10 (0xa), region = 113 }
 0x314   :  { %1600 = vsyncpa [#allocation4], 1 }
 0x315   :  { %1602 = vsyncpa [#allocation4 + $0x1], 1 }
 0x316   :  { %1603 = vsyncpa [#allocation7], 1 }
 0x317   :  { %1605 = vsyncpa [#allocation7 + $0x1], 1 }
 0x318   :  { %1606 = vsyncpa [#allocation10], 1 }
 0x319   :  { %1607 = vsyncpa [#allocation5], 1 }
 0x31a   :  { %1609 = vsyncpa [#allocation5 + $0x1], 1 }

// kernel: feature_extractor_forward.4
= control target key start
LH: loop header
LB: loop body
LE: loop exit
PB: predicated region body
PF: predicated region fallthrough
CT: control target
= control target key end

     0   :  { %10 = vsyncpa [#allocation3], 0  ;;  %s2906_s0 = inlined_call_operand.vmem [shape: bf16[2,104,128], index: 0, kind: input, shape index: {}]   ;;  %s2907_s1 = inlined_call_operand.hbm [shape: bf16[9,128,128], index: 1, kind: input, shape index: {}]   ;;  %s2908_s2 = inlined_call_operand.hbm [shape: f32[1,128], index: 2, kind: input, shape index: {}]   ;;  %s2909_s3 = inlined_call_operand.hbm [shape: bf16[64,78], index: 3, kind: input, shape index: {}]   ;;  %s2910_s4 = inlined_call_operand.hbm [shape: f32[4,16], index: 4, kind: input, shape index: {}]   ;;  %s2911_s5 = inlined_call_operand.vmem [shape: bf16[2,4,128], index: 5, kind: output, shape index: {}]  }
   0x1   :  { %11 = vsyncpa [#allocation5], 0 }
   0x2   :  { %12 = vsyncpa [#allocation8], 0  ;;  %s2624_s18 = smov 0  }
   0x3 LB: > { %s185_s21 = sshll.u32 %s2908_s2, 4  ;;  %s2633_s22 = sadd.s32 4294967295, %s2586_s18   ;;  %s2586_s18 = sphi %s2624_s18, %s18_s18   ;;  %s186_s21 = int_to_ptr.hbm [resolvable:$true] %s185_s21 }
   0x4   : > { %p1890_p0 = scmp.ge.s32.totalorder %s2586_s18, 1  ;;  %p159_p1 = scmp.lt.s32.totalorder %s2586_s18, 3 }
   0x5   : > { %p2420_p2 = scmp.eq.s32.totalorder %s2633_s22, 0  ;;  %s2588_s24 = smov [#allocation4]  }
   0x6   : > { %p2638_p3 = pnand %p1890_p0, %p159_p1  ;;  %s187_s25 = sshll.u32 %s2588_s24, 4  ;;  %s188_s25 = int_to_ptr.vmem [resolvable:$true] %s187_s25 }
   0x7   : > { %s170_s28 = sshll.u32 %s2907_s1, 4  ;;  %s2589_s30 = smov [#allocation2]   ;;  %s171_s28 = int_to_ptr.hbm [resolvable:$true] %s170_s28 }
   0x8   : > { %p2407_p4 = pneg %p2638_p3  ;;  %s172_s6 = sshll.u32 %s2589_s30, 4  ;;  %s173_s6 = int_to_ptr.vmem [resolvable:$true] %s172_s6 }
   0x9   : > { %s196_s9 = sshll.u32 %s2909_s3, 4  ;;  %s2590_s10 = smov 64   ;;  %s197_s9 = int_to_ptr.hbm [resolvable:$true] %s196_s9 }
   0xa   : > { %p2649_p5 = pnand %p2420_p2, %p2407_p4  ;;  %s2591_s11 = smov 4  }
   0xb   : > { %s2592_s12 = smov [#allocation6]   ;;  %s211_s16 = sshll.u32 %s2910_s4, 4  ;;  %s212_s16 = int_to_ptr.hbm [resolvable:$true] %s211_s16 }
   0xc   : > { %2413 = dma.hbm_to_vmem [thread:$0]  (!%p2649_p5), %s186_s21, 16, %s188_s25, [#allocation5]  }
   0xd   : > { %2410 = dma.hbm_to_vmem [thread:$0]  (!%p2649_p5), %s171_s28, 9216, %s173_s6, [#allocation3], %s2590_s10, %s2590_s10, %s2591_s11  }
   0xe   : > { %s198_s13 = sshll.u32 %s2592_s12, 4  ;;  %s2593_s17 = smov [#allocation7]   ;;  %s199_s13 = int_to_ptr.vmem [resolvable:$true] %s198_s13 }
   0xf   : > { %2416 = dma.hbm_to_vmem [thread:$0]  (!%p2649_p5), %s197_s9, 512, %s199_s13, [#allocation5], %s2590_s10, %s2590_s10, %s2591_s11  }
  0x10   : > { %s213_s19 = sshll.u32 %s2593_s17, 4  ;;  %234 = sbr.rel (%p2638_p3) target bundleno = 728 (0x2d8), region = 40  ;;  %s214_s19 = int_to_ptr.vmem [resolvable:$true] %s213_s19 }
  0x11   : > { %2419 = dma.hbm_to_vmem [thread:$0]  (!%p2649_p5), %s212_s16, 64, %s214_s19, [#allocation8]  }
  0x15   : > { %2572 = dma.done.wait (%p2420_p2), [#allocation3], 9216  }
  0x16   : > { %2574 = vsyncadd (%p2420_p2), [#allocation3], 4294958080 }
  0x17   : > { %2576 = dma.done.wait (%p2420_p2), [#allocation5], 528  }
  0x18   : > { %2578 = vsyncadd (%p2420_p2), [#allocation5], 4294966768 }
  0x19   : > { %2580 = dma.done.wait (%p2420_p2), [#allocation8], 64  }
  0x1a   : > { %2582 = vsyncadd (%p2420_p2), [#allocation8], 4294967232  ;;  %p277_p6 = scmp.lt.s32.totalorder %s2633_s22, 1  ;;  %v2296_v0 = vld [vmem:[#allocation2 + $0x78] sm:$0xff]  ;;  %v2295_v3 = vld [vmem:[#allocation2 + $0x70] sm:$0xff]  ;;  %vm594_vm1 = vcmask 1046528  }
  0x1b   : > { %v2288_v1 = vld [vmem:[#allocation2 + $0x38] sm:$0xff]  ;;  %2377 = vmatpush.bf16.msra.mxu3 %v2296_v0  ;;  %v2287_v4 = vld [vmem:[#allocation2 + $0x30] sm:$0xff]  ;;  %449 = vmatpush.bf16.msra.mxu0 %v2296_v0  ;;  %v2294_v6 = vld [vmem:[#allocation2 + $0x68] sm:$0xff]  ;;  %vm356_vm0 = vsmask.f32 7424  ;;  %vm1083_vm3 = vcmask 1045504  }
  0x1c   : > { %v2304_v2 = vld [vmem:[#allocation2 + $0xb8] sm:$0xff]  ;;  %539 = vmatpush.bf16.msra.mxu1 %v2288_v1  ;;  %v2303_v5 = vld [vmem:[#allocation2 + $0xb0] sm:$0xff]  ;;  %s2915_s22 = smov (!%p277_p6, %s2633_s22), 1  ;;  %v2286_v7 = vld [vmem:[#allocation2 + $0x28] sm:$0xff]  ;;  %vm915_vm2 = vsmask.f32 6400 }
  0x1d   : > { %657 = vmatpush.bf16.msra.mxu2 %v2304_v2  ;;  %v2302_v8 = vld [vmem:[#allocation2 + $0xa8] sm:$0xff]  ;;  %s2390_s20 = smul.u32 52, %s2915_s22  ;;  %v2293_v9 = vld [vmem:[#allocation2 + $0x60] sm:$0xff]  ;;  %v2292_v12 = vld [vmem:[#allocation2 + $0x58] sm:$0xff]  ;;  %vm1549_vm4 = vcmask 1044480   ;;  %vm1715_vm6 = vcmask 637952  }
  0x1e   : > { %v2285_v10 = vld [vmem:[#allocation2 + $0x20] sm:$0xff]  ;;  %v2284_v13 = vld [vmem:[#allocation2 + $0x18] sm:$0xff]  ;;  %v2291_v16 = vld [vmem:[#allocation2 + $0x50] sm:$0xff]  ;;  %vm1377_vm5 = vsmask.f32 5376  ;;  %vm1768_vm7 = vcmask 130048  }
  0x1f   : > { %2378 = vmatpush.bf16.msra.mxu3 %v2295_v3  ;;  %450 = vmatpush.bf16.msra.mxu0 %v2295_v3  ;;  %v2301_v11 = vld [vmem:[#allocation2 + $0xa0] sm:$0xff]  ;;  %s2689_s24 = scalar_lea.vmem %s2906_s0, %s2390_s20  ;;  %v2300_v15 = vld [vmem:[#allocation2 + $0x98] sm:$0xff]  ;;  %v2283_v17 = vld [vmem:[#allocation2 + $0x10] sm:$0xff]  ;;  %s1902_s25 = sshll.u32 %s2915_s22, 1 }
  0x20   : > { %540 = vmatpush.bf16.msra.mxu1 %v2287_v4  ;;  %v2692_v14 = vld [vmem:[%s2689_s24 + $0x10] sm:$0xff]  ;;  %v2695_v18 = vld [vmem:[%s2689_s24 + $0x18] sm:$0xff]  ;;  %v2371_v20 = vld [vmem:[%s2689_s24] sm:$0xff]   ;;  %s285_s28 = scalar_lea.vmem %s2911_s5, %s1902_s25 }
  0x21   : > { %658 = vmatpush.bf16.msra.mxu2 %v2303_v5  ;;  %v373_v19 = vshll.u32 %v2692_v14, 16  ;;  %v2299_v21 = vld [vmem:[#allocation2 + $0x90] sm:$0xff]  ;;  %v360_v22 = vshll.u32 %v2371_v20, 16  ;;  %v2374_v23 = vld [vmem:[%s2689_s24] sm:$0xf0]  ;;  %v2702_v25 = vld [vmem:[%s2689_s24 + $0x8] sm:$0xff] }
  0x22   : > { %v2375_v24 = vld [vmem:[%s2689_s24] sm:$0xe]  ;;  %v2290_v26 = vld [vmem:[#allocation2 + $0x48] sm:$0xff]  ;;  %v377_v29 = vshrl.u32 %v2692_v14, 16  ;;  %v381_v30 = vshll.u32 %v2695_v18, 16  ;;  %v358_v32 = vshrl.u32 %v2371_v20, 16 }
  0x23   : > { %2379 = vmatpush.bf16.msra.mxu3 %v2294_v6  ;;  %451 = vmatpush.bf16.msra.mxu0 %v2294_v6  ;;  %v2282_v27 = vld [vmem:[#allocation2 + $0x8] sm:$0xff]  ;;  %v2704_v28 = vrot.slane %v373_v19, 1  ;;  %v362_v33 = vrot.slane %v360_v22, 1  ;;  %v2376_v34 = vor.u32 %v2375_v24, %v2374_v23  ;;  %v365_v35 = vshll.u32 %v2702_v25, 16  ;;  %v2289_v36 = vld [vmem:[#allocation2 + $0x40] sm:$0xff]  ;;  %v2317_v47 = vld [vmem:[#allocation2 + $0xf8] sm:$0xff] }
  0x24   : > { %541 = vmatpush.bf16.msra.mxu1 %v2286_v7  ;;  %v2298_v31 = vld [vmem:[#allocation2 + $0x88] sm:$0xff]  ;;  %v2281_v37 = vld [vmem:[#allocation2] sm:$0xff]  ;;  %v383_v39 = vrot.slane %v381_v30, 1  ;;  %v596_v42 = vrot.slane %v2702_v25, 1  ;;  %v2329_v48 = vld [vmem:[#allocation2 + $0x138] sm:$0xff]  ;;  %v385_v56 = vshrl.u32 %v2695_v18, 16 }
  0x25   : > { %659 = vmatpush.bf16.msra.mxu2 %v2302_v8  ;;  %v379_v38 = vor.u32 %v377_v29, %v2704_v28  ;;  %v2297_v40 = vld [vmem:[#allocation2 + $0x80] sm:$0xff]  ;;  %v595_v41 = vrot.slane %v2376_v34, 1  ;;  %v363_v43 = vor.u32 %v362_v33, %v358_v32  ;;  %v367_v44 = vrot.slane %v365_v35, 1  ;;  %v2316_v52 = vld [vmem:[#allocation2 + $0xf0] sm:$0xff]  ;;  %v2315_v54 = vld [vmem:[#allocation2 + $0xe8] sm:$0xff] }
  0x26   : > { %v2712_v45 = vld [vmem:[%s2689_s24 + $0x20] sm:$0xff]   ;;  %v2328_v53 = vld [vmem:[#allocation2 + $0x130] sm:$0xff]  ;;  %v2327_v55 = vld [vmem:[#allocation2 + $0x128] sm:$0xff]  ;;  %v369_v59 = vshrl.u32 %v2702_v25, 16  ;;  %v387_v63 = vor.u32 %v385_v56, %v383_v39  ;;  %v598_v1 = vrot.slane %v2692_v14, 1  ;;  %v600_v35 = vrot.slane %v2695_v18, 1 }
  0x27   : > { %2380 = vmatpush.bf16.msra.mxu3 %v2293_v9  ;;  %452 = vmatpush.bf16.msra.mxu0 %v2293_v9  ;;  %v2715_v46 = vld [vmem:[%s2689_s24 + $0x20] sm:$0xf]   ;;  %v384_v49 = vsel %vm356_vm0, %v379_v38, %v383_v39  ;;  %v597_v50 = vsel %vm594_vm1, %v595_v41, %v596_v42  ;;  %v368_v51 = vsel %vm356_vm0, %v363_v43, %v367_v44  ;;  %v389_v57 = vshll.u32 %v2712_v45, 16  ;;  %v859_v61 = vld [vmem:[%s2689_s24 + $0x4] sm:$0xe]  ;;  %v2725_v62 = vld [vmem:[%s2689_s24 + $0x8] sm:$0xff]  }
  0x28   : > { %542 = vmatpush.bf16.msra.mxu1 %v2285_v10  ;;  %v2314_v58 = vld [vmem:[#allocation2 + $0xe0] sm:$0xff]  ;;  %v371_v2 = vor.u32 %v369_v59, %v367_v44  ;;  %v898_v3 = vunpack.c.l.b16 %v859_v61  ;;  %v899_v4 = vunpack.c.l.b16 %v2725_v62  ;;  %v2313_v5 = vld [vmem:[#allocation2 + $0xd8] sm:$0xff]  ;;  %v599_v8 = vsel %vm594_vm1, %v596_v42, %v598_v1  ;;  %v2734_v10 = vld [vmem:[%s2689_s24 + $0xc] sm:$0xff] }
  0x29   : > { %660 = vmatpush.bf16.msra.mxu2 %v2301_v11  ;;  %v2326_v60 = vld [vmem:[#allocation2 + $0x120] sm:$0xff]  ;;  %v391_v0 = vrot.slane %v389_v57, 1  ;;  %v2325_v6 = vld [vmem:[#allocation2 + $0x118] sm:$0xff]  ;;  %v2336_v22 = vld [vmem:[#allocation2 + $0x170] sm:$0xff]  ;;  %v393_v34 = vshrl.u32 %v2712_v45, 16  ;;  %v601_v41 = vsel %vm594_vm1, %v598_v1, %v600_v35  ;;  %v602_v61 = vrot.slane %v2712_v45, 1 }
  0x2a   : > { %v376_v9 = vsel %vm356_vm0, %v371_v2, %v2704_v28  ;;  %v909_v11 = vpack.c.b16 %v899_v4, %v898_v3  ;;  %v2348_v23 = vld [vmem:[#allocation2 + $0x1b0] sm:$0xff]  ;;  %v2311_v24 = vld [vmem:[#allocation2 + $0xc8] sm:$0xff]  ;;  %v2310_v32 = vld [vmem:[#allocation2 + $0xc0] sm:$0xff] }
  0x2b   : > { %2381 = vmatpush.bf16.msra.mxu3 %v2292_v12  ;;  %453 = vmatpush.bf16.msra.mxu0 %v2292_v12  ;;  %v392_v7 = vsel %vm356_vm0, %v387_v63, %v391_v0  ;;  %v2312_v12 = vld [vmem:[#allocation2 + $0xd0] sm:$0xff]  ;;  %v2335_v30 = vld [vmem:[#allocation2 + $0x168] sm:$0xff]  ;;  %v2322_v33 = vld [vmem:[#allocation2 + $0x100] sm:$0xff]  ;;  %v603_v3 = vsel %vm594_vm1, %v600_v35, %v602_v61 }
  0x2c   : > { %543 = vmatpush.bf16.msra.mxu1 %v2284_v13  ;;  %v2324_v13 = vld [vmem:[#allocation2 + $0x110] sm:$0xff]  ;;  %v920_v19 = vshll.u32 %v909_v11, 16  ;;  %v2334_v38 = vld [vmem:[#allocation2 + $0x160] sm:$0xff]  ;;  %v2333_v44 = vld [vmem:[#allocation2 + $0x158] sm:$0xff] }
  0x2d   : > { %661 = vmatpush.bf16.msra.mxu2 %v2300_v15  ;;  %v2337_v15 = vld [vmem:[#allocation2 + $0x178] sm:$0xff]  ;;  %v2346_v39 = vld [vmem:[#allocation2 + $0x1a0] sm:$0xff] }
  0x2e   : > { %v2746_v43 = vld [vmem:[%s2689_s24 + $0x14] sm:$0xff]  ;;  %v2342_v1 = vld [vmem:[#allocation2 + $0x180] sm:$0xff] }
  0x2f   : > { %2382 = vmatpush.bf16.msra.mxu3 %v2291_v16  ;;  %454 = vmatpush.bf16.msra.mxu0 %v2291_v16  ;;  %v2349_v16 = vld [vmem:[#allocation2 + $0x1b8] sm:$0xff] }
  0x30   : > { %544 = vmatpush.bf16.msra.mxu1 %v2283_v17  ;;  %v917_v17 = vshrl.u32 %v909_v11, 16 }
  0x31   : > { %662 = vmatpush.bf16.msra.mxu2 %v2299_v21  ;;  %v928_v21 = vshll.u32 %v2734_v10, 16 }
  0x33   : > { %2383 = vmatpush.bf16.msra.mxu3 %v2290_v26  ;;  %455 = vmatpush.bf16.msra.mxu0 %v2290_v26  ;;  %v2323_v26 = vld [vmem:[#allocation2 + $0x108] sm:$0xff]  ;;  %v930_v29 = vrot.slane %v928_v21, 2 }
  0x34   : > { %545 = vmatpush.bf16.msra.mxu1 %v2282_v27  ;;  %v919_v27 = vrot.slane %v917_v17, 1  ;;  %v1192_v21 = vld [vmem:[%s2689_s24 + $0x8] sm:$0xc] }
  0x35   : > { %663 = vmatpush.bf16.msra.mxu2 %v2298_v31  ;;  %v2347_v31 = vld [vmem:[#allocation2 + $0x1a8] sm:$0xff] }
  0x37   : > { %2384 = vmatpush.bf16.msra.mxu3 %v2289_v36  ;;  %456 = vmatpush.bf16.msra.mxu0 %v2289_v36 }
  0x38   : > { %546 = vmatpush.bf16.msra.mxu1 %v2281_v37 }
  0x39   : > { %664 = vmatpush.bf16.msra.mxu2 %v2297_v40  ;;  %v395_v40 = vor.u32 %v393_v34, %v391_v0  ;;  %v2330_v0 = vld [vmem:[#allocation2 + $0x140] sm:$0xff] }
  0x3a   : > { %467 = vmatmul.bf16.vlgmr.msra.gmra.mxu3 %v384_v49  ;;  %457 = vmatmul.bf16.vlgmr.msra.gmra.mxu0 %v368_v51  ;;  %v2305_v49 = vld [vmem:[%s2689_s24 + $0x4] sm:$0xf0]  ;;  %v937_v51 = vshll.u32 %v2746_v43, 16 }
  0x3b   : > { %815 = vmatpush.bf16.msrb.mxu3 %v2317_v47  ;;  %1018 = vmatpush.bf16.msrb.mxu0 %v2329_v48  ;;  %v2345_v47 = vld [vmem:[#allocation2 + $0x198] sm:$0xff]  ;;  %v2013_v48 = vld [vmem:[%s2689_s24 + $0x4] sm:$0xe] }
  0x3c   : > { %547 = vmatmul.bf16.vlgmr.msra.gmra.mxu1 %v2371_v20  ;;  %665 = vmatmul.bf16.vlgmr.msra.gmra.mxu2 %v597_v50  ;;  %v925_v20 = vshrl.u32 %v2734_v10, 16  ;;  %v934_v50 = vshrl.u32 %v2746_v43, 16  ;;  %v939_v57 = vrot.slane %v937_v51, 2 }
  0x3d   : > { %1148 = vmatpush.bf16.msrb.mxu1 %v2337_v15  ;;  %1312 = vmatpush.bf16.msrb.mxu2 %v2349_v16 }
  0x3e   : > { %v927_v28 = vrot.slane %v925_v20, 1  ;;  %v936_v56 = vrot.slane %v934_v50, 1  ;;  %v2771_v20 = vld [vmem:[%s2689_s24 + $0x24] sm:$0xff] }
  0x3f   : > { %816 = vmatpush.bf16.msrb.mxu3 %v2316_v52  ;;  %1019 = vmatpush.bf16.msrb.mxu0 %v2328_v53  ;;  %v2332_v52 = vld [vmem:[#allocation2 + $0x150] sm:$0xff] }
  0x40   : > { %v931_v37 = vor.u32 %v930_v29, %v927_v28  ;;  %v2344_v53 = vld [vmem:[#allocation2 + $0x190] sm:$0xff]  ;;  %v940_v63 = vor.u32 %v939_v57, %v936_v56 }
  0x41   : > { %1149 = vmatpush.bf16.msrb.mxu1 %v2336_v22  ;;  %1313 = vmatpush.bf16.msrb.mxu2 %v2348_v23  ;;  %v2357_v22 = vld [vmem:[#allocation2 + $0x1f8] sm:$0xff]  ;;  %v2356_v28 = vld [vmem:[#allocation2 + $0x1f0] sm:$0xff] }
  0x42   : > { %v2365_v23 = vld [vmem:[#allocation2 + $0x238] sm:$0xff]  ;;  %v2364_v29 = vld [vmem:[#allocation2 + $0x230] sm:$0xff] }
  0x43   : > { %817 = vmatpush.bf16.msrb.mxu3 %v2315_v54  ;;  %1020 = vmatpush.bf16.msrb.mxu0 %v2327_v55  ;;  %v2306_v54 = vld [vmem:[%s2689_s24 + $0xc] sm:$0xff]  ;;  %v2014_v55 = vor.u32 %v2305_v49, %v2013_v48 }
  0x44   : > { %v869_v48 = vld [vmem:[%s2689_s24 + $0x2c] sm:$0x1]  ;;  %v2352_v56 = vld [vmem:[#allocation2 + $0x1d0] sm:$0xff] }
  0x45   : > { %1150 = vmatpush.bf16.msrb.mxu1 %v2335_v30  ;;  %1314 = vmatpush.bf16.msrb.mxu2 %v2347_v31  ;;  %v753_v59 = vrot.slane %v2014_v55, 1  ;;  %v2308_v30 = vld [vmem:[%s2689_s24 + $0x1c] sm:$0xff]  ;;  %v2360_v57 = vld [vmem:[#allocation2 + $0x210] sm:$0xff] }
  0x47   : > { %818 = vmatpush.bf16.msrb.mxu3 %v2314_v58  ;;  %1021 = vmatpush.bf16.msrb.mxu0 %v2326_v60  ;;  %v2343_v58 = vld [vmem:[#allocation2 + $0x188] sm:$0xff]  ;;  %v754_v60 = vrot.slane %v2306_v54, 1  ;;  %v2361_v54 = vld [vmem:[#allocation2 + $0x218] sm:$0xff] }
  0x49   : > { %1151 = vmatpush.bf16.msrb.mxu1 %v2334_v38  ;;  %1315 = vmatpush.bf16.msrb.mxu2 %v2346_v39  ;;  %v755_v2 = vsel %vm594_vm1, %v753_v59, %v754_v60  ;;  %v758_v38 = vrot.slane %v2308_v30, 1 }
  0x4a   : > { %472 = vmatmul.bf16.gmra.mxu3 %v392_v7  ;;  %462 = vmatmul.bf16.gmra.mxu0 %v376_v9  ;;  %v2307_v9 = vld [vmem:[%s2689_s24 + $0x14] sm:$0xff] }
  0x4b   : > { %819 = vmatpush.bf16.msrb.mxu3 %v2313_v5  ;;  %1022 = vmatpush.bf16.msrb.mxu0 %v2325_v6  ;;  %v941_v5 = vsel %vm915_vm2, %v931_v37, %v940_v63  ;;  %v2759_v6 = vld [vmem:[%s2689_s24 + $0x1c] sm:$0xff] }
  0x4c   : > { %552 = vmatmul.bf16.gmra.mxu1 %v2702_v25  ;;  %670 = vmatmul.bf16.gmra.mxu2 %v599_v8  ;;  %v922_v25 = vrot.slane %v920_v19, 2  ;;  %v943_v45 = vshrl.u32 %v2759_v6, 16  ;;  %v946_v7 = vshll.u32 %v2759_v6, 16  ;;  %v2583_v8 = vld [vmem:[%s2689_s24 + $0x20] sm:$0x70] }
  0x4d   : > { %1152 = vmatpush.bf16.msrb.mxu1 %v2333_v44  ;;  %1316 = vmatpush.bf16.msrb.mxu2 %v2345_v47  ;;  %v2446_v16 = vor.u32 %v2583_v8, %v2715_v46  ;;  %v1062_v19 = vld [vmem:[%s2689_s24 + $0x4] sm:$0xc]  ;;  %v1232_v46 = vunpack.c.h.b16 %v2725_v62 }
  0x4e   : > { %v923_v36 = vor.u32 %v922_v25, %v919_v27  ;;  %v945_v11 = vrot.slane %v943_v45, 1  ;;  %v952_v27 = vshrl.u32 %v2771_v20, 16  ;;  %v955_v25 = vshll.u32 %v2771_v20, 16  ;;  %v2354_v44 = vld [vmem:[#allocation2 + $0x1e0] sm:$0xff] }
  0x4f   : > { %820 = vmatpush.bf16.msrb.mxu3 %v2312_v12  ;;  %1023 = vmatpush.bf16.msrb.mxu0 %v2324_v13  ;;  %v948_v12 = vrot.slane %v946_v7, 2  ;;  %v756_v13 = vrot.slane %v2307_v9, 1  ;;  %v2362_v47 = vld [vmem:[#allocation2 + $0x220] sm:$0xff] }
  0x50   : > { %v932_v42 = vsel %vm915_vm2, %v923_v36, %v931_v37  ;;  %v954_v34 = vrot.slane %v952_v27, 1  ;;  %v957_v35 = vrot.slane %v955_v25, 2  ;;  %v2355_v36 = vld [vmem:[#allocation2 + $0x1e8] sm:$0xff] }
  0x51   : > { %1153 = vmatpush.bf16.msrb.mxu1 %v2332_v52  ;;  %1317 = vmatpush.bf16.msrb.mxu2 %v2344_v53  ;;  %v949_v15 = vor.u32 %v948_v12, %v945_v11  ;;  %v757_v17 = vsel %vm594_vm1, %v754_v60, %v756_v13  ;;  %v2363_v37 = vld [vmem:[#allocation2 + $0x228] sm:$0xff]  ;;  %v759_v49 = vsel %vm594_vm1, %v756_v13, %v758_v38  ;;  %v908_v52 = vunpack.c.l.b16 %v869_v48  ;;  %v2353_v53 = vld [vmem:[#allocation2 + $0x1d8] sm:$0xff]  ;;  %v2810_v12 = vld [vmem:[%s2689_s24 + $0x20] sm:$0xff] }
  0x52   : > { %v2351_v60 = vld [vmem:[#allocation2 + $0x1c8] sm:$0xff] }
  0x53   : > { %821 = vmatpush.bf16.msrb.mxu3 %v2311_v24  ;;  %1024 = vmatpush.bf16.msrb.mxu0 %v2323_v26  ;;  %v1081_v24 = vunpack.c.l.b16 %v1062_v19  ;;  %v1231_v26 = vunpack.c.l.b16 %v1192_v21  ;;  %v2795_v55 = vpack.c.b16 %v908_v52, %v908_v52  ;;  %v1528_v11 = vld [vmem:[%s2689_s24 + $0x8] sm:$0x8] }
  0x55   : > { %1318 = vmatpush.bf16.msrb.mxu2 %v2343_v58  ;;  %v1082_v31 = vpack.c.b16 %v899_v4, %v1081_v24  ;;  %v2799_v58 = vld [vmem:[%s2689_s24 + $0x18] sm:$0xff]  ;;  %v961_v59 = vshll.u32 %v2795_v55, 16 }
  0x57   : > { %822 = vmatpush.bf16.msrb.mxu3 %v2310_v32  ;;  %1025 = vmatpush.bf16.msrb.mxu0 %v2322_v33  ;;  %v2781_v32 = vld [vmem:[%s2689_s24 + $0x10] sm:$0xff]  ;;  %v2785_v33 = vpack.c.b16 %v1232_v46, %v1231_v26  ;;  %v1084_v39 = vrot.slane %v1082_v31, 2 }
  0x58   : > { %v1390_v24 = vshll.u32 %v2781_v32, 16 }
  0x59   : > { %1319 = vmatpush.bf16.msrb.mxu2 %v2342_v1  ;;  %v1248_v4 = vrot.slane %v2785_v33, 2  ;;  %v1251_v1 = vrot.slane %v2799_v58, 2  ;;  %v1379_v62 = vshrl.u32 %v2785_v33, 16 }
  0x5a   : > { %477 = vmatmul.bf16.gmra.mxu3 %v395_v40  ;;  %1026 = vmatmul.bf16.vlgmr.msrb.gmra.mxu0 %v932_v42  ;;  %v1085_v40 = vrot.slane %v2734_v10, 2  ;;  %v958_v42 = vor.u32 %v957_v35, %v954_v34  ;;  %v1392_v25 = vrot.slane %v1390_v24, 3 }
  0x5b   : > { %1484 = vmatpush.bf16.msra.mxu3 %v2357_v22  ;;  %1614 = vmatpush.bf16.msra.mxu0 %v2365_v23  ;;  %v1387_v23 = vshrl.u32 %v2781_v32, 16  ;;  %v1381_v26 = vrot.slane %v1379_v62, 2 }
  0x5c   : > { %557 = vmatmul.bf16.gmra.mxu1 %v2692_v14  ;;  %675 = vmatmul.bf16.gmra.mxu2 %v601_v41  ;;  %v2331_v14 = vld [vmem:[#allocation2 + $0x148] sm:$0xff]  ;;  %v1249_v41 = vrot.slane %v2781_v32, 2  ;;  %v1086_v50 = vsel %vm1083_vm3, %v1084_v39, %v1085_v40  ;;  %v959_v10 = vsel %vm915_vm2, %v949_v15, %v958_v42 }
  0x5d   : > { %1154 = vmatpush.bf16.msrb.mxu1 %v2331_v14  ;;  %v2309_v14 = vld [vmem:[%s2689_s24 + $0x24] sm:$0xff]  ;;  %v1389_v27 = vrot.slane %v1387_v23, 2 }
  0x5e   : > { %v1250_v51 = vsel %vm1083_vm3, %v1248_v4, %v1249_v41  ;;  %v1252_v8 = vsel %vm1083_vm3, %v1249_v41, %v1251_v1  ;;  %v1202_v4 = vld [vmem:[%s2689_s24 + $0x30] sm:$0x1]  ;;  %v1399_v41 = vshll.u32 %v2799_v58, 16 }
  0x5f   : > { %1485 = vmatpush.bf16.msra.mxu3 %v2356_v28  ;;  %1615 = vmatpush.bf16.msra.mxu0 %v2364_v29  ;;  %v2825_v28 = vld [vmem:[%s2689_s24 + $0x28] sm:$0xff]  ;;  %v1091_v29 = vrot.slane %v2771_v20, 2  ;;  %v1393_v31 = vor.u32 %v1392_v25, %v1389_v27  ;;  %v1396_v20 = vshrl.u32 %v2799_v58, 16  ;;  %v1356_v27 = vld [vmem:[%s2689_s24 + $0x30] sm:$0x3] }
  0x60   : > { %v1255_v34 = vrot.slane %v2825_v28, 2 }
  0x61   : > { %1155 = vmatpush.bf16.msrb.mxu1 %v2330_v0  ;;  %v1087_v0 = vrot.slane %v2746_v43, 2  ;;  %v1547_v43 = vunpack.c.l.b16 %v1528_v11 }
  0x63   : > { %1486 = vmatpush.bf16.msra.mxu3 %v2355_v36  ;;  %1616 = vmatpush.bf16.msra.mxu0 %v2363_v37  ;;  %v1088_v7 = vsel %vm1083_vm3, %v1085_v40, %v1087_v0  ;;  %v1548_v13 = vpack.c.b16 %v1232_v46, %v1547_v43 }
  0x67   : > { %1487 = vmatpush.bf16.msra.mxu3 %v2354_v44  ;;  %1617 = vmatpush.bf16.msra.mxu0 %v2362_v47 }
  0x6a   : > { %823 = vmatmul.bf16.vlgmr.msrb.gmra.mxu3 %v755_v2  ;;  %1031 = vmatmul.bf16.gmra.mxu0 %v941_v5  ;;  %v963_v2 = vrot.slane %v961_v59, 2  ;;  %v2358_v5 = vld [vmem:[#allocation2 + $0x200] sm:$0xff] }
  0x6b   : > { %1488 = vmatpush.bf16.msra.mxu3 %v2353_v53  ;;  %1618 = vmatpush.bf16.msra.mxu0 %v2361_v54  ;;  %v1093_v53 = vrot.slane %v2795_v55, 2 }
  0x6c   : > { %562 = vmatmul.bf16.gmra.mxu1 %v2695_v18  ;;  %680 = vmatmul.bf16.gmra.mxu2 %v603_v3  ;;  %v950_v18 = vsel %vm915_vm2, %v940_v63, %v949_v15  ;;  %v760_v63 = vrot.slane %v2309_v14, 1  ;;  %v2350_v3 = vld [vmem:[#allocation2 + $0x1c0] sm:$0xff]  ;;  %v964_v9 = vsel %vm915_vm2, %v958_v42, %v963_v2  ;;  %v1089_v15 = vrot.slane %v2759_v6, 2 }
  0x6d   : > { %v1382_v6 = vshll.u32 %v2785_v33, 16  ;;  %v1553_v33 = vrot.slane %v2799_v58, 3  ;;  %v1241_v42 = vunpack.c.l.b16 %v1202_v4  ;;  %v1555_v14 = vrot.slane %v2810_v12, 3 }
  0x6e   : > { %v761_v45 = vsel %vm594_vm1, %v758_v38, %v760_v63  ;;  %v1090_v19 = vsel %vm1083_vm3, %v1087_v0, %v1089_v15 }
  0x6f   : > { %1489 = vmatpush.bf16.msra.mxu3 %v2352_v56  ;;  %1619 = vmatpush.bf16.msra.mxu0 %v2360_v57  ;;  %v1384_v46 = vrot.slane %v1382_v6, 3 }
  0x71   : > { %v1385_v30 = vor.u32 %v1384_v46, %v1381_v26  ;;  %v1414_v26 = vshrl.u32 %v2825_v28, 16  ;;  %v1417_v46 = vshll.u32 %v2825_v28, 16 }
  0x73   : > { %1490 = vmatpush.bf16.msra.mxu3 %v2351_v60  ;;  %v1394_v36 = vsel %vm1377_vm5, %v1385_v30, %v1393_v31  ;;  %v1375_v30 = vunpack.c.l.b16 %v1356_v27 }
  0x77   : > { %1491 = vmatpush.bf16.msra.mxu3 %v2350_v3  ;;  %v1556_v3 = vsel %vm1549_vm4, %v1553_v33, %v1555_v14 }
  0x7a   : > { %828 = vmatmul.bf16.gmra.mxu3 %v757_v17  ;;  %1036 = vmatmul.bf16.gmra.mxu0 %v950_v18  ;;  %v1550_v17 = vrot.slane %v1548_v13, 3  ;;  %v1551_v18 = vrot.slane %v2781_v32, 3  ;;  %v1092_v32 = vsel %vm1083_vm3, %v1089_v15, %v1091_v29 }
  0x7c   : > { %567 = vmatmul.bf16.gmra.mxu1 %v2446_v16  ;;  %685 = vmatmul.bf16.gmra.mxu2 %v602_v61  ;;  %v2359_v61 = vld [vmem:[#allocation2 + $0x208] sm:$0xff]  ;;  %v1253_v16 = vrot.slane %v2810_v12, 2  ;;  %v1552_v22 = vsel %vm1549_vm4, %v1550_v17, %v1551_v18  ;;  %v1554_v39 = vsel %vm1549_vm4, %v1551_v18, %v1553_v33  ;;  %v1557_v18 = vrot.slane %v2825_v28, 3 }
  0x7d   : > { %1620 = vmatpush.bf16.msra.mxu0 %v2359_v61  ;;  %v1094_v61 = vsel %vm1083_vm3, %v1091_v29, %v1093_v53  ;;  %v1416_v33 = vrot.slane %v1414_v26, 2 }
  0x7e   : > { %v1254_v21 = vsel %vm1083_vm3, %v1251_v1, %v1253_v16  ;;  %v1256_v37 = vsel %vm1083_vm3, %v1253_v16, %v1255_v34  ;;  %v1558_v24 = vsel %vm1549_vm4, %v1555_v14, %v1557_v18 }
  0x81   : > { %1621 = vmatpush.bf16.msra.mxu0 %v2358_v5  ;;  %v1405_v5 = vshrl.u32 %v2810_v12, 16 }
  0x83   : > { %v1407_v11 = vrot.slane %v1405_v5, 2 }
  0x8a   : > { %833 = vmatmul.bf16.gmra.mxu3 %v759_v49  ;;  %1041 = vmatmul.bf16.gmra.mxu0 %v959_v10  ;;  %v1398_v49 = vrot.slane %v1396_v20, 2  ;;  %v1247_v10 = vpack.c.b16 %v1241_v42, %v1241_v42 }
  0x8c   : > { %1156 = vmatmul.bf16.vlgmr.msrb.gmra.mxu1 %v1086_v50  ;;  %1320 = vmatmul.bf16.vlgmr.msrb.gmra.mxu2 %v1250_v51  ;;  %v1401_v50 = vrot.slane %v1399_v41, 3  ;;  %v1257_v57 = vrot.slane %v1247_v10, 2 }
  0x8e   : > { %v1402_v54 = vor.u32 %v1401_v50, %v1398_v49  ;;  %v1258_v1 = vsel %vm1083_vm3, %v1255_v34, %v1257_v57 }
  0x9a   : > { %838 = vmatmul.bf16.gmra.mxu3 %v761_v45  ;;  %1046 = vmatmul.bf16.gmra.mxu0 %v964_v9  ;;  %v1408_v45 = vshll.u32 %v2810_v12, 16 }
  0x9c   : > { %1161 = vmatmul.bf16.gmra.mxu1 %v1088_v7  ;;  %1325 = vmatmul.bf16.gmra.mxu2 %v1252_v8  ;;  %v1410_v43 = vrot.slane %v1408_v45, 3 }
  0x9e   : > { %v1411_v17 = vor.u32 %v1410_v43, %v1407_v11 }
  0xa0   : > { %v1412_v62 = vsel %vm1377_vm5, %v1402_v54, %v1411_v17 }
  0xaa   : > { %843 = vmatmul.bf16.gmra.mxu3 %v760_v63  ;;  %1622 = vmatmul.bf16.vlgmr.msra.gmra.mxu0 %v1552_v22  ;;  %v1403_v63 = vsel %vm1377_vm5, %v1393_v31, %v1402_v54 }
  0xac   : > { %1166 = vmatmul.bf16.gmra.mxu1 %v1090_v19  ;;  %1330 = vmatmul.bf16.gmra.mxu2 %v1254_v21 }
  0xb7   : > { %v458_v38 = vpop.f32.mrf.mxu0 }
  0xb9   : > { %v548_v35 = vpop.f32.mrf.mxu1 }
  0xba   : > { %v549_v40 = vadd.f32 %v548_v35, %v458_v38  ;;  %1492 = vmatmul.bf16.vlgmr.msra.gmra.mxu3 %v1394_v36  ;;  %1627 = vmatmul.bf16.gmra.mxu0 %v1554_v39  ;;  %v1419_v35 = vrot.slane %v1417_v46, 3 }
  0xbc   : > { %1171 = vmatmul.bf16.gmra.mxu1 %v1092_v32  ;;  %1335 = vmatmul.bf16.gmra.mxu2 %v1256_v37  ;;  %v1376_v37 = vpack.c.b16 %v1375_v30, %v1375_v30  ;;  %v1420_v38 = vor.u32 %v1419_v35, %v1416_v33 }
  0xbd   : > { %v468_v44 = vpop.f32.mrf.mxu3 }
  0xbe   : > { %v1559_v39 = vrot.slane %v1376_v37, 3  ;;  %v1421_v28 = vsel %vm1377_vm5, %v1411_v17, %v1420_v38  ;;  %v1426_v49 = vshll.u32 %v1376_v37, 16 }
  0xbf   : > { %v666_v47 = vpop.f32.mrf.mxu2  ;;  %v460_v52 = vpop.f32.mrf.mxu0 }
  0xc0   : > { %v2837_v51 = vadd.f32 %v666_v47, %v549_v40  ;;  %v1560_v47 = vsel %vm1549_vm4, %v1557_v18, %v1559_v39  ;;  %v1428_v57 = vrot.slane %v1426_v49, 3 }
  0xc1   : > { %v550_v48 = vpop.f32.mrf.mxu1 }
  0xc2   : > { %v551_v56 = vadd.f32 %v550_v48, %v460_v52  ;;  %v1423_v48 = vshrl.u32 %v1376_v37, 16 }
  0xc5   : > { %v470_v59 = vpop.f32.mrf.mxu3 }
  0xc7   : > { %v668_v58 = vpop.f32.mrf.mxu2  ;;  %v463_v2 = vpop.f32.mrf.mxu0 }
  0xc8   : > { %v2843_v0 = vadd.f32 %v668_v58, %v551_v56  ;;  %v1425_v56 = vrot.slane %v1423_v48, 2 }
  0xc9   : > { %v553_v60 = vpop.f32.mrf.mxu1 }
  0xca   : > { %v554_v55 = vadd.f32 %v553_v60, %v463_v2  ;;  %1497 = vmatmul.bf16.gmra.mxu3 %v1403_v63  ;;  %1632 = vmatmul.bf16.gmra.mxu0 %v1556_v3  ;;  %v1429_v60 = vor.u32 %v1428_v57, %v1425_v56 }
  0xcc   : > { %1176 = vmatmul.bf16.gmra.mxu1 %v1094_v61  ;;  %1340 = vmatmul.bf16.gmra.mxu2 %v1258_v1 }
  0xcd   : > { %v473_v7 = vpop.f32.mrf.mxu3 }
  0xcf   : > { %v671_v8 = vpop.f32.mrf.mxu2  ;;  %v465_v15 = vpop.f32.mrf.mxu0 }
  0xd0   : > { %v2849_v13 = vadd.f32 %v671_v8, %v554_v55  ;;  %v1430_v55 = vsel %vm1377_vm5, %v1420_v38, %v1429_v60  ;;  %v2874_v60 = vld [vmem:[#allocation4] ss:$0 sm:$0xff] }
  0xd1   : > { %v555_v9 = vpop.f32.mrf.mxu1 }
  0xd2   : > { %v556_v16 = vadd.f32 %v555_v9, %v465_v15 }
  0xd5   : > { %v475_v19 = vpop.f32.mrf.mxu3 }
  0xd7   : > { %v673_v21 = vpop.f32.mrf.mxu2  ;;  %v1027_v23 = vpop.f32.mrf.mxu0 }
  0xd8   : > { %v2853_v12 = vadd.f32 %v673_v21, %v556_v16 }
  0xd9   : > { %v558_v22 = vpop.f32.mrf.mxu1 }
  0xda   : > { %v559_v6 = vadd.f32 %v558_v22, %v468_v44  ;;  %1502 = vmatmul.bf16.gmra.mxu3 %v1412_v62  ;;  %1637 = vmatmul.bf16.gmra.mxu0 %v1558_v24 }
  0xdd   : > { %v478_v25 = vpop.f32.mrf.mxu3 }
  0xdf   : > { %v676_v29 = vpop.f32.mrf.mxu2  ;;  %v1029_v36 = vpop.f32.mrf.mxu0 }
  0xe0   : > { %v695_v31 = vadd.f32 %v676_v29, %v559_v6 }
  0xe1   : > { %v560_v34 = vpop.f32.mrf.mxu1 }
  0xe2   : > { %v561_v32 = vadd.f32 %v560_v34, %v470_v59 }
  0xe5   : > { %v480_v40 = vpop.f32.mrf.mxu3 }
  0xe7   : > { %v678_v4 = vpop.f32.mrf.mxu2  ;;  %v1032_v44 = vpop.f32.mrf.mxu0 }
  0xe8   : > { %v696_v20 = vadd.f32 %v678_v4, %v561_v32 }
  0xe9   : > { %v563_v41 = vpop.f32.mrf.mxu1 }
  0xea   : > { %v564_v42 = vadd.f32 %v563_v41, %v473_v7  ;;  %1507 = vmatmul.bf16.gmra.mxu3 %v1421_v28  ;;  %1642 = vmatmul.bf16.gmra.mxu0 %v1560_v47 }
  0xed   : > { %v824_v50 = vpop.f32.mrf.mxu3 }
  0xee   : > { %v849_v52 = vadd.f32 %v824_v50, %v2837_v51 }
  0xef   : > { %v681_v10 = vpop.f32.mrf.mxu2  ;;  %v1034_v59 = vpop.f32.mrf.mxu0 }
  0xf0   : > { %v697_v53 = vadd.f32 %v681_v10, %v564_v42  ;;  %v1052_v58 = vadd.f32 %v1027_v23, %v849_v52 }
  0xf1   : > { %v565_v54 = vpop.f32.mrf.mxu1 }
  0xf2   : > { %v566_v14 = vadd.f32 %v565_v54, %v475_v19 }
  0xf5   : > { %v826_v61 = vpop.f32.mrf.mxu3 }
  0xf6   : > { %v850_v1 = vadd.f32 %v826_v61, %v2843_v0 }
  0xf7   : > { %v683_v63 = vpop.f32.mrf.mxu2  ;;  %v1037_v45 = vpop.f32.mrf.mxu0 }
  0xf8   : > { %v698_v2 = vadd.f32 %v683_v63, %v566_v14  ;;  %v1053_v7 = vadd.f32 %v1029_v36, %v850_v1 }
  0xf9   : > { %v568_v3 = vpop.f32.mrf.mxu1 }
  0xfa   : > { %v569_v5 = vadd.f32 %v568_v3, %v478_v25  ;;  %1512 = vmatmul.bf16.gmra.mxu3 %v1430_v55 }
  0xfd   : > { %v829_v51 = vpop.f32.mrf.mxu3 }
  0xfe   : > { %v851_v9 = vadd.f32 %v829_v51, %v2849_v13 }
  0xff   : > { %v686_v8 = vpop.f32.mrf.mxu2  ;;  %v1039_v16 = vpop.f32.mrf.mxu0 }
 0x100   : > { %v699_v11 = vadd.f32 %v686_v8, %v569_v5  ;;  %v1054_v17 = vadd.f32 %v1032_v44, %v851_v9 }
 0x101   : > { %v570_v43 = vpop.f32.mrf.mxu1 }
 0x102   : > { %v571_v15 = vadd.f32 %v570_v43, %v480_v40 }
 0x105   : > { %v831_v18 = vpop.f32.mrf.mxu3 }
 0x106   : > { %v852_v0 = vadd.f32 %v831_v18, %v2853_v12 }
 0x107   : > { %v688_v19 = vpop.f32.mrf.mxu2  ;;  %v1042_v6 = vpop.f32.mrf.mxu0 }
 0x108   : > { %v700_v21 = vadd.f32 %v688_v19, %v571_v15  ;;  %v1055_v23 = vadd.f32 %v1034_v59, %v852_v0 }
 0x109   : > { %v1157_v22 = vpop.f32.mrf.mxu1 }
 0x10a   : > { %v1182_v62 = vadd.f32 %v1157_v22, %v1052_v58 }
 0x10d   : > { %v834_v24 = vpop.f32.mrf.mxu3 }
 0x10e   : > { %v853_v26 = vadd.f32 %v834_v24, %v695_v31 }
 0x10f   : > { %v1321_v46 = vpop.f32.mrf.mxu2  ;;  %v1044_v29 = vpop.f32.mrf.mxu0 }
 0x110   : > { %v1346_v27 = vadd.f32 %v1321_v46, %v1182_v62  ;;  %v1056_v30 = vadd.f32 %v1037_v45, %v853_v26 }
 0x111   : > { %v1159_v25 = vpop.f32.mrf.mxu1 }
 0x112   : > { %v1183_v13 = vadd.f32 %v1159_v25, %v1053_v7 }
 0x115   : > { %v836_v34 = vpop.f32.mrf.mxu3 }
 0x116   : > { %v854_v33 = vadd.f32 %v836_v34, %v696_v20 }
 0x117   : > { %v1323_v35 = vpop.f32.mrf.mxu2  ;;  %v1047_v38 = vpop.f32.mrf.mxu0 }
 0x118   : > { %v1347_v32 = vadd.f32 %v1323_v35, %v1183_v13  ;;  %v1057_v12 = vadd.f32 %v1039_v16, %v854_v33 }
 0x119   : > { %v1162_v36 = vpop.f32.mrf.mxu1 }
 0x11a   : > { %v1184_v37 = vadd.f32 %v1162_v36, %v1054_v17 }
 0x11d   : > { %v839_v39 = vpop.f32.mrf.mxu3 }
 0x11e   : > { %v855_v40 = vadd.f32 %v839_v39, %v697_v53 }
 0x11f   : > { %v1326_v4 = vpop.f32.mrf.mxu2  ;;  %v1049_v31 = vpop.f32.mrf.mxu0 }
 0x120   : > { %v1348_v41 = vadd.f32 %v1326_v4, %v1184_v37  ;;  %v2866_v28 = vadd.f32 %v1042_v6, %v855_v40 }
 0x121   : > { %v1164_v58 = vpop.f32.mrf.mxu1 }
 0x122   : > { %v1185_v16 = vadd.f32 %v1164_v58, %v1055_v23 }
 0x125   : > { %v841_v42 = vpop.f32.mrf.mxu3 }
 0x126   : > { %v856_v44 = vadd.f32 %v841_v42, %v698_v2 }
 0x127   : > { %v1623_v49 = vpop.f32.mrf.mxu0  ;;  %v1328_v61 = vpop.f32.mrf.mxu2 }
 0x128   : > { %v2868_v47 = vadd.f32 %v1044_v29, %v856_v44  ;;  %v1349_v17 = vadd.f32 %v1328_v61, %v1185_v16 }
 0x129   : > { %v1167_v51 = vpop.f32.mrf.mxu1 }
 0x12a   : > { %v1186_v26 = vadd.f32 %v1167_v51, %v1056_v30 }
 0x12d   : > { %v844_v48 = vpop.f32.mrf.mxu3 }
 0x12e   : > { %v857_v20 = vadd.f32 %v844_v48, %v699_v11 }
 0x12f   : > { %v1625_v54 = vpop.f32.mrf.mxu0  ;;  %v1331_v43 = vpop.f32.mrf.mxu2 }
 0x130   : > { %v2870_v50 = vadd.f32 %v1047_v38, %v857_v20  ;;  %v1350_v13 = vadd.f32 %v1331_v43, %v1186_v26 }
 0x135   : > { %v846_v10 = vpop.f32.mrf.mxu3 }
 0x136   : > { %v858_v52 = vadd.f32 %v846_v10, %v700_v21  ;;  %v1169_v21 = vpop.f32.mrf.mxu1 }
 0x137   : > { %v1628_v59 = vpop.f32.mrf.mxu0  ;;  %v1333_v6 = vpop.f32.mrf.mxu2  ;;  %v1187_v35 = vadd.f32 %v1169_v21, %v1057_v12 }
 0x138   : > { %v2872_v56 = vadd.f32 %v1049_v31, %v858_v52 }
 0x139   : > { %v1351_v36 = vadd.f32 %v1333_v6, %v1187_v35 }
 0x13d   : > { %v1493_v53 = vpop.f32.mrf.mxu3 }
 0x13e   : > { %v1518_v57 = vadd.f32 %v1493_v53, %v1346_v27  ;;  %v1172_v33 = vpop.f32.mrf.mxu1 }
 0x13f   : > { %v1630_v5 = vpop.f32.mrf.mxu0  ;;  %v1188_v42 = vadd.f32 %v1172_v33, %v2866_v28 }
 0x140   : > { %v1648_v14 = vadd.f32 %v1623_v49, %v1518_v57 }
 0x142   : > { %v1662_v2 = vadd.f32 %v2874_v60, %v1648_v14 }
 0x144   : > { %v1672_v45 = vmax.f32 %v1662_v2, 0.0 }
 0x145   : > { %v1495_v63 = vpop.f32.mrf.mxu3 }
 0x146   : > { %v1519_v1 = vadd.f32 %v1495_v63, %v1347_v32  ;;  %v1336_v32 = vpop.f32.mrf.mxu2  ;;  %v1174_v31 = vpop.f32.mrf.mxu1 }
 0x147   : > { %v1633_v19 = vpop.f32.mrf.mxu0  ;;  %v1352_v10 = vadd.f32 %v1336_v32, %v1188_v42 }
 0x148   : > { %v1649_v3 = vadd.f32 %v1625_v54, %v1519_v1  ;;  %v1189_v54 = vadd.f32 %v1174_v31, %v2868_v47 }
 0x14a   : > { %v1663_v55 = vadd.f32 %v2874_v60, %v1649_v3 }
 0x14c   : > { %v1673_v7 = vmax.f32 %v1663_v55, 0.0 }
 0x14d   : > { %v1498_v8 = vpop.f32.mrf.mxu3 }
 0x14e   : > { %v1520_v9 = vadd.f32 %v1498_v8, %v1348_v41  ;;  %v2878_v11 = vpack.c.bf16 %v1673_v7, %v1672_v45  ;;  %v1338_v49 = vpop.f32.mrf.mxu2 }
 0x14f   : > { %v1635_v34 = vpop.f32.mrf.mxu0  ;;  %v1353_v57 = vadd.f32 %v1338_v49, %v1189_v54 }
 0x150   : > { %v1650_v15 = vadd.f32 %v1628_v59, %v1520_v9  ;;  %v1177_v59 = vpop.f32.mrf.mxu1 }
 0x151   : > { %v1190_v3 = vadd.f32 %v1177_v59, %v2870_v50 }
 0x152   : > { %v1664_v22 = vadd.f32 %v2874_v60, %v1650_v15 }
 0x154   : > { %v1674_v46 = vmax.f32 %v1664_v22, 0.0 }
 0x155   : > { %v1500_v18 = vpop.f32.mrf.mxu3 }
 0x156   : > { %v1521_v0 = vadd.f32 %v1500_v18, %v1349_v17  ;;  %v1341_v63 = vpop.f32.mrf.mxu2 }
 0x157   : > { %v1638_v41 = vpop.f32.mrf.mxu0  ;;  %v1354_v51 = vadd.f32 %v1341_v63, %v1190_v3 }
 0x158   : > { %v1651_v62 = vadd.f32 %v1630_v5, %v1521_v0  ;;  %v1179_v8 = vpop.f32.mrf.mxu1 }
 0x159   : > { %v1191_v15 = vadd.f32 %v1179_v8, %v2872_v56  ;;  %v2366_v56 = vld [vmem:[#allocation6] sm:$0xff] }
 0x15a   : > { %v1665_v24 = vadd.f32 %v2874_v60, %v1651_v62 }
 0x15c   : > { %v1675_v27 = vmax.f32 %v1665_v24, 0.0 }
 0x15d   : > { %v1503_v25 = vpop.f32.mrf.mxu3 }
 0x15e   : > { %v2882_v29 = vpack.c.bf16 %v1675_v27, %v1674_v46  ;;  %v1522_v23 = vadd.f32 %v1503_v25, %v1350_v13  ;;  %v1343_v43 = vpop.f32.mrf.mxu2  ;;  %v2369_v46 = vld [vmem:[#allocation6 + $0x18] sm:$0xff]  ;;  %v2368_v27 = vld [vmem:[#allocation6 + $0x10] sm:$0xff] }
 0x15f   : > { %v1640_v53 = vpop.f32.mrf.mxu0  ;;  %v1355_v16 = vadd.f32 %v1343_v43, %v1191_v15 }
 0x160   : > { %v1652_v37 = vadd.f32 %v1633_v19, %v1522_v23 }
 0x162   : > { %v1666_v40 = vadd.f32 %v2874_v60, %v1652_v37 }
 0x164   : > { %v1676_v44 = vmax.f32 %v1666_v40, 0.0 }
 0x165   : > { %v1505_v38 = vpop.f32.mrf.mxu3 }
 0x166   : > { %v1523_v39 = vadd.f32 %v1505_v38, %v1351_v36 }
 0x167   : > { %v1643_v45 = vpop.f32.mrf.mxu0 }
 0x168   : > { %v1653_v4 = vadd.f32 %v1635_v34, %v1523_v39 }
 0x16a   : > { %v1667_v30 = vadd.f32 %v2874_v60, %v1653_v4  ;;  %v1767_v4 = vld [vmem:[#allocation7] sm:$0xf] }
 0x16c   : > { %v1677_v48 = vmax.f32 %v1667_v30, 0.0 }
 0x16d   : > { %v1508_v20 = vpop.f32.mrf.mxu3 }
 0x16e   : > { %v1684_v12 = vpack.c.bf16 %v1677_v48, %v1676_v44  ;;  %v1524_v52 = vadd.f32 %v1508_v20, %v1352_v10 }
 0x16f   : > { %v1645_v0 = vpop.f32.mrf.mxu0 }
 0x170   : > { %v1654_v14 = vadd.f32 %v1638_v41, %v1524_v52 }
 0x172   : > { %v1668_v1 = vadd.f32 %v2874_v60, %v1654_v14 }
 0x174   : > { %v1678_v55 = vmax.f32 %v1668_v1, 0.0 }
 0x175   : > { %v1510_v58 = vpop.f32.mrf.mxu3 }
 0x176   : > { %v1525_v61 = vadd.f32 %v1510_v58, %v1353_v57 }
 0x178   : > { %v1655_v2 = vadd.f32 %v1640_v53, %v1525_v61 }
 0x17a   : > { %v1669_v28 = vadd.f32 %v2874_v60, %v1655_v2 }
 0x17c   : > { %v1679_v5 = vmax.f32 %v1669_v28, 0.0 }
 0x17d   : > { %v1513_v7 = vpop.f32.mrf.mxu3 }
 0x17e   : > { %v1685_v47 = vpack.c.bf16 %v1679_v5, %v1678_v55  ;;  %v1526_v9 = vadd.f32 %v1513_v7, %v1354_v51 }
 0x180   : > { %v1656_v17 = vadd.f32 %v1643_v45, %v1526_v9 }
 0x182   : > { %v1670_v21 = vadd.f32 %v2874_v60, %v1656_v17 }
 0x184   : > { %v1680_v62 = vmax.f32 %v1670_v21, 0.0 }
 0x185   : > { %v1515_v18 = vpop.f32.mrf.mxu3 }
 0x186   : > { %v1527_v19 = vadd.f32 %v1515_v18, %v1355_v16 }
 0x188   : > { %v1657_v22 = vadd.f32 %v1645_v0, %v1527_v19 }
 0x18a   : > { %v1671_v50 = vadd.f32 %v2874_v60, %v1657_v22  ;;  %v2367_v60 = vld [vmem:[#allocation6 + $0x8] sm:$0xff] }
 0x18c   : > { %v1681_v6 = vmax.f32 %v1671_v50, 0.0 }
 0x18e   : > { %v1686_v24 = vpack.c.bf16 %v1681_v6, %v1680_v62 }
 0x190   : > { %v1730_v26 = vsel %vm594_vm1, %v1686_v24, 0 }
 0x191   : > { %1735 = vmatpush.bf16.msra.mxu1 %v1730_v26  ;;  %2385 = vmatpush.bf16.msra.mxu2 %v1730_v26 }
 0x195   : > { %1736 = vmatpush.bf16.msra.mxu1 %v1685_v47  ;;  %2386 = vmatpush.bf16.msra.mxu2 %v1685_v47 }
 0x199   : > { %1737 = vmatpush.bf16.msra.mxu1 %v1684_v12  ;;  %2387 = vmatpush.bf16.msra.mxu2 %v1684_v12 }
 0x19d   : > { %1738 = vmatpush.bf16.msra.mxu1 %v2882_v29  ;;  %2388 = vmatpush.bf16.msra.mxu2 %v2882_v29 }
 0x1a1   : > { %1739 = vmatpush.bf16.msra.mxu1 %v2878_v11  ;;  %2389 = vmatpush.bf16.msra.mxu2 %v2878_v11 }
 0x1a4   : > { %2271 = vmatmul.msk.bf16.vlgmr.msra.gmra.mxu1 %vm1715_vm6, %v2366_v56  ;;  %2274 = vmatmul.msk.bf16.vlgmr.msra.gmra.mxu2 %vm1715_vm6, %v2369_v46 }
 0x1b4   : > { %2272 = vmatmul.msk.bf16.gmra.mxu1 %vm1715_vm6, %v2367_v60 }
 0x1c4   : > { %2273 = vmatmul.msk.bf16.gmra.mxu1 %vm1715_vm6, %v2368_v27 }
 0x221   : > { %v1741_v25 = vpop.f32.mrf.mxu1 }
 0x227   : > { %v1756_v33 = vpop.f32.mrf.mxu2 }
 0x229   : > { %v1743_v13 = vpop.f32.mrf.mxu1 }
 0x22f   : > { %v1758_v32 = vpop.f32.mrf.mxu2 }
 0x231   : > { %v1746_v34 = vpop.f32.mrf.mxu1 }
 0x232   : > { %v1761_v11 = vmax.f32 %v1741_v25, %v1746_v34 }
 0x239   : > { %v1748_v23 = vpop.f32.mrf.mxu1 }
 0x23a   : > { %v1762_v36 = vmax.f32 %v1743_v13, %v1748_v23 }
 0x241   : > { %v1751_v29 = vpop.f32.mrf.mxu1 }
 0x242   : > { %v1763_v37 = vmax.f32 %v1751_v29, %v1756_v33 }
 0x244   : > { %v1765_v40 = vmax.f32 %v1761_v11, %v1763_v37 }
 0x249   : > { %v1753_v35 = vpop.f32.mrf.mxu1 }
 0x24a   : > { %v1764_v38 = vmax.f32 %v1753_v35, %v1758_v32 }
 0x24c   : > { %v1766_v39 = vmax.f32 %v1762_v36, %v1764_v38 }
 0x24e   : > { %1786 = vmatpush.msrb.mxu2 %v1766_v39 }
 0x250   : > { %1787 = vmatpush.msrb.mxu2 %v1765_v40 }
 0x251   : > { %2275 = vmatmul.msk.f32.vlgmr.msrb.gmra.mxu2 %vm1768_vm7, %v1767_v4 }
 0x2d4   : > { %v1789_v41 = vpop.f32.mrf.mxu2 }
 0x2d5   : > { %v1792_v30 = vpack.c.bf16 %v1789_v41, %v1789_v41 }
 0x2d7   : > { %1793 = vst [vmem:[%s285_s28] sm:$0x3] %v1792_v30 }
 0x2d8 PF: > { %s18_s18 = sadd.s32 1, %s2586_s18  }
 0x2d9   : > { %p15_p7 = scmp.ge.s32.totalorder %s18_s18, 4  }
 0x2db   :  { %17 = sbr.rel (!%p15_p7) target bundleno = 3 (0x3), region = 95 }
 0x2e0   :  { %1813 = vsyncpa [#allocation3], 1 }
 0x2e1   :  { %1815 = vsyncpa [#allocation3 + $0x1], 1 }
 0x2e2   :  { %1816 = vsyncpa [#allocation5], 1 }
 0x2e3   :  { %1817 = vsyncpa [#allocation8], 1 }

// kernel: feature_extractor_forward.3
= control target key start
LH: loop header
LB: loop body
LE: loop exit
PB: predicated region body
PF: predicated region fallthrough
CT: control target
= control target key end

     0   :  { %9 = vsyncpa [#allocation3], 0  ;;  %s7334_s0 = inlined_call_operand.vmem [shape: bf16[2,324,16], index: 0, kind: input, shape index: {}]   ;;  %s7335_s1 = inlined_call_operand.hbm [shape: bf16[9,16,128], index: 1, kind: input, shape index: {}]   ;;  %s7336_s2 = inlined_call_operand.hbm [shape: f32[1,128], index: 2, kind: input, shape index: {}]   ;;  %s7337_s3 = inlined_call_operand.vmem [shape: bf16[416,286], index: 3, kind: input, shape index: {}]   ;;  %s7338_s4 = inlined_call_operand.vmem [shape: bf16[2,104,128], index: 4, kind: output, shape index: {}]  }
   0x1   :  { %10 = vsyncpa [#allocation5], 0  ;;  %s5530_s15 = smov 0  }
   0x2 LB: > { %s147_s18 = sshll.u32 %s7335_s1, 4  ;;  %s4352_s19 = sadd.s32 4294967295, %s5499_s15   ;;  %s5499_s15 = sphi %s5530_s15, %s16_s15   ;;  %s148_s18 = int_to_ptr.hbm [resolvable:$true] %s147_s18 }
   0x3   : > { %p4354_p0 = scmp.ge.s32.totalorder %s5499_s15, 1  ;;  %p136_p1 = scmp.lt.s32.totalorder %s5499_s15, 3 }
   0x4   : > { %p5400_p2 = scmp.eq.s32.totalorder %s4352_s19, 0  ;;  %s5501_s21 = smov [#allocation2]  }
   0x5   : > { %p5541_p3 = pnand %p4354_p0, %p136_p1  ;;  %s149_s22 = sshll.u32 %s5501_s21, 4  ;;  %s150_s22 = int_to_ptr.vmem [resolvable:$true] %s149_s22 }
   0x6   : > { %s162_s25 = sshll.u32 %s7336_s2, 4  ;;  %s5502_s26 = smov [#allocation4]   ;;  %s163_s25 = int_to_ptr.hbm [resolvable:$true] %s162_s25 }
   0x7   : > { %p5393_p4 = pneg %p5541_p3  ;;  %s164_s27 = sshll.u32 %s5502_s26, 4  ;;  %s165_s27 = int_to_ptr.vmem [resolvable:$true] %s164_s27 }
   0x8   : > { %s5503_s28 = smov 64   ;;  %s5504_s29 = smov 4  }
   0x9   : > { %p5394_p5 = pnand %p5400_p2, %p5393_p4  ;;  %188 = sbr.rel (%p5541_p3) target bundleno = 1674 (0x68a), region = 36 }
   0xb   : > { %5396 = dma.hbm_to_vmem [thread:$0]  (!%p5394_p5), %s148_s18, 1152, %s150_s22, [#allocation3], %s5503_s28, %s5503_s28, %s5504_s29  }
   0xc   : > { %5399 = dma.hbm_to_vmem [thread:$0]  (!%p5394_p5), %s163_s25, 16, %s165_s27, [#allocation5]  }
   0xe   : > { %5490 = dma.done.wait (%p5400_p2), [#allocation3], 1152  }
   0xf   : > { %5492 = vsyncadd (%p5400_p2), [#allocation3], 4294966144 }
  0x10   : > { %5494 = dma.done.wait (%p5400_p2), [#allocation5], 16  }
  0x11   : > { %5496 = vsyncadd (%p5400_p2), [#allocation5], 4294967280  ;;  %p220_p6 = scmp.lt.s32.totalorder %s4352_s19, 1  ;;  %v5190_v0 = vld [vmem:[#allocation2 + $0x8] sm:$0xff]  ;;  %v5191_v6 = vld [vmem:[#allocation2 + $0x10] sm:$0xff]  ;;  %vm819_vm1 = vcmask 1046528  }
  0x12   : > { %v5576_v7 = vld [vmem:[#allocation2 + $0x18] sm:$0xff]  ;;  %575 = vmatpush.bf16.msra.mxu0 %v5190_v0  ;;  %v5189_v10 = vld [vmem:[#allocation2] sm:$0xff]  ;;  %vm363_vm0 = vsmask.f32 7424  ;;  %5381 = vmatpush.bf16.msra.mxu2 %v5191_v6  ;;  %vm513_vm2 = vcmask 130048   ;;  %vm1911_vm3 = vcmask 1045504  }
  0x13   : > { %s7490_s19 = smov (!%p220_p6, %s4352_s19), 1  ;;  %5382 = vmatpush.bf16.msra.mxu3 %v5576_v7  ;;  %5380 = vmatpush.bf16.msra.mxu1 %v5189_v10  ;;  %vm2516_vm4 = vsmask.f32 5376  ;;  %vm1542_vm5 = vsmask.f32 6400  ;;  %vm2889_vm6 = vcmask 1044480  }
  0x14   : > { %s5383_s30 = smul.u32 164, %s7490_s19  ;;  %vm3710_vm7 = vcmask 244736  }
  0x15   : > { %s5384_s8 = smul.u32 52, %s7490_s19 }
  0x16   : > { %s5563_s7 = scalar_lea.vmem %s7334_s0, %s5383_s30  ;;  %720 = vmatpush.bf16.msrb.mxu0 %v5189_v10 }
  0x17   : > { %v5566_v1 = vld [vmem:[%s5563_s7] sm:$0xff]   ;;  %v5569_v2 = vld [vmem:[%s5563_s7 + $0x8] sm:$0xff]  ;;  %v5574_v5 = vld [vmem:[%s5563_s7 + $0x10] sm:$0xff]  ;;  %s7278_s11 = scalar_lea.vmem %s7338_s4, %s5384_s8 }
  0x18   : > { %v365_v3 = vshrl.u32 %v5566_v1, 16  ;;  %v367_v4 = vshll.u32 %v5566_v1, 16  ;;  %v372_v8 = vshll.u32 %v5569_v2, 16  ;;  %v5175_v9 = vld [vmem:[%s5563_s7 + $0x18] sm:$0xff]  ;;  %v7340_v13 = vrot.slane %v5574_v5, 1  ;;  %v5195_v14 = vld [vmem:[%s5563_s7 + $0x20] sm:$0xff]  ;;  %4455 = vmatmul.msk.bf16.vlgmr.msra.gmra.mxu1 %vm513_vm2, %v5574_v5 }
  0x19   : > { %v5581_v11 = vld [vmem:[%s5563_s7 + $0x18] sm:$0xff]  ;;  %v825_v16 = vrot.slane %v5175_v9, 1  ;;  %v1184_v19 = vrot.slane %v5195_v14, 1  ;;  %v5176_v23 = vld [vmem:[%s5563_s7 + $0x20] sm:$0xff]  ;;  %v376_v24 = vshrl.u32 %v5569_v2, 16  ;;  %v380_v25 = vshll.u32 %v5574_v5, 16 }
  0x1a   : > { %v369_v12 = vrot.slane %v367_v4, 1  ;;  %v374_v15 = vrot.slane %v372_v8, 1  ;;  %v7339_v17 = vrot.slane %v5581_v11, 1  ;;  %v5196_v26 = vld [vmem:[%s5563_s7 + $0x28] sm:$0xff]  ;;  %v827_v27 = vrot.slane %v5176_v23, 1  ;;  %v5197_v37 = vld [vmem:[%s5563_s7 + $0x30] sm:$0xff] }
  0x1b   : > { %v826_v20 = vsel %vm819_vm1, %v7340_v13, %v825_v16  ;;  %v382_v29 = vrot.slane %v380_v25, 1  ;;  %v1186_v30 = vrot.slane %v5196_v26, 1  ;;  %v5177_v34 = vld [vmem:[%s5563_s7 + $0x28] sm:$0xff]  ;;  %v384_v35 = vshrl.u32 %v5574_v5, 16  ;;  %v5178_v45 = vld [vmem:[%s5563_s7 + $0x30] sm:$0xff]  ;;  %v5198_v48 = vld [vmem:[%s5563_s7 + $0x38] sm:$0xff] }
  0x1c   : > { %v370_v18 = vor.u32 %v369_v12, %v365_v3  ;;  %4477 = vmatmul.msk.bf16.vlgmr.msra.gmra.mxu2 %vm513_vm2, %v826_v20  ;;  %v1185_v22 = vsel %vm819_vm1, %v7339_v17, %v1184_v19  ;;  %v378_v28 = vor.u32 %v376_v24, %v374_v15  ;;  %v828_v31 = vsel %vm819_vm1, %v825_v16, %v827_v27  ;;  %v5179_v56 = vld [vmem:[%s5563_s7 + $0x38] sm:$0xff]  ;;  %v5199_v59 = vld [vmem:[%s5563_s7 + $0x40] sm:$0xff]  ;;  %v5200_v10 = vld [vmem:[%s5563_s7 + $0x48] sm:$0xff] }
  0x1d   : > { %4571 = vmatmul.msk.bf16.vlgmr.msra.gmra.mxu3 %vm513_vm2, %v1185_v22  ;;  %v1187_v33 = vsel %vm819_vm1, %v1184_v19, %v1186_v30  ;;  %v388_v36 = vshll.u32 %v5175_v9, 16  ;;  %v829_v38 = vrot.slane %v5177_v34, 1  ;;  %v386_v39 = vor.u32 %v384_v35, %v382_v29 }
  0x1e   : > { %v375_v21 = vsel %vm363_vm0, %v370_v18, %v374_v15  ;;  %v383_v32 = vsel %vm363_vm0, %v378_v28, %v382_v29  ;;  %v1188_v41 = vrot.slane %v5197_v37, 1  ;;  %v392_v46 = vshrl.u32 %v5175_v9, 16 }
  0x1f   : > { %4431 = vmatmul.msk.bf16.vlgmr.msra.gmra.mxu0 %vm513_vm2, %v375_v21  ;;  %v390_v40 = vrot.slane %v388_v36, 1  ;;  %v830_v42 = vsel %vm819_vm1, %v827_v27, %v829_v38  ;;  %v396_v47 = vshll.u32 %v5176_v23, 16  ;;  %v831_v49 = vrot.slane %v5178_v45, 1  ;;  %v5181_v21 = vld [vmem:[%s5563_s7 + $0x48] sm:$0xff]  ;;  %v5201_v27 = vld [vmem:[%s5563_s7 + $0x50] sm:$0xff] }
  0x20   : > { %922 = vmatpush.bf16.msra.mxu0 %v5191_v6  ;;  %v1189_v44 = vsel %vm819_vm1, %v1186_v30, %v1188_v41  ;;  %v1190_v52 = vrot.slane %v5198_v48, 1  ;;  %v400_v57 = vshrl.u32 %v5176_v23, 16  ;;  %v404_v58 = vshll.u32 %v5177_v34, 16  ;;  %v5180_v6 = vld [vmem:[%s5563_s7 + $0x40] sm:$0xff] }
  0x21   : > { %v391_v43 = vsel %vm363_vm0, %v386_v39, %v390_v40  ;;  %v394_v50 = vor.u32 %v392_v46, %v390_v40  ;;  %v398_v51 = vrot.slane %v396_v47, 1  ;;  %v832_v53 = vsel %vm819_vm1, %v829_v38, %v831_v49  ;;  %v5202_v38 = vld [vmem:[%s5563_s7 + $0x58] sm:$0xff] }
  0x22   : > { %v1191_v55 = vsel %vm819_vm1, %v1188_v41, %v1190_v52  ;;  %v833_v60 = vrot.slane %v5179_v56, 1  ;;  %v406_v62 = vrot.slane %v404_v58, 1  ;;  %v1192_v63 = vrot.slane %v5199_v59, 1 }
  0x23   : > { %v399_v54 = vsel %vm363_vm0, %v394_v50, %v398_v51  ;;  %v402_v61 = vor.u32 %v400_v57, %v398_v51  ;;  %v408_v8 = vshrl.u32 %v5177_v34, 16  ;;  %v835_v12 = vrot.slane %v5180_v6, 1 }
  0x24   : > { %v834_v0 = vsel %vm819_vm1, %v831_v49, %v833_v60  ;;  %v1193_v4 = vsel %vm819_vm1, %v1190_v52, %v1192_v63  ;;  %v1194_v16 = vrot.slane %v5200_v10, 1  ;;  %v416_v22 = vshrl.u32 %v5178_v45, 16  ;;  %v5203_v49 = vld [vmem:[%s5563_s7 + $0x60] sm:$0xff] }
  0x25   : > { %v407_v3 = vsel %vm363_vm0, %v402_v61, %v406_v62  ;;  %v410_v14 = vor.u32 %v408_v8, %v406_v62  ;;  %v836_v18 = vsel %vm819_vm1, %v833_v60, %v835_v12  ;;  %v837_v24 = vrot.slane %v5181_v21, 1  ;;  %v5682_v62 = vld [vmem:[%s5563_s7 + $0x60] sm:$0xff] }
  0x26   : > { %v1195_v20 = vsel %vm819_vm1, %v1192_v63, %v1194_v16  ;;  %v1196_v28 = vrot.slane %v5201_v27, 1  ;;  %v1198_v39 = vrot.slane %v5202_v38, 1  ;;  %v1200_v50 = vrot.slane %v5203_v49, 1 }
  0x27   : > { %v838_v29 = vsel %vm819_vm1, %v835_v12, %v837_v24  ;;  %v440_v59 = vshrl.u32 %v5181_v21, 16 }
  0x28   : > { %4456 = vmatmul.msk.bf16.gmra.mxu1 %vm513_vm2, %v5175_v9  ;;  %v412_v9 = vshll.u32 %v5178_v45, 16 }
  0x2a   : > { %v414_v15 = vrot.slane %v412_v9, 1 }
  0x2c   : > { %4478 = vmatmul.msk.bf16.gmra.mxu2 %vm513_vm2, %v828_v31  ;;  %v415_v19 = vsel %vm363_vm0, %v410_v14, %v414_v15  ;;  %v418_v25 = vor.u32 %v416_v22, %v414_v15  ;;  %v1197_v31 = vsel %vm819_vm1, %v1194_v16, %v1196_v28 }
  0x2d   : > { %4572 = vmatmul.msk.bf16.gmra.mxu3 %vm513_vm2, %v1187_v33  ;;  %v428_v33 = vshll.u32 %v5180_v6, 16 }
  0x2f   : > { %4432 = vmatmul.msk.bf16.gmra.mxu0 %vm513_vm2, %v383_v32  ;;  %v424_v32 = vshrl.u32 %v5179_v56, 16  ;;  %v430_v37 = vrot.slane %v428_v33, 1 }
  0x38   : > { %4457 = vmatmul.msk.bf16.gmra.mxu1 %vm513_vm2, %v5176_v23  ;;  %v420_v23 = vshll.u32 %v5179_v56, 16 }
  0x3a   : > { %v422_v26 = vrot.slane %v420_v23, 1 }
  0x3c   : > { %4479 = vmatmul.msk.bf16.gmra.mxu2 %vm513_vm2, %v830_v42  ;;  %v423_v30 = vsel %vm363_vm0, %v418_v25, %v422_v26  ;;  %v426_v36 = vor.u32 %v424_v32, %v422_v26  ;;  %v1199_v42 = vsel %vm819_vm1, %v1196_v28, %v1198_v39  ;;  %v5205_v28 = vld [vmem:[%s5563_s7 + $0x70] sm:$0xff] }
  0x3d   : > { %4573 = vmatmul.msk.bf16.gmra.mxu3 %vm513_vm2, %v1189_v44  ;;  %v436_v44 = vshll.u32 %v5181_v21, 16 }
  0x3e   : > { %v431_v41 = vsel %vm363_vm0, %v426_v36, %v430_v37 }
  0x3f   : > { %4433 = vmatmul.msk.bf16.gmra.mxu0 %vm513_vm2, %v391_v43  ;;  %v432_v43 = vshrl.u32 %v5180_v6, 16  ;;  %v438_v48 = vrot.slane %v436_v44, 1  ;;  %v460_v44 = vshll.u32 %v5682_v62, 16 }
  0x41   : > { %v434_v47 = vor.u32 %v432_v43, %v430_v37  ;;  %v442_v63 = vor.u32 %v440_v59, %v438_v48 }
  0x48   : > { %4458 = vmatmul.msk.bf16.gmra.mxu1 %vm513_vm2, %v5177_v34  ;;  %v5182_v34 = vld [vmem:[%s5563_s7 + $0x50] sm:$0xff] }
  0x49   : > { %v839_v35 = vrot.slane %v5182_v34, 1  ;;  %v444_v60 = vshll.u32 %v5182_v34, 16 }
  0x4b   : > { %v840_v40 = vsel %vm819_vm1, %v837_v24, %v839_v35  ;;  %v5700_v24 = vld [vmem:[%s5563_s7 + $0x68] sm:$0xff] }
  0x4c   : > { %4480 = vmatmul.msk.bf16.gmra.mxu2 %vm513_vm2, %v832_v53  ;;  %v439_v53 = vsel %vm363_vm0, %v434_v47, %v438_v48  ;;  %v845_v27 = vrot.slane %v5700_v24, 1  ;;  %v5717_v48 = vld [vmem:[%s5563_s7 + $0x70] sm:$0xff] }
  0x4d   : > { %4574 = vmatmul.msk.bf16.gmra.mxu3 %vm513_vm2, %v1191_v55  ;;  %v1201_v55 = vsel %vm819_vm1, %v1198_v39, %v1200_v50 }
  0x4f   : > { %4434 = vmatmul.msk.bf16.gmra.mxu0 %vm513_vm2, %v399_v54 }
  0x58   : > { %4459 = vmatmul.msk.bf16.gmra.mxu1 %vm513_vm2, %v5178_v45  ;;  %v5666_v45 = vld [vmem:[%s5563_s7 + $0x58] sm:$0xff] }
  0x59   : > { %v841_v46 = vrot.slane %v5666_v45, 1  ;;  %v452_v22 = vshll.u32 %v5666_v45, 16  ;;  %v456_v43 = vshrl.u32 %v5666_v45, 16 }
  0x5b   : > { %v842_v51 = vsel %vm819_vm1, %v839_v35, %v841_v46  ;;  %v454_v26 = vrot.slane %v452_v22, 1  ;;  %v5736_v22 = vld [vmem:[%s5563_s7 + $0x78] sm:$0xff] }
  0x5c   : > { %4481 = vmatmul.msk.bf16.gmra.mxu2 %vm513_vm2, %v834_v0  ;;  %v446_v0 = vrot.slane %v444_v60, 1 }
  0x5d   : > { %4575 = vmatmul.msk.bf16.gmra.mxu3 %vm513_vm2, %v1193_v4  ;;  %v5204_v4 = vld [vmem:[%s5563_s7 + $0x68] sm:$0xff] }
  0x5e   : > { %v1202_v9 = vrot.slane %v5204_v4, 1  ;;  %v447_v14 = vsel %vm363_vm0, %v442_v63, %v446_v0 }
  0x5f   : > { %4435 = vmatmul.msk.bf16.gmra.mxu0 %vm513_vm2, %v407_v3  ;;  %v843_v3 = vrot.slane %v5682_v62, 1 }
  0x60   : > { %v1203_v16 = vsel %vm819_vm1, %v1200_v50, %v1202_v9  ;;  %v458_v50 = vor.u32 %v456_v43, %v454_v26 }
  0x61   : > { %v844_v10 = vsel %vm819_vm1, %v841_v46, %v843_v3  ;;  %v846_v32 = vsel %vm819_vm1, %v843_v3, %v845_v27 }
  0x68   : > { %4460 = vmatmul.msk.bf16.gmra.mxu1 %vm513_vm2, %v5179_v56 }
  0x6c   : > { %4482 = vmatmul.msk.bf16.gmra.mxu2 %vm513_vm2, %v836_v18 }
  0x6d   : > { %4576 = vmatmul.msk.bf16.gmra.mxu3 %vm513_vm2, %v1195_v20 }
  0x6f   : > { %4436 = vmatmul.msk.bf16.gmra.mxu0 %vm513_vm2, %v415_v19 }
  0x78   : > { %4461 = vmatmul.msk.bf16.gmra.mxu1 %vm513_vm2, %v5180_v6 }
  0x7c   : > { %4483 = vmatmul.msk.bf16.gmra.mxu2 %vm513_vm2, %v838_v29 }
  0x7d   : > { %4577 = vmatmul.msk.bf16.gmra.mxu3 %vm513_vm2, %v1197_v31  ;;  %v1204_v31 = vrot.slane %v5205_v28, 1  ;;  %v5207_v28 = vld [vmem:[%s5563_s7 + $0x80] sm:$0xff] }
  0x7f   : > { %4437 = vmatmul.msk.bf16.gmra.mxu0 %vm513_vm2, %v423_v30 }
  0x88   : > { %4462 = vmatmul.msk.bf16.gmra.mxu1 %vm513_vm2, %v5181_v21  ;;  %v448_v21 = vshrl.u32 %v5182_v34, 16 }
  0x8a   : > { %v450_v25 = vor.u32 %v448_v21, %v446_v0 }
  0x8c   : > { %4484 = vmatmul.msk.bf16.gmra.mxu2 %vm513_vm2, %v840_v40  ;;  %v455_v35 = vsel %vm363_vm0, %v450_v25, %v454_v26 }
  0x8d   : > { %4578 = vmatmul.msk.bf16.gmra.mxu3 %vm513_vm2, %v1199_v42 }
  0x8f   : > { %4438 = vmatmul.msk.bf16.gmra.mxu0 %vm513_vm2, %v431_v41 }
  0x95   : > { %v732_v54 = vpop.f32.mrf.mxu1 }
  0x98   : > { %4463 = vmatmul.msk.bf16.gmra.mxu1 %vm513_vm2, %v5182_v34  ;;  %v1205_v34 = vsel %vm819_vm1, %v1202_v9, %v1204_v31 }
  0x9c   : > { %v5671_v52 = vpop.f32.mrf.mxu0  ;;  %4485 = vmatmul.msk.bf16.gmra.mxu2 %vm513_vm2, %v842_v51  ;;  %v462_v51 = vrot.slane %v460_v44, 1 }
  0x9d   : > { %4579 = vmatmul.msk.bf16.gmra.mxu3 %vm513_vm2, %v1201_v55  ;;  %v734_v61 = vpop.f32.mrf.mxu1 }
  0x9e   : > { %v463_v63 = vsel %vm363_vm0, %v458_v50, %v462_v51 }
  0x9f   : > { %4439 = vmatmul.msk.bf16.gmra.mxu0 %vm513_vm2, %v439_v53  ;;  %v934_v56 = vpop.f32.mrf.mxu2  ;;  %v847_v53 = vrot.slane %v5717_v48, 1 }
  0xa0   : > { %v1293_v57 = vpop.f32.mrf.mxu3 }
  0xa1   : > { %v848_v60 = vsel %vm819_vm1, %v845_v27, %v847_v53  ;;  %v849_v27 = vrot.slane %v5736_v22, 1 }
  0xa4   : > { %v5679_v58 = vpop.f32.mrf.mxu0 }
  0xa5   : > { %v737_v15 = vpop.f32.mrf.mxu1 }
  0xa7   : > { %v936_v6 = vpop.f32.mrf.mxu2 }
  0xa8   : > { %v1295_v8 = vpop.f32.mrf.mxu3  ;;  %4464 = vmatmul.msk.bf16.gmra.mxu1 %vm513_vm2, %v5666_v45 }
  0xac   : > { %v5687_v12 = vpop.f32.mrf.mxu0  ;;  %4486 = vmatmul.msk.bf16.gmra.mxu2 %vm513_vm2, %v844_v10 }
  0xad   : > { %4580 = vmatmul.msk.bf16.gmra.mxu3 %vm513_vm2, %v1203_v16  ;;  %v739_v23 = vpop.f32.mrf.mxu1 }
  0xaf   : > { %4440 = vmatmul.msk.bf16.gmra.mxu0 %vm513_vm2, %v447_v14  ;;  %v939_v18 = vpop.f32.mrf.mxu2  ;;  %v464_v14 = vshrl.u32 %v5682_v62, 16 }
  0xb0   : > { %v1298_v19 = vpop.f32.mrf.mxu3 }
  0xb4   : > { %v5696_v20 = vpop.f32.mrf.mxu0 }
  0xb5   : > { %v742_v36 = vpop.f32.mrf.mxu1 }
  0xb7   : > { %v941_v29 = vpop.f32.mrf.mxu2 }
  0xb8   : > { %v1300_v30 = vpop.f32.mrf.mxu3  ;;  %4465 = vmatmul.msk.bf16.gmra.mxu1 %vm513_vm2, %v5682_v62 }
  0xbc   : > { %v587_v33 = vpop.f32.mrf.mxu0  ;;  %4487 = vmatmul.msk.bf16.gmra.mxu2 %vm513_vm2, %v846_v32 }
  0xbd   : > { %v733_v37 = vadd.f32 %v732_v54, %v587_v33  ;;  %4581 = vmatmul.msk.bf16.gmra.mxu3 %vm513_vm2, %v1205_v34  ;;  %v744_v46 = vpop.f32.mrf.mxu1  ;;  %v5206_v54 = vld [vmem:[%s5563_s7 + $0x78] sm:$0xff]  ;;  %v1208_v33 = vrot.slane %v5207_v28, 1 }
  0xbe   : > { %v1206_v59 = vrot.slane %v5206_v54, 1 }
  0xbf   : > { %v1018_v38 = vadd.f32 %v934_v56, %v733_v37  ;;  %4441 = vmatmul.msk.bf16.gmra.mxu0 %vm513_vm2, %v455_v35  ;;  %v944_v40 = vpop.f32.mrf.mxu2  ;;  %v850_v35 = vsel %vm819_vm1, %v847_v53, %v849_v27 }
  0xc0   : > { %v1303_v41 = vpop.f32.mrf.mxu3 }
  0xc1   : > { %v5712_v39 = vadd.f32 %v1293_v57, %v1018_v38 }
  0xc4   : > { %v589_v42 = vpop.f32.mrf.mxu0 }
  0xc5   : > { %v735_v47 = vadd.f32 %v734_v61, %v589_v42  ;;  %v747_v0 = vpop.f32.mrf.mxu1  ;;  %v1207_v61 = vsel %vm819_vm1, %v1204_v31, %v1206_v59 }
  0xc7   : > { %v1019_v49 = vadd.f32 %v936_v6, %v735_v47  ;;  %v946_v56 = vpop.f32.mrf.mxu2  ;;  %v472_v47 = vshrl.u32 %v5700_v24, 16 }
  0xc8   : > { %v1305_v57 = vpop.f32.mrf.mxu3  ;;  %4466 = vmatmul.msk.bf16.gmra.mxu1 %vm513_vm2, %v5700_v24 }
  0xc9   : > { %v5721_v55 = vadd.f32 %v1295_v8, %v1019_v49 }
  0xcc   : > { %v592_v45 = vpop.f32.mrf.mxu0  ;;  %4488 = vmatmul.msk.bf16.gmra.mxu2 %vm513_vm2, %v848_v60  ;;  %v5208_v60 = vld [vmem:[%s5563_s7 + $0x88] sm:$0xff] }
  0xcd   : > { %v738_v3 = vadd.f32 %v737_v15, %v592_v45  ;;  %4582 = vmatmul.msk.bf16.gmra.mxu3 %vm513_vm2, %v1207_v61  ;;  %v468_v15 = vshll.u32 %v5700_v24, 16  ;;  %v749_v16 = vpop.f32.mrf.mxu1  ;;  %v1210_v24 = vrot.slane %v5208_v60, 1 }
  0xcf   : > { %v1020_v4 = vadd.f32 %v939_v18, %v738_v3  ;;  %4442 = vmatmul.msk.bf16.gmra.mxu0 %vm513_vm2, %v463_v63  ;;  %v949_v8 = vpop.f32.mrf.mxu2  ;;  %v466_v18 = vor.u32 %v464_v14, %v462_v51  ;;  %v470_v26 = vrot.slane %v468_v15, 1  ;;  %v5757_v51 = vld [vmem:[%s5563_s7 + $0x80] sm:$0xff] }
  0xd0   : > { %v1308_v9 = vpop.f32.mrf.mxu3 }
  0xd1   : > { %v5731_v6 = vadd.f32 %v1298_v19, %v1020_v4  ;;  %v471_v34 = vsel %vm363_vm0, %v466_v18, %v470_v26  ;;  %v474_v53 = vor.u32 %v472_v47, %v470_v26  ;;  %v480_v18 = vshrl.u32 %v5717_v48, 16 }
  0xd4   : > { %v594_v10 = vpop.f32.mrf.mxu0 }
  0xd5   : > { %v740_v21 = vadd.f32 %v739_v23, %v594_v10  ;;  %v752_v37 = vpop.f32.mrf.mxu1  ;;  %v1209_v23 = vsel %vm819_vm1, %v1206_v59, %v1208_v33  ;;  %v851_v59 = vrot.slane %v5757_v51, 1 }
  0xd7   : > { %v1021_v25 = vadd.f32 %v941_v29, %v740_v21  ;;  %v951_v19 = vpop.f32.mrf.mxu2  ;;  %v852_v61 = vsel %vm819_vm1, %v849_v27, %v851_v59 }
  0xd8   : > { %v1310_v32 = vpop.f32.mrf.mxu3  ;;  %4467 = vmatmul.msk.bf16.gmra.mxu1 %vm513_vm2, %v5717_v48 }
  0xd9   : > { %v5740_v31 = vadd.f32 %v1300_v30, %v1021_v25 }
  0xdc   : > { %v597_v62 = vpop.f32.mrf.mxu0  ;;  %4489 = vmatmul.msk.bf16.gmra.mxu2 %vm513_vm2, %v850_v35 }
  0xdd   : > { %v743_v29 = vadd.f32 %v742_v36, %v597_v62  ;;  %4583 = vmatmul.msk.bf16.gmra.mxu3 %vm513_vm2, %v1209_v23  ;;  %v476_v36 = vshll.u32 %v5717_v48, 16  ;;  %v5754_v49 = vpop.f32.mrf.mxu1 }
  0xdf   : > { %v1022_v30 = vadd.f32 %v944_v40, %v743_v29  ;;  %4443 = vmatmul.msk.bf16.gmra.mxu0 %vm513_vm2, %v471_v34  ;;  %v954_v42 = vpop.f32.mrf.mxu2  ;;  %v478_v54 = vrot.slane %v476_v36, 1  ;;  %v5209_v34 = vld [vmem:[%s5563_s7 + $0x90] sm:$0xff] }
  0xe0   : > { %v1313_v43 = vpop.f32.mrf.mxu3  ;;  %v1212_v48 = vrot.slane %v5209_v34, 1 }
  0xe1   : > { %v5750_v38 = vadd.f32 %v1303_v41, %v1022_v30 }
  0xe2   : > { %v1213_v47 = vsel %vm819_vm1, %v1210_v24, %v1212_v48 }
  0xe4   : > { %v599_v44 = vpop.f32.mrf.mxu0 }
  0xe5   : > { %v745_v50 = vadd.f32 %v744_v46, %v599_v44  ;;  %v479_v46 = vsel %vm363_vm0, %v474_v53, %v478_v54  ;;  %v757_v4 = vpop.f32.mrf.mxu1 }
  0xe7   : > { %v1023_v40 = vadd.f32 %v946_v56, %v745_v50  ;;  %v5763_v45 = vpop.f32.mrf.mxu2  ;;  %v1211_v56 = vsel %vm819_vm1, %v1208_v33, %v1210_v24  ;;  %v5782_v33 = vld [vmem:[%s5563_s7 + $0x88] sm:$0xff]  }
  0xe8   : > { %v5765_v63 = vpop.f32.mrf.mxu3  ;;  %4468 = vmatmul.msk.bf16.gmra.mxu1 %vm513_vm2, %v5736_v22  ;;  %v853_v62 = vrot.slane %v5782_v33, 1 }
  0xe9   : > { %v5761_v41 = vadd.f32 %v1305_v57, %v1023_v40 }
  0xea   : > { %v854_v30 = vsel %vm819_vm1, %v851_v59, %v853_v62  ;;  %v492_v59 = vshll.u32 %v5757_v51, 16 }
  0xec   : > { %v602_v3 = vpop.f32.mrf.mxu0  ;;  %4490 = vmatmul.msk.bf16.gmra.mxu2 %vm513_vm2, %v852_v61 }
  0xed   : > { %v748_v10 = vadd.f32 %v747_v0, %v602_v3  ;;  %4584 = vmatmul.msk.bf16.gmra.mxu3 %vm513_vm2, %v1211_v56  ;;  %v484_v0 = vshll.u32 %v5736_v22, 16  ;;  %v5779_v26 = vpop.f32.mrf.mxu1 }
  0xef   : > { %v1024_v57 = vadd.f32 %v949_v8, %v748_v10  ;;  %4444 = vmatmul.msk.bf16.gmra.mxu0 %vm513_vm2, %v479_v46  ;;  %v959_v15 = vpop.f32.mrf.mxu2  ;;  %v482_v8 = vor.u32 %v480_v18, %v478_v54  ;;  %v486_v35 = vrot.slane %v484_v0, 1  ;;  %v5369_v10 = vld [vmem:[%s5563_s7 + $0x88] sm:$0xf]  }
  0xf0   : > { %v1318_v21 = vpop.f32.mrf.mxu3 }
  0xf1   : > { %v5775_v14 = vadd.f32 %v1308_v9, %v1024_v57  ;;  %v5379_v57 = vld [vmem:[%s5563_s7 + $0x88] sm:$0x70] }
  0xf2   : > { %v5370_v18 = vor.u32 %v5379_v57, %v5369_v10 }
  0xf4   : > { %v604_v25 = vpop.f32.mrf.mxu0 }
  0xf5   : > { %v750_v27 = vadd.f32 %v749_v16, %v604_v25  ;;  %v487_v16 = vsel %vm363_vm0, %v482_v8, %v486_v35 }
  0xf7   : > { %v1025_v28 = vadd.f32 %v951_v19, %v750_v27  ;;  %v5788_v23 = vpop.f32.mrf.mxu2  ;;  %v762_v19 = vpop.f32.mrf.mxu1 }
  0xf8   : > { %v5790_v29 = vpop.f32.mrf.mxu3  ;;  %4469 = vmatmul.msk.bf16.gmra.mxu1 %vm513_vm2, %v5757_v51 }
  0xf9   : > { %v5786_v9 = vadd.f32 %v1310_v32, %v1025_v28 }
  0xfc   : > { %v607_v44 = vpop.f32.mrf.mxu0  ;;  %4491 = vmatmul.msk.bf16.gmra.mxu2 %vm513_vm2, %v854_v30 }
  0xfd   : > { %v753_v36 = vadd.f32 %v752_v37, %v607_v44  ;;  %4585 = vmatmul.msk.bf16.gmra.mxu3 %vm513_vm2, %v1213_v47  ;;  %v488_v37 = vshrl.u32 %v5736_v22, 16 }
  0xff   : > { %v1026_v32 = vadd.f32 %v954_v42, %v753_v36  ;;  %4445 = vmatmul.msk.bf16.gmra.mxu0 %vm513_vm2, %v487_v16  ;;  %v964_v40 = vpop.f32.mrf.mxu2  ;;  %v5806_v60 = vpop.f32.mrf.mxu1  ;;  %v490_v24 = vor.u32 %v488_v37, %v486_v35  ;;  %v494_v42 = vrot.slane %v492_v59, 1  ;;  %v496_v35 = vshrl.u32 %v5757_v51, 16 }
 0x100   : > { %v1323_v53 = vpop.f32.mrf.mxu3 }
 0x101   : > { %v5800_v50 = vadd.f32 %v1313_v43, %v1026_v32  ;;  %v495_v43 = vsel %vm363_vm0, %v490_v24, %v494_v42  ;;  %v504_v24 = vshrl.u32 %v5782_v33, 16 }
 0x104   : > { %v5802_v54 = vpop.f32.mrf.mxu0 }
 0x107   : > { %v5808_v61 = vpop.f32.mrf.mxu2  ;;  %v767_v56 = vpop.f32.mrf.mxu1 }
 0x108   : > { %v5810_v3 = vpop.f32.mrf.mxu3  ;;  %4470 = vmatmul.msk.bf16.gmra.mxu1 %vm513_vm2, %v5370_v18 }
 0x10c   : > { %v612_v46 = vpop.f32.mrf.mxu0  ;;  %4492 = vmatmul.msk.bf16.gmra.mxu2 %vm513_vm2, %v853_v62  ;;  %v498_v62 = vor.u32 %v496_v35, %v494_v42 }
 0x10d   : > { %v758_v25 = vadd.f32 %v757_v4, %v612_v46  ;;  %4586 = vmatmul.msk.bf16.gmra.mxu3 %vm513_vm2, %v1212_v48  ;;  %v500_v4 = vshll.u32 %v5782_v33, 16 }
 0x10f   : > { %v1028_v22 = vadd.f32 %v959_v15, %v758_v25  ;;  %4446 = vmatmul.msk.bf16.gmra.mxu0 %vm513_vm2, %v495_v43  ;;  %v969_v27 = vpop.f32.mrf.mxu2  ;;  %v5825_v34 = vpop.f32.mrf.mxu1  ;;  %v502_v15 = vrot.slane %v500_v4, 1 }
 0x110   : > { %v1328_v28 = vpop.f32.mrf.mxu3 }
 0x111   : > { %v5819_v0 = vadd.f32 %v1318_v21, %v1028_v22  ;;  %v503_v21 = vsel %vm363_vm0, %v498_v62, %v502_v15  ;;  %v506_v43 = vor.u32 %v504_v24, %v502_v15 }
 0x114   : > { %v5821_v8 = vpop.f32.mrf.mxu0 }
 0x117   : > { %v5827_v30 = vpop.f32.mrf.mxu2  ;;  %v772_v47 = vpop.f32.mrf.mxu1 }
 0x118   : > { %v5829_v44 = vpop.f32.mrf.mxu3 }
 0x119   : > { %7351 = vst [vmem:[#allocation8_spill] sm:$0xff] %v5829_v44 }
 0x11c   : > { %v617_v48 = vpop.f32.mrf.mxu0 }
 0x11d   : > { %v763_v16 = vadd.f32 %v762_v19, %v617_v48 }
 0x11f   : > { %v1030_v36 = vadd.f32 %v964_v40, %v763_v16  ;;  %4447 = vmatmul.msk.bf16.gmra.mxu0 %vm513_vm2, %v503_v21  ;;  %v974_v51 = vpop.f32.mrf.mxu2  ;;  %v5838_v42 = vpop.f32.mrf.mxu1 }
 0x120   : > { %v1333_v37 = vpop.f32.mrf.mxu3  ;;  %7352 = vst [vmem:[#allocation9_spill] sm:$0xff] %v5838_v42 }
 0x121   : > { %v5833_v32 = vadd.f32 %v1323_v53, %v1030_v36 }
 0x124   : > { %v5835_v59 = vpop.f32.mrf.mxu0 }
 0x127   : > { %v5840_v46 = vpop.f32.mrf.mxu2  ;;  %v777_v25 = vpop.f32.mrf.mxu1 }
 0x128   : > { %7353 = vst [vmem:[#allocation10_spill] sm:$0xff] %v5840_v46  ;;  %v5842_v57 = vpop.f32.mrf.mxu3 }
 0x129   : > { %7354 = vst [vmem:[#allocation11_spill] sm:$0xff] %v5842_v57 }
 0x12c   : > { %v622_v10 = vpop.f32.mrf.mxu0 }
 0x12d   : > { %v768_v19 = vadd.f32 %v767_v56, %v622_v10  ;;  %v5371_v10 = vld [vmem:[%s5563_s7] sm:$0xf0] }
 0x12f   : > { %v1032_v40 = vadd.f32 %v969_v27, %v768_v19  ;;  %4448 = vmatmul.msk.bf16.gmra.mxu0 %vm513_vm2, %v506_v43  ;;  %v979_v22 = vpop.f32.mrf.mxu2  ;;  %v5849_v4 = vpop.f32.mrf.mxu1  ;;  %v5372_v19 = vld [vmem:[%s5563_s7] sm:$0xe] }
 0x130   : > { %v1338_v35 = vpop.f32.mrf.mxu3  ;;  %7355 = vst [vmem:[#allocation12_spill] sm:$0xff] %v5849_v4  ;;  %v5211_v4 = vld [vmem:[%s5563_s7 + $0x10] sm:$0xff] }
 0x131   : > { %v5845_v53 = vadd.f32 %v1328_v28, %v1032_v40  ;;  %v5373_v40 = vor.u32 %v5372_v19, %v5371_v10 }
 0x134   : > { %v5847_v18 = vpop.f32.mrf.mxu0 }
 0x137   : > { %v5851_v48 = vpop.f32.mrf.mxu2  ;;  %v782_v21 = vpop.f32.mrf.mxu1 }
 0x138   : > { %7356 = vst [vmem:[#allocation13_spill] sm:$0xff] %v5851_v48  ;;  %v5855_v56 = vpop.f32.mrf.mxu3 }
 0x139   : > { %7357 = vst [vmem:[#allocation14_spill] sm:$0xff] %v5855_v56 }
 0x13c   : > { %v627_v33 = vpop.f32.mrf.mxu0 }
 0x13d   : > { %v773_v62 = vadd.f32 %v772_v47, %v627_v33 }
 0x13f   : > { %v1034_v15 = vadd.f32 %v974_v51, %v773_v62  ;;  %4453 = vmatmul.msk.bf16.vlgmr.msrb.gmra.mxu0 %vm513_vm2, %v5566_v1  ;;  %v984_v16 = vpop.f32.mrf.mxu2  ;;  %v5864_v51 = vpop.f32.mrf.mxu1  ;;  %v820_v62 = vrot.slane %v5373_v40, 1 }
 0x140   : > { %1281 = vmatpush.bf16.msrb.mxu0 %v5576_v7  ;;  %v1343_v36 = vpop.f32.mrf.mxu3  ;;  %7360 = vst [vmem:[#allocation17_spill] sm:$0xff] %v5864_v51 }
 0x141   : > { %v5858_v27 = vadd.f32 %v1333_v37, %v1034_v15 }
 0x143   : > { %7358 = vst [vmem:[#allocation15_spill] sm:$0xff] %v5858_v27 }
 0x144   : > { %v5860_v28 = vpop.f32.mrf.mxu0 }
 0x145   : > { %7359 = vst [vmem:[#allocation16_spill] sm:$0xff] %v5860_v28 }
 0x147   : > { %v5870_v7 = vpop.f32.mrf.mxu2 }
 0x148   : > { %7362 = vst [vmem:[#allocation19_spill] sm:$0xff] %v5870_v7  ;;  %v5874_v33 = vpop.f32.mrf.mxu3  ;;  %v2144_v7 = vld [vmem:[%s5563_s7 + $0x10] sm:$0xc] }
 0x149   : > { %7364 = vst [vmem:[#allocation21_spill] sm:$0xff] %v5874_v33  ;;  %v5192_v33 = vld [vmem:[%s5563_s7 + $0x8] sm:$0xf0] }
 0x14c   : > { %v632_v47 = vpop.f32.mrf.mxu0 }
 0x14d   : > { %v778_v24 = vadd.f32 %v777_v25, %v632_v47  ;;  %v821_v25 = vrot.slane %v5569_v2, 1 }
 0x14f   : > { %v1036_v43 = vadd.f32 %v979_v22, %v778_v24  ;;  %4454 = vmatmul.msk.bf16.gmra.mxu0 %vm513_vm2, %v5569_v2  ;;  %v787_v22 = vpop.f32.mrf.mxu1  ;;  %v822_v47 = vsel %vm819_vm1, %v820_v62, %v821_v25  ;;  %v989_v24 = vpop.f32.mrf.mxu2  ;;  %v7370_v62 = vrot.slane %v5574_v5, 1  ;;  %v5904_v5 = vld [vmem:[%s5563_s7 + $0x10] sm:$0xff] }
 0x151   : > { %v5866_v1 = vadd.f32 %v1338_v35, %v1036_v43  ;;  %v1348_v35 = vpop.f32.mrf.mxu3 }
 0x153   : > { %7361 = vst [vmem:[#allocation18_spill] sm:$0xff] %v5866_v1 }
 0x154   : > { %v5872_v37 = vpop.f32.mrf.mxu0 }
 0x155   : > { %7363 = vst [vmem:[#allocation20_spill] sm:$0xff] %v5872_v37 }
 0x157   : > { %v5883_v19 = vpop.f32.mrf.mxu1  ;;  %v5885_v2 = vpop.f32.mrf.mxu2 }
 0x158   : > { %7367 = vst [vmem:[#allocation24_spill] sm:$0xff] %v5883_v19  ;;  %v4495_v19 = vld [vmem:[%s5563_s7 + $0x8] sm:$0xe] }
 0x159   : > { %7368 = vst [vmem:[#allocation25_spill] sm:$0xff] %v5885_v2  ;;  %v5887_v40 = vpop.f32.mrf.mxu3 }
 0x15a   : > { %7369 = vst [vmem:[#allocation26_spill] sm:$0xff] %v5887_v40 }
 0x15c   : > { %v637_v15 = vpop.f32.mrf.mxu0 }
 0x15d   : > { %v783_v17 = vadd.f32 %v782_v21, %v637_v15 }
 0x15f   : > { %v1038_v43 = vadd.f32 %v984_v16, %v783_v17  ;;  %4475 = vmatmul.msk.bf16.vlgmr.msra.gmra.mxu0 %vm513_vm2, %v822_v47  ;;  %v824_v17 = vsel %vm819_vm1, %v821_v25, %v7370_v62  ;;  %v994_v47 = vpop.f32.mrf.mxu2  ;;  %v4496_v25 = vor.u32 %v5192_v33, %v4495_v19  ;;  %v5248_v33 = vld [vmem:[#allocation2 + $0x38] sm:$0xff] }
 0x160   : > { %2754 = vmatpush.bf16.msrb.mxu3 %v5248_v33 }
 0x161   : > { %v5879_v13 = vadd.f32 %v1343_v36, %v1038_v43  ;;  %v792_v36 = vpop.f32.mrf.mxu1  ;;  %v1353_v2 = vpop.f32.mrf.mxu3  ;;  %v1179_v62 = vrot.slane %v4496_v25, 1  ;;  %v1410_v25 = vld [vmem:[%s5563_s7 + $0xc] sm:$0xf] }
 0x162   : > { %v1487_v37 = vunpack.c.l.b16 %v1410_v25 }
 0x163   : > { %7365 = vst [vmem:[#allocation22_spill] sm:$0xff] %v5879_v13  ;;  %v5899_v13 = vld [vmem:[%s5563_s7 + $0x14] sm:$0xf] }
 0x164   : > { %v5881_v10 = vpop.f32.mrf.mxu0  ;;  %7372 = vst [vmem:[#allocation28_spill] sm:$0xff] %v5899_v13 }
 0x165   : > { %7366 = vst [vmem:[#allocation23_spill] sm:$0xff] %v5881_v10 }
 0x167   : > { %v5915_v51 = vpop.f32.mrf.mxu2 }
 0x168   : > { %7375 = vst [vmem:[#allocation31_spill] sm:$0xff] %v5915_v51  ;;  %v5229_v51 = vld [vmem:[#allocation2 + $0x28] sm:$0xff] }
 0x169   : > { %2016 = vmatpush.bf16.msrb.mxu1 %v5229_v51 }
 0x16c   : > { %v642_v21 = vpop.f32.mrf.mxu0 }
 0x16d   : > { %v788_v16 = vadd.f32 %v787_v22, %v642_v21  ;;  %v2221_v22 = vunpack.c.l.b16 %v2144_v7  ;;  %v7341_v21 = vunpack.c.l.b16 %v5899_v13  ;;  %v5228_v7 = vld [vmem:[#allocation2 + $0x20] sm:$0xff] }
 0x16e   : > { %1776 = vmatpush.bf16.msra.mxu0 %v5228_v7 }
 0x16f   : > { %v1040_v15 = vadd.f32 %v989_v24, %v788_v16  ;;  %4476 = vmatmul.msk.bf16.gmra.mxu0 %vm513_vm2, %v824_v17  ;;  %v5908_v24 = vld [vmem:[%s5563_s7 + $0x18] sm:$0xff]  ;;  %v1180_v17 = vrot.slane %v5904_v5, 1  ;;  %v5913_v16 = vpop.f32.mrf.mxu1 }
 0x170   : > { %7374 = vst [vmem:[#allocation30_spill] sm:$0xff] %v5913_v16  ;;  %v2278_v10 = vrot.slane %v5908_v24, 2  ;;  %v2526_v56 = vshrl.u32 %v5908_v24, 16  ;;  %v5922_v16 = vpop.f32.mrf.mxu3  ;;  %v2529_v46 = vshll.u32 %v5908_v24, 16 }
 0x171   : > { %v5893_v43 = vadd.f32 %v1348_v35, %v1040_v15  ;;  %v2258_v35 = vpack.c.b16 %v7341_v21, %v2221_v22  ;;  %v5247_v15 = vld [vmem:[#allocation2 + $0x30] sm:$0xff]  ;;  %v1904_v22 = vld [vmem:[%s5563_s7 + $0x8] sm:$0xc]  ;;  %v1181_v21 = vsel %vm819_vm1, %v1179_v62, %v1180_v17  ;;  %7376 = vst [vmem:[#allocation32_spill] sm:$0xff] %v5922_v16 }
 0x172   : > { %2381 = vmatpush.bf16.msrb.mxu2 %v5247_v15  ;;  %v2528_v57 = vrot.slane %v2526_v56, 2  ;;  %v1909_v27 = vunpack.c.l.b16 %v1904_v22  ;;  %v2531_v33 = vrot.slane %v2529_v46, 3  ;;  %v999_v56 = vpop.f32.mrf.mxu2 }
 0x173   : > { %7371 = vst [vmem:[#allocation27_spill] sm:$0xff] %v5893_v43  ;;  %v2518_v43 = vshrl.u32 %v2258_v35, 16  ;;  %v2277_v19 = vrot.slane %v2258_v35, 2 }
 0x174   : > { %v5901_v40 = vpop.f32.mrf.mxu0  ;;  %v2532_v51 = vor.u32 %v2531_v33, %v2528_v57 }
 0x175   : > { %7373 = vst [vmem:[#allocation29_spill] sm:$0xff] %v5901_v40  ;;  %v2521_v40 = vshll.u32 %v2258_v35, 16  ;;  %v2279_v15 = vsel %vm1911_vm3, %v2277_v19, %v2278_v10  ;;  %v2520_v48 = vrot.slane %v2518_v43, 2  ;;  %v1910_v19 = vpack.c.b16 %v1487_v37, %v1909_v27 }
 0x176   : > { %4771 = vmatmul.msk.bf16.vlgmr.msrb.gmra.mxu2 %vm513_vm2, %v2279_v15  ;;  %v1913_v43 = vrot.slane %v5211_v4, 2 }
 0x177   : > { %v2523_v35 = vrot.slane %v2521_v40, 3 }
 0x178   : > { %v1358_v46 = vpop.f32.mrf.mxu3 }
 0x179   : > { %v2524_v7 = vor.u32 %v2523_v35, %v2520_v48  ;;  %v5231_v48 = vld [vmem:[%s5563_s7 + $0x20] sm:$0xff] }
 0x17a   : > { %v2280_v57 = vrot.slane %v5231_v48, 2 }
 0x17b   : > { %v2533_v24 = vsel %vm2516_vm4, %v2524_v7, %v2532_v51 }
 0x17c   : > { %v647_v5 = vpop.f32.mrf.mxu0  ;;  %4793 = vmatmul.msk.bf16.vlgmr.msrb.gmra.mxu3 %vm513_vm2, %v2533_v24  ;;  %v5212_v24 = vld [vmem:[%s5563_s7 + $0x18] sm:$0xff] }
 0x17d   : > { %v793_v1 = vadd.f32 %v792_v36, %v647_v5  ;;  %v797_v36 = vpop.f32.mrf.mxu1  ;;  %v1912_v5 = vrot.slane %v1910_v19, 2 }
 0x17f   : > { %v1042_v62 = vadd.f32 %v994_v47, %v793_v1  ;;  %4569 = vmatmul.msk.bf16.vlgmr.msrb.gmra.mxu0 %vm513_vm2, %v1181_v21  ;;  %v1914_v1 = vsel %vm1911_vm3, %v1912_v5, %v1913_v43  ;;  %v1409_v47 = vld [vmem:[%s5563_s7 + $0x8] sm:$0xe]  ;;  %v2538_v21 = vshll.u32 %v5231_v48, 16  ;;  %v2281_v5 = vsel %vm1911_vm3, %v2278_v10, %v2280_v57 }
 0x180   : > { %4681 = vmatmul.msk.bf16.vlgmr.msrb.gmra.mxu1 %vm513_vm2, %v1914_v1  ;;  %v1486_v27 = vunpack.c.l.b16 %v1409_v47  ;;  %v5947_v47 = vpop.f32.mrf.mxu2 }
 0x181   : > { %v5929_v40 = vadd.f32 %v1353_v2, %v1042_v62  ;;  %v2535_v2 = vshrl.u32 %v5231_v48, 16  ;;  %v2540_v15 = vrot.slane %v2538_v21, 3  ;;  %v7379_v62 = vrot.slane %v5581_v11, 1  ;;  %7381 = vst [vmem:[#allocation36_spill] sm:$0xff] %v5947_v47  ;;  %v5950_v21 = vpop.f32.mrf.mxu3 }
 0x182   : > { %v1523_v19 = vpack.c.b16 %v1487_v37, %v1486_v27  ;;  %v1915_v48 = vrot.slane %v5212_v24, 2  ;;  %7382 = vst [vmem:[#allocation37_spill] sm:$0xff] %v5950_v21  ;;  %v1555_v37 = vshll.u32 %v5211_v4, 16 }
 0x183   : > { %7377 = vst [vmem:[#allocation33_spill] sm:$0xff] %v5929_v40  ;;  %v2537_v22 = vrot.slane %v2535_v2, 2  ;;  %v1183_v7 = vsel %vm819_vm1, %v1180_v17, %v7379_v62  ;;  %v1552_v62 = vshrl.u32 %v5211_v4, 16 }
 0x184   : > { %v5931_v25 = vpop.f32.mrf.mxu0  ;;  %v1544_v11 = vshrl.u32 %v1523_v19, 16  ;;  %v1547_v17 = vshll.u32 %v1523_v19, 16  ;;  %v5232_v19 = vld [vmem:[%s5563_s7 + $0x28] sm:$0xff] }
 0x185   : > { %7378 = vst [vmem:[#allocation34_spill] sm:$0xff] %v5931_v25  ;;  %v5942_v33 = vpop.f32.mrf.mxu1  ;;  %v2541_v16 = vor.u32 %v2540_v15, %v2537_v22  ;;  %v2282_v21 = vrot.slane %v5232_v19, 2 }
 0x186   : > { %7380 = vst [vmem:[#allocation35_spill] sm:$0xff] %v5942_v33  ;;  %4772 = vmatmul.msk.bf16.gmra.mxu2 %vm513_vm2, %v2281_v5  ;;  %v1546_v22 = vrot.slane %v1544_v11, 1  ;;  %v1549_v15 = vrot.slane %v1547_v17, 2  ;;  %v1557_v5 = vrot.slane %v1555_v37, 2 }
 0x187   : > { %v2542_v10 = vsel %vm2516_vm4, %v2532_v51, %v2541_v16  ;;  %v2547_v51 = vshll.u32 %v5232_v19, 16  ;;  %v2283_v37 = vsel %vm1911_vm3, %v2280_v57, %v2282_v21 }
 0x188   : > { %v1004_v4 = vpop.f32.mrf.mxu2 }
 0x189   : > { %v2549_v11 = vrot.slane %v2547_v51, 3 }
 0x18c   : > { %v652_v35 = vpop.f32.mrf.mxu0  ;;  %4794 = vmatmul.msk.bf16.gmra.mxu3 %vm513_vm2, %v2542_v10  ;;  %v5213_v10 = vld [vmem:[%s5563_s7 + $0x20] sm:$0xff] }
 0x18d   : > { %v798_v1 = vadd.f32 %v797_v36, %v652_v35  ;;  %v1916_v36 = vsel %vm1911_vm3, %v1913_v43, %v1915_v48  ;;  %v1363_v43 = vpop.f32.mrf.mxu3  ;;  %v1917_v33 = vrot.slane %v5213_v10, 2 }
 0x18f   : > { %v1044_v2 = vadd.f32 %v999_v56, %v798_v1  ;;  %4570 = vmatmul.msk.bf16.gmra.mxu0 %vm513_vm2, %v1183_v7  ;;  %v1554_v56 = vrot.slane %v1552_v62, 1  ;;  %v802_v7 = vpop.f32.mrf.mxu1 }
 0x190   : > { %4682 = vmatmul.msk.bf16.gmra.mxu1 %vm513_vm2, %v1916_v36 }
 0x191   : > { %v5952_v27 = vadd.f32 %v1358_v46, %v1044_v2  ;;  %v1550_v46 = vor.u32 %v1549_v15, %v1546_v22  ;;  %v1558_v1 = vor.u32 %v1557_v5, %v1554_v56  ;;  %v2544_v2 = vshrl.u32 %v5232_v19, 16 }
 0x192   : > { %v1561_v56 = vshrl.u32 %v5212_v24, 16  ;;  %v1564_v5 = vshll.u32 %v5212_v24, 16  ;;  %v5233_v24 = vld [vmem:[%s5563_s7 + $0x30] sm:$0xff] }
 0x193   : > { %7383 = vst [vmem:[#allocation38_spill] sm:$0xff] %v5952_v27  ;;  %v2546_v47 = vrot.slane %v2544_v2, 2  ;;  %v1559_v62 = vsel %vm1542_vm5, %v1550_v46, %v1558_v1  ;;  %v5970_v2 = vpop.f32.mrf.mxu2 }
 0x194   : > { %v5956_v35 = vpop.f32.mrf.mxu0  ;;  %7387 = vst [vmem:[#allocation42_spill] sm:$0xff] %v5970_v2  ;;  %v1563_v51 = vrot.slane %v1561_v56, 1 }
 0x195   : > { %7384 = vst [vmem:[#allocation39_spill] sm:$0xff] %v5956_v35  ;;  %v2550_v27 = vor.u32 %v2549_v11, %v2546_v47  ;;  %v5976_v47 = vpop.f32.mrf.mxu3  ;;  %v2553_v11 = vshrl.u32 %v5233_v24, 16 }
 0x196   : > { %4773 = vmatmul.msk.bf16.gmra.mxu2 %vm513_vm2, %v2283_v37  ;;  %7389 = vst [vmem:[#allocation44_spill] sm:$0xff] %v5976_v47  ;;  %v2284_v37 = vrot.slane %v5233_v24, 2  ;;  %v5214_v47 = vld [vmem:[%s5563_s7 + $0x28] sm:$0xff] }
 0x197   : > { %v5966_v15 = vpop.f32.mrf.mxu1  ;;  %v2551_v57 = vsel %vm2516_vm4, %v2541_v16, %v2550_v27  ;;  %v2555_v16 = vrot.slane %v2553_v11, 2  ;;  %v1573_v11 = vshll.u32 %v5213_v10, 16 }
 0x198   : > { %7385 = vst [vmem:[#allocation40_spill] sm:$0xff] %v5966_v15  ;;  %v2285_v56 = vsel %vm1911_vm3, %v2282_v21, %v2284_v37 }
 0x19c   : > { %v657_v17 = vpop.f32.mrf.mxu0  ;;  %4795 = vmatmul.msk.bf16.gmra.mxu3 %vm513_vm2, %v2551_v57 }
 0x19d   : > { %v803_v36 = vadd.f32 %v802_v7, %v657_v17  ;;  %v1918_v7 = vsel %vm1911_vm3, %v1915_v48, %v1917_v33  ;;  %v2556_v17 = vshll.u32 %v5233_v24, 16  ;;  %v1368_v57 = vpop.f32.mrf.mxu3  ;;  %v1570_v24 = vshrl.u32 %v5213_v10, 16 }
 0x19f   : > { %v1046_v22 = vadd.f32 %v1004_v4, %v803_v36  ;;  %4659 = vmatmul.msk.bf16.vlgmr.msra.gmra.mxu0 %vm513_vm2, %v1559_v62  ;;  %v1566_v4 = vrot.slane %v1564_v5, 2  ;;  %v807_v62 = vpop.f32.mrf.mxu1  ;;  %v2558_v36 = vrot.slane %v2556_v17, 3 }
 0x1a0   : > { %4683 = vmatmul.msk.bf16.gmra.mxu1 %vm513_vm2, %v1918_v7 }
 0x1a1   : > { %v5968_v19 = vadd.f32 %v1363_v43, %v1046_v22  ;;  %v1567_v43 = vor.u32 %v1566_v4, %v1563_v51  ;;  %v1009_v22 = vpop.f32.mrf.mxu2  ;;  %v2559_v7 = vor.u32 %v2558_v36, %v2555_v16  ;;  %v1919_v51 = vrot.slane %v5214_v47, 2  ;;  %v5234_v16 = vld [vmem:[%s5563_s7 + $0x38] sm:$0xff] }
 0x1a2   : > { %v2286_v10 = vrot.slane %v5234_v16, 2 }
 0x1a3   : > { %7386 = vst [vmem:[#allocation41_spill] sm:$0xff] %v5968_v19  ;;  %v1568_v2 = vsel %vm1542_vm5, %v1558_v1, %v1567_v43  ;;  %v2560_v19 = vsel %vm2516_vm4, %v2550_v27, %v2559_v7  ;;  %v1920_v1 = vsel %vm1911_vm3, %v1917_v33, %v1919_v51 }
 0x1a4   : > { %v5974_v46 = vpop.f32.mrf.mxu0  ;;  %v2287_v33 = vsel %vm1911_vm3, %v2284_v37, %v2286_v10  ;;  %v5235_v37 = vld [vmem:[%s5563_s7 + $0x40] sm:$0xff] }
 0x1a5   : > { %7388 = vst [vmem:[#allocation43_spill] sm:$0xff] %v5974_v46 }
 0x1a6   : > { %4774 = vmatmul.msk.bf16.gmra.mxu2 %vm513_vm2, %v2285_v56 }
 0x1ac   : > { %v662_v48 = vpop.f32.mrf.mxu0  ;;  %4796 = vmatmul.msk.bf16.gmra.mxu3 %vm513_vm2, %v2560_v19 }
 0x1ad   : > { %v808_v5 = vadd.f32 %v807_v62, %v662_v48  ;;  %v1572_v62 = vrot.slane %v1570_v24, 1  ;;  %v1575_v48 = vrot.slane %v1573_v11, 2  ;;  %v1579_v11 = vshrl.u32 %v5214_v47, 16 }
 0x1af   : > { %v1048_v4 = vadd.f32 %v1009_v22, %v808_v5  ;;  %4660 = vmatmul.msk.bf16.gmra.mxu0 %vm513_vm2, %v1568_v2  ;;  %v1576_v36 = vor.u32 %v1575_v48, %v1572_v62  ;;  %v2562_v2 = vshrl.u32 %v5234_v16, 16  ;;  %v2565_v22 = vshll.u32 %v5234_v16, 16 }
 0x1b0   : > { %4684 = vmatmul.msk.bf16.gmra.mxu1 %vm513_vm2, %v1920_v1  ;;  %v1582_v1 = vshll.u32 %v5214_v47, 16 }
 0x1b1   : > { %v5986_v17 = vadd.f32 %v1368_v57, %v1048_v4  ;;  %v2564_v56 = vrot.slane %v2562_v2, 2  ;;  %v2567_v5 = vrot.slane %v2565_v22, 3  ;;  %v1577_v27 = vsel %vm1542_vm5, %v1567_v43, %v1576_v36  ;;  %v5215_v4 = vld [vmem:[%s5563_s7 + $0x30] sm:$0xff] }
 0x1b2   : > { %v1921_v19 = vrot.slane %v5215_v4, 2  ;;  %v1581_v2 = vrot.slane %v1579_v11, 1  ;;  %v1584_v43 = vrot.slane %v1582_v1, 2 }
 0x1b3   : > { %7390 = vst [vmem:[#allocation45_spill] sm:$0xff] %v5986_v17  ;;  %v2568_v24 = vor.u32 %v2567_v5, %v2564_v56  ;;  %v2571_v56 = vshrl.u32 %v5235_v37, 16  ;;  %v2574_v5 = vshll.u32 %v5235_v37, 16 }
 0x1b4   : > { %v5990_v21 = vpop.f32.mrf.mxu0  ;;  %v1922_v48 = vsel %vm1911_vm3, %v1919_v51, %v1921_v19  ;;  %v1585_v22 = vor.u32 %v1584_v43, %v1581_v2 }
 0x1b5   : > { %7391 = vst [vmem:[#allocation46_spill] sm:$0xff] %v5990_v21  ;;  %v2569_v62 = vsel %vm2516_vm4, %v2559_v7, %v2568_v24  ;;  %v2576_v17 = vrot.slane %v2574_v5, 3  ;;  %v5216_v21 = vld [vmem:[%s5563_s7 + $0x38] sm:$0xff] }
 0x1b6   : > { %4775 = vmatmul.msk.bf16.gmra.mxu2 %vm513_vm2, %v2287_v33  ;;  %v2288_v33 = vrot.slane %v5235_v37, 2  ;;  %v1586_v7 = vsel %vm1542_vm5, %v1576_v36, %v1585_v22  ;;  %v1923_v1 = vrot.slane %v5216_v21, 2 }
 0x1b8   : > { %v2289_v51 = vsel %vm1911_vm3, %v2286_v10, %v2288_v33  ;;  %v1924_v43 = vsel %vm1911_vm3, %v1921_v19, %v1923_v1  ;;  %v5236_v10 = vld [vmem:[%s5563_s7 + $0x48] sm:$0xff] }
 0x1bc   : > { %v722_v57 = vpop.f32.mrf.mxu0  ;;  %4797 = vmatmul.msk.bf16.gmra.mxu3 %vm513_vm2, %v2569_v62  ;;  %v1588_v62 = vshrl.u32 %v5215_v4, 16 }
 0x1bf   : > { %4661 = vmatmul.msk.bf16.gmra.mxu0 %vm513_vm2, %v1577_v27  ;;  %v2573_v27 = vrot.slane %v2571_v56, 2  ;;  %v1590_v56 = vrot.slane %v1588_v62, 1  ;;  %v5217_v62 = vld [vmem:[%s5563_s7 + $0x40] sm:$0xff] }
 0x1c0   : > { %4685 = vmatmul.msk.bf16.gmra.mxu1 %vm513_vm2, %v1922_v48  ;;  %v1591_v48 = vshll.u32 %v5215_v4, 16  ;;  %v723_v4 = vadd.f32 %v722_v57, %v5671_v52 }
 0x1c1   : > { %v2577_v11 = vor.u32 %v2576_v17, %v2573_v27  ;;  %v2580_v17 = vshrl.u32 %v5236_v10, 16  ;;  %v2583_v27 = vshll.u32 %v5236_v10, 16 }
 0x1c2   : > { %v1593_v36 = vrot.slane %v1591_v48, 2 }
 0x1c3   : > { %v2578_v2 = vsel %vm2516_vm4, %v2568_v24, %v2577_v11  ;;  %v2585_v15 = vrot.slane %v2583_v27, 3 }
 0x1c4   : > { %v724_v16 = vpop.f32.mrf.mxu0  ;;  %v1594_v5 = vor.u32 %v1593_v36, %v1590_v56  ;;  %v1597_v56 = vshrl.u32 %v5216_v21, 16  ;;  %v1600_v36 = vshll.u32 %v5216_v21, 16 }
 0x1c5   : > { %v725_v57 = vadd.f32 %v724_v16, %v5679_v58 }
 0x1c6   : > { %4776 = vmatmul.msk.bf16.gmra.mxu2 %vm513_vm2, %v2289_v51  ;;  %v2290_v51 = vrot.slane %v5236_v10, 2  ;;  %v1595_v19 = vsel %vm1542_vm5, %v1585_v22, %v1594_v5 }
 0x1c8   : > { %v2291_v46 = vsel %vm1911_vm3, %v2288_v33, %v2290_v51  ;;  %v1602_v33 = vrot.slane %v1600_v36, 2 }
 0x1cc   : > { %v727_v47 = vpop.f32.mrf.mxu0  ;;  %4798 = vmatmul.msk.bf16.gmra.mxu3 %vm513_vm2, %v2578_v2 }
 0x1cf   : > { %4662 = vmatmul.msk.bf16.gmra.mxu0 %vm513_vm2, %v1586_v7  ;;  %v2582_v7 = vrot.slane %v2580_v17, 2  ;;  %v1599_v17 = vrot.slane %v1597_v56, 1  ;;  %v5218_v56 = vld [vmem:[%s5563_s7 + $0x48] sm:$0xff] }
 0x1d0   : > { %4686 = vmatmul.msk.bf16.gmra.mxu1 %vm513_vm2, %v1924_v43  ;;  %v1925_v43 = vrot.slane %v5217_v62, 2 }
 0x1d1   : > { %v2586_v2 = vor.u32 %v2585_v15, %v2582_v7  ;;  %v5237_v15 = vld [vmem:[%s5563_s7 + $0x50] sm:$0xff] }
 0x1d2   : > { %v1926_v52 = vsel %vm1911_vm3, %v1923_v1, %v1925_v43  ;;  %v2589_v7 = vshrl.u32 %v5237_v15, 16  ;;  %v2292_v21 = vrot.slane %v5237_v15, 2 }
 0x1d3   : > { %v2587_v10 = vsel %vm2516_vm4, %v2577_v11, %v2586_v2  ;;  %v728_v11 = vadd.f32 %v727_v47, %v5687_v12 }
 0x1d4   : > { %v729_v37 = vpop.f32.mrf.mxu0  ;;  %v2293_v16 = vsel %vm1911_vm3, %v2290_v51, %v2292_v21 }
 0x1d5   : > { %v730_v47 = vadd.f32 %v729_v37, %v5696_v20  ;;  %v6047_v20 = vpop.f32.mrf.mxu1 }
 0x1d6   : > { %4777 = vmatmul.msk.bf16.gmra.mxu2 %vm513_vm2, %v2291_v46  ;;  %v1603_v46 = vor.u32 %v1602_v33, %v1599_v17  ;;  %7394 = vst [vmem:[#allocation49_spill] sm:$0xff] %v6047_v20 }
 0x1d8   : > { %v1604_v58 = vsel %vm1542_vm5, %v1594_v5, %v1603_v46 }
 0x1dc   : > { %v924_v24 = vpop.f32.mrf.mxu0  ;;  %4799 = vmatmul.msk.bf16.gmra.mxu3 %vm513_vm2, %v2587_v10 }
 0x1dd   : > { %v1014_v48 = vadd.f32 %v924_v24, %v723_v4  ;;  %v2592_v4 = vshll.u32 %v5237_v15, 16  ;;  %v2591_v24 = vrot.slane %v2589_v7, 2  ;;  %v6041_v7 = vld [vmem:[%s5563_s7 + $0x58] sm:$0xff] }
 0x1de   : > { %7392 = vst [vmem:[#allocation47_spill] sm:$0xff] %v6041_v7  ;;  %v2294_v37 = vrot.slane %v6041_v7, 2 }
 0x1df   : > { %4663 = vmatmul.msk.bf16.gmra.mxu0 %vm513_vm2, %v1595_v19  ;;  %v2594_v1 = vrot.slane %v2592_v4, 3  ;;  %v6043_v4 = vpop.f32.mrf.mxu2 }
 0x1e0   : > { %4687 = vmatmul.msk.bf16.gmra.mxu1 %vm513_vm2, %v1926_v52  ;;  %v1927_v52 = vrot.slane %v5218_v56, 2  ;;  %7393 = vst [vmem:[#allocation48_spill] sm:$0xff] %v6043_v4 }
 0x1e1   : > { %v2595_v10 = vor.u32 %v2594_v1, %v2591_v24 }
 0x1e2   : > { %v1928_v12 = vsel %vm1911_vm3, %v1925_v43, %v1927_v52  ;;  %v2601_v43 = vshll.u32 %v6041_v7, 16 }
 0x1e3   : > { %v2596_v17 = vsel %vm2516_vm4, %v2586_v2, %v2595_v10  ;;  %v2598_v2 = vshrl.u32 %v6041_v7, 16  ;;  %v5220_v7 = vld [vmem:[%s5563_s7 + $0x58] sm:$0xff] }
 0x1e4   : > { %v926_v22 = vpop.f32.mrf.mxu0  ;;  %v1633_v13 = vshrl.u32 %v5220_v7, 16 }
 0x1e5   : > { %v1015_v27 = vadd.f32 %v926_v22, %v725_v57  ;;  %v1606_v57 = vshrl.u32 %v5217_v62, 16  ;;  %v1609_v22 = vshll.u32 %v5217_v62, 16  ;;  %v2600_v24 = vrot.slane %v2598_v2, 2 }
 0x1e6   : > { %4778 = vmatmul.msk.bf16.gmra.mxu2 %vm513_vm2, %v2293_v16  ;;  %v5219_v16 = vld [vmem:[%s5563_s7 + $0x50] sm:$0xff] }
 0x1e7   : > { %v1608_v33 = vrot.slane %v1606_v57, 1  ;;  %v1611_v51 = vrot.slane %v1609_v22, 2  ;;  %v1624_v4 = vshrl.u32 %v5219_v16, 16  ;;  %v1627_v20 = vshll.u32 %v5219_v16, 16 }
 0x1e9   : > { %v1612_v62 = vor.u32 %v1611_v51, %v1608_v33  ;;  %v1629_v35 = vrot.slane %v1627_v20, 2 }
 0x1ec   : > { %v929_v19 = vpop.f32.mrf.mxu0  ;;  %4800 = vmatmul.msk.bf16.gmra.mxu3 %vm513_vm2, %v2596_v17  ;;  %v1929_v17 = vrot.slane %v5219_v16, 2  ;;  %v6094_v16 = vld [vmem:[%s5563_s7 + $0x68] sm:$0xff] }
 0x1ed   : > { %v1016_v36 = vadd.f32 %v929_v19, %v728_v11  ;;  %v2603_v11 = vrot.slane %v2601_v43, 3  ;;  %v1613_v19 = vsel %vm1542_vm5, %v1603_v46, %v1612_v62  ;;  %7397 = vst [vmem:[#allocation52_spill] sm:$0xff] %v6094_v16 }
 0x1ef   : > { %4664 = vmatmul.msk.bf16.gmra.mxu0 %vm513_vm2, %v1604_v58  ;;  %v2295_v58 = vsel %vm1911_vm3, %v2292_v21, %v2294_v37  ;;  %v2604_v22 = vor.u32 %v2603_v11, %v2600_v24  ;;  %v1930_v21 = vsel %vm1911_vm3, %v1927_v52, %v1929_v17  ;;  %v6068_v24 = vld [vmem:[%s5563_s7 + $0x60] sm:$0xff] }
 0x1f0   : > { %4688 = vmatmul.msk.bf16.gmra.mxu1 %vm513_vm2, %v1928_v12  ;;  %v6057_v12 = vpop.f32.mrf.mxu3  ;;  %7396 = vst [vmem:[#allocation51_spill] sm:$0xff] %v6068_v24  ;;  %v2610_v52 = vshll.u32 %v6068_v24, 16 }
 0x1f1   : > { %7395 = vst [vmem:[#allocation50_spill] sm:$0xff] %v6057_v12  ;;  %v2605_v46 = vsel %vm2516_vm4, %v2595_v10, %v2604_v22  ;;  %v2607_v10 = vshrl.u32 %v6068_v24, 16 }
 0x1f4   : > { %v931_v5 = vpop.f32.mrf.mxu0 }
 0x1f5   : > { %v6036_v15 = vadd.f32 %v931_v5, %v730_v47  ;;  %v1615_v47 = vshrl.u32 %v5218_v56, 16  ;;  %v1618_v5 = vshll.u32 %v5218_v56, 16 }
 0x1f6   : > { %4779 = vmatmul.msk.bf16.gmra.mxu2 %vm513_vm2, %v2295_v58 }
 0x1f7   : > { %v1617_v2 = vrot.slane %v1615_v47, 1  ;;  %v1620_v43 = vrot.slane %v1618_v5, 2  ;;  %v2296_v47 = vrot.slane %v6068_v24, 2  ;;  %v2612_v5 = vrot.slane %v2610_v52, 3 }
 0x1f9   : > { %v6059_v33 = vpop.f32.mrf.mxu2  ;;  %v1621_v56 = vor.u32 %v1620_v43, %v1617_v2  ;;  %v1931_v43 = vrot.slane %v5220_v7, 2 }
 0x1fc   : > { %v1283_v1 = vpop.f32.mrf.mxu0  ;;  %4801 = vmatmul.msk.bf16.gmra.mxu3 %vm513_vm2, %v2605_v46  ;;  %v1622_v46 = vsel %vm1542_vm5, %v1612_v62, %v1621_v56 }
 0x1fd   : > { %v6053_v57 = vadd.f32 %v1283_v1, %v1014_v48  ;;  %v2018_v51 = vpop.f32.mrf.mxu1 }
 0x1ff   : > { %4665 = vmatmul.msk.bf16.gmra.mxu0 %vm513_vm2, %v1613_v19  ;;  %v2756_v11 = vpop.f32.mrf.mxu3 }
 0x200   : > { %4689 = vmatmul.msk.bf16.gmra.mxu1 %vm513_vm2, %v1930_v21  ;;  %v2297_v21 = vsel %vm1911_vm3, %v2294_v37, %v2296_v47  ;;  %v1932_v37 = vsel %vm1911_vm3, %v1929_v17, %v1931_v43 }
 0x201   : > { %v6070_v19 = vpop.f32.mrf.mxu2 }
 0x204   : > { %v1285_v48 = vpop.f32.mrf.mxu0 }
 0x205   : > { %v6063_v1 = vadd.f32 %v1285_v48, %v1015_v27  ;;  %v2020_v58 = vpop.f32.mrf.mxu1  ;;  %v2609_v27 = vrot.slane %v2607_v10, 2 }
 0x206   : > { %4780 = vmatmul.msk.bf16.gmra.mxu2 %vm513_vm2, %v2297_v21 }
 0x207   : > { %v2613_v2 = vor.u32 %v2612_v5, %v2609_v27  ;;  %v2758_v24 = vpop.f32.mrf.mxu3 }
 0x209   : > { %v6082_v10 = vpop.f32.mrf.mxu2  ;;  %v2614_v62 = vsel %vm2516_vm4, %v2604_v22, %v2613_v2  ;;  %v2616_v22 = vshrl.u32 %v6094_v16, 16 }
 0x20b   : > { %v2618_v17 = vrot.slane %v2616_v22, 2 }
 0x20c   : > { %v1288_v48 = vpop.f32.mrf.mxu0  ;;  %4802 = vmatmul.msk.bf16.gmra.mxu3 %vm513_vm2, %v2614_v62 }
 0x20d   : > { %v6078_v12 = vadd.f32 %v1288_v48, %v1016_v36  ;;  %v6084_v52 = vpop.f32.mrf.mxu1  ;;  %v1626_v48 = vrot.slane %v1624_v4, 1  ;;  %v2619_v4 = vshll.u32 %v6094_v16, 16 }
 0x20f   : > { %4666 = vmatmul.msk.bf16.gmra.mxu0 %vm513_vm2, %v1622_v46  ;;  %v1630_v5 = vor.u32 %v1629_v35, %v1626_v48  ;;  %v6096_v46 = vpop.f32.mrf.mxu3  ;;  %v5221_v35 = vld [vmem:[%s5563_s7 + $0x60] sm:$0xff] }
 0x210   : > { %4690 = vmatmul.msk.bf16.gmra.mxu1 %vm513_vm2, %v1932_v37  ;;  %v1933_v42 = vrot.slane %v5221_v35, 2 }
 0x211   : > { %v6098_v21 = vpop.f32.mrf.mxu2  ;;  %v1631_v37 = vsel %vm1542_vm5, %v1621_v56, %v1630_v5 }
 0x214   : > { %v1290_v36 = vpop.f32.mrf.mxu0 }
 0x215   : > { %v6089_v27 = vadd.f32 %v1290_v36, %v6036_v15  ;;  %v6102_v20 = vpop.f32.mrf.mxu1  ;;  %v2298_v15 = vrot.slane %v6094_v16, 2  ;;  %v2621_v36 = vrot.slane %v2619_v4, 3  ;;  %v1636_v16 = vshll.u32 %v5220_v7, 16  ;;  %v6124_v7 = vld [vmem:[%s5563_s7 + $0x70] sm:$0xff] }
 0x216   : > { %7398 = vst [vmem:[#allocation53_spill] sm:$0xff] %v6124_v7 }
 0x217   : > { %v2299_v40 = vsel %vm1911_vm3, %v2296_v47, %v2298_v15  ;;  %v2622_v25 = vor.u32 %v2621_v36, %v2618_v17  ;;  %v2763_v22 = vpop.f32.mrf.mxu3  ;;  %v1638_v36 = vrot.slane %v1636_v16, 2  ;;  %v2300_v16 = vrot.slane %v6124_v7, 2 }
 0x218   : > { %4781 = vmatmul.msk.bf16.gmra.mxu2 %vm513_vm2, %v2299_v40 }
 0x219   : > { %v6111_v4 = vpop.f32.mrf.mxu2  ;;  %v2623_v47 = vsel %vm2516_vm4, %v2613_v2, %v2622_v25 }
 0x21c   : > { %v1778_v62 = vpop.f32.mrf.mxu0  ;;  %4803 = vmatmul.msk.bf16.gmra.mxu3 %vm513_vm2, %v2623_v47 }
 0x21d   : > { %v1868_v48 = vadd.f32 %v1778_v62, %v6053_v57  ;;  %v6114_v44 = vpop.f32.mrf.mxu1  ;;  %v1934_v57 = vsel %vm1911_vm3, %v1931_v43, %v1933_v42 }
 0x21f   : > { %v2108_v28 = vadd.f32 %v2018_v51, %v1868_v48  ;;  %4667 = vmatmul.msk.bf16.gmra.mxu0 %vm513_vm2, %v1631_v37  ;;  %v1635_v51 = vrot.slane %v1633_v13, 1  ;;  %v6126_v37 = vpop.f32.mrf.mxu3  ;;  %v2628_v13 = vshll.u32 %v6124_v7, 16 }
 0x220   : > { %4691 = vmatmul.msk.bf16.gmra.mxu1 %vm513_vm2, %v1934_v57 }
 0x221   : > { %v2473_v56 = vadd.f32 %v6059_v33, %v2108_v28  ;;  %v1639_v33 = vor.u32 %v1638_v36, %v1635_v51  ;;  %v6128_v2 = vpop.f32.mrf.mxu2  ;;  %v2630_v47 = vrot.slane %v2628_v13, 3  ;;  %v5222_v51 = vld [vmem:[%s5563_s7 + $0x68] sm:$0xff] }
 0x223   : > { %v6118_v40 = vadd.f32 %v2756_v11, %v2473_v56  ;;  %v2625_v11 = vshrl.u32 %v6124_v7, 16  ;;  %v1640_v57 = vsel %vm1542_vm5, %v1630_v5, %v1639_v33 }
 0x224   : > { %v1780_v17 = vpop.f32.mrf.mxu0 }
 0x225   : > { %v1869_v62 = vadd.f32 %v1780_v17, %v6063_v1  ;;  %v6133_v1 = vpop.f32.mrf.mxu1  ;;  %v2627_v48 = vrot.slane %v2625_v11, 2  ;;  %v2301_v17 = vsel %vm1911_vm3, %v2298_v15, %v2300_v16  ;;  %v1645_v11 = vshll.u32 %v5221_v35, 16 }
 0x227   : > { %v2109_v28 = vadd.f32 %v2020_v58, %v1869_v62  ;;  %v2631_v62 = vor.u32 %v2630_v47, %v2627_v48  ;;  %v2768_v13 = vpop.f32.mrf.mxu3 }
 0x228   : > { %4782 = vmatmul.msk.bf16.gmra.mxu2 %vm513_vm2, %v2301_v17 }
 0x229   : > { %v2474_v43 = vadd.f32 %v6070_v19, %v2109_v28  ;;  %v1935_v19 = vrot.slane %v5222_v51, 2 }
 0x22b   : > { %v6136_v56 = vadd.f32 %v2758_v24, %v2474_v43  ;;  %v1642_v24 = vshrl.u32 %v5221_v35, 16  ;;  %v6145_v43 = vpop.f32.mrf.mxu2  ;;  %v6159_v35 = vld [vmem:[%s5563_s7 + $0x78] sm:$0xff] }
 0x22c   : > { %v1783_v58 = vpop.f32.mrf.mxu0  ;;  %7399 = vst [vmem:[#allocation54_spill] sm:$0xff] %v6159_v35 }
 0x22d   : > { %v1870_v36 = vadd.f32 %v1783_v58, %v6078_v12  ;;  %v6148_v15 = vpop.f32.mrf.mxu1  ;;  %v2632_v12 = vsel %vm2516_vm4, %v2622_v25, %v2631_v62  ;;  %v1936_v58 = vsel %vm1911_vm3, %v1933_v42, %v1935_v19  ;;  %v1644_v47 = vrot.slane %v1642_v24, 1 }
 0x22e   : > { %4804 = vmatmul.msk.bf16.gmra.mxu3 %vm513_vm2, %v2632_v12 }
 0x22f   : > { %v2110_v28 = vadd.f32 %v6084_v52, %v1870_v36  ;;  %4668 = vmatmul.msk.bf16.gmra.mxu0 %vm513_vm2, %v1640_v57  ;;  %v1647_v57 = vrot.slane %v1645_v11, 2  ;;  %v6162_v36 = vpop.f32.mrf.mxu3  ;;  %v2302_v11 = vrot.slane %v6159_v35, 2 }
 0x230   : > { %4692 = vmatmul.msk.bf16.gmra.mxu1 %vm513_vm2, %v1936_v58 }
 0x231   : > { %v2475_v5 = vadd.f32 %v6082_v10, %v2110_v28  ;;  %v1648_v25 = vor.u32 %v1647_v57, %v1644_v47  ;;  %v2637_v28 = vshll.u32 %v6159_v35, 16  ;;  %v2303_v47 = vsel %vm1911_vm3, %v2300_v16, %v2302_v11  ;;  %v5223_v57 = vld [vmem:[%s5563_s7 + $0x70] sm:$0xff] }
 0x233   : > { %v6153_v48 = vadd.f32 %v6096_v46, %v2475_v5  ;;  %v6164_v42 = vpop.f32.mrf.mxu2  ;;  %v2634_v46 = vshrl.u32 %v6159_v35, 16  ;;  %v2639_v58 = vrot.slane %v2637_v28, 3 }
 0x234   : > { %v1785_v52 = vpop.f32.mrf.mxu0 }
 0x235   : > { %v1871_v17 = vadd.f32 %v1785_v52, %v6089_v27  ;;  %v6169_v24 = vpop.f32.mrf.mxu1  ;;  %v2636_v5 = vrot.slane %v2634_v46, 2  ;;  %v1649_v52 = vsel %vm1542_vm5, %v1639_v33, %v1648_v25  ;;  %v1654_v46 = vshll.u32 %v5222_v51, 16 }
 0x237   : > { %v2111_v10 = vadd.f32 %v6102_v20, %v1871_v17  ;;  %v2640_v7 = vor.u32 %v2639_v58, %v2636_v5  ;;  %v2773_v28 = vpop.f32.mrf.mxu3 }
 0x238   : > { %4783 = vmatmul.msk.bf16.gmra.mxu2 %vm513_vm2, %v2303_v47 }
 0x239   : > { %v2476_v27 = vadd.f32 %v6098_v21, %v2111_v10  ;;  %v1937_v21 = vrot.slane %v5223_v57, 2 }
 0x23b   : > { %v6172_v12 = vadd.f32 %v2763_v22, %v2476_v27  ;;  %v1651_v22 = vshrl.u32 %v5222_v51, 16  ;;  %v6181_v27 = vpop.f32.mrf.mxu2  ;;  %v6195_v51 = vld [vmem:[%s5563_s7 + $0x80] sm:$0xff] }
 0x23c   : > { %v1788_v20 = vpop.f32.mrf.mxu0  ;;  %7400 = vst [vmem:[#allocation55_spill] sm:$0xff] %v6195_v51 }
 0x23d   : > { %v1872_v17 = vadd.f32 %v1788_v20, %v5712_v39  ;;  %v6184_v16 = vpop.f32.mrf.mxu1  ;;  %v2641_v39 = vsel %vm2516_vm4, %v2631_v62, %v2640_v7  ;;  %v1938_v20 = vsel %vm1911_vm3, %v1935_v19, %v1937_v21  ;;  %v1653_v58 = vrot.slane %v1651_v22, 1 }
 0x23e   : > { %4805 = vmatmul.msk.bf16.gmra.mxu3 %vm513_vm2, %v2641_v39 }
 0x23f   : > { %v2112_v10 = vadd.f32 %v6114_v44, %v1872_v17  ;;  %4669 = vmatmul.msk.bf16.gmra.mxu0 %vm513_vm2, %v1649_v52  ;;  %v1656_v52 = vrot.slane %v1654_v46, 2  ;;  %v6198_v17 = vpop.f32.mrf.mxu3  ;;  %v2304_v46 = vrot.slane %v6195_v51, 2 }
 0x240   : > { %4693 = vmatmul.msk.bf16.gmra.mxu1 %vm513_vm2, %v1938_v20 }
 0x241   : > { %v2477_v33 = vadd.f32 %v6111_v4, %v2112_v10  ;;  %v1657_v62 = vor.u32 %v1656_v52, %v1653_v58  ;;  %v2646_v10 = vshll.u32 %v6195_v51, 16  ;;  %v2305_v58 = vsel %vm1911_vm3, %v2302_v11, %v2304_v46  ;;  %v5224_v52 = vld [vmem:[%s5563_s7 + $0x78] sm:$0xff] }
 0x243   : > { %v6189_v5 = vadd.f32 %v6126_v37, %v2477_v33  ;;  %v6200_v19 = vpop.f32.mrf.mxu2  ;;  %v2643_v37 = vshrl.u32 %v6195_v51, 16  ;;  %v2648_v20 = vrot.slane %v2646_v10, 3 }
 0x244   : > { %v1790_v44 = vpop.f32.mrf.mxu0 }
 0x245   : > { %v1873_v47 = vadd.f32 %v1790_v44, %v5721_v55  ;;  %v6205_v22 = vpop.f32.mrf.mxu1  ;;  %v2645_v33 = vrot.slane %v2643_v37, 2  ;;  %v1658_v44 = vsel %vm1542_vm5, %v1648_v25, %v1657_v62  ;;  %v1663_v37 = vshll.u32 %v5223_v57, 16 }
 0x247   : > { %v2113_v4 = vadd.f32 %v6133_v1, %v1873_v47  ;;  %v2649_v35 = vor.u32 %v2648_v20, %v2645_v33  ;;  %v2778_v10 = vpop.f32.mrf.mxu3 }
 0x248   : > { %4784 = vmatmul.msk.bf16.gmra.mxu2 %vm513_vm2, %v2305_v58 }
 0x249   : > { %v2478_v55 = vadd.f32 %v6128_v2, %v2113_v4  ;;  %v1939_v2 = vrot.slane %v5224_v52, 2  ;;  %v2650_v11 = vsel %vm2516_vm4, %v2640_v7, %v2649_v35 }
 0x24b   : > { %v6208_v39 = vadd.f32 %v2768_v13, %v2478_v55  ;;  %v1660_v13 = vshrl.u32 %v5223_v57, 16  ;;  %v6221_v51 = vpop.f32.mrf.mxu2 }
 0x24c   : > { %v1793_v1 = vpop.f32.mrf.mxu0 }
 0x24d   : > { %v1874_v47 = vadd.f32 %v1793_v1, %v5731_v6  ;;  %v6218_v25 = vpop.f32.mrf.mxu1  ;;  %v1940_v6 = vsel %vm1911_vm3, %v1937_v21, %v1939_v2  ;;  %v1662_v20 = vrot.slane %v1660_v13, 1  ;;  %v1665_v1 = vrot.slane %v1663_v37, 2 }
 0x24e   : > { %4806 = vmatmul.msk.bf16.gmra.mxu3 %vm513_vm2, %v2650_v11 }
 0x24f   : > { %v2114_v4 = vadd.f32 %v6148_v15, %v1874_v47  ;;  %4670 = vmatmul.msk.bf16.gmra.mxu0 %vm513_vm2, %v1658_v44  ;;  %v1666_v57 = vor.u32 %v1665_v1, %v1662_v20  ;;  %v6234_v58 = vpop.f32.mrf.mxu3  ;;  %v5225_v20 = vld [vmem:[%s5563_s7 + $0x80] sm:$0xff] }
 0x250   : > { %4694 = vmatmul.msk.bf16.gmra.mxu1 %vm513_vm2, %v1940_v6 }
 0x251   : > { %v2479_v55 = vadd.f32 %v6145_v43, %v2114_v4  ;;  %v6231_v43 = vld [vmem:[%s5563_s7 + $0x88] sm:$0xff] }
 0x252   : > { %v2655_v21 = vshll.u32 %v6231_v43, 16 }
 0x253   : > { %v6225_v33 = vadd.f32 %v6162_v36, %v2479_v55  ;;  %v2652_v36 = vshrl.u32 %v6231_v43, 16  ;;  %v6245_v6 = vpop.f32.mrf.mxu2 }
 0x254   : > { %v1795_v15 = vpop.f32.mrf.mxu0  ;;  %v2657_v55 = vrot.slane %v2655_v21, 3 }
 0x255   : > { %v1875_v44 = vadd.f32 %v1795_v15, %v5740_v31  ;;  %v6239_v4 = vpop.f32.mrf.mxu1  ;;  %v2306_v31 = vrot.slane %v6231_v43, 2  ;;  %v2654_v13 = vrot.slane %v2652_v36, 2  ;;  %v1672_v36 = vshll.u32 %v5224_v52, 16 }
 0x257   : > { %v2115_v7 = vadd.f32 %v6169_v24, %v1875_v44  ;;  %v1667_v24 = vsel %vm1542_vm5, %v1657_v62, %v1666_v57  ;;  %v2307_v15 = vsel %vm1911_vm3, %v2304_v46, %v2306_v31  ;;  %v1941_v44 = vrot.slane %v5225_v20, 2  ;;  %v2783_v21 = vpop.f32.mrf.mxu3 }
 0x258   : > { %4785 = vmatmul.msk.bf16.gmra.mxu2 %vm513_vm2, %v2307_v15 }
 0x259   : > { %v2480_v47 = vadd.f32 %v6164_v42, %v2115_v7  ;;  %v2658_v42 = vor.u32 %v2657_v55, %v2654_v13  ;;  %v1942_v46 = vsel %vm1911_vm3, %v1939_v2, %v1941_v44  ;;  %v1674_v55 = vrot.slane %v1672_v36, 2 }
 0x25b   : > { %v6242_v37 = vadd.f32 %v2773_v28, %v2480_v47  ;;  %v1669_v28 = vshrl.u32 %v5224_v52, 16  ;;  %v2659_v47 = vsel %vm2516_vm4, %v2649_v35, %v2658_v42  ;;  %v6267_v35 = vld [vmem:[%s5563_s7 + $0x90] sm:$0xff] }
 0x25c   : > { %v1798_v11 = vpop.f32.mrf.mxu0 }
 0x25d   : > { %v1876_v1 = vadd.f32 %v1798_v11, %v5750_v38  ;;  %v1671_v13 = vrot.slane %v1669_v28, 1  ;;  %v6259_v15 = vpop.f32.mrf.mxu1 }
 0x25e   : > { %4807 = vmatmul.msk.bf16.gmra.mxu3 %vm513_vm2, %v2659_v47 }
 0x25f   : > { %v2116_v7 = vadd.f32 %v6184_v16, %v1876_v1  ;;  %4671 = vmatmul.msk.bf16.gmra.mxu0 %vm513_vm2, %v1667_v24  ;;  %v6270_v2 = vpop.f32.mrf.mxu3  ;;  %v2661_v24 = vshrl.u32 %v6267_v35, 16  ;;  %v2664_v1 = vshll.u32 %v6267_v35, 16 }
 0x260   : > { %4695 = vmatmul.msk.bf16.gmra.mxu1 %vm513_vm2, %v1942_v46 }
 0x261   : > { %v2481_v62 = vadd.f32 %v6181_v27, %v2116_v7  ;;  %v6264_v27 = vpop.f32.mrf.mxu2  ;;  %v2308_v7 = vrot.slane %v6267_v35, 2  ;;  %v2663_v28 = vrot.slane %v2661_v24, 2  ;;  %v1681_v24 = vshll.u32 %v5225_v20, 16 }
 0x263   : > { %v6257_v38 = vadd.f32 %v6198_v17, %v2481_v62  ;;  %v1675_v17 = vor.u32 %v1674_v55, %v1671_v13  ;;  %v2666_v62 = vrot.slane %v2664_v1, 3 }
 0x264   : > { %v1800_v11 = vpop.f32.mrf.mxu0 }
 0x265   : > { %v1877_v16 = vadd.f32 %v1800_v11, %v5761_v41  ;;  %v1676_v46 = vsel %vm1542_vm5, %v1666_v57, %v1675_v17  ;;  %v5226_v11 = vld [vmem:[%s5563_s7 + $0x88] sm:$0xff]  ;;  %v6283_v55 = vpop.f32.mrf.mxu1 }
 0x267   : > { %v2117_v52 = vadd.f32 %v6205_v22, %v1877_v16  ;;  %v2309_v22 = vsel %vm1911_vm3, %v2306_v31, %v2308_v7  ;;  %v2667_v16 = vor.u32 %v2666_v62, %v2663_v28  ;;  %v6290_v31 = vpop.f32.mrf.mxu3 }
 0x268   : > { %4786 = vmatmul.msk.bf16.gmra.mxu2 %vm513_vm2, %v2309_v22 }
 0x269   : > { %v2482_v41 = vadd.f32 %v6200_v19, %v2117_v52  ;;  %v1943_v19 = vrot.slane %v5226_v11, 2  ;;  %v6287_v1 = vpop.f32.mrf.mxu2 }
 0x26b   : > { %v6276_v36 = vadd.f32 %v2778_v10, %v2482_v41  ;;  %v1678_v10 = vshrl.u32 %v5225_v20, 16  ;;  %v1944_v41 = vsel %vm1911_vm3, %v1941_v44, %v1943_v19  ;;  %v6301_v20 = vld [vmem:[%s5563_s7 + $0x98] sm:$0xff] }
 0x26c   : > { %v1803_v47 = vpop.f32.mrf.mxu0  ;;  %7401 = vst [vmem:[#allocation56_spill] sm:$0xff] %v6301_v20  ;;  %v2673_v44 = vshll.u32 %v6301_v20, 16 }
 0x26d   : > { %v1878_v13 = vadd.f32 %v1803_v47, %v5775_v14  ;;  %v2668_v14 = vsel %vm2516_vm4, %v2658_v42, %v2667_v16  ;;  %v1683_v47 = vrot.slane %v1681_v24, 2  ;;  %v6304_v22 = vpop.f32.mrf.mxu1  ;;  %v755_v24 = vadd.f32 %v5754_v49, %v5802_v54 }
 0x26e   : > { %4808 = vmatmul.msk.bf16.gmra.mxu3 %vm513_vm2, %v2668_v14  ;;  %v1687_v54 = vshrl.u32 %v5226_v11, 16 }
 0x26f   : > { %v2118_v52 = vadd.f32 %v6218_v25, %v1878_v13  ;;  %4672 = vmatmul.msk.bf16.gmra.mxu0 %vm513_vm2, %v1676_v46  ;;  %v1680_v25 = vrot.slane %v1678_v10, 1  ;;  %v1027_v49 = vadd.f32 %v5763_v45, %v755_v24 }
 0x270   : > { %4696 = vmatmul.msk.bf16.gmra.mxu1 %vm513_vm2, %v1944_v41 }
 0x271   : > { %v2483_v57 = vadd.f32 %v6221_v51, %v2118_v52  ;;  %v1684_v42 = vor.u32 %v1683_v47, %v1680_v25  ;;  %v6309_v52 = vpop.f32.mrf.mxu2 }
 0x273   : > { %v6295_v28 = vadd.f32 %v6234_v58, %v2483_v57  ;;  %v2670_v58 = vshrl.u32 %v6301_v20, 16  ;;  %v1685_v41 = vsel %vm1542_vm5, %v1675_v17, %v1684_v42 }
 0x274   : > { %v1805_v62 = vpop.f32.mrf.mxu0 }
 0x275   : > { %v1879_v46 = vadd.f32 %v1805_v62, %v5786_v9  ;;  %v2310_v9 = vrot.slane %v6301_v20, 2  ;;  %v2672_v10 = vrot.slane %v2670_v58, 2  ;;  %v6317_v62 = vpop.f32.mrf.mxu3  ;;  %v6327_v17 = vpop.f32.mrf.mxu1 }
 0x277   : > { %v2119_v51 = vadd.f32 %v6239_v4, %v1879_v46  ;;  %v2675_v4 = vrot.slane %v2673_v44, 3  ;;  %v2311_v25 = vsel %vm1911_vm3, %v2308_v7, %v2310_v9  ;;  %v1689_v44 = vrot.slane %v1687_v54, 1 }
 0x278   : > { %4787 = vmatmul.msk.bf16.gmra.mxu2 %vm513_vm2, %v2311_v25 }
 0x279   : > { %v2484_v13 = vadd.f32 %v6245_v6, %v2119_v51  ;;  %v5227_v6 = vld [vmem:[%s5563_s7 + $0x90] sm:$0xff]  ;;  %v2676_v46 = vor.u32 %v2675_v4, %v2672_v10  ;;  %v2509_v10 = vld [vmem:[%s5563_s7 + $0xa0] sm:$0x3] }
 0x27a   : > { %v1945_v51 = vrot.slane %v5227_v6, 2  ;;  %v2514_v45 = vunpack.c.l.b16 %v2509_v10 }
 0x27b   : > { %v6314_v57 = vadd.f32 %v2783_v21, %v2484_v13  ;;  %v1690_v21 = vshll.u32 %v5226_v11, 16  ;;  %v2677_v7 = vsel %vm2516_vm4, %v2667_v16, %v2676_v46  ;;  %v2180_v11 = vld [vmem:[%s5563_s7 + $0xa0] sm:$0x1] }
 0x27c   : > { %v1808_v14 = vpop.f32.mrf.mxu0  ;;  %v1946_v58 = vsel %vm1911_vm3, %v1943_v19, %v1945_v51  ;;  %v2257_v19 = vunpack.c.l.b16 %v2180_v11  ;;  %v6343_v25 = vpack.c.b16 %v2514_v45, %v2514_v45 }
 0x27d   : > { %v6322_v47 = vadd.f32 %v1808_v14, %v5800_v50  ;;  %v1386_v50 = vadd.f32 %v5765_v63, %v1027_v49  ;;  %v1692_v13 = vrot.slane %v1690_v21, 2  ;;  %v6333_v14 = vpop.f32.mrf.mxu2  ;;  %v6341_v16 = vpop.f32.mrf.mxu3 }
 0x27e   : > { %7402 = vst [vmem:[#allocation57_spill] sm:$0xff] %v6333_v14  ;;  %4809 = vmatmul.msk.bf16.gmra.mxu3 %vm513_vm2, %v2677_v7  ;;  %v2276_v49 = vpack.c.b16 %v2257_v19, %v2257_v19  ;;  %v2679_v21 = vshrl.u32 %v6343_v25, 16  ;;  %v2682_v10 = vshll.u32 %v6343_v25, 16  ;;  %v760_v7 = vadd.f32 %v5779_v26, %v5821_v8 }
 0x27f   : > { %4673 = vmatmul.msk.bf16.gmra.mxu0 %vm513_vm2, %v1685_v41  ;;  %v1445_v41 = vld [vmem:[%s5563_s7 + $0x98] sm:$0x1]  ;;  %7403 = vst [vmem:[#allocation58_spill] sm:$0xff] %v6341_v16  ;;  %v1693_v63 = vor.u32 %v1692_v13, %v1689_v44  ;;  %v2058_v16 = vpop.f32.mrf.mxu1  ;;  %v1696_v26 = vshrl.u32 %v5227_v6, 16  ;;  %v1699_v8 = vshll.u32 %v5227_v6, 16 }
 0x280   : > { %4697 = vmatmul.msk.bf16.gmra.mxu1 %vm513_vm2, %v1946_v58  ;;  %v1522_v54 = vunpack.c.l.b16 %v1445_v41  ;;  %v2684_v20 = vrot.slane %v2682_v10, 3 }
 0x281   : > { %v1694_v14 = vsel %vm1542_vm5, %v1684_v42, %v1693_v63  ;;  %v1698_v10 = vrot.slane %v1696_v26, 1 }
 0x282   : > { %v1541_v11 = vpack.c.b16 %v1522_v54, %v1522_v54 }
 0x284   : > { %v1810_v4 = vpop.f32.mrf.mxu0  ;;  %v1947_v19 = vrot.slane %v1541_v11, 2 }
 0x285   : > { %v6335_v24 = vadd.f32 %v1810_v4, %v1386_v50  ;;  %v2312_v50 = vrot.slane %v2276_v49, 2  ;;  %v2681_v4 = vrot.slane %v2679_v21, 2  ;;  %v2423_v13 = vpop.f32.mrf.mxu2  ;;  %v1029_v49 = vadd.f32 %v5788_v23, %v760_v7  ;;  %v2796_v21 = vpop.f32.mrf.mxu3 }
 0x287   : > { %v2313_v45 = vsel %vm1911_vm3, %v2310_v9, %v2312_v50  ;;  %v2685_v41 = vor.u32 %v2684_v20, %v2681_v4  ;;  %v1948_v9 = vsel %vm1911_vm3, %v1945_v51, %v1947_v19  ;;  %v1388_v54 = vadd.f32 %v5790_v29, %v1029_v49  ;;  %v6364_v23 = vpop.f32.mrf.mxu1 }
 0x288   : > { %4788 = vmatmul.msk.bf16.gmra.mxu2 %vm513_vm2, %v2313_v45  ;;  %v1701_v50 = vrot.slane %v1699_v8, 2  ;;  %v765_v29 = vadd.f32 %v5806_v60, %v5835_v59  ;;  %v1705_v59 = vshll.u32 %v1541_v11, 16 }
 0x289   : > { %v2686_v42 = vsel %vm2516_vm4, %v2676_v46, %v2685_v41 }
 0x28a   : > { %v1702_v20 = vor.u32 %v1701_v50, %v1698_v10  ;;  %v1031_v45 = vadd.f32 %v5808_v61, %v765_v29  ;;  %v770_v61 = vadd.f32 %v5825_v34, %v5847_v18 }
 0x28c   : > { %v1813_v58 = vpop.f32.mrf.mxu0  ;;  %v1703_v4 = vsel %vm1542_vm5, %v1693_v63, %v1702_v20  ;;  %v1390_v8 = vadd.f32 %v5810_v3, %v1031_v45  ;;  %v1707_v63 = vrot.slane %v1705_v59, 2  ;;  %v1033_v11 = vadd.f32 %v5827_v30, %v770_v61  ;;  %v7407_v59 = vld [vmem:[#allocation16_spill] sm:$0xff] }
 0x28d   : > { %v6352_v44 = vadd.f32 %v1813_v58, %v5819_v0  ;;  %v6366_v6 = vpop.f32.mrf.mxu2  ;;  %v6368_v46 = vpop.f32.mrf.mxu3 }
 0x28e   : > { %4810 = vmatmul.msk.bf16.gmra.mxu3 %vm513_vm2, %v2686_v42 }
 0x28f   : > { %4674 = vmatmul.msk.bf16.gmra.mxu0 %vm513_vm2, %v1694_v14  ;;  %v5249_v14 = vld [vmem:[#allocation2 + $0x40] sm:$0xff]  ;;  %v2063_v19 = vpop.f32.mrf.mxu1 }
 0x290   : > { %4698 = vmatmul.msk.bf16.gmra.mxu1 %vm513_vm2, %v1948_v9  ;;  %2994 = vmatpush.bf16.msrb.mxu0 %v5249_v14 }
 0x294   : > { %v1815_v0 = vpop.f32.mrf.mxu0 }
 0x295   : > { %v6360_v58 = vadd.f32 %v1815_v0, %v1388_v54  ;;  %v2428_v26 = vpop.f32.mrf.mxu2  ;;  %v2801_v9 = vpop.f32.mrf.mxu3  ;;  %v1708_v0 = vsel %vm1542_vm5, %v1702_v20, %v1707_v63  ;;  %v7408_v63 = vld [vmem:[#allocation9_spill] sm:$0xff] }
 0x29c   : > { %v1818_v51 = vpop.f32.mrf.mxu0 }
 0x29d   : > { %v1884_v7 = vadd.f32 %v1818_v51, %v5833_v32  ;;  %v6381_v32 = vpop.f32.mrf.mxu1  ;;  %v6390_v10 = vpop.f32.mrf.mxu3  ;;  %v7404_v51 = vld [vmem:[#allocation8_spill] sm:$0xff] }
 0x29e   : > { %v1392_v34 = vadd.f32 %v7404_v51, %v1033_v11 }
 0x29f   : > { %v2124_v41 = vadd.f32 %v2058_v16, %v1884_v7  ;;  %4675 = vmatmul.msk.bf16.gmra.mxu0 %vm513_vm2, %v1703_v4  ;;  %v7405_v7 = vld [vmem:[#allocation28_spill] sm:$0xff] }
 0x2a0   : > { %v7406_v45 = vunpack.c.l.b16 %v7405_v7 }
 0x2a1   : > { %v2489_v49 = vadd.f32 %v2423_v13, %v2124_v41  ;;  %v6386_v13 = vpop.f32.mrf.mxu2 }
 0x2a3   : > { %v6377_v42 = vadd.f32 %v2796_v21, %v2489_v49  ;;  %v2882_v21 = vld [vmem:[%s5563_s7 + $0x10] sm:$0x8] }
 0x2a4   : > { %v1820_v60 = vpop.f32.mrf.mxu0  ;;  %v2887_v14 = vunpack.c.l.b16 %v2882_v21  ;;  %v7410_v21 = vld [vmem:[#allocation10_spill] sm:$0xff] }
 0x2a5   : > { %v6379_v54 = vadd.f32 %v1820_v60, %v1390_v8  ;;  %v2068_v4 = vpop.f32.mrf.mxu1  ;;  %v5417_v60 = vld [vmem:[%s5563_s7 + $0x18] sm:$0xff] }
 0x2a6   : > { %v2891_v30 = vrot.slane %v5417_v60, 3  ;;  %v5418_v60 = vld [vmem:[%s5563_s7 + $0x20] sm:$0xff] }
 0x2a9   : > { %v2433_v49 = vpop.f32.mrf.mxu2 }
 0x2ac   : > { %v1823_v16 = vpop.f32.mrf.mxu0 }
 0x2ad   : > { %v1886_v3 = vadd.f32 %v1823_v16, %v5845_v53  ;;  %v2888_v53 = vpack.c.b16 %v7406_v45, %v2887_v14  ;;  %v7409_v16 = vld [vmem:[#allocation15_spill] sm:$0xff] }
 0x2af   : > { %v2126_v50 = vadd.f32 %v2063_v19, %v1886_v3  ;;  %4676 = vmatmul.msk.bf16.gmra.mxu0 %vm513_vm2, %v1708_v0  ;;  %v2890_v8 = vrot.slane %v2888_v53, 3  ;;  %v2806_v19 = vpop.f32.mrf.mxu3  ;;  %v6406_v3 = vpop.f32.mrf.mxu1 }
 0x2b1   : > { %v2491_v29 = vadd.f32 %v2428_v26, %v2126_v50  ;;  %v775_v26 = vadd.f32 %v7408_v63, %v7407_v59  ;;  %v6410_v14 = vpop.f32.mrf.mxu2  ;;  %v2893_v59 = vrot.slane %v5418_v60, 3 }
 0x2b2   : > { %7411 = vst [vmem:[#allocation8_spill] sm:$0xff] %v6410_v14 }
 0x2b3   : > { %v6395_v18 = vadd.f32 %v2801_v9, %v2491_v29  ;;  %v2892_v9 = vsel %vm2889_vm6, %v2890_v8, %v2891_v30  ;;  %v1035_v11 = vadd.f32 %v7410_v21, %v775_v26  ;;  %v7414_v26 = vld [vmem:[#allocation20_spill] sm:$0xff] }
 0x2b4   : > { %v1825_v20 = vpop.f32.mrf.mxu0 }
 0x2b5   : > { %v6399_v41 = vadd.f32 %v1825_v20, %v1392_v34  ;;  %v7413_v34 = vld [vmem:[#allocation11_spill] sm:$0xff] }
 0x2b6   : > { %v1394_v20 = vadd.f32 %v7413_v34, %v1035_v11  ;;  %v7417_v11 = vld [vmem:[#allocation13_spill] sm:$0xff] }
 0x2b7   : > { %v6412_v51 = vpop.f32.mrf.mxu3  ;;  %v2073_v8 = vpop.f32.mrf.mxu1 }
 0x2b8   : > { %7412 = vst [vmem:[#allocation28_spill] sm:$0xff] %v6412_v51 }
 0x2b9   : > { %v2438_v63 = vpop.f32.mrf.mxu2 }
 0x2bc   : > { %v1828_v61 = vpop.f32.mrf.mxu0 }
 0x2bd   : > { %v1888_v0 = vadd.f32 %v1828_v61, %v7409_v16 }
 0x2bf   : > { %v2128_v50 = vadd.f32 %v2068_v4, %v1888_v0  ;;  %4815 = vmatmul.msk.bf16.vlgmr.msrb.gmra.mxu0 %vm513_vm2, %v2892_v9  ;;  %v7415_v4 = vld [vmem:[#allocation12_spill] sm:$0xff]  ;;  %v2811_v16 = vpop.f32.mrf.mxu3  ;;  %v7416_v0 = vld [vmem:[#allocation18_spill] sm:$0xff]  ;;  %v6426_v34 = vpop.f32.mrf.mxu1 }
 0x2c0   : > { %v780_v61 = vadd.f32 %v7415_v4, %v7414_v26  ;;  %7418 = vst [vmem:[#allocation16_spill] sm:$0xff] %v6426_v34  ;;  %v5420_v34 = vld [vmem:[%s5563_s7 + $0x30] sm:$0xff] }
 0x2c1   : > { %v2493_v29 = vadd.f32 %v2433_v49, %v2128_v50  ;;  %v2894_v49 = vsel %vm2889_vm6, %v2891_v30, %v2893_v59  ;;  %v6431_v4 = vpop.f32.mrf.mxu2 }
 0x2c2   : > { %7421 = vst [vmem:[#allocation15_spill] sm:$0xff] %v6431_v4 }
 0x2c3   : > { %v6415_v7 = vadd.f32 %v2806_v19, %v2493_v29  ;;  %v1037_v19 = vadd.f32 %v7417_v11, %v780_v61  ;;  %v7424_v61 = vld [vmem:[#allocation23_spill] sm:$0xff] }
 0x2c4   : > { %v1830_v45 = vpop.f32.mrf.mxu0 }
 0x2c5   : > { %v6417_v53 = vadd.f32 %v1830_v45, %v1394_v20  ;;  %v7419_v20 = vld [vmem:[#allocation14_spill] sm:$0xff] }
 0x2c6   : > { %v1396_v45 = vadd.f32 %v7419_v20, %v1037_v19  ;;  %v7426_v19 = vld [vmem:[#allocation22_spill] sm:$0xff] }
 0x2c7   : > { %v6435_v30 = vpop.f32.mrf.mxu3 }
 0x2c8   : > { %7423 = vst [vmem:[#allocation11_spill] sm:$0xff] %v6435_v30  ;;  %v7428_v30 = vld [vmem:[#allocation21_spill] sm:$0xff] }
 0x2cc   : > { %v1833_v9 = vpop.f32.mrf.mxu0 }
 0x2cd   : > { %v1890_v21 = vadd.f32 %v1833_v9, %v7416_v0  ;;  %v5419_v9 = vld [vmem:[%s5563_s7 + $0x28] sm:$0xff] }
 0x2ce   : > { %v2895_v0 = vrot.slane %v5419_v9, 3 }
 0x2cf   : > { %v2130_v50 = vadd.f32 %v2073_v8, %v1890_v21  ;;  %4816 = vmatmul.msk.bf16.gmra.mxu0 %vm513_vm2, %v2894_v49  ;;  %v7425_v8 = vld [vmem:[#allocation17_spill] sm:$0xff]  ;;  %v2078_v21 = vpop.f32.mrf.mxu1 }
 0x2d0   : > { %v785_v49 = vadd.f32 %v7425_v8, %v7424_v61  ;;  %v2896_v11 = vsel %vm2889_vm6, %v2893_v59, %v2895_v0  ;;  %v2897_v59 = vrot.slane %v5420_v34, 3  ;;  %v5421_v34 = vld [vmem:[%s5563_s7 + $0x38] sm:$0xff] }
 0x2d1   : > { %v2495_v29 = vadd.f32 %v2438_v63, %v2130_v50  ;;  %v2443_v50 = vpop.f32.mrf.mxu2 }
 0x2d3   : > { %v6429_v60 = vadd.f32 %v2811_v16, %v2495_v29  ;;  %v7427_v29 = vld [vmem:[#allocation19_spill] sm:$0xff] }
 0x2d4   : > { %v1835_v26 = vpop.f32.mrf.mxu0  ;;  %v1039_v20 = vadd.f32 %v7427_v29, %v785_v49  ;;  %v2898_v49 = vsel %vm2889_vm6, %v2895_v0, %v2897_v59 }
 0x2d5   : > { %7420 = vst [vmem:[#allocation9_spill] sm:$0xff] %v6429_v60  ;;  %v6433_v51 = vadd.f32 %v1835_v26, %v1396_v45  ;;  %v2816_v45 = vpop.f32.mrf.mxu3 }
 0x2d6   : > { %v1398_v9 = vadd.f32 %v7428_v30, %v1039_v20  ;;  %v7434_v30 = vld [vmem:[#allocation26_spill] sm:$0xff] }
 0x2d7   : > { %7422 = vst [vmem:[#allocation10_spill] sm:$0xff] %v6433_v51  ;;  %v7429_v51 = vld [vmem:[#allocation29_spill] sm:$0xff] }
 0x2dc   : > { %v1838_v63 = vpop.f32.mrf.mxu0 }
 0x2dd   : > { %v1892_v16 = vadd.f32 %v1838_v63, %v7426_v19  ;;  %v7430_v63 = vld [vmem:[#allocation24_spill] sm:$0xff] }
 0x2de   : > { %v790_v19 = vadd.f32 %v7430_v63, %v7429_v51  ;;  %v7437_v51 = vld [vmem:[#allocation30_spill] sm:$0xff] }
 0x2df   : > { %v2132_v4 = vadd.f32 %v2078_v21, %v1892_v16  ;;  %4817 = vmatmul.msk.bf16.gmra.mxu0 %vm513_vm2, %v2896_v11  ;;  %v7431_v21 = vld [vmem:[#allocation27_spill] sm:$0xff] }
 0x2e1   : > { %v2497_v26 = vadd.f32 %v2443_v50, %v2132_v4  ;;  %v7433_v4 = vld [vmem:[#allocation25_spill] sm:$0xff] }
 0x2e2   : > { %v1041_v16 = vadd.f32 %v7433_v4, %v790_v19  ;;  %v7440_v19 = vld [vmem:[#allocation31_spill] sm:$0xff] }
 0x2e3   : > { %v6445_v60 = vadd.f32 %v2816_v45, %v2497_v26  ;;  %v2899_v45 = vrot.slane %v5421_v34, 3  ;;  %v7436_v26 = vld [vmem:[#allocation34_spill] sm:$0xff]  ;;  %v7443_v34 = vld [vmem:[#allocation39_spill] sm:$0xff] }
 0x2e4   : > { %v1840_v61 = vpop.f32.mrf.mxu0  ;;  %v1400_v50 = vadd.f32 %v7434_v30, %v1041_v16 }
 0x2e5   : > { %v6447_v8 = vadd.f32 %v1840_v61, %v1398_v9  ;;  %v795_v9 = vadd.f32 %v7437_v51, %v7436_v26  ;;  %v2900_v0 = vsel %vm2889_vm6, %v2897_v59, %v2899_v45  ;;  %v7444_v26 = vld [vmem:[#allocation35_spill] sm:$0xff] }
 0x2e6   : > { %v800_v51 = vadd.f32 %v7444_v26, %v7443_v34  ;;  %v7451_v34 = vld [vmem:[#allocation40_spill] sm:$0xff] }
 0x2ec   : > { %v1843_v14 = vpop.f32.mrf.mxu0 }
 0x2ed   : > { %v6454_v11 = vadd.f32 %v1843_v14, %v7431_v21  ;;  %v7438_v14 = vld [vmem:[#allocation33_spill] sm:$0xff]  ;;  %v1043_v21 = vadd.f32 %v7440_v19, %v795_v9  ;;  %v7447_v9 = vld [vmem:[#allocation36_spill] sm:$0xff] }
 0x2ee   : > { %v1045_v19 = vadd.f32 %v7447_v9, %v800_v51  ;;  %v7453_v51 = vld [vmem:[#allocation42_spill] sm:$0xff] }
 0x2ef   : > { %7432 = vst [vmem:[#allocation20_spill] sm:$0xff] %v6454_v11  ;;  %4818 = vmatmul.msk.bf16.gmra.mxu0 %vm513_vm2, %v2898_v49  ;;  %v7441_v49 = vld [vmem:[#allocation32_spill] sm:$0xff]  ;;  %v7457_v11 = vld [vmem:[#allocation45_spill] sm:$0xff] }
 0x2f0   : > { %v1402_v4 = vadd.f32 %v7441_v49, %v1043_v21 }
 0x2f4   : > { %v1845_v29 = vpop.f32.mrf.mxu0 }
 0x2f5   : > { %v6459_v20 = vadd.f32 %v1845_v29, %v1400_v50  ;;  %v5422_v50 = vld [vmem:[%s5563_s7 + $0x40] sm:$0xff] }
 0x2f6   : > { %v2901_v29 = vrot.slane %v5422_v50, 3 }
 0x2f7   : > { %7435 = vst [vmem:[#allocation12_spill] sm:$0xff] %v6459_v20 }
 0x2f8   : > { %v2902_v59 = vsel %vm2889_vm6, %v2899_v45, %v2901_v29 }
 0x2fc   : > { %v1848_v61 = vpop.f32.mrf.mxu0 }
 0x2fd   : > { %v6466_v63 = vadd.f32 %v1848_v61, %v7438_v14  ;;  %v7445_v61 = vld [vmem:[#allocation38_spill] sm:$0xff] }
 0x2ff   : > { %7439 = vst [vmem:[#allocation18_spill] sm:$0xff] %v6466_v63  ;;  %4819 = vmatmul.msk.bf16.gmra.mxu0 %vm513_vm2, %v2900_v0  ;;  %v7448_v0 = vld [vmem:[#allocation37_spill] sm:$0xff] }
 0x300   : > { %v1404_v21 = vadd.f32 %v7448_v0, %v1045_v19 }
 0x304   : > { %v1850_v16 = vpop.f32.mrf.mxu0 }
 0x305   : > { %v6471_v30 = vadd.f32 %v1850_v16, %v1402_v4  ;;  %v5423_v16 = vld [vmem:[%s5563_s7 + $0x48] sm:$0xff] }
 0x306   : > { %v2903_v50 = vrot.slane %v5423_v16, 3 }
 0x307   : > { %7442 = vst [vmem:[#allocation13_spill] sm:$0xff] %v6471_v30  ;;  %v7450_v30 = vld [vmem:[#allocation43_spill] sm:$0xff] }
 0x308   : > { %v805_v26 = vadd.f32 %v7451_v34, %v7450_v30  ;;  %v2904_v45 = vsel %vm2889_vm6, %v2901_v29, %v2903_v50 }
 0x30a   : > { %v1047_v9 = vadd.f32 %v7453_v51, %v805_v26 }
 0x30c   : > { %v1853_v20 = vpop.f32.mrf.mxu0 }
 0x30d   : > { %v6478_v14 = vadd.f32 %v1853_v20, %v7445_v61  ;;  %v7452_v20 = vld [vmem:[#allocation41_spill] sm:$0xff] }
 0x30f   : > { %7446 = vst [vmem:[#allocation14_spill] sm:$0xff] %v6478_v14  ;;  %4820 = vmatmul.msk.bf16.gmra.mxu0 %vm513_vm2, %v2902_v59  ;;  %v7454_v59 = vld [vmem:[#allocation44_spill] sm:$0xff]  ;;  %v7456_v14 = vld [vmem:[#allocation49_spill] sm:$0xff] }
 0x310   : > { %v1406_v19 = vadd.f32 %v7454_v59, %v1047_v9 }
 0x314   : > { %v1855_v49 = vpop.f32.mrf.mxu0 }
 0x315   : > { %v6483_v4 = vadd.f32 %v1855_v49, %v1404_v21  ;;  %v5424_v49 = vld [vmem:[%s5563_s7 + $0x50] sm:$0xff] }
 0x316   : > { %v2905_v16 = vrot.slane %v5424_v49, 3 }
 0x317   : > { %7449 = vst [vmem:[#allocation23_spill] sm:$0xff] %v6483_v4  ;;  %v7455_v4 = vld [vmem:[#allocation46_spill] sm:$0xff] }
 0x318   : > { %v810_v30 = vadd.f32 %v7456_v14, %v7455_v4  ;;  %v2906_v29 = vsel %vm2889_vm6, %v2903_v50, %v2905_v16 }
 0x31c   : > { %v1858_v63 = vpop.f32.mrf.mxu0 }
 0x31d   : > { %v6490_v61 = vadd.f32 %v1858_v63, %v7452_v20  ;;  %v7458_v20 = vld [vmem:[#allocation48_spill] sm:$0xff] }
 0x31e   : > { %v1049_v26 = vadd.f32 %v7458_v20, %v810_v30  ;;  %v7461_v20 = vld [vmem:[#allocation51_spill] sm:$0xff] }
 0x31f   : > { %4821 = vmatmul.msk.bf16.gmra.mxu0 %vm513_vm2, %v2904_v45  ;;  %v7459_v45 = vld [vmem:[#allocation50_spill] sm:$0xff] }
 0x320   : > { %v1408_v51 = vadd.f32 %v7459_v45, %v1049_v26  ;;  %v2909_v26 = vrot.slane %v7461_v20, 3 }
 0x324   : > { %v1860_v0 = vpop.f32.mrf.mxu0 }
 0x325   : > { %v6495_v21 = vadd.f32 %v1860_v0, %v1406_v19  ;;  %v7460_v19 = vld [vmem:[#allocation47_spill] sm:$0xff] }
 0x326   : > { %v2907_v0 = vrot.slane %v7460_v19, 3 }
 0x328   : > { %v2908_v14 = vsel %vm2889_vm6, %v2905_v16, %v2907_v0 }
 0x32c   : > { %v1863_v34 = vpop.f32.mrf.mxu0 }
 0x32d   : > { %v6502_v63 = vadd.f32 %v1863_v34, %v7457_v11  ;;  %v6513_v11 = vld [vmem:[#allocation4] ss:$0 sm:$0xff] }
 0x32f   : > { %4822 = vmatmul.msk.bf16.gmra.mxu0 %vm513_vm2, %v2906_v29 }
 0x334   : > { %v1865_v9 = vpop.f32.mrf.mxu0 }
 0x335   : > { %v6507_v59 = vadd.f32 %v1865_v9, %v1408_v51 }
 0x33c   : > { %v2996_v49 = vpop.f32.mrf.mxu0 }
 0x33d   : > { %v3086_v4 = vadd.f32 %v2996_v49, %v6118_v40  ;;  %v2910_v40 = vsel %vm2889_vm6, %v2907_v0, %v2909_v26 }
 0x33f   : > { %4823 = vmatmul.msk.bf16.gmra.mxu0 %vm513_vm2, %v2908_v14  ;;  %v3126_v30 = vadd.f32 %v6513_v11, %v3086_v4 }
 0x341   : > { %v3162_v45 = vmax.f32 %v3126_v30, 0.0 }
 0x344   : > { %v2998_v50 = vpop.f32.mrf.mxu0 }
 0x345   : > { %v3087_v34 = vadd.f32 %v2998_v50, %v6136_v56  ;;  %v7462_v50 = vld [vmem:[#allocation52_spill] sm:$0xff] }
 0x347   : > { %v3127_v29 = vadd.f32 %v6513_v11, %v3087_v34  ;;  %v2911_v34 = vrot.slane %v7462_v50, 3 }
 0x349   : > { %v3163_v51 = vmax.f32 %v3127_v29, 0.0  ;;  %v2912_v0 = vsel %vm2889_vm6, %v2909_v26, %v2911_v34 }
 0x34b   : > { %v6519_v9 = vpack.c.bf16 %v3163_v51, %v3162_v45 }
 0x34c   : > { %v3001_v16 = vpop.f32.mrf.mxu0 }
 0x34d   : > { %v3088_v19 = vadd.f32 %v3001_v16, %v6153_v48 }
 0x34f   : > { %4824 = vmatmul.msk.bf16.gmra.mxu0 %vm513_vm2, %v2910_v40  ;;  %v3128_v14 = vadd.f32 %v6513_v11, %v3088_v19  ;;  %v7463_v19 = vld [vmem:[#allocation53_spill] sm:$0xff] }
 0x351   : > { %v3164_v30 = vmax.f32 %v3128_v14, 0.0 }
 0x354   : > { %v3003_v49 = vpop.f32.mrf.mxu0 }
 0x355   : > { %v3089_v56 = vadd.f32 %v3003_v49, %v6172_v12  ;;  %v2913_v49 = vrot.slane %v7463_v19, 3 }
 0x357   : > { %v3129_v4 = vadd.f32 %v6513_v11, %v3089_v56  ;;  %v2914_v26 = vsel %vm2889_vm6, %v2911_v34, %v2913_v49 }
 0x359   : > { %v3165_v29 = vmax.f32 %v3129_v4, 0.0 }
 0x35b   : > { %v6528_v20 = vpack.c.bf16 %v3165_v29, %v3164_v30 }
 0x35c   : > { %v3006_v45 = vpop.f32.mrf.mxu0 }
 0x35d   : > { %v3090_v48 = vadd.f32 %v3006_v45, %v6189_v5 }
 0x35f   : > { %4825 = vmatmul.msk.bf16.gmra.mxu0 %vm513_vm2, %v2912_v0  ;;  %v3130_v16 = vadd.f32 %v6513_v11, %v3090_v48  ;;  %v7464_v0 = vld [vmem:[#allocation54_spill] sm:$0xff] }
 0x360   : > { %v2915_v48 = vrot.slane %v7464_v0, 3 }
 0x361   : > { %v3166_v14 = vmax.f32 %v3130_v16, 0.0 }
 0x362   : > { %v2916_v34 = vsel %vm2889_vm6, %v2913_v49, %v2915_v48 }
 0x364   : > { %v3008_v51 = vpop.f32.mrf.mxu0 }
 0x365   : > { %v3091_v12 = vadd.f32 %v3008_v51, %v6208_v39 }
 0x367   : > { %v3131_v40 = vadd.f32 %v6513_v11, %v3091_v12 }
 0x369   : > { %v3167_v56 = vmax.f32 %v3131_v40, 0.0 }
 0x36b   : > { %v6537_v4 = vpack.c.bf16 %v3167_v56, %v3166_v14 }
 0x36c   : > { %v3011_v50 = vpop.f32.mrf.mxu0 }
 0x36d   : > { %v3092_v5 = vadd.f32 %v3011_v50, %v6225_v33  ;;  %v7465_v50 = vld [vmem:[#allocation55_spill] sm:$0xff] }
 0x36f   : > { %4826 = vmatmul.msk.bf16.gmra.mxu0 %vm513_vm2, %v2914_v26  ;;  %v3132_v29 = vadd.f32 %v6513_v11, %v3092_v5  ;;  %v2917_v26 = vrot.slane %v7465_v50, 3 }
 0x371   : > { %v3168_v51 = vmax.f32 %v3132_v29, 0.0  ;;  %v2918_v49 = vsel %vm2889_vm6, %v2915_v48, %v2917_v26 }
 0x374   : > { %v3013_v30 = vpop.f32.mrf.mxu0 }
 0x375   : > { %v3093_v39 = vadd.f32 %v3013_v30, %v6242_v37 }
 0x377   : > { %v3133_v45 = vadd.f32 %v6513_v11, %v3093_v39 }
 0x379   : > { %v3169_v16 = vmax.f32 %v3133_v45, 0.0 }
 0x37b   : > { %v6546_v12 = vpack.c.bf16 %v3169_v16, %v3168_v51  ;;  %v2120_v51 = vadd.f32 %v6259_v15, %v6322_v47 }
 0x37c   : > { %v3016_v40 = vpop.f32.mrf.mxu0 }
 0x37d   : > { %v3094_v33 = vadd.f32 %v3016_v40, %v6257_v38  ;;  %v2919_v40 = vrot.slane %v6231_v43, 3  ;;  %v2485_v48 = vadd.f32 %v6264_v27, %v2120_v51 }
 0x37f   : > { %4827 = vmatmul.msk.bf16.gmra.mxu0 %vm513_vm2, %v2916_v34  ;;  %v3134_v14 = vadd.f32 %v6513_v11, %v3094_v33 }
 0x381   : > { %v3170_v5 = vmax.f32 %v3134_v14, 0.0 }
 0x384   : > { %v3018_v19 = vpop.f32.mrf.mxu0 }
 0x385   : > { %v3095_v37 = vadd.f32 %v3018_v19, %v6276_v36  ;;  %v2121_v19 = vadd.f32 %v6283_v55, %v6335_v24  ;;  %v2122_v55 = vadd.f32 %v6304_v22, %v6352_v44  ;;  %v7467_v44 = vld [vmem:[#allocation58_spill] sm:$0xff] }
 0x387   : > { %v3135_v56 = vadd.f32 %v6513_v11, %v3095_v37  ;;  %v2920_v37 = vsel %vm2889_vm6, %v2917_v26, %v2919_v40  ;;  %v2921_v26 = vrot.slane %v6267_v35, 3 }
 0x389   : > { %v3171_v30 = vmax.f32 %v3135_v56, 0.0  ;;  %v2486_v56 = vadd.f32 %v6287_v1, %v2121_v19  ;;  %v2487_v1 = vadd.f32 %v6309_v52, %v2122_v55 }
 0x38b   : > { %v6555_v29 = vpack.c.bf16 %v3171_v30, %v3170_v5  ;;  %v2859_v43 = vadd.f32 %v6290_v31, %v2486_v56  ;;  %v2123_v30 = vadd.f32 %v6327_v17, %v6360_v58  ;;  %v7468_v17 = vld [vmem:[#allocation56_spill] sm:$0xff] }
 0x38c   : > { %v3021_v39 = vpop.f32.mrf.mxu0  ;;  %v2923_v58 = vrot.slane %v7468_v17, 3 }
 0x38d   : > { %v3096_v38 = vadd.f32 %v3021_v39, %v6295_v28 }
 0x38e   : > { %v2924_v19 = vsel %vm2889_vm6, %v2921_v26, %v2923_v58 }
 0x38f   : > { %4828 = vmatmul.msk.bf16.gmra.mxu0 %vm513_vm2, %v2918_v49  ;;  %v3136_v0 = vadd.f32 %v6513_v11, %v3096_v38  ;;  %v2922_v49 = vsel %vm2889_vm6, %v2919_v40, %v2921_v26  ;;  %v2860_v38 = vadd.f32 %v6317_v62, %v2487_v1  ;;  %v2125_v62 = vadd.f32 %v6364_v23, %v6379_v54  ;;  %v7470_v1 = vld [vmem:[#allocation28_spill] sm:$0xff] }
 0x390   : > { %v2925_v54 = vrot.slane %v6343_v25, 3 }
 0x391   : > { %v3172_v34 = vmax.f32 %v3136_v0, 0.0 }
 0x394   : > { %v3023_v45 = vpop.f32.mrf.mxu0 }
 0x395   : > { %v3097_v36 = vadd.f32 %v3023_v45, %v6314_v57  ;;  %v2858_v57 = vadd.f32 %v6270_v2, %v2485_v48  ;;  %v7466_v45 = vld [vmem:[#allocation57_spill] sm:$0xff] }
 0x396   : > { %v2488_v0 = vadd.f32 %v7466_v45, %v2123_v30 }
 0x397   : > { %v3137_v16 = vadd.f32 %v6513_v11, %v3097_v36 }
 0x398   : > { %v2861_v35 = vadd.f32 %v7467_v44, %v2488_v0 }
 0x399   : > { %v3173_v33 = vmax.f32 %v3137_v16, 0.0 }
 0x39b   : > { %v3203_v28 = vpack.c.bf16 %v3173_v33, %v3172_v34 }
 0x39c   : > { %v3026_v14 = vpop.f32.mrf.mxu0 }
 0x39d   : > { %v3098_v15 = vadd.f32 %v3026_v14, %v2858_v57 }
 0x39f   : > { %4829 = vmatmul.msk.bf16.gmra.mxu0 %vm513_vm2, %v2920_v37  ;;  %v3138_v50 = vadd.f32 %v6513_v11, %v3098_v15  ;;  %v2490_v37 = vadd.f32 %v6366_v6, %v2125_v62  ;;  %v2127_v6 = vadd.f32 %v6381_v32, %v6399_v41 }
 0x3a1   : > { %v3174_v5 = vmax.f32 %v3138_v50, 0.0  ;;  %v2863_v57 = vadd.f32 %v6368_v46, %v2490_v37  ;;  %v2926_v46 = vsel %vm2889_vm6, %v2923_v58, %v2925_v54 }
 0x3a4   : > { %v3028_v47 = vpop.f32.mrf.mxu0 }
 0x3a5   : > { %v3099_v27 = vadd.f32 %v3028_v47, %v2859_v43 }
 0x3a7   : > { %v3139_v24 = vadd.f32 %v6513_v11, %v3099_v27 }
 0x3a9   : > { %v3175_v2 = vmax.f32 %v3139_v24, 0.0 }
 0x3ab   : > { %v3204_v39 = vpack.c.bf16 %v3175_v2, %v3174_v5  ;;  %v7469_v5 = vld [vmem:[#allocation8_spill] sm:$0xff] }
 0x3ac   : > { %v3031_v31 = vpop.f32.mrf.mxu0 }
 0x3ad   : > { %v3100_v22 = vadd.f32 %v3031_v31, %v2860_v38 }
 0x3af   : > { %4830 = vmatmul.msk.bf16.gmra.mxu0 %vm513_vm2, %v2922_v49  ;;  %v3140_v51 = vadd.f32 %v6513_v11, %v3100_v22 }
 0x3b1   : > { %v3176_v34 = vmax.f32 %v3140_v51, 0.0 }
 0x3b4   : > { %v3033_v36 = vpop.f32.mrf.mxu0 }
 0x3b5   : > { %v3101_v52 = vadd.f32 %v3033_v36, %v2861_v35  ;;  %v7473_v36 = vld [vmem:[#allocation9_spill] sm:$0xff] }
 0x3b7   : > { %v3141_v16 = vadd.f32 %v6513_v11, %v3101_v52 }
 0x3b9   : > { %v3177_v33 = vmax.f32 %v3141_v16, 0.0  ;;  %v7474_v16 = vld [vmem:[#allocation15_spill] sm:$0xff] }
 0x3bb   : > { %v3205_v40 = vpack.c.bf16 %v3177_v33, %v3176_v34  ;;  %v7475_v34 = vld [vmem:[#allocation11_spill] sm:$0xff] }
 0x3bc   : > { %v3036_v48 = vpop.f32.mrf.mxu0 }
 0x3bd   : > { %v3102_v14 = vadd.f32 %v3036_v48, %v6377_v42  ;;  %3793 = vmatpush.bf16.msra.mxu1 %v3205_v40 }
 0x3bf   : > { %4831 = vmatmul.msk.bf16.gmra.mxu0 %vm513_vm2, %v2924_v19  ;;  %v3142_v15 = vadd.f32 %v6513_v11, %v3102_v14 }
 0x3c1   : > { %3794 = vmatpush.bf16.msra.mxu1 %v3204_v39  ;;  %v3178_v47 = vmax.f32 %v3142_v15, 0.0  ;;  %v2080_v39 = vpop.f32.mrf.mxu1 }
 0x3c2   : > { %v2133_v15 = vadd.f32 %v2080_v39, %v6447_v8 }
 0x3c4   : > { %v3038_v56 = vpop.f32.mrf.mxu0 }
 0x3c5   : > { %v3103_v43 = vadd.f32 %v3038_v56, %v2863_v57  ;;  %3795 = vmatpush.bf16.msra.mxu1 %v3203_v28  ;;  %v2492_v28 = vadd.f32 %v6386_v13, %v2127_v6  ;;  %v2129_v13 = vadd.f32 %v6406_v3, %v6417_v53  ;;  %v7471_v3 = vld [vmem:[#allocation10_spill] sm:$0xff]  ;;  %v7472_v53 = vld [vmem:[#allocation16_spill] sm:$0xff] }
 0x3c6   : > { %v2131_v22 = vadd.f32 %v7472_v53, %v7471_v3  ;;  %v7478_v3 = vld [vmem:[#allocation18_spill] sm:$0xff] }
 0x3c7   : > { %v3143_v23 = vadd.f32 %v6513_v11, %v3103_v43  ;;  %v2865_v25 = vadd.f32 %v6390_v10, %v2492_v28  ;;  %v2494_v2 = vadd.f32 %v7469_v5, %v2129_v13 }
 0x3c8   : > { %v2496_v17 = vadd.f32 %v7474_v16, %v2131_v22 }
 0x3c9   : > { %v3179_v50 = vmax.f32 %v3143_v23, 0.0  ;;  %3796 = vmatpush.bf16.msra.mxu1 %v6555_v29  ;;  %v2867_v30 = vadd.f32 %v7470_v1, %v2494_v2  ;;  %v2083_v52 = vpop.f32.mrf.mxu1 }
 0x3ca   : > { %v2869_v33 = vadd.f32 %v7475_v34, %v2496_v17 }
 0x3cb   : > { %v6603_v42 = vpack.c.bf16 %v3179_v50, %v3178_v47 }
 0x3cc   : > { %v3041_v27 = vpop.f32.mrf.mxu0 }
 0x3cd   : > { %v3104_v55 = vadd.f32 %v3041_v27, %v6395_v18  ;;  %3797 = vmatpush.bf16.msra.mxu1 %v6546_v12 }
 0x3cf   : > { %4832 = vmatmul.msk.bf16.gmra.mxu0 %vm513_vm2, %v2926_v46  ;;  %v3144_v32 = vadd.f32 %v6513_v11, %v3104_v55 }
 0x3d1   : > { %3798 = vmatpush.bf16.msra.mxu1 %v6537_v4  ;;  %v3180_v26 = vmax.f32 %v3144_v32, 0.0  ;;  %v2085_v37 = vpop.f32.mrf.mxu1  ;;  %v7476_v32 = vld [vmem:[#allocation20_spill] sm:$0xff] }
 0x3d4   : > { %v3043_v29 = vpop.f32.mrf.mxu0 }
 0x3d5   : > { %v3105_v41 = vadd.f32 %v3043_v29, %v2865_v25  ;;  %3799 = vmatpush.bf16.msra.mxu1 %v6528_v20 }
 0x3d7   : > { %v3145_v24 = vadd.f32 %v6513_v11, %v3105_v41  ;;  %v2134_v41 = vadd.f32 %v2083_v52, %v7476_v32  ;;  %v7479_v52 = vld [vmem:[#allocation13_spill] sm:$0xff] }
 0x3d9   : > { %v3181_v18 = vmax.f32 %v3145_v24, 0.0  ;;  %3800 = vmatpush.bf16.msra.mxu1 %v6519_v9  ;;  %v2445_v9 = vpop.f32.mrf.mxu2  ;;  %v2088_v27 = vpop.f32.mrf.mxu1 }
 0x3da   : > { %v2498_v50 = vadd.f32 %v2445_v9, %v2133_v15  ;;  %v2136_v53 = vadd.f32 %v2088_v27, %v7478_v3  ;;  %v7480_v15 = vld [vmem:[#allocation14_spill] sm:$0xff] }
 0x3db   : > { %v6618_v12 = vpack.c.bf16 %v3181_v18, %v3180_v26  ;;  %v4835_v3 = vld [vmem:[%s7337_s3] sm:$0xf] }
 0x3dc   : > { %v3046_v4 = vpop.f32.mrf.mxu0 }
 0x3dd   : > { %v3106_v10 = vadd.f32 %v3046_v4, %v6415_v7  ;;  %v2818_v7 = vpop.f32.mrf.mxu3  ;;  %v7477_v4 = vld [vmem:[#allocation12_spill] sm:$0xff] }
 0x3de   : > { %v2871_v46 = vadd.f32 %v2818_v7, %v2498_v50 }
 0x3df   : > { %v3146_v31 = vadd.f32 %v6513_v11, %v3106_v10  ;;  %v2135_v10 = vadd.f32 %v2085_v37, %v7477_v4 }
 0x3e1   : > { %v3182_v45 = vmax.f32 %v3146_v31, 0.0  ;;  %v2448_v58 = vpop.f32.mrf.mxu2  ;;  %v2090_v5 = vpop.f32.mrf.mxu1 }
 0x3e2   : > { %v2499_v13 = vadd.f32 %v2448_v58, %v2134_v41  ;;  %v2137_v16 = vadd.f32 %v2090_v5, %v7479_v52 }
 0x3e4   : > { %v3048_v20 = vpop.f32.mrf.mxu0 }
 0x3e5   : > { %v3107_v49 = vadd.f32 %v3048_v20, %v2867_v30  ;;  %v2821_v19 = vpop.f32.mrf.mxu3 }
 0x3e6   : > { %v2872_v1 = vadd.f32 %v2821_v19, %v2499_v13 }
 0x3e7   : > { %v3147_v38 = vadd.f32 %v6513_v11, %v3107_v49 }
 0x3e9   : > { %v3183_v0 = vmax.f32 %v3147_v38, 0.0  ;;  %v2450_v23 = vpop.f32.mrf.mxu2 }
 0x3ea   : > { %v2500_v30 = vadd.f32 %v2450_v23, %v2135_v10 }
 0x3eb   : > { %v6627_v44 = vpack.c.bf16 %v3183_v0, %v3182_v45  ;;  %v2093_v0 = vpop.f32.mrf.mxu1 }
 0x3ec   : > { %v3051_v35 = vpop.f32.mrf.mxu0  ;;  %v2138_v23 = vadd.f32 %v2093_v0, %v7480_v15 }
 0x3ed   : > { %v3108_v51 = vadd.f32 %v3051_v35, %v7473_v36  ;;  %v2823_v6 = vpop.f32.mrf.mxu3 }
 0x3ee   : > { %v2873_v31 = vadd.f32 %v2823_v6, %v2500_v30 }
 0x3ef   : > { %v3148_v40 = vadd.f32 %v6513_v11, %v3108_v51 }
 0x3f1   : > { %v3184_v57 = vmax.f32 %v3148_v40, 0.0  ;;  %v2453_v29 = vpop.f32.mrf.mxu2 }
 0x3f2   : > { %v2501_v51 = vadd.f32 %v2453_v29, %v2136_v53 }
 0x3f3   : > { %v2095_v40 = vpop.f32.mrf.mxu1 }
 0x3f4   : > { %v3053_v62 = vpop.f32.mrf.mxu0 }
 0x3f5   : > { %v3109_v48 = vadd.f32 %v3053_v62, %v2869_v33  ;;  %v2826_v18 = vpop.f32.mrf.mxu3 }
 0x3f6   : > { %v2874_v33 = vadd.f32 %v2826_v18, %v2501_v51 }
 0x3f7   : > { %v3149_v14 = vadd.f32 %v6513_v11, %v3109_v48 }
 0x3f9   : > { %v3185_v56 = vmax.f32 %v3149_v14, 0.0  ;;  %v2455_v39 = vpop.f32.mrf.mxu2 }
 0x3fa   : > { %v2502_v62 = vadd.f32 %v2455_v39, %v2137_v16 }
 0x3fb   : > { %v6635_v43 = vpack.c.bf16 %v3185_v56, %v3184_v57  ;;  %v2098_v27 = vpop.f32.mrf.mxu1 }
 0x3fc   : > { %v3056_v54 = vpop.f32.mrf.mxu0 }
 0x3fd   : > { %v3110_v47 = vadd.f32 %v3056_v54, %v6445_v60  ;;  %v2828_v49 = vpop.f32.mrf.mxu3 }
 0x3fe   : > { %v2875_v19 = vadd.f32 %v2828_v49, %v2502_v62 }
 0x3ff   : > { %v3150_v28 = vadd.f32 %v6513_v11, %v3110_v47 }
 0x401   : > { %v3186_v8 = vmax.f32 %v3150_v28, 0.0  ;;  %v2458_v36 = vpop.f32.mrf.mxu2 }
 0x403   : > { %v2100_v13 = vpop.f32.mrf.mxu1 }
 0x404   : > { %v3058_v55 = vpop.f32.mrf.mxu0  ;;  %v2141_v49 = vadd.f32 %v2100_v13, %v6495_v21 }
 0x405   : > { %v3111_v25 = vadd.f32 %v3058_v55, %v2871_v46  ;;  %v2831_v34 = vpop.f32.mrf.mxu3  ;;  %v2503_v46 = vadd.f32 %v2458_v36, %v2138_v23  ;;  %v7481_v55 = vld [vmem:[#allocation23_spill] sm:$0xff] }
 0x406   : > { %v2139_v28 = vadd.f32 %v2095_v40, %v7481_v55 }
 0x407   : > { %v3151_v24 = vadd.f32 %v6513_v11, %v3111_v25  ;;  %v2876_v41 = vadd.f32 %v2831_v34, %v2503_v46  ;;  %v4837_v46 = vld [vmem:[%s7337_s3 + $0xc] sm:$0xf0] }
 0x409   : > { %v3187_v26 = vmax.f32 %v3151_v24, 0.0  ;;  %v2460_v14 = vpop.f32.mrf.mxu2 }
 0x40a   : > { %v2504_v24 = vadd.f32 %v2460_v14, %v2139_v28 }
 0x40b   : > { %v6642_v60 = vpack.c.bf16 %v3187_v26, %v3186_v8  ;;  %v2103_v0 = vpop.f32.mrf.mxu1 }
 0x40c   : > { %v3061_v2 = vpop.f32.mrf.mxu0  ;;  %v2142_v34 = vadd.f32 %v2103_v0, %v6502_v63  ;;  %v5254_v63 = vld [vmem:[%s7337_s3 + $0x20] sm:$0xf0] }
 0x40d   : > { %v3112_v20 = vadd.f32 %v3061_v2, %v2872_v1  ;;  %v2833_v47 = vpop.f32.mrf.mxu3  ;;  %v2140_v2 = vadd.f32 %v2098_v27, %v6490_v61  ;;  %v5251_v61 = vld [vmem:[%s7337_s3 + $0x8] sm:$0xf0]  ;;  %v5250_v27 = vld [vmem:[%s7337_s3 + $0x4] sm:$0xf] }
 0x40e   : > { %v2877_v18 = vadd.f32 %v2833_v47, %v2504_v24  ;;  %v4840_v28 = vor.u32 %v5250_v27, %v4837_v46  ;;  %v4931_v46 = vld [vmem:[%s7337_s3 + $0xc0] sm:$0xf] }
 0x40f   : > { %v3152_v9 = vadd.f32 %v6513_v11, %v3112_v20 }
 0x411   : > { %v3188_v7 = vmax.f32 %v3152_v9, 0.0  ;;  %v2463_v32 = vpop.f32.mrf.mxu2 }
 0x413   : > { %v2105_v62 = vpop.f32.mrf.mxu1 }
 0x414   : > { %v3063_v38 = vpop.f32.mrf.mxu0  ;;  %v2143_v14 = vadd.f32 %v2105_v62, %v6507_v59  ;;  %v5264_v62 = vld [vmem:[%s7337_s3 + $0x70] sm:$0xf0] }
 0x415   : > { %v3113_v45 = vadd.f32 %v3063_v38, %v2873_v31  ;;  %v2836_v26 = vpop.f32.mrf.mxu3  ;;  %v2505_v31 = vadd.f32 %v2463_v32, %v2140_v2  ;;  %v5260_v2 = vld [vmem:[%s7337_s3 + $0x50] sm:$0xf0] }
 0x417   : > { %v3153_v22 = vadd.f32 %v6513_v11, %v3113_v45  ;;  %v2878_v53 = vadd.f32 %v2836_v26, %v2505_v31  ;;  %v5253_v26 = vld [vmem:[%s7337_s3 + $0x1c] sm:$0xf] }
 0x419   : > { %v3189_v35 = vmax.f32 %v3153_v22, 0.0  ;;  %v2465_v30 = vpop.f32.mrf.mxu2 }
 0x41a   : > { %v2506_v22 = vadd.f32 %v2465_v30, %v2141_v49  ;;  %v4867_v49 = vld [vmem:[%s7337_s3 + $0x38] sm:$0xf] }
 0x41b   : > { %v3211_v17 = vpack.c.bf16 %v3189_v35, %v3188_v7  ;;  %v4836_v7 = vor.u32 %v5251_v61, %v4835_v3  ;;  %v5259_v61 = vld [vmem:[%s7337_s3 + $0x4c] sm:$0xf] }
 0x41c   : > { %v3066_v58 = vpop.f32.mrf.mxu0 }
 0x41d   : > { %v3114_v48 = vadd.f32 %v3066_v58, %v2874_v33  ;;  %v2838_v9 = vpop.f32.mrf.mxu3  ;;  %3801 = vmatmul.bf16.vlgmr.msra.gmra.mxu1 %v4836_v7  ;;  %v4879_v7 = vld [vmem:[%s7337_s3 + $0x50] sm:$0xf] }
 0x41e   : > { %v2879_v36 = vadd.f32 %v2838_v9, %v2506_v22  ;;  %v4883_v9 = vld [vmem:[%s7337_s3 + $0x60] sm:$0xf] }
 0x41f   : > { %v3154_v57 = vadd.f32 %v6513_v11, %v3114_v48 }
 0x421   : > { %v3190_v50 = vmax.f32 %v3154_v57, 0.0  ;;  %v2468_v21 = vpop.f32.mrf.mxu2 }
 0x424   : > { %v3068_v37 = vpop.f32.mrf.mxu0 }
 0x425   : > { %v3115_v56 = vadd.f32 %v3068_v37, %v2875_v19  ;;  %v2841_v58 = vpop.f32.mrf.mxu3  ;;  %v2507_v19 = vadd.f32 %v2468_v21, %v2142_v34  ;;  %v4895_v21 = vld [vmem:[%s7337_s3 + $0x78] sm:$0xf] }
 0x427   : > { %v3155_v54 = vadd.f32 %v6513_v11, %v3115_v56  ;;  %v2880_v15 = vadd.f32 %v2841_v58, %v2507_v19  ;;  %v4885_v58 = vld [vmem:[%s7337_s3 + $0x6c] sm:$0xf0] }
 0x429   : > { %v3191_v6 = vmax.f32 %v3155_v54, 0.0  ;;  %v2470_v57 = vpop.f32.mrf.mxu2 }
 0x42a   : > { %v2508_v23 = vadd.f32 %v2470_v57, %v2143_v14  ;;  %v4897_v57 = vld [vmem:[%s7337_s3 + $0x84] sm:$0xf0] }
 0x42b   : > { %v3212_v25 = vpack.c.bf16 %v3191_v6, %v3190_v50 }
 0x42c   : > { %v3071_v29 = vpop.f32.mrf.mxu0 }
 0x42d   : > { %v3116_v8 = vadd.f32 %v3071_v29, %v2876_v41  ;;  %v5252_v41 = vld [vmem:[%s7337_s3 + $0x10] sm:$0xf0] }
 0x42f   : > { %v3156_v10 = vadd.f32 %v6513_v11, %v3116_v8 }
 0x431   : > { %v3192_v39 = vmax.f32 %v3156_v10, 0.0  ;;  %v5255_v10 = vld [vmem:[%s7337_s3 + $0x28] sm:$0xf0] }
 0x434   : > { %v3073_v4 = vpop.f32.mrf.mxu0 }
 0x435   : > { %v3117_v5 = vadd.f32 %v3073_v4, %v2877_v18  ;;  %v4849_v18 = vld [vmem:[%s7337_s3 + $0x24] sm:$0xf0]  ;;  %v4855_v4 = vld [vmem:[%s7337_s3 + $0x20] sm:$0xf] }
 0x436   : > { %v4852_v13 = vor.u32 %v5253_v26, %v4849_v18  ;;  %v4856_v30 = vor.u32 %v5255_v10, %v4855_v4  ;;  %v4933_v4 = vld [vmem:[%s7337_s3 + $0xcc] sm:$0xf0] }
 0x437   : > { %v3157_v1 = vadd.f32 %v6513_v11, %v3117_v5  ;;  %v4871_v5 = vld [vmem:[%s7337_s3 + $0x48] sm:$0xf] }
 0x439   : > { %v3193_v20 = vmax.f32 %v3157_v1, 0.0  ;;  %v4872_v1 = vor.u32 %v5260_v2, %v4871_v5  ;;  %v4939_v2 = vld [vmem:[%s7337_s3 + $0xc8] sm:$0xf] }
 0x43b   : > { %v3213_v38 = vpack.c.bf16 %v3193_v20, %v3192_v39  ;;  %v5256_v39 = vld [vmem:[%s7337_s3 + $0x34] sm:$0xf]  ;;  %v4861_v20 = vld [vmem:[%s7337_s3 + $0x3c] sm:$0xf0] }
 0x43c   : > { %v3076_v45 = vpop.f32.mrf.mxu0  ;;  %v4864_v31 = vor.u32 %v5256_v39, %v4861_v20  ;;  %v4955_v39 = vld [vmem:[%s7337_s3 + $0xf0] sm:$0xf]  ;;  %v5281_v20 = vld [vmem:[%s7337_s3 + $0xf8] sm:$0xf0] }
 0x43d   : > { %3932 = vmatpush.bf16.msra.mxu2 %v3213_v38  ;;  %v3118_v35 = vadd.f32 %v3076_v45, %v2878_v53  ;;  %v5258_v38 = vld [vmem:[%s7337_s3 + $0x40] sm:$0xf0]  ;;  %v5263_v45 = vld [vmem:[%s7337_s3 + $0x68] sm:$0xf0]  ;;  %v4873_v53 = vld [vmem:[%s7337_s3 + $0x54] sm:$0xf0] }
 0x43e   : > { %v4884_v0 = vor.u32 %v5263_v45, %v4883_v9  ;;  %v4868_v3 = vor.u32 %v5258_v38, %v4867_v49  ;;  %v4876_v22 = vor.u32 %v5259_v61, %v4873_v53  ;;  %v4956_v49 = vor.u32 %v5281_v20, %v4955_v39  ;;  %v5277_v45 = vld [vmem:[%s7337_s3 + $0xdc] sm:$0xf]  ;;  %v4981_v39 = vld [vmem:[%s7337_s3 + $0x12c] sm:$0xf0] }
 0x43f   : > { %v3158_v52 = vadd.f32 %v6513_v11, %v3118_v35  ;;  %v5261_v35 = vld [vmem:[%s7337_s3 + $0x58] sm:$0xf0] }
 0x441   : > { %3933 = vmatpush.bf16.msra.mxu2 %v3212_v25  ;;  %v3194_v40 = vmax.f32 %v3158_v52, 0.0  ;;  %v4880_v52 = vor.u32 %v5261_v35, %v4879_v7 }
 0x444   : > { %v3078_v51 = vpop.f32.mrf.mxu0 }
 0x445   : > { %v3119_v16 = vadd.f32 %v3078_v51, %v2879_v36  ;;  %3934 = vmatpush.bf16.msra.mxu2 %v3211_v17  ;;  %v4847_v17 = vld [vmem:[%s7337_s3 + $0x18] sm:$0xf]  ;;  %v5266_v36 = vld [vmem:[%s7337_s3 + $0x80] sm:$0xf0] }
 0x446   : > { %v4848_v54 = vor.u32 %v5254_v63, %v4847_v17  ;;  %v4896_v51 = vor.u32 %v5266_v36, %v4895_v21  ;;  %v4903_v17 = vld [vmem:[%s7337_s3 + $0x80] sm:$0xf]  ;;  %v5267_v63 = vld [vmem:[%s7337_s3 + $0x88] sm:$0xf0] }
 0x447   : > { %v3159_v33 = vadd.f32 %v6513_v11, %v3119_v16  ;;  %v5262_v16 = vld [vmem:[%s7337_s3 + $0x64] sm:$0xf]  ;;  %v4951_v21 = vld [vmem:[%s7337_s3 + $0xe0] sm:$0xf]  ;;  %v5279_v36 = vld [vmem:[%s7337_s3 + $0xe8] sm:$0xf0] }
 0x448   : > { %3806 = vmatmul.bf16.gmra.mxu1 %v4848_v54  ;;  %v4888_v34 = vor.u32 %v5262_v16, %v4885_v58  ;;  %v5284_v16 = vld [vmem:[%s7337_s3 + $0x110] sm:$0xf0] }
 0x449   : > { %v3195_v48 = vmax.f32 %v3159_v33, 0.0  ;;  %3935 = vmatpush.bf16.msra.mxu2 %v6642_v60  ;;  %v2843_v60 = vpop.f32.mrf.mxu3  ;;  %v4891_v33 = vld [vmem:[%s7337_s3 + $0x68] sm:$0xf] }
 0x44a   : > { %v2881_v59 = vadd.f32 %v2843_v60, %v2508_v23  ;;  %v4892_v14 = vor.u32 %v5264_v62, %v4891_v33  ;;  %v5272_v23 = vld [vmem:[%s7337_s3 + $0xb0] sm:$0xf0]  ;;  %v4904_v60 = vor.u32 %v5267_v63, %v4903_v17 }
 0x44b   : > { %v3214_v37 = vpack.c.bf16 %v3195_v48, %v3194_v40  ;;  %v4907_v40 = vld [vmem:[%s7337_s3 + $0x90] sm:$0xf]  ;;  %v5269_v48 = vld [vmem:[%s7337_s3 + $0x98] sm:$0xf0] }
 0x44c   : > { %v3081_v56 = vpop.f32.mrf.mxu0  ;;  %v4908_v19 = vor.u32 %v5269_v48, %v4907_v40  ;;  %v4952_v48 = vor.u32 %v5279_v36, %v4951_v21 }
 0x44d   : > { %3936 = vmatpush.bf16.msra.mxu2 %v6635_v43  ;;  %v3120_v47 = vadd.f32 %v3081_v56, %v2880_v15  ;;  %v4919_v15 = vld [vmem:[%s7337_s3 + $0xa8] sm:$0xf] }
 0x44e   : > { %v4920_v54 = vor.u32 %v5272_v23, %v4919_v15  ;;  %v4963_v23 = vld [vmem:[%s7337_s3 + $0xf8] sm:$0xf] }
 0x44f   : > { %v3160_v43 = vadd.f32 %v6513_v11, %v3120_v47  ;;  %v5268_v47 = vld [vmem:[%s7337_s3 + $0x94] sm:$0xf] }
 0x451   : > { %3937 = vmatpush.bf16.msra.mxu2 %v6627_v44  ;;  %v3196_v44 = vmax.f32 %v3160_v43, 0.0  ;;  %v4915_v43 = vld [vmem:[%s7337_s3 + $0x98] sm:$0xf] }
 0x454   : > { %v3083_v50 = vpop.f32.mrf.mxu0 }
 0x455   : > { %v3121_v6 = vadd.f32 %v3083_v50, %v2881_v59  ;;  %3938 = vmatpush.bf16.msra.mxu2 %v6618_v12  ;;  %v4843_v12 = vld [vmem:[%s7337_s3 + $0x8] sm:$0xf]  ;;  %v4909_v59 = vld [vmem:[%s7337_s3 + $0x9c] sm:$0xf0] }
 0x456   : > { %v4844_v8 = vor.u32 %v5252_v41, %v4843_v12  ;;  %v4912_v50 = vor.u32 %v5268_v47, %v4909_v59  ;;  %v4927_v41 = vld [vmem:[%s7337_s3 + $0xb0] sm:$0xf]  ;;  %v4979_v47 = vld [vmem:[%s7337_s3 + $0x120] sm:$0xf]  ;;  %v5287_v59 = vld [vmem:[%s7337_s3 + $0x128] sm:$0xf0] }
 0x457   : > { %v3161_v55 = vadd.f32 %v6513_v11, %v3121_v6  ;;  %v4859_v11 = vld [vmem:[%s7337_s3 + $0x30] sm:$0xf]  ;;  %v5270_v6 = vld [vmem:[%s7337_s3 + $0xa0] sm:$0xf0] }
 0x459   : > { %v3197_v25 = vmax.f32 %v3161_v55, 0.0  ;;  %3939 = vmatpush.bf16.msra.mxu2 %v6603_v42  ;;  %v5257_v42 = vld [vmem:[%s7337_s3 + $0x38] sm:$0xf0]  ;;  %v5275_v55 = vld [vmem:[%s7337_s3 + $0xc8] sm:$0xf0] }
 0x45a   : > { %v4860_v24 = vor.u32 %v5257_v42, %v4859_v11  ;;  %v5273_v11 = vld [vmem:[%s7337_s3 + $0xb8] sm:$0xf0] }
 0x45b   : > { %v3215_v29 = vpack.c.bf16 %v3197_v25, %v3196_v44  ;;  %v4916_v44 = vor.u32 %v5270_v6, %v4915_v43  ;;  %v5271_v25 = vld [vmem:[%s7337_s3 + $0xac] sm:$0xf]  ;;  %v4928_v18 = vor.u32 %v5273_v11, %v4927_v41  ;;  %v4980_v43 = vor.u32 %v5287_v59, %v4979_v47 }
 0x45c   : > { %3940 = vmatmul.bf16.vlgmr.msra.gmra.mxu2 %v4840_v28  ;;  %3811 = vmatmul.bf16.gmra.mxu1 %v4860_v24  ;;  %v4932_v28 = vor.u32 %v5275_v55, %v4931_v46  ;;  %v4943_v24 = vld [vmem:[%s7337_s3 + $0xd8] sm:$0xf] }
 0x45d   : > { %v3791_v32 = vsel %vm819_vm1, %v3215_v29, 0  ;;  %v4921_v29 = vld [vmem:[%s7337_s3 + $0xb4] sm:$0xf0] }
 0x45e   : > { %4077 = vmatpush.bf16.msra.mxu3 %v3791_v32  ;;  %v4924_v12 = vor.u32 %v5271_v25, %v4921_v29 }
 0x462   : > { %4078 = vmatpush.bf16.msra.mxu3 %v3214_v37  ;;  %v5265_v37 = vld [vmem:[%s7337_s3 + $0x7c] sm:$0xf] }
 0x463   : > { %v4900_v56 = vor.u32 %v5265_v37, %v4897_v57 }
 0x465   : > { %5145 = vmatmul.msk.bf16.vlgmr.msra.gmra.mxu3 %vm3710_vm7, %v4844_v8  ;;  %v5278_v8 = vld [vmem:[%s7337_s3 + $0xe0] sm:$0xf0] }
 0x466   : > { %v4944_v26 = vor.u32 %v5278_v8, %v4943_v24  ;;  %v5285_v24 = vld [vmem:[%s7337_s3 + $0x118] sm:$0xf0] }
 0x46c   : > { %3945 = vmatmul.bf16.gmra.mxu2 %v4852_v13  ;;  %3816 = vmatmul.bf16.gmra.mxu1 %v4872_v1  ;;  %v5274_v13 = vld [vmem:[%s7337_s3 + $0xc4] sm:$0xf]  ;;  %v5276_v1 = vld [vmem:[%s7337_s3 + $0xd0] sm:$0xf0] }
 0x46d   : > { %v4936_v5 = vor.u32 %v5274_v13, %v4933_v4  ;;  %v4940_v9 = vor.u32 %v5276_v1, %v4939_v2 }
 0x475   : > { %5146 = vmatmul.msk.bf16.gmra.mxu3 %vm3710_vm7, %v4856_v30 }
 0x47c   : > { %3950 = vmatmul.bf16.gmra.mxu2 %v4864_v31  ;;  %3821 = vmatmul.bf16.gmra.mxu1 %v4884_v0  ;;  %v4945_v0 = vld [vmem:[%s7337_s3 + $0xe4] sm:$0xf0] }
 0x47d   : > { %v4948_v7 = vor.u32 %v5277_v45, %v4945_v0  ;;  %v4987_v0 = vld [vmem:[%s7337_s3 + $0x128] sm:$0xf] }
 0x485   : > { %5147 = vmatmul.msk.bf16.gmra.mxu3 %vm3710_vm7, %v4868_v3 }
 0x48c   : > { %3955 = vmatmul.bf16.gmra.mxu2 %v4876_v22  ;;  %3826 = vmatmul.bf16.gmra.mxu1 %v4896_v51 }
 0x495   : > { %5148 = vmatmul.msk.bf16.gmra.mxu3 %vm3710_vm7, %v4880_v52  ;;  %v4967_v52 = vld [vmem:[%s7337_s3 + $0x108] sm:$0xf] }
 0x49a   : > { %v3802_v27 = vpop.f32.mrf.mxu1 }
 0x49c   : > { %3960 = vmatmul.bf16.gmra.mxu2 %v4888_v34  ;;  %3831 = vmatmul.bf16.gmra.mxu1 %v4908_v19  ;;  %v4968_v34 = vor.u32 %v5284_v16, %v4967_v52  ;;  %v5280_v19 = vld [vmem:[%s7337_s3 + $0xf4] sm:$0xf] }
 0x4a2   : > { %v3804_v32 = vpop.f32.mrf.mxu1 }
 0x4a5   : > { %5149 = vmatmul.msk.bf16.gmra.mxu3 %vm3710_vm7, %v4892_v14  ;;  %v4957_v14 = vld [vmem:[%s7337_s3 + $0xfc] sm:$0xf0] }
 0x4a6   : > { %v4960_v63 = vor.u32 %v5280_v19, %v4957_v14 }
 0x4ac   : > { %3965 = vmatmul.bf16.gmra.mxu2 %v4900_v56  ;;  %3836 = vmatmul.bf16.gmra.mxu1 %v4920_v54  ;;  %v5282_v54 = vld [vmem:[%s7337_s3 + $0x100] sm:$0xf0] }
 0x4ad   : > { %v4964_v55 = vor.u32 %v5282_v54, %v4963_v23  ;;  %v5296_v23 = vld [vmem:[%s7337_s3 + $0x170] sm:$0xf0] }
 0x4b5   : > { %5150 = vmatmul.msk.bf16.gmra.mxu3 %vm3710_vm7, %v4904_v60 }
 0x4bc   : > { %3970 = vmatmul.bf16.gmra.mxu2 %v4912_v50  ;;  %3841 = vmatmul.bf16.gmra.mxu1 %v4932_v28  ;;  %v5283_v28 = vld [vmem:[%s7337_s3 + $0x10c] sm:$0xf] }
 0x4c5   : > { %5151 = vmatmul.msk.bf16.gmra.mxu3 %vm3710_vm7, %v4916_v44  ;;  %v3807_v42 = vpop.f32.mrf.mxu1  ;;  %v4969_v44 = vld [vmem:[%s7337_s3 + $0x114] sm:$0xf0] }
 0x4c6   : > { %v4972_v41 = vor.u32 %v5283_v28, %v4969_v44 }
 0x4cc   : > { %3975 = vmatmul.bf16.gmra.mxu2 %v4924_v12  ;;  %3846 = vmatmul.bf16.gmra.mxu1 %v4944_v26  ;;  %v4991_v26 = vld [vmem:[%s7337_s3 + $0x138] sm:$0xf] }
 0x4cd   : > { %v3809_v10 = vpop.f32.mrf.mxu1 }
 0x4d5   : > { %5152 = vmatmul.msk.bf16.gmra.mxu3 %vm3710_vm7, %v4928_v18  ;;  %v5290_v18 = vld [vmem:[%s7337_s3 + $0x140] sm:$0xf0] }
 0x4d6   : > { %v4992_v4 = vor.u32 %v5290_v18, %v4991_v26 }
 0x4d9   : > { %v3812_v30 = vpop.f32.mrf.mxu1 }
 0x4dc   : > { %3980 = vmatmul.bf16.gmra.mxu2 %v4936_v5  ;;  %3851 = vmatmul.bf16.gmra.mxu1 %v4956_v49 }
 0x4df   : > { %v3941_v31 = vpop.f32.mrf.mxu2 }
 0x4e0   : > { %v3942_v38 = vadd.f32 %v3941_v31, %v3802_v27 }
 0x4e1   : > { %v3814_v3 = vpop.f32.mrf.mxu1 }
 0x4e5   : > { %5153 = vmatmul.msk.bf16.gmra.mxu3 %vm3710_vm7, %v4940_v9 }
 0x4e7   : > { %v3943_v61 = vpop.f32.mrf.mxu2 }
 0x4e8   : > { %v4080_v53 = vpop.f32.mrf.mxu3  ;;  %v3944_v22 = vadd.f32 %v3943_v61, %v3804_v32 }
 0x4e9   : > { %v6857_v35 = vadd.f32 %v4080_v53, %v3942_v38  ;;  %v3817_v51 = vpop.f32.mrf.mxu1  ;;  %v5003_v53 = vld [vmem:[%s7337_s3 + $0x150] sm:$0xf] }
 0x4ec   : > { %3985 = vmatmul.bf16.gmra.mxu2 %v4948_v7  ;;  %3856 = vmatmul.bf16.gmra.mxu1 %v4968_v34  ;;  %v4993_v34 = vld [vmem:[%s7337_s3 + $0x144] sm:$0xf0] }
 0x4ef   : > { %v3946_v58 = vpop.f32.mrf.mxu2 }
 0x4f0   : > { %v4082_v33 = vpop.f32.mrf.mxu3  ;;  %v3947_v62 = vadd.f32 %v3946_v58, %v3807_v42  ;;  %v4975_v42 = vld [vmem:[%s7337_s3 + $0x110] sm:$0xf]  ;;  %v5289_v58 = vld [vmem:[%s7337_s3 + $0x13c] sm:$0xf] }
 0x4f1   : > { %v6871_v40 = vadd.f32 %v4082_v33, %v3944_v22  ;;  %v3819_v37 = vpop.f32.mrf.mxu1  ;;  %v4976_v1 = vor.u32 %v5285_v24, %v4975_v42  ;;  %v5293_v22 = vld [vmem:[%s7337_s3 + $0x158] sm:$0xf0]  ;;  %v4996_v14 = vor.u32 %v5289_v58, %v4993_v34  ;;  %v5027_v24 = vld [vmem:[%s7337_s3 + $0x180] sm:$0xf] }
 0x4f2   : > { %v5004_v21 = vor.u32 %v5293_v22, %v5003_v53  ;;  %v5039_v53 = vld [vmem:[%s7337_s3 + $0x198] sm:$0xf]  ;;  %v5302_v22 = vld [vmem:[%s7337_s3 + $0x1a0] sm:$0xf0] }
 0x4f5   : > { %5154 = vmatmul.msk.bf16.gmra.mxu3 %vm3710_vm7, %v4952_v48 }
 0x4f7   : > { %v3948_v57 = vpop.f32.mrf.mxu2 }
 0x4f8   : > { %v4085_v56 = vpop.f32.mrf.mxu3  ;;  %v3949_v17 = vadd.f32 %v3948_v57, %v3809_v10  ;;  %v4999_v57 = vld [vmem:[%s7337_s3 + $0x140] sm:$0xf] }
 0x4f9   : > { %v6880_v15 = vadd.f32 %v4085_v56, %v3947_v62  ;;  %v3822_v60 = vpop.f32.mrf.mxu1  ;;  %v5291_v56 = vld [vmem:[%s7337_s3 + $0x148] sm:$0xf0] }
 0x4fc   : > { %3990 = vmatmul.bf16.gmra.mxu2 %v4960_v63  ;;  %3861 = vmatmul.bf16.gmra.mxu1 %v4980_v43  ;;  %v5015_v63 = vld [vmem:[%s7337_s3 + $0x168] sm:$0xf]  ;;  %v5000_v43 = vor.u32 %v5291_v56, %v4999_v57 }
 0x4ff   : > { %v3951_v50 = vpop.f32.mrf.mxu2 }
 0x500   : > { %v4087_v6 = vpop.f32.mrf.mxu3  ;;  %v3952_v27 = vadd.f32 %v3951_v50, %v3812_v30  ;;  %v5286_v30 = vld [vmem:[%s7337_s3 + $0x124] sm:$0xf] }
 0x501   : > { %v6894_v46 = vadd.f32 %v4087_v6, %v3949_v17  ;;  %v3824_v25 = vpop.f32.mrf.mxu1  ;;  %v4984_v9 = vor.u32 %v5286_v30, %v4981_v39  ;;  %v5292_v6 = vld [vmem:[%s7337_s3 + $0x154] sm:$0xf]  ;;  %v5017_v30 = vld [vmem:[%s7337_s3 + $0x174] sm:$0xf0] }
 0x505   : > { %5155 = vmatmul.msk.bf16.gmra.mxu3 %vm3710_vm7, %v4964_v55 }
 0x507   : > { %v3953_v29 = vpop.f32.mrf.mxu2 }
 0x508   : > { %v4090_v32 = vpop.f32.mrf.mxu3  ;;  %v3954_v12 = vadd.f32 %v3953_v29, %v3814_v3  ;;  %v5288_v3 = vld [vmem:[%s7337_s3 + $0x130] sm:$0xf0] }
 0x509   : > { %v6903_v11 = vadd.f32 %v4090_v32, %v3952_v27  ;;  %v3827_v8 = vpop.f32.mrf.mxu1  ;;  %v4988_v16 = vor.u32 %v5288_v3, %v4987_v0  ;;  %v5005_v27 = vld [vmem:[%s7337_s3 + $0x15c] sm:$0xf0]  ;;  %v5023_v0 = vld [vmem:[%s7337_s3 + $0x170] sm:$0xf]  ;;  %v5297_v3 = vld [vmem:[%s7337_s3 + $0x178] sm:$0xf0] }
 0x50a   : > { %v5008_v29 = vor.u32 %v5292_v6, %v5005_v27  ;;  %v5024_v58 = vor.u32 %v5297_v3, %v5023_v0 }
 0x50c   : > { %3995 = vmatmul.bf16.gmra.mxu2 %v4972_v41  ;;  %3866 = vmatmul.bf16.gmra.mxu1 %v4992_v4  ;;  %v5294_v41 = vld [vmem:[%s7337_s3 + $0x160] sm:$0xf0] }
 0x50f   : > { %v3956_v13 = vpop.f32.mrf.mxu2 }
 0x510   : > { %v4092_v10 = vpop.f32.mrf.mxu3  ;;  %v3957_v5 = vadd.f32 %v3956_v13, %v3817_v51 }
 0x511   : > { %v6917_v2 = vadd.f32 %v4092_v10, %v3954_v12  ;;  %v3829_v20 = vpop.f32.mrf.mxu1  ;;  %v5011_v12 = vld [vmem:[%s7337_s3 + $0x158] sm:$0xf] }
 0x515   : > { %5156 = vmatmul.msk.bf16.gmra.mxu3 %vm3710_vm7, %v4976_v1  ;;  %v5295_v1 = vld [vmem:[%s7337_s3 + $0x16c] sm:$0xf] }
 0x517   : > { %v3958_v31 = vpop.f32.mrf.mxu2 }
 0x518   : > { %v4095_v49 = vpop.f32.mrf.mxu3  ;;  %v3959_v38 = vadd.f32 %v3958_v31, %v3819_v37 }
 0x519   : > { %v6926_v45 = vadd.f32 %v4095_v49, %v3957_v5  ;;  %v3832_v61 = vpop.f32.mrf.mxu1  ;;  %v5012_v5 = vor.u32 %v5294_v41, %v5011_v12  ;;  %v5041_v12 = vld [vmem:[%s7337_s3 + $0x1a4] sm:$0xf0] }
 0x51c   : > { %4000 = vmatmul.bf16.gmra.mxu2 %v4984_v9  ;;  %3871 = vmatmul.bf16.gmra.mxu1 %v5004_v21  ;;  %v5040_v21 = vor.u32 %v5302_v22, %v5039_v53  ;;  %v5304_v22 = vld [vmem:[%s7337_s3 + $0x1b4] sm:$0xf] }
 0x51f   : > { %v3961_v7 = vpop.f32.mrf.mxu2 }
 0x520   : > { %v4097_v36 = vpop.f32.mrf.mxu3  ;;  %v3962_v51 = vadd.f32 %v3961_v7, %v3822_v60  ;;  %v5016_v60 = vor.u32 %v5296_v23, %v5015_v63  ;;  %v5035_v23 = vld [vmem:[%s7337_s3 + $0x188] sm:$0xf] }
 0x521   : > { %v6940_v52 = vadd.f32 %v4097_v36, %v3959_v38  ;;  %v3834_v33 = vpop.f32.mrf.mxu1  ;;  %v5020_v38 = vor.u32 %v5295_v1, %v5017_v30  ;;  %v5063_v30 = vld [vmem:[%s7337_s3 + $0x1c8] sm:$0xf] }
 0x525   : > { %5157 = vmatmul.msk.bf16.gmra.mxu3 %vm3710_vm7, %v4988_v16 }
 0x527   : > { %v3963_v62 = vpop.f32.mrf.mxu2 }
 0x528   : > { %v4100_v48 = vpop.f32.mrf.mxu3  ;;  %v3964_v19 = vadd.f32 %v3963_v62, %v3824_v25  ;;  %v5029_v62 = vld [vmem:[%s7337_s3 + $0x18c] sm:$0xf0] }
 0x529   : > { %v6949_v37 = vadd.f32 %v4100_v48, %v3962_v51  ;;  %v3837_v17 = vpop.f32.mrf.mxu1 }
 0x52c   : > { %4005 = vmatmul.bf16.gmra.mxu2 %v4996_v14  ;;  %3876 = vmatmul.bf16.gmra.mxu1 %v5016_v60 }
 0x52f   : > { %v3966_v54 = vpop.f32.mrf.mxu2 }
 0x530   : > { %v4102_v47 = vpop.f32.mrf.mxu3  ;;  %v3967_v59 = vadd.f32 %v3966_v54, %v3827_v8  ;;  %v5299_v8 = vld [vmem:[%s7337_s3 + $0x188] sm:$0xf0]  ;;  %v5300_v54 = vld [vmem:[%s7337_s3 + $0x190] sm:$0xf0] }
 0x531   : > { %v6963_v50 = vadd.f32 %v4102_v47, %v3964_v19  ;;  %v3839_v55 = vpop.f32.mrf.mxu1  ;;  %v5028_v18 = vor.u32 %v5299_v8, %v5027_v24  ;;  %v5051_v47 = vld [vmem:[%s7337_s3 + $0x1b0] sm:$0xf] }
 0x535   : > { %5158 = vmatmul.msk.bf16.gmra.mxu3 %vm3710_vm7, %v5000_v43 }
 0x537   : > { %v3968_v28 = vpop.f32.mrf.mxu2 }
 0x538   : > { %v4105_v44 = vpop.f32.mrf.mxu3  ;;  %v3969_v25 = vadd.f32 %v3968_v28, %v3829_v20 }
 0x539   : > { %v6972_v32 = vadd.f32 %v4105_v44, %v3967_v59  ;;  %v3842_v42 = vpop.f32.mrf.mxu1  ;;  %v5305_v59 = vld [vmem:[%s7337_s3 + $0x1b8] sm:$0xf0]  ;;  %v5036_v44 = vor.u32 %v5300_v54, %v5035_v23 }
 0x53a   : > { %v5052_v6 = vor.u32 %v5305_v59, %v5051_v47 }
 0x53c   : > { %4010 = vmatmul.bf16.gmra.mxu2 %v5008_v29  ;;  %3881 = vmatmul.bf16.gmra.mxu1 %v5028_v18  ;;  %v5301_v29 = vld [vmem:[%s7337_s3 + $0x19c] sm:$0xf] }
 0x53f   : > { %v3971_v26 = vpop.f32.mrf.mxu2 }
 0x540   : > { %v4107_v13 = vpop.f32.mrf.mxu3  ;;  %v3972_v4 = vadd.f32 %v3971_v26, %v3832_v61  ;;  %v5044_v26 = vor.u32 %v5301_v29, %v5041_v12 }
 0x541   : > { %v6986_v10 = vadd.f32 %v4107_v13, %v3969_v25  ;;  %v3844_v39 = vpop.f32.mrf.mxu1 }
 0x545   : > { %5159 = vmatmul.msk.bf16.gmra.mxu3 %vm3710_vm7, %v5012_v5  ;;  %v5303_v5 = vld [vmem:[%s7337_s3 + $0x1a8] sm:$0xf0] }
 0x547   : > { %v3973_v20 = vpop.f32.mrf.mxu2 }
 0x548   : > { %v4110_v31 = vpop.f32.mrf.mxu3  ;;  %v3974_v49 = vadd.f32 %v3973_v20, %v3834_v33  ;;  %v5298_v33 = vld [vmem:[%s7337_s3 + $0x184] sm:$0xf] }
 0x549   : > { %v6995_v9 = vadd.f32 %v4110_v31, %v3972_v4  ;;  %v3847_v61 = vpop.f32.mrf.mxu1  ;;  %v5032_v56 = vor.u32 %v5298_v33, %v5029_v62  ;;  %v5047_v4 = vld [vmem:[%s7337_s3 + $0x1a0] sm:$0xf] }
 0x54a   : > { %v5048_v3 = vor.u32 %v5303_v5, %v5047_v4  ;;  %v5071_v4 = vld [vmem:[%s7337_s3 + $0x1d0] sm:$0xf]  ;;  %v5309_v5 = vld [vmem:[%s7337_s3 + $0x1d8] sm:$0xf0] }
 0x54c   : > { %4015 = vmatmul.bf16.gmra.mxu2 %v5020_v38  ;;  %3886 = vmatmul.bf16.gmra.mxu1 %v5040_v21 }
 0x54f   : > { %v3976_v7 = vpop.f32.mrf.mxu2 }
 0x550   : > { %v4112_v36 = vpop.f32.mrf.mxu3  ;;  %v3977_v51 = vadd.f32 %v3976_v7, %v3837_v17  ;;  %v5053_v7 = vld [vmem:[%s7337_s3 + $0x1bc] sm:$0xf0] }
 0x551   : > { %v7009_v16 = vadd.f32 %v4112_v36, %v3974_v49  ;;  %v3849_v48 = vpop.f32.mrf.mxu1 }
 0x553   : > { %v4210_v34 = vmax.f32 %v6857_v35, %v7009_v16 }
 0x555   : > { %5160 = vmatmul.msk.bf16.gmra.mxu3 %vm3710_vm7, %v5024_v58  ;;  %v5056_v58 = vor.u32 %v5304_v22, %v5053_v7  ;;  %v5072_v22 = vor.u32 %v5309_v5, %v5071_v4  ;;  %v5313_v4 = vld [vmem:[%s7337_s3 + $0x1fc] sm:$0xf]  ;;  %v5089_v5 = vld [vmem:[%s7337_s3 + $0x204] sm:$0xf0] }
 0x557   : > { %v3978_v19 = vpop.f32.mrf.mxu2 }
 0x558   : > { %v4115_v14 = vpop.f32.mrf.mxu3  ;;  %v3979_v57 = vadd.f32 %v3978_v19, %v3839_v55  ;;  %v5059_v19 = vld [vmem:[%s7337_s3 + $0x1b8] sm:$0xf] }
 0x559   : > { %v7020_v17 = vadd.f32 %v4115_v14, %v3977_v51  ;;  %v3852_v60 = vpop.f32.mrf.mxu1  ;;  %v5306_v14 = vld [vmem:[%s7337_s3 + $0x1c0] sm:$0xf0] }
 0x55b   : > { %v4211_v63 = vmax.f32 %v6871_v40, %v7020_v17 }
 0x55c   : > { %4020 = vmatmul.bf16.gmra.mxu2 %v5032_v56  ;;  %3891 = vmatmul.bf16.gmra.mxu1 %v5052_v6  ;;  %v5311_v56 = vld [vmem:[%s7337_s3 + $0x1e8] sm:$0xf0]  ;;  %v5060_v6 = vor.u32 %v5306_v14, %v5059_v19 }
 0x55f   : > { %v3981_v43 = vpop.f32.mrf.mxu2 }
 0x560   : > { %v4117_v27 = vpop.f32.mrf.mxu3  ;;  %v3982_v55 = vadd.f32 %v3981_v43, %v3842_v42 }
 0x561   : > { %v7036_v28 = vadd.f32 %v4117_v27, %v3979_v57  ;;  %v3854_v41 = vpop.f32.mrf.mxu1 }
 0x563   : > { %v4212_v25 = vmax.f32 %v6880_v15, %v7036_v28 }
 0x565   : > { %5161 = vmatmul.msk.bf16.gmra.mxu3 %vm3710_vm7, %v5036_v44  ;;  %v5065_v44 = vld [vmem:[%s7337_s3 + $0x1d4] sm:$0xf0] }
 0x567   : > { %v3983_v24 = vpop.f32.mrf.mxu2 }
 0x568   : > { %v4120_v42 = vpop.f32.mrf.mxu3  ;;  %v3984_v8 = vadd.f32 %v3983_v24, %v3844_v39  ;;  %v5308_v39 = vld [vmem:[%s7337_s3 + $0x1d0] sm:$0xf0] }
 0x569   : > { %v7047_v18 = vadd.f32 %v4120_v42, %v3982_v55  ;;  %v3857_v1 = vpop.f32.mrf.mxu1  ;;  %v5064_v31 = vor.u32 %v5308_v39, %v5063_v30  ;;  %v5307_v55 = vld [vmem:[%s7337_s3 + $0x1cc] sm:$0xf]  ;;  %v5314_v39 = vld [vmem:[%s7337_s3 + $0x200] sm:$0xf0] }
 0x56a   : > { %v5068_v42 = vor.u32 %v5307_v55, %v5065_v44 }
 0x56b   : > { %v4213_v13 = vmax.f32 %v6894_v46, %v7047_v18 }
 0x56c   : > { %4025 = vmatmul.bf16.gmra.mxu2 %v5044_v26  ;;  %3896 = vmatmul.bf16.gmra.mxu1 %v5064_v31 }
 0x56f   : > { %v3986_v20 = vpop.f32.mrf.mxu2 }
 0x570   : > { %v4122_v49 = vpop.f32.mrf.mxu3  ;;  %v3987_v38 = vadd.f32 %v3986_v20, %v3847_v61 }
 0x571   : > { %v7063_v0 = vadd.f32 %v4122_v49, %v3984_v8  ;;  %v3859_v21 = vpop.f32.mrf.mxu1 }
 0x573   : > { %v4214_v53 = vmax.f32 %v6903_v11, %v7063_v0 }
 0x575   : > { %5162 = vmatmul.msk.bf16.gmra.mxu3 %vm3710_vm7, %v5048_v3 }
 0x577   : > { %v3988_v36 = vpop.f32.mrf.mxu2 }
 0x578   : > { %v4125_v61 = vpop.f32.mrf.mxu3  ;;  %v3989_v51 = vadd.f32 %v3988_v36, %v3849_v48  ;;  %v5075_v48 = vld [vmem:[%s7337_s3 + $0x1e0] sm:$0xf]  ;;  %v5310_v36 = vld [vmem:[%s7337_s3 + $0x1e4] sm:$0xf] }
 0x579   : > { %v7074_v33 = vadd.f32 %v4125_v61, %v3987_v38  ;;  %v3862_v57 = vpop.f32.mrf.mxu1  ;;  %v5076_v54 = vor.u32 %v5311_v56, %v5075_v48  ;;  %v5077_v61 = vld [vmem:[%s7337_s3 + $0x1ec] sm:$0xf0] }
 0x57a   : > { %v5080_v14 = vor.u32 %v5310_v36, %v5077_v61  ;;  %v5315_v36 = vld [vmem:[%s7337_s3 + $0x208] sm:$0xf0] }
 0x57b   : > { %v4215_v62 = vmax.f32 %v6917_v2, %v7074_v33 }
 0x57c   : > { %4030 = vmatmul.bf16.gmra.mxu2 %v5056_v58  ;;  %3901 = vmatmul.bf16.gmra.mxu1 %v5076_v54  ;;  %v5312_v54 = vld [vmem:[%s7337_s3 + $0x1f0] sm:$0xf0] }
 0x57f   : > { %v3991_v23 = vpop.f32.mrf.mxu2 }
 0x580   : > { %v4127_v47 = vpop.f32.mrf.mxu3  ;;  %v3992_v59 = vadd.f32 %v3991_v23, %v3852_v60  ;;  %v5083_v23 = vld [vmem:[%s7337_s3 + $0x1e8] sm:$0xf] }
 0x581   : > { %v7090_v43 = vadd.f32 %v4127_v47, %v3989_v51  ;;  %v3864_v29 = vpop.f32.mrf.mxu1 }
 0x585   : > { %5163 = vmatmul.msk.bf16.gmra.mxu3 %vm3710_vm7, %v5060_v6 }
 0x587   : > { %v3993_v12 = vpop.f32.mrf.mxu2 }
 0x588   : > { %v4130_v60 = vpop.f32.mrf.mxu3  ;;  %v3994_v24 = vadd.f32 %v3993_v12, %v3854_v41  ;;  %v5087_v41 = vld [vmem:[%s7337_s3 + $0x1f8] sm:$0xf] }
 0x589   : > { %v7101_v8 = vadd.f32 %v4130_v60, %v3992_v59  ;;  %v3867_v30 = vpop.f32.mrf.mxu1  ;;  %v5088_v31 = vor.u32 %v5314_v39, %v5087_v41  ;;  %v5317_v59 = vld [vmem:[%s7337_s3 + $0x218] sm:$0xf0] }
 0x58b   : > { %v7483_v33 = vmax.f32 %v6940_v52, %v7101_v8 }
 0x58c   : > { %4035 = vmatmul.bf16.gmra.mxu2 %v5068_v42  ;;  %3906 = vmatmul.bf16.gmra.mxu1 %v5088_v31  ;;  %v5092_v31 = vor.u32 %v5313_v4, %v5089_v5 }
 0x58f   : > { %v3996_v20 = vpop.f32.mrf.mxu2 }
 0x590   : > { %v4132_v49 = vpop.f32.mrf.mxu3  ;;  %v3997_v38 = vadd.f32 %v3996_v20, %v3857_v1 }
 0x591   : > { %v7117_v3 = vadd.f32 %v4132_v49, %v3994_v24  ;;  %v3869_v51 = vpop.f32.mrf.mxu1  ;;  %v5084_v24 = vor.u32 %v5312_v54, %v5083_v23 }
 0x595   : > { %5164 = vmatmul.msk.bf16.gmra.mxu3 %vm3710_vm7, %v5072_v22  ;;  %v5095_v22 = vld [vmem:[%s7337_s3 + $0x200] sm:$0xf] }
 0x597   : > { %v3998_v58 = vpop.f32.mrf.mxu2 }
 0x598   : > { %v4135_v1 = vpop.f32.mrf.mxu3  ;;  %v3999_v19 = vadd.f32 %v3998_v58, %v3859_v21  ;;  %v5099_v21 = vld [vmem:[%s7337_s3 + $0x210] sm:$0xf]  ;;  %v5320_v58 = vld [vmem:[%s7337_s3 + $0x230] sm:$0xf0] }
 0x599   : > { %v7128_v48 = vadd.f32 %v4135_v1, %v3997_v38  ;;  %v3872_v47 = vpop.f32.mrf.mxu1  ;;  %v5100_v55 = vor.u32 %v5317_v59, %v5099_v21  ;;  %v5096_v21 = vor.u32 %v5315_v36, %v5095_v22 }
 0x59c   : > { %4040 = vmatmul.bf16.gmra.mxu2 %v5080_v14  ;;  %3911 = vmatmul.bf16.gmra.mxu1 %v5100_v55  ;;  %v5101_v55 = vld [vmem:[%s7337_s3 + $0x21c] sm:$0xf0] }
 0x59f   : > { %v4001_v6 = vpop.f32.mrf.mxu2 }
 0x5a0   : > { %v4137_v44 = vpop.f32.mrf.mxu3  ;;  %v4002_v12 = vadd.f32 %v4001_v6, %v3862_v57  ;;  %v5316_v6 = vld [vmem:[%s7337_s3 + $0x214] sm:$0xf] }
 0x5a1   : > { %v7144_v60 = vadd.f32 %v4137_v44, %v3999_v19  ;;  %v3874_v41 = vpop.f32.mrf.mxu1  ;;  %v5104_v4 = vor.u32 %v5316_v6, %v5101_v55 }
 0x5a5   : > { %5165 = vmatmul.msk.bf16.gmra.mxu3 %vm3710_vm7, %v5084_v24 }
 0x5a7   : > { %v4003_v39 = vpop.f32.mrf.mxu2 }
 0x5a8   : > { %v4140_v57 = vpop.f32.mrf.mxu3  ;;  %v4004_v20 = vadd.f32 %v4003_v39, %v3864_v29  ;;  %v5111_v29 = vld [vmem:[%s7337_s3 + $0x228] sm:$0xf]  ;;  %v5107_v39 = vld [vmem:[%s7337_s3 + $0x218] sm:$0xf] }
 0x5a9   : > { %v7155_v49 = vadd.f32 %v4140_v57, %v4002_v12  ;;  %v3877_v61 = vpop.f32.mrf.mxu1  ;;  %v5112_v19 = vor.u32 %v5320_v58, %v5111_v29  ;;  %v5318_v57 = vld [vmem:[%s7337_s3 + $0x220] sm:$0xf0] }
 0x5ac   : > { %4045 = vmatmul.bf16.gmra.mxu2 %v5092_v31  ;;  %3916 = vmatmul.bf16.gmra.mxu1 %v5112_v19  ;;  %v5123_v31 = vld [vmem:[%s7337_s3 + $0x240] sm:$0xf]  ;;  %v5108_v19 = vor.u32 %v5318_v57, %v5107_v39  ;;  %v5135_v39 = vld [vmem:[%s7337_s3 + $0x258] sm:$0xf] }
 0x5af   : > { %v4006_v1 = vpop.f32.mrf.mxu2 }
 0x5b0   : > { %v4142_v14 = vpop.f32.mrf.mxu3  ;;  %v4007_v23 = vadd.f32 %v4006_v1, %v3867_v30 }
 0x5b1   : > { %v7171_v54 = vadd.f32 %v4142_v14, %v4004_v20  ;;  %v3879_v44 = vpop.f32.mrf.mxu1  ;;  %v5319_v14 = vld [vmem:[%s7337_s3 + $0x22c] sm:$0xf] }
 0x5b5   : > { %5166 = vmatmul.msk.bf16.gmra.mxu3 %vm3710_vm7, %v5096_v21 }
 0x5b7   : > { %v4008_v12 = vpop.f32.mrf.mxu2 }
 0x5b8   : > { %v4145_v30 = vpop.f32.mrf.mxu3  ;;  %v4009_v24 = vadd.f32 %v4008_v12, %v3869_v51  ;;  %v5323_v51 = vld [vmem:[%s7337_s3 + $0x248] sm:$0xf0] }
 0x5b9   : > { %v7182_v5 = vadd.f32 %v4145_v30, %v4007_v23  ;;  %v3882_v20 = vpop.f32.mrf.mxu1  ;;  %v5124_v36 = vor.u32 %v5323_v51, %v5123_v31  ;;  %v5113_v23 = vld [vmem:[%s7337_s3 + $0x234] sm:$0xf0] }
 0x5ba   : > { %v5116_v30 = vor.u32 %v5319_v14, %v5113_v23  ;;  %v5125_v14 = vld [vmem:[%s7337_s3 + $0x24c] sm:$0xf0] }
 0x5bc   : > { %4050 = vmatmul.bf16.gmra.mxu2 %v5104_v4  ;;  %3921 = vmatmul.bf16.gmra.mxu1 %v5124_v36  ;;  %v5321_v4 = vld [vmem:[%s7337_s3 + $0x238] sm:$0xf0] }
 0x5bf   : > { %v4011_v22 = vpop.f32.mrf.mxu2 }
 0x5c0   : > { %v4147_v29 = vpop.f32.mrf.mxu3  ;;  %v4012_v58 = vadd.f32 %v4011_v22, %v3872_v47 }
 0x5c1   : > { %v7196_v1 = vadd.f32 %v4147_v29, %v4009_v24  ;;  %v3884_v6 = vpop.f32.mrf.mxu1  ;;  %v5119_v24 = vld [vmem:[%s7337_s3 + $0x230] sm:$0xf] }
 0x5c2   : > { %v5120_v29 = vor.u32 %v5321_v4, %v5119_v24  ;;  %v5131_v24 = vld [vmem:[%s7337_s3 + $0x248] sm:$0xf]  ;;  %v5324_v4 = vld [vmem:[%s7337_s3 + $0x250] sm:$0xf0] }
 0x5c5   : > { %5167 = vmatmul.msk.bf16.gmra.mxu3 %vm3710_vm7, %v5108_v19  ;;  %v5322_v19 = vld [vmem:[%s7337_s3 + $0x244] sm:$0xf] }
 0x5c7   : > { %v4013_v21 = vpop.f32.mrf.mxu2 }
 0x5c8   : > { %v4150_v55 = vpop.f32.mrf.mxu3  ;;  %v4014_v12 = vadd.f32 %v4013_v21, %v3874_v41  ;;  %v5326_v41 = vld [vmem:[%s7337_s3 + $0x260] sm:$0xf0] }
 0x5c9   : > { %v7205_v47 = vadd.f32 %v4150_v55, %v4012_v58  ;;  %v5136_v31 = vor.u32 %v5326_v41, %v5135_v39  ;;  %v3887_v58 = vpop.f32.mrf.mxu1 }
 0x5cc   : > { %4055 = vmatmul.bf16.gmra.mxu2 %v5116_v30  ;;  %3926 = vmatmul.bf16.gmra.mxu1 %v5136_v31  ;;  %v5128_v30 = vor.u32 %v5322_v19, %v5125_v14 }
 0x5cf   : > { %v4016_v57 = vpop.f32.mrf.mxu2 }
 0x5d0   : > { %v4152_v51 = vpop.f32.mrf.mxu3  ;;  %v4017_v22 = vadd.f32 %v4016_v57, %v3877_v61 }
 0x5d1   : > { %v7219_v36 = vadd.f32 %v4152_v51, %v4014_v12  ;;  %v3889_v12 = vpop.f32.mrf.mxu1  ;;  %v5132_v51 = vor.u32 %v5324_v4, %v5131_v24 }
 0x5d5   : > { %5168 = vmatmul.msk.bf16.gmra.mxu3 %vm3710_vm7, %v5120_v29 }
 0x5d7   : > { %v4018_v23 = vpop.f32.mrf.mxu2 }
 0x5d8   : > { %v4155_v21 = vpop.f32.mrf.mxu3  ;;  %v4019_v55 = vadd.f32 %v4018_v23, %v3879_v44  ;;  %v5325_v44 = vld [vmem:[%s7337_s3 + $0x25c] sm:$0xf] }
 0x5d9   : > { %v7228_v61 = vadd.f32 %v4155_v21, %v4017_v22  ;;  %v5137_v22 = vld [vmem:[%s7337_s3 + $0x264] sm:$0xf0]  ;;  %v3892_v29 = vpop.f32.mrf.mxu1 }
 0x5da   : > { %v5140_v21 = vor.u32 %v5325_v44, %v5137_v22 }
 0x5dc   : > { %4060 = vmatmul.bf16.gmra.mxu2 %v5128_v30 }
 0x5df   : > { %v4021_v39 = vpop.f32.mrf.mxu2 }
 0x5e0   : > { %v4157_v41 = vpop.f32.mrf.mxu3  ;;  %v4022_v57 = vadd.f32 %v4021_v39, %v3882_v20  ;;  %v5143_v20 = vld [vmem:[%s7337_s3 + $0x260] sm:$0xf] }
 0x5e1   : > { %v7236_v31 = vadd.f32 %v4157_v41, %v4019_v55  ;;  %v5327_v55 = vld [vmem:[%s7337_s3 + $0x268] sm:$0xf0]  ;;  %v3894_v4 = vpop.f32.mrf.mxu1 }
 0x5e2   : > { %v5144_v59 = vor.u32 %v5327_v55, %v5143_v20 }
 0x5e5   : > { %5169 = vmatmul.msk.bf16.gmra.mxu3 %vm3710_vm7, %v5132_v51 }
 0x5e7   : > { %v4023_v19 = vpop.f32.mrf.mxu2 }
 0x5e8   : > { %v4160_v14 = vpop.f32.mrf.mxu3  ;;  %v4024_v23 = vadd.f32 %v4023_v19, %v3884_v6 }
 0x5e9   : > { %v7245_v30 = vadd.f32 %v4160_v14, %v4022_v57  ;;  %v3897_v19 = vpop.f32.mrf.mxu1 }
 0x5ec   : > { %4065 = vmatmul.bf16.gmra.mxu2 %v5140_v21 }
 0x5ef   : > { %v4026_v24 = vpop.f32.mrf.mxu2 }
 0x5f0   : > { %v4162_v39 = vpop.f32.mrf.mxu3  ;;  %v4027_v41 = vadd.f32 %v4026_v24, %v3887_v58 }
 0x5f1   : > { %v7253_v51 = vadd.f32 %v4162_v39, %v4024_v23  ;;  %v3899_v56 = vpop.f32.mrf.mxu1 }
 0x5f5   : > { %5170 = vmatmul.msk.bf16.gmra.mxu3 %vm3710_vm7, %v5144_v59 }
 0x5f7   : > { %v4028_v6 = vpop.f32.mrf.mxu2 }
 0x5f8   : > { %v4165_v57 = vpop.f32.mrf.mxu3  ;;  %v4029_v44 = vadd.f32 %v4028_v6, %v3889_v12 }
 0x5f9   : > { %v7256_v22 = vadd.f32 %v4165_v57, %v4027_v41  ;;  %v3902_v20 = vpop.f32.mrf.mxu1 }
 0x5ff   : > { %v4031_v14 = vpop.f32.mrf.mxu2 }
 0x600   : > { %v4167_v21 = vpop.f32.mrf.mxu3  ;;  %v4032_v38 = vadd.f32 %v4031_v14, %v3892_v29 }
 0x601   : > { %v7258_v42 = vadd.f32 %v4167_v21, %v4029_v44  ;;  %v3904_v41 = vpop.f32.mrf.mxu1 }
 0x607   : > { %v4033_v7 = vpop.f32.mrf.mxu2 }
 0x608   : > { %v4170_v26 = vpop.f32.mrf.mxu3  ;;  %v4034_v58 = vadd.f32 %v4033_v7, %v3894_v4 }
 0x609   : > { %v7260_v23 = vadd.f32 %v4170_v26, %v4032_v38  ;;  %v3907_v27 = vpop.f32.mrf.mxu1 }
 0x60f   : > { %v4036_v55 = vpop.f32.mrf.mxu2 }
 0x610   : > { %v4172_v59 = vpop.f32.mrf.mxu3  ;;  %v4037_v24 = vadd.f32 %v4036_v55, %v3897_v19 }
 0x611   : > { %v7262_v39 = vadd.f32 %v4172_v59, %v4034_v58  ;;  %v3909_v59 = vpop.f32.mrf.mxu1 }
 0x617   : > { %v4038_v12 = vpop.f32.mrf.mxu2 }
 0x618   : > { %v4175_v6 = vpop.f32.mrf.mxu3  ;;  %v4039_v29 = vadd.f32 %v4038_v12, %v3899_v56 }
 0x619   : > { %v7264_v57 = vadd.f32 %v4175_v6, %v4037_v24 }
 0x61f   : > { %v4041_v44 = vpop.f32.mrf.mxu2 }
 0x620   : > { %v4177_v14 = vpop.f32.mrf.mxu3  ;;  %v4042_v38 = vadd.f32 %v4041_v44, %v3902_v20 }
 0x621   : > { %v4178_v21 = vadd.f32 %v4177_v14, %v4039_v29 }
 0x623   : > { %v4223_v26 = vmax.f32 %v7182_v5, %v4178_v21 }
 0x625   : > { %v4236_v7 = vmax.f32 %v4210_v34, %v4223_v26 }
 0x627   : > { %v4043_v4 = vpop.f32.mrf.mxu2 }
 0x628   : > { %v4180_v19 = vpop.f32.mrf.mxu3  ;;  %v4044_v16 = vadd.f32 %v4043_v4, %v3904_v41 }
 0x629   : > { %v4181_v58 = vadd.f32 %v4180_v19, %v4042_v38 }
 0x62b   : > { %v4224_v55 = vmax.f32 %v7196_v1, %v4181_v58 }
 0x62d   : > { %v4237_v56 = vmax.f32 %v4211_v63, %v4224_v55  ;;  %v3912_v63 = vpop.f32.mrf.mxu1 }
 0x62f   : > { %v5339_v35 = vpack.c.bf16 %v4237_v56, %v4236_v7  ;;  %v4046_v34 = vpop.f32.mrf.mxu2 }
 0x630   : > { %v4182_v5 = vpop.f32.mrf.mxu3  ;;  %v4047_v17 = vadd.f32 %v4046_v34, %v3907_v27 }
 0x631   : > { %5340 = vst [vmem:[%s7278_s11] sm:$0xff] %v5339_v35   ;;  %v4183_v20 = vadd.f32 %v4182_v5, %v4044_v16 }
 0x633   : > { %v4225_v1 = vmax.f32 %v7205_v47, %v4183_v20 }
 0x635   : > { %v4238_v40 = vmax.f32 %v4212_v25, %v4225_v1  ;;  %v3914_v26 = vpop.f32.mrf.mxu1 }
 0x637   : > { %v4048_v24 = vpop.f32.mrf.mxu2 }
 0x638   : > { %v4185_v12 = vpop.f32.mrf.mxu3  ;;  %v4049_v14 = vadd.f32 %v4048_v24, %v3909_v59 }
 0x639   : > { %v4186_v6 = vadd.f32 %v4185_v12, %v4047_v17 }
 0x63b   : > { %v4226_v29 = vmax.f32 %v7219_v36, %v4186_v6  ;;  %v7485_v6 = vmax.f32 %v6963_v50, %v7128_v48 }
 0x63d   : > { %v4239_v41 = vmax.f32 %v4213_v13, %v4226_v29  ;;  %v3917_v46 = vpop.f32.mrf.mxu1 }
 0x63f   : > { %v5344_v44 = vpack.c.bf16 %v4239_v41, %v4238_v40  ;;  %v4051_v21 = vpop.f32.mrf.mxu2 }
 0x640   : > { %v4187_v47 = vpop.f32.mrf.mxu3  ;;  %v4052_v27 = vadd.f32 %v4051_v21, %v3912_v63 }
 0x641   : > { %5374 = vst [vmem:[%s7278_s11 + $0x8] sm:$0xff] %v5344_v44   ;;  %v4188_v15 = vadd.f32 %v4187_v47, %v4049_v14 }
 0x643   : > { %v4227_v28 = vmax.f32 %v7228_v61, %v4188_v15 }
 0x645   : > { %v4240_v25 = vmax.f32 %v4214_v53, %v4227_v28  ;;  %v3919_v0 = vpop.f32.mrf.mxu1  ;;  %v7482_v53 = vmax.f32 %v6926_v45, %v7090_v43  ;;  %v7484_v43 = vmax.f32 %v6949_v37, %v7117_v3 }
 0x647   : > { %v4053_v36 = vpop.f32.mrf.mxu2 }
 0x648   : > { %v4190_v7 = vpop.f32.mrf.mxu3  ;;  %v4054_v19 = vadd.f32 %v4053_v36, %v3914_v26  ;;  %v7486_v26 = vmax.f32 %v6972_v32, %v7144_v60  ;;  %v7488_v60 = vmax.f32 %v6995_v9, %v7171_v54 }
 0x649   : > { %v4191_v38 = vadd.f32 %v4190_v7, %v4052_v27  ;;  %v7487_v27 = vmax.f32 %v6986_v10, %v7155_v49 }
 0x64b   : > { %v4228_v18 = vmax.f32 %v7236_v31, %v4191_v38 }
 0x64d   : > { %v4241_v13 = vmax.f32 %v4215_v62, %v4228_v18  ;;  %v3922_v34 = vpop.f32.mrf.mxu1 }
 0x64f   : > { %v5349_v4 = vpack.c.bf16 %v4241_v13, %v4240_v25  ;;  %v4056_v58 = vpop.f32.mrf.mxu2 }
 0x650   : > { %v4192_v55 = vpop.f32.mrf.mxu3  ;;  %v4057_v56 = vadd.f32 %v4056_v58, %v3917_v46 }
 0x651   : > { %5375 = vst [vmem:[%s7278_s11 + $0x10] sm:$0xff] %v5349_v4   ;;  %v4193_v61 = vadd.f32 %v4192_v55, %v4054_v19 }
 0x653   : > { %v4229_v11 = vmax.f32 %v7245_v30, %v4193_v61 }
 0x655   : > { %v4242_v59 = vmax.f32 %v7482_v53, %v4229_v11 }
 0x657   : > { %v4058_v31 = vpop.f32.mrf.mxu2 }
 0x658   : > { %v4195_v35 = vpop.f32.mrf.mxu3  ;;  %v4059_v20 = vadd.f32 %v4058_v31, %v3919_v0 }
 0x659   : > { %v4196_v16 = vadd.f32 %v4195_v35, %v4057_v56 }
 0x65b   : > { %v4230_v2 = vmax.f32 %v7253_v51, %v4196_v16  ;;  %v3924_v51 = vpop.f32.mrf.mxu1 }
 0x65d   : > { %v4243_v62 = vmax.f32 %v7483_v33, %v4230_v2 }
 0x65f   : > { %v5354_v5 = vpack.c.bf16 %v4243_v62, %v4242_v59  ;;  %v4061_v1 = vpop.f32.mrf.mxu2 }
 0x660   : > { %v4197_v30 = vpop.f32.mrf.mxu3  ;;  %v4062_v63 = vadd.f32 %v4061_v1, %v3922_v34 }
 0x661   : > { %5376 = vst [vmem:[%s7278_s11 + $0x18] sm:$0xff] %v5354_v5   ;;  %v4198_v40 = vadd.f32 %v4197_v30, %v4059_v20 }
 0x663   : > { %v4231_v45 = vmax.f32 %v7256_v22, %v4198_v40  ;;  %v3927_v21 = vpop.f32.mrf.mxu1 }
 0x665   : > { %v4244_v17 = vmax.f32 %v7484_v43, %v4231_v45 }
 0x667   : > { %v4063_v12 = vpop.f32.mrf.mxu2 }
 0x668   : > { %v4200_v24 = vpop.f32.mrf.mxu3  ;;  %v4064_v44 = vadd.f32 %v4063_v12, %v3924_v51 }
 0x669   : > { %v4201_v52 = vadd.f32 %v4200_v24, %v4062_v63 }
 0x66b   : > { %v4232_v8 = vmax.f32 %v7258_v42, %v4201_v52  ;;  %v3929_v48 = vpop.f32.mrf.mxu1 }
 0x66d   : > { %v4245_v29 = vmax.f32 %v7485_v6, %v4232_v8 }
 0x66f   : > { %v5359_v41 = vpack.c.bf16 %v4245_v29, %v4244_v17  ;;  %v4066_v37 = vpop.f32.mrf.mxu2 }
 0x670   : > { %v4202_v14 = vpop.f32.mrf.mxu3  ;;  %v4067_v42 = vadd.f32 %v4066_v37, %v3927_v21 }
 0x671   : > { %5377 = vst [vmem:[%s7278_s11 + $0x20] sm:$0xff] %v5359_v41   ;;  %v4203_v22 = vadd.f32 %v4202_v14, %v4064_v44 }
 0x673   : > { %v4233_v3 = vmax.f32 %v7260_v23, %v4203_v22 }
 0x675   : > { %v4246_v47 = vmax.f32 %v7486_v26, %v4233_v3 }
 0x677   : > { %v4068_v25 = vpop.f32.mrf.mxu2 }
 0x678   : > { %v4205_v15 = vpop.f32.mrf.mxu3  ;;  %v4069_v38 = vadd.f32 %v4068_v25, %v3929_v48 }
 0x679   : > { %v4206_v28 = vadd.f32 %v4205_v15, %v4067_v42 }
 0x67b   : > { %v4234_v50 = vmax.f32 %v7262_v39, %v4206_v28 }
 0x67d   : > { %v4247_v36 = vmax.f32 %v7487_v27, %v4234_v50 }
 0x67f   : > { %v5364_v7 = vpack.c.bf16 %v4247_v36, %v4246_v47 }
 0x680   : > { %v4207_v46 = vpop.f32.mrf.mxu3 }
 0x681   : > { %5378 = vst [vmem:[%s7278_s11 + $0x28] sm:$0xff] %v5364_v7   ;;  %v4208_v23 = vadd.f32 %v4207_v46, %v4069_v38 }
 0x683   : > { %v4235_v32 = vmax.f32 %v7264_v57, %v4208_v23 }
 0x685   : > { %v4248_v18 = vmax.f32 %v7488_v60, %v4235_v32 }
 0x687   : > { %v4261_v13 = vpack.c.bf16 %v4248_v18, %v4248_v18 }
 0x689   : > { %4274 = vst [vmem:[%s7278_s11 + $0x30] sm:$0xf] %v4261_v13 }
 0x68a PF: > { %s16_s15 = sadd.s32 1, %s5499_s15  }
 0x68b   : > { %p13_p7 = scmp.ge.s32.totalorder %s16_s15, 4  }
 0x68d   :  { %15 = sbr.rel (!%p13_p7) target bundleno = 2 (0x2), region = 83 }
 0x692   :  { %4296 = vsyncpa [#allocation3], 1 }
 0x693   :  { %4298 = vsyncpa [#allocation3 + $0x1], 1 }
 0x694   :  { %4299 = vsyncpa [#allocation5], 1 }

</bundles_post_ra>
